<compile_context>
chip_gen: v5e
topology: v5e:2x2
jax: 0.10.0
libtpu: 0.0.40
codegen_flags: <defaults>
</compile_context>

<pallas_src>
import functools

import jax
import jax.numpy as jnp
import numpy as np
from jax import lax
from jax.experimental import pallas as pl
from jax.experimental.pallas import tpu as pltpu

EPS = 1e-5  # nn.BatchNorm2d default eps
VMEM_LIMIT = 32 * 1024 * 1024


# --------------------------------------------------------------------------- #
# Kernel 1/2: [optional per-channel affine + relu] -> conv3x3 -> bf16 output +
#             per-image partial BN statistics ([sum, sum_sq] per channel).
# --------------------------------------------------------------------------- #
def _conv_stats_kernel(*refs, apply_affine_relu):
    if apply_affine_relu:
        x_ref, scale_ref, shift_ref, w_ref, y_ref, s_ref, xp_ref = refs
    else:
        x_ref, w_ref, y_ref, s_ref, xp_ref = refs
        scale_ref = shift_ref = None

    _, H, W, Cin = x_ref.shape
    Cout = w_ref.shape[-1]

    xin = x_ref[0].astype(jnp.float32)                      # (H, W, Cin)
    if apply_affine_relu:
        sc = scale_ref[...].reshape(1, 1, Cin)
        sh = shift_ref[...].reshape(1, 1, Cin)
        xin = jnp.maximum(xin * sc + sh, 0.0)               # relu(bn(prev conv))

    # --- Halo handling: persistent padded scratch, interior store only. ---
    # Border re-zeroed every step (tiny) for megacore-sharding safety; see note
    # at the top of the file.
    zrow = jnp.zeros((1, W + 2, Cin), jnp.bfloat16)
    zcol = jnp.zeros((H + 2, 1, Cin), jnp.bfloat16)
    xp_ref[0:1, :, :] = zrow
    xp_ref[H + 1:H + 2, :, :] = zrow
    xp_ref[:, 0:1, :] = zcol
    xp_ref[:, W + 1:W + 2, :] = zcol
    xp_ref[1:H + 1, 1:W + 1, :] = xin.astype(jnp.bfloat16)  # single interior store

    # --- Conv3x3 = 9 accumulating MXU pushes (K = Cin). ---
    # No im2col patch / no concatenate copies are ever materialized; operands
    # are bf16, accumulation stays f32.
    acc = None
    for ky in range(3):
        for kx in range(3):
            tap = ky * 3 + kx
            lhs = xp_ref[ky:ky + H, kx:kx + W, :].reshape(H * W, Cin)
            part = jnp.dot(lhs, w_ref[tap],
                           preferred_element_type=jnp.float32)
            acc = part if acc is None else acc + part        # (H*W, Cout) f32

    # Intermediate conv output stored as bf16 (pure intermediate -> halves HBM
    # traffic); BN stats come from the f32 accumulator below.
    y_ref[0] = acc.reshape(H, W, Cout).astype(jnp.bfloat16)

    # Per-channel partial stats on the MXU (which has slack at Cout=64) instead
    # of cross-sublane XLU reductions.  M=8 keeps shapes tile-aligned at the
    # same MXU cost as M=1; only row 0 is used.
    ones8 = jnp.ones((8, H * W), jnp.float32)
    ssum = jnp.dot(ones8, acc, preferred_element_type=jnp.float32)[0:1, :]
    ssq = jnp.dot(ones8, acc * acc, preferred_element_type=jnp.float32)[0:1, :]
    s_ref[0] = jnp.concatenate([ssum, ssq], axis=0)          # (2, Cout)


def _conv_bn_stage(x, w_taps, scale=None, shift=None):
    """conv3x3(optionally relu(x*scale+shift)) with per-image BN partial stats."""
    N, H, W, Cin = x.shape
    Cout = w_taps.shape[-1]
    apply_affine_relu = scale is not None

    block_act_in = pl.BlockSpec((1, H, W, Cin), lambda n: (n, 0, 0, 0))
    block_act_out = pl.BlockSpec((1, H, W, Cout), lambda n: (n, 0, 0, 0))
    block_vec = pl.BlockSpec((1, Cin), lambda n: (0, 0))
    block_w = pl.BlockSpec((9, Cin, Cout), lambda n: (0, 0, 0))
    block_s = pl.BlockSpec((1, 2, Cout), lambda n: (n, 0, 0))

    in_specs = [block_act_in]
    args = [x]
    if apply_affine_relu:
        in_specs += [block_vec, block_vec]
        args += [scale, shift]
    in_specs += [block_w]
    args += [w_taps]

    kernel = functools.partial(_conv_stats_kernel,
                               apply_affine_relu=apply_affine_relu)
    y, s = pl.pallas_call(
        kernel,
        grid=(N,),
        in_specs=in_specs,
        out_specs=[block_act_out, block_s],
        out_shape=[jax.ShapeDtypeStruct((N, H, W, Cout), jnp.bfloat16),
                   jax.ShapeDtypeStruct((N, 2, Cout), jnp.float32)],
        scratch_shapes=[pltpu.VMEM((H + 2, W + 2, Cin), jnp.bfloat16)],
        compiler_params=pltpu.CompilerParams(
            dimension_semantics=("parallel",),
            vmem_limit_bytes=VMEM_LIMIT),
    )(*args)
    return y, s


# --------------------------------------------------------------------------- #
# Kernel 3: bn2 affine + identity residual + relu -- lane-dense elementwise.
# Blocks are (1, H, W*C) so every vreg / store uses full 128-lane width.
# --------------------------------------------------------------------------- #
def _bn_res_relu_kernel(y_ref, r_ref, scale_ref, shift_ref, o_ref):
    sc = scale_ref[...]                                      # (1, W*C)
    sh = shift_ref[...]
    o_ref[0] = jnp.maximum(
        y_ref[0].astype(jnp.float32) * sc + sh + r_ref[0], 0.0)


def _bn_res_relu(y, res, scale, shift):
    N, H, W, C = y.shape
    L = W * C
    y2 = y.reshape(N, H, L)                                  # free row-major merge
    r2 = res.reshape(N, H, L)
    sc = jnp.tile(scale.reshape(1, C), (1, W))               # value at w*C+c = scale[c]
    sh = jnp.tile(shift.reshape(1, C), (1, W))

    block = pl.BlockSpec((1, H, L), lambda n: (n, 0, 0))
    block_vec = pl.BlockSpec((1, L), lambda n: (0, 0))
    out = pl.pallas_call(
        _bn_res_relu_kernel,
        grid=(N,),
        in_specs=[block, block, block_vec, block_vec],
        out_specs=block,
        out_shape=jax.ShapeDtypeStruct((N, H, L), jnp.float32),
        compiler_params=pltpu.CompilerParams(
            dimension_semantics=("parallel",),
            vmem_limit_bytes=VMEM_LIMIT),
    )(y2, r2, sc, sh)
    return out.reshape(N, H, W, C)


# --------------------------------------------------------------------------- #
# BN fold: reduce per-image [sum, sum_sq] -> per-channel (scale, shift).
# PyTorch training semantics: batch stats over (N,H,W), biased variance.
# --------------------------------------------------------------------------- #
def _bn_fold(stats, count, gamma, beta):
    tot = jnp.sum(stats, axis=0)                             # (2, C)
    mean = tot[0] / count
    var = jnp.maximum(tot[1] / count - mean * mean, 0.0)     # clamp: cancellation
    scale = gamma.reshape(-1) * lax.rsqrt(var + EPS)
    shift = beta.reshape(-1) - mean * scale
    return scale.reshape(1, -1), shift.reshape(1, -1)


def basic_block(x, w1, g1, b1, w2, g2, b2):
    """BasicBlock forward.  x NHWC; inplanes == planes, stride=1, downsample=None."""
    N, H, W, C = x.shape
    count = jnp.float32(N * H * W)
    w1b = w1.astype(jnp.bfloat16)                   # (9, Cin, Cout) per-tap weights
    w2b = w2.astype(jnp.bfloat16)

    y1, s1 = _conv_bn_stage(x, w1b)                 # conv1 output (bf16) + stats
    sc1, sh1 = _bn_fold(s1, count, g1, b1)          # bn1 folded affine (tiny)
    y2, s2 = _conv_bn_stage(y1, w2b, sc1, sh1)      # relu(bn1(.)) -> conv2 + stats
    sc2, sh2 = _bn_fold(s2, count, g2, b2)          # bn2 folded affine (tiny)
    return _bn_res_relu(y2, x, sc2, sh2)            # relu(bn2(conv2) + x)


# ------------------------------ pure-JAX reference --------------------------- #
def _ref_block(x, w1, g1, b1, w2, g2, b2):
    def conv(inp, w):
        whwio = w.reshape(3, 3, inp.shape[-1], w.shape[-1])
        return lax.conv_general_dilated(
            inp, whwio, (1, 1), "SAME",
            dimension_numbers=("NHWC", "HWIO", "NHWC"),
            precision=lax.Precision.HIGHEST)

    def bn(y, g, b):
        m = jnp.mean(y, axis=(0, 1, 2), keepdims=True)
        v = jnp.mean((y - m) ** 2, axis=(0, 1, 2), keepdims=True)
        return (y - m) / jnp.sqrt(v + EPS) * g.reshape(1, 1, 1, -1) + b.reshape(1, 1, 1, -1)

    out = jnp.maximum(bn(conv(x, w1), g1, b1), 0.0)
    out = bn(conv(out, w2), g2, b2) + x
    return jnp.maximum(out, 0.0)


if __name__ == "__main__":
    # Small shapes consistent with BasicBlock(inplanes=64, planes=64, stride=1).
    N, H, W, C = 2, 16, 16, 64
    key = jax.random.PRNGKey(0)
    ks = jax.random.split(key, 7)

    x = jax.random.normal(ks[0], (N, H, W, C), jnp.float32)          # NHWC
    w1 = 0.1 * jax.random.normal(ks[1], (9, C, C), jnp.float32)      # conv1 weight
    w2 = 0.1 * jax.random.normal(ks[2], (9, C, C), jnp.float32)      # conv2 weight
    g1 = 1.0 + 0.1 * jax.random.normal(ks[3], (1, C), jnp.float32)   # bn1 gamma
    b1 = 0.1 * jax.random.normal(ks[4], (1, C), jnp.float32)         # bn1 beta
    g2 = 1.0 + 0.1 * jax.random.normal(ks[5], (1, C), jnp.float32)   # bn2 gamma
    b2 = 0.1 * jax.random.normal(ks[6], (1, C), jnp.float32)         # bn2 beta

    out = jax.block_until_ready(jax.jit(basic_block)(x, w1, g1, b1, w2, g2, b2))

    # Tolerance accounts for bf16 MXU operands + bf16 intermediate storage
    # (f32 accumulation / f32 stats) vs the HIGHEST-precision f32 reference.
    ref = _ref_block(x, w1, g1, b1, w2, g2, b2)
    np.testing.assert_allclose(np.asarray(out), np.asarray(ref), rtol=3e-2, atol=3e-2)
    print("KERNEL_OK")
</pallas_src>

<mosaic_0001>
module attributes {stable_mosaic.version = 11 : i64} {
  func.func @_conv_stats_kernel(%arg0: i32, %arg1: memref<1x16x16x64xf32, #tpu.memory_space<vmem>>, %arg2: memref<9x64x64xbf16, #tpu.memory_space<vmem>>, %arg3: memref<1x16x16x64xbf16, #tpu.memory_space<vmem>>, %arg4: memref<1x2x64xf32, #tpu.memory_space<vmem>>, %arg5: memref<18x18x64xbf16, #tpu.memory_space<vmem>>) attributes {dimension_semantics = [#tpu.dimension_semantics<parallel>], iteration_bounds = array<i64: 2>, scalar_prefetch = 0 : i64, scratch_operands = 1 : i64, tpu.core_type = #tpu.core_type<tc>, window_params = [{transform_indices = @transform_0, window_bounds = array<i64: 1, 16, 16, 64>}, {pipeline_mode = #tpu.pipeline_mode<synchronous>, transform_indices = @transform_1, window_bounds = array<i64: 9, 64, 64>}, {transform_indices = @transform_2, window_bounds = array<i64: 1, 16, 16, 64>}, {transform_indices = @transform_3, window_bounds = array<i64: 1, 2, 64>}]} {
    %c0 = arith.constant 0 : index
    %c0_0 = arith.constant 0 : index
    %c0_1 = arith.constant 0 : index
    %c0_2 = arith.constant 0 : index
    %0 = vector.load %arg1[%c0, %c0_0, %c0_1, %c0_2] : memref<1x16x16x64xf32, #tpu.memory_space<vmem>>, vector<1x16x16x64xf32>
    %1 = vector.shape_cast %0 : vector<1x16x16x64xf32> to vector<16x16x64xf32>
    %cst = arith.constant 0.000000e+00 : bf16
    %2 = vector.broadcast %cst : bf16 to vector<1x18x64xbf16>
    %cst_3 = arith.constant 0.000000e+00 : bf16
    %3 = vector.broadcast %cst_3 : bf16 to vector<18x1x64xbf16>
    %c0_4 = arith.constant 0 : index
    %c0_5 = arith.constant 0 : index
    %c0_6 = arith.constant 0 : index
    %4 = vector.load %arg5[%c0_4, %c0_5, %c0_6] : memref<18x18x64xbf16, #tpu.memory_space<vmem>>, vector<1x18x64xbf16>
    tpu.vector_store %arg5[%c0_4, %c0_5, %c0_6], %2 {strides = array<i32>} : memref<18x18x64xbf16, #tpu.memory_space<vmem>>, vector<1x18x64xbf16>,
    %c17 = arith.constant 17 : index
    %c0_7 = arith.constant 0 : index
    %c0_8 = arith.constant 0 : index
    %5 = vector.load %arg5[%c17, %c0_7, %c0_8] : memref<18x18x64xbf16, #tpu.memory_space<vmem>>, vector<1x18x64xbf16>
    tpu.vector_store %arg5[%c17, %c0_7, %c0_8], %2 {strides = array<i32>} : memref<18x18x64xbf16, #tpu.memory_space<vmem>>, vector<1x18x64xbf16>,
    %c0_9 = arith.constant 0 : index
    %c0_10 = arith.constant 0 : index
    %c0_11 = arith.constant 0 : index
    %6 = vector.load %arg5[%c0_9, %c0_10, %c0_11] : memref<18x18x64xbf16, #tpu.memory_space<vmem>>, vector<18x1x64xbf16>
    tpu.vector_store %arg5[%c0_9, %c0_10, %c0_11], %3 {strides = array<i32>} : memref<18x18x64xbf16, #tpu.memory_space<vmem>>, vector<18x1x64xbf16>,
    %c0_12 = arith.constant 0 : index
    %c17_13 = arith.constant 17 : index
    %c0_14 = arith.constant 0 : index
    %7 = vector.load %arg5[%c0_12, %c17_13, %c0_14] : memref<18x18x64xbf16, #tpu.memory_space<vmem>>, vector<18x1x64xbf16>
    tpu.vector_store %arg5[%c0_12, %c17_13, %c0_14], %3 {strides = array<i32>} : memref<18x18x64xbf16, #tpu.memory_space<vmem>>, vector<18x1x64xbf16>,
    %8 = arith.truncf %1 : vector<16x16x64xf32> to vector<16x16x64xbf16>
    %c1 = arith.constant 1 : index
    %c1_15 = arith.constant 1 : index
    %c0_16 = arith.constant 0 : index
    %9 = vector.load %arg5[%c1, %c1_15, %c0_16] : memref<18x18x64xbf16, #tpu.memory_space<vmem>>, vector<16x16x64xbf16>
    tpu.vector_store %arg5[%c1, %c1_15, %c0_16], %8 {strides = array<i32>} : memref<18x18x64xbf16, #tpu.memory_space<vmem>>, vector<16x16x64xbf16>,
    %c0_17 = arith.constant 0 : index
    %c0_18 = arith.constant 0 : index
    %c0_19 = arith.constant 0 : index
    %10 = vector.load %arg5[%c0_17, %c0_18, %c0_19] : memref<18x18x64xbf16, #tpu.memory_space<vmem>>, vector<16x16x64xbf16>
    %11 = vector.shape_cast %10 : vector<16x16x64xbf16> to vector<256x64xbf16>
    %c0_20 = arith.constant 0 : index
    %c0_21 = arith.constant 0 : index
    %c0_22 = arith.constant 0 : index
    %12 = vector.load %arg2[%c0_20, %c0_21, %c0_22] : memref<9x64x64xbf16, #tpu.memory_space<vmem>>, vector<1x64x64xbf16>
    %13 = vector.shape_cast %12 : vector<1x64x64xbf16> to vector<64x64xbf16>
    %cst_23 = arith.constant dense<0.000000e+00> : vector<256x64xf32>
    %14 = tpu.matmul %11, %13, %cst_23 {dimension_numbers = #tpu.dot_dimension_numbers<[1], [0], [0], [1], [0, 0, 1, 1], [], []>} : vector<256x64xbf16>, vector<64x64xbf16>, vector<256x64xf32> -> vector<256x64xf32>
    %c0_24 = arith.constant 0 : index
    %c1_25 = arith.constant 1 : index
    %c0_26 = arith.constant 0 : index
    %15 = vector.load %arg5[%c0_24, %c1_25, %c0_26] : memref<18x18x64xbf16, #tpu.memory_space<vmem>>, vector<16x16x64xbf16>
    %16 = vector.shape_cast %15 : vector<16x16x64xbf16> to vector<256x64xbf16>
    %c1_27 = arith.constant 1 : index
    %c0_28 = arith.constant 0 : index
    %c0_29 = arith.constant 0 : index
    %17 = vector.load %arg2[%c1_27, %c0_28, %c0_29] : memref<9x64x64xbf16, #tpu.memory_space<vmem>>, vector<1x64x64xbf16>
    %18 = vector.shape_cast %17 : vector<1x64x64xbf16> to vector<64x64xbf16>
    %cst_30 = arith.constant dense<0.000000e+00> : vector<256x64xf32>
    %19 = tpu.matmul %16, %18, %cst_30 {dimension_numbers = #tpu.dot_dimension_numbers<[1], [0], [0], [1], [0, 0, 1, 1], [], []>} : vector<256x64xbf16>, vector<64x64xbf16>, vector<256x64xf32> -> vector<256x64xf32>
    %20 = arith.addf %14, %19 : vector<256x64xf32>
    %c0_31 = arith.constant 0 : index
    %c2 = arith.constant 2 : index
    %c0_32 = arith.constant 0 : index
    %21 = vector.load %arg5[%c0_31, %c2, %c0_32] : memref<18x18x64xbf16, #tpu.memory_space<vmem>>, vector<16x16x64xbf16>
    %22 = vector.shape_cast %21 : vector<16x16x64xbf16> to vector<256x64xbf16>
    %c2_33 = arith.constant 2 : index
    %c0_34 = arith.constant 0 : index
    %c0_35 = arith.constant 0 : index
    %23 = vector.load %arg2[%c2_33, %c0_34, %c0_35] : memref<9x64x64xbf16, #tpu.memory_space<vmem>>, vector<1x64x64xbf16>
    %24 = vector.shape_cast %23 : vector<1x64x64xbf16> to vector<64x64xbf16>
    %cst_36 = arith.constant dense<0.000000e+00> : vector<256x64xf32>
    %25 = tpu.matmul %22, %24, %cst_36 {dimension_numbers = #tpu.dot_dimension_numbers<[1], [0], [0], [1], [0, 0, 1, 1], [], []>} : vector<256x64xbf16>, vector<64x64xbf16>, vector<256x64xf32> -> vector<256x64xf32>
    %26 = arith.addf %20, %25 : vector<256x64xf32>
    %c1_37 = arith.constant 1 : index
    %c0_38 = arith.constant 0 : index
    %c0_39 = arith.constant 0 : index
    %27 = vector.load %arg5[%c1_37, %c0_38, %c0_39] : memref<18x18x64xbf16, #tpu.memory_space<vmem>>, vector<16x16x64xbf16>
    %28 = vector.shape_cast %27 : vector<16x16x64xbf16> to vector<256x64xbf16>
    %c3 = arith.constant 3 : index
    %c0_40 = arith.constant 0 : index
    %c0_41 = arith.constant 0 : index
    %29 = vector.load %arg2[%c3, %c0_40, %c0_41] : memref<9x64x64xbf16, #tpu.memory_space<vmem>>, vector<1x64x64xbf16>
    %30 = vector.shape_cast %29 : vector<1x64x64xbf16> to vector<64x64xbf16>
    %cst_42 = arith.constant dense<0.000000e+00> : vector<256x64xf32>
    %31 = tpu.matmul %28, %30, %cst_42 {dimension_numbers = #tpu.dot_dimension_numbers<[1], [0], [0], [1], [0, 0, 1, 1], [], []>} : vector<256x64xbf16>, vector<64x64xbf16>, vector<256x64xf32> -> vector<256x64xf32>
    %32 = arith.addf %26, %31 : vector<256x64xf32>
    %c1_43 = arith.constant 1 : index
    %c1_44 = arith.constant 1 : index
    %c0_45 = arith.constant 0 : index
    %33 = vector.load %arg5[%c1_43, %c1_44, %c0_45] : memref<18x18x64xbf16, #tpu.memory_space<vmem>>, vector<16x16x64xbf16>
    %34 = vector.shape_cast %33 : vector<16x16x64xbf16> to vector<256x64xbf16>
    %c4 = arith.constant 4 : index
    %c0_46 = arith.constant 0 : index
    %c0_47 = arith.constant 0 : index
    %35 = vector.load %arg2[%c4, %c0_46, %c0_47] : memref<9x64x64xbf16, #tpu.memory_space<vmem>>, vector<1x64x64xbf16>
    %36 = vector.shape_cast %35 : vector<1x64x64xbf16> to vector<64x64xbf16>
    %cst_48 = arith.constant dense<0.000000e+00> : vector<256x64xf32>
    %37 = tpu.matmul %34, %36, %cst_48 {dimension_numbers = #tpu.dot_dimension_numbers<[1], [0], [0], [1], [0, 0, 1, 1], [], []>} : vector<256x64xbf16>, vector<64x64xbf16>, vector<256x64xf32> -> vector<256x64xf32>
    %38 = arith.addf %32, %37 : vector<256x64xf32>
    %c1_49 = arith.constant 1 : index
    %c2_50 = arith.constant 2 : index
    %c0_51 = arith.constant 0 : index
    %39 = vector.load %arg5[%c1_49, %c2_50, %c0_51] : memref<18x18x64xbf16, #tpu.memory_space<vmem>>, vector<16x16x64xbf16>
    %40 = vector.shape_cast %39 : vector<16x16x64xbf16> to vector<256x64xbf16>
    %c5 = arith.constant 5 : index
    %c0_52 = arith.constant 0 : index
    %c0_53 = arith.constant 0 : index
    %41 = vector.load %arg2[%c5, %c0_52, %c0_53] : memref<9x64x64xbf16, #tpu.memory_space<vmem>>, vector<1x64x64xbf16>
    %42 = vector.shape_cast %41 : vector<1x64x64xbf16> to vector<64x64xbf16>
    %cst_54 = arith.constant dense<0.000000e+00> : vector<256x64xf32>
    %43 = tpu.matmul %40, %42, %cst_54 {dimension_numbers = #tpu.dot_dimension_numbers<[1], [0], [0], [1], [0, 0, 1, 1], [], []>} : vector<256x64xbf16>, vector<64x64xbf16>, vector<256x64xf32> -> vector<256x64xf32>
    %44 = arith.addf %38, %43 : vector<256x64xf32>
    %c2_55 = arith.constant 2 : index
    %c0_56 = arith.constant 0 : index
    %c0_57 = arith.constant 0 : index
    %45 = vector.load %arg5[%c2_55, %c0_56, %c0_57] : memref<18x18x64xbf16, #tpu.memory_space<vmem>>, vector<16x16x64xbf16>
    %46 = vector.shape_cast %45 : vector<16x16x64xbf16> to vector<256x64xbf16>
    %c6 = arith.constant 6 : index
    %c0_58 = arith.constant 0 : index
    %c0_59 = arith.constant 0 : index
    %47 = vector.load %arg2[%c6, %c0_58, %c0_59] : memref<9x64x64xbf16, #tpu.memory_space<vmem>>, vector<1x64x64xbf16>
    %48 = vector.shape_cast %47 : vector<1x64x64xbf16> to vector<64x64xbf16>
    %cst_60 = arith.constant dense<0.000000e+00> : vector<256x64xf32>
    %49 = tpu.matmul %46, %48, %cst_60 {dimension_numbers = #tpu.dot_dimension_numbers<[1], [0], [0], [1], [0, 0, 1, 1], [], []>} : vector<256x64xbf16>, vector<64x64xbf16>, vector<256x64xf32> -> vector<256x64xf32>
    %50 = arith.addf %44, %49 : vector<256x64xf32>
    %c2_61 = arith.constant 2 : index
    %c1_62 = arith.constant 1 : index
    %c0_63 = arith.constant 0 : index
    %51 = vector.load %arg5[%c2_61, %c1_62, %c0_63] : memref<18x18x64xbf16, #tpu.memory_space<vmem>>, vector<16x16x64xbf16>
    %52 = vector.shape_cast %51 : vector<16x16x64xbf16> to vector<256x64xbf16>
    %c7 = arith.constant 7 : index
    %c0_64 = arith.constant 0 : index
    %c0_65 = arith.constant 0 : index
    %53 = vector.load %arg2[%c7, %c0_64, %c0_65] : memref<9x64x64xbf16, #tpu.memory_space<vmem>>, vector<1x64x64xbf16>
    %54 = vector.shape_cast %53 : vector<1x64x64xbf16> to vector<64x64xbf16>
    %cst_66 = arith.constant dense<0.000000e+00> : vector<256x64xf32>
    %55 = tpu.matmul %52, %54, %cst_66 {dimension_numbers = #tpu.dot_dimension_numbers<[1], [0], [0], [1], [0, 0, 1, 1], [], []>} : vector<256x64xbf16>, vector<64x64xbf16>, vector<256x64xf32> -> vector<256x64xf32>
    %56 = arith.addf %50, %55 : vector<256x64xf32>
    %c2_67 = arith.constant 2 : index
    %c2_68 = arith.constant 2 : index
    %c0_69 = arith.constant 0 : index
    %57 = vector.load %arg5[%c2_67, %c2_68, %c0_69] : memref<18x18x64xbf16, #tpu.memory_space<vmem>>, vector<16x16x64xbf16>
    %58 = vector.shape_cast %57 : vector<16x16x64xbf16> to vector<256x64xbf16>
    %c8 = arith.constant 8 : index
    %c0_70 = arith.constant 0 : index
    %c0_71 = arith.constant 0 : index
    %59 = vector.load %arg2[%c8, %c0_70, %c0_71] : memref<9x64x64xbf16, #tpu.memory_space<vmem>>, vector<1x64x64xbf16>
    %60 = vector.shape_cast %59 : vector<1x64x64xbf16> to vector<64x64xbf16>
    %cst_72 = arith.constant dense<0.000000e+00> : vector<256x64xf32>
    %61 = tpu.matmul %58, %60, %cst_72 {dimension_numbers = #tpu.dot_dimension_numbers<[1], [0], [0], [1], [0, 0, 1, 1], [], []>} : vector<256x64xbf16>, vector<64x64xbf16>, vector<256x64xf32> -> vector<256x64xf32>
    %62 = arith.addf %56, %61 : vector<256x64xf32>
    %63 = vector.shape_cast %62 : vector<256x64xf32> to vector<16x16x64xf32>
    %64 = arith.truncf %63 : vector<16x16x64xf32> to vector<16x16x64xbf16>
    %c0_73 = arith.constant 0 : index
    %c0_74 = arith.constant 0 : index
    %c0_75 = arith.constant 0 : index
    %c0_76 = arith.constant 0 : index
    %65 = vector.load %arg3[%c0_73, %c0_74, %c0_75, %c0_76] : memref<1x16x16x64xbf16, #tpu.memory_space<vmem>>, vector<1x16x16x64xbf16>
    %66 = vector.shape_cast %65 : vector<1x16x16x64xbf16> to vector<16x16x64xbf16>
    %67 = vector.shape_cast %64 : vector<16x16x64xbf16> to vector<1x16x16x64xbf16>
    tpu.vector_store %arg3[%c0_73, %c0_74, %c0_75, %c0_76], %67 {strides = array<i32>} : memref<1x16x16x64xbf16, #tpu.memory_space<vmem>>, vector<1x16x16x64xbf16>,
    %cst_77 = arith.constant 1.000000e+00 : f32
    %68 = vector.broadcast %cst_77 : f32 to vector<8x256xf32>
    %cst_78 = arith.constant dense<0.000000e+00> : vector<8x64xf32>
    %69 = tpu.matmul %68, %62, %cst_78 {dimension_numbers = #tpu.dot_dimension_numbers<[1], [0], [0], [1], [0, 0, 1, 1], [], []>} : vector<8x256xf32>, vector<256x64xf32>, vector<8x64xf32> -> vector<8x64xf32>
    %70 = vector.extract_strided_slice %69 {offsets = [0, 0], sizes = [1, 64], strides = [1, 1]} : vector<8x64xf32> to vector<1x64xf32>
    %71 = arith.mulf %62, %62 : vector<256x64xf32>
    %cst_79 = arith.constant dense<0.000000e+00> : vector<8x64xf32>
    %72 = tpu.matmul %68, %71, %cst_79 {dimension_numbers = #tpu.dot_dimension_numbers<[1], [0], [0], [1], [0, 0, 1, 1], [], []>} : vector<8x256xf32>, vector<256x64xf32>, vector<8x64xf32> -> vector<8x64xf32>
    %73 = vector.extract_strided_slice %72 {offsets = [0, 0], sizes = [1, 64], strides = [1, 1]} : vector<8x64xf32> to vector<1x64xf32>
    %74 = tpu.concatenate %70, %73 in 0 : vector<1x64xf32>, vector<1x64xf32> -> vector<2x64xf32>
    %c0_80 = arith.constant 0 : index
    %c0_81 = arith.constant 0 : index
    %c0_82 = arith.constant 0 : index
    %75 = vector.load %arg4[%c0_80, %c0_81, %c0_82] : memref<1x2x64xf32, #tpu.memory_space<vmem>>, vector<1x2x64xf32>
    %76 = vector.shape_cast %75 : vector<1x2x64xf32> to vector<2x64xf32>
    %77 = vector.shape_cast %74 : vector<2x64xf32> to vector<1x2x64xf32>
    tpu.vector_store %arg4[%c0_80, %c0_81, %c0_82], %77 {strides = array<i32>} : memref<1x2x64xf32, #tpu.memory_space<vmem>>, vector<1x2x64xf32>,
    return
  }
  func.func @transform_0(%arg0: i32) -> (i32, i32, i32, i32) {
    %c0_i32 = arith.constant 0 : i32
    %c0_i32_0 = arith.constant 0 : i32
    %c0_i32_1 = arith.constant 0 : i32
    %c0_i32_2 = arith.constant 0 : i32
    return %arg0, %c0_i32, %c0_i32_0, %c0_i32_1 : i32, i32, i32, i32
  }
  func.func @transform_1(%arg0: i32) -> (i32, i32, i32) {
    %c0_i32 = arith.constant 0 : i32
    %c0_i32_0 = arith.constant 0 : i32
    %c0_i32_1 = arith.constant 0 : i32
    %c0_i32_2 = arith.constant 0 : i32
    return %c0_i32, %c0_i32_0, %c0_i32_1 : i32, i32, i32
  }
  func.func @transform_2(%arg0: i32) -> (i32, i32, i32, i32) {
    %c0_i32 = arith.constant 0 : i32
    %c0_i32_0 = arith.constant 0 : i32
    %c0_i32_1 = arith.constant 0 : i32
    %c0_i32_2 = arith.constant 0 : i32
    return %arg0, %c0_i32, %c0_i32_0, %c0_i32_1 : i32, i32, i32, i32
  }
  func.func @transform_3(%arg0: i32) -> (i32, i32, i32) {
    %c0_i32 = arith.constant 0 : i32
    %c0_i32_0 = arith.constant 0 : i32
    %c0_i32_1 = arith.constant 0 : i32
    return %arg0, %c0_i32, %c0_i32_0 : i32, i32, i32
  }
}

module attributes {stable_mosaic.version = 11 : i64} {
  func.func @_conv_stats_kernel(%arg0: i32, %arg1: memref<1x16x16x64xbf16, #tpu.memory_space<vmem>>, %arg2: memref<1x64xf32, #tpu.memory_space<vmem>>, %arg3: memref<1x64xf32, #tpu.memory_space<vmem>>, %arg4: memref<9x64x64xbf16, #tpu.memory_space<vmem>>, %arg5: memref<1x16x16x64xbf16, #tpu.memory_space<vmem>>, %arg6: memref<1x2x64xf32, #tpu.memory_space<vmem>>, %arg7: memref<18x18x64xbf16, #tpu.memory_space<vmem>>) attributes {dimension_semantics = [#tpu.dimension_semantics<parallel>], iteration_bounds = array<i64: 2>, scalar_prefetch = 0 : i64, scratch_operands = 1 : i64, tpu.core_type = #tpu.core_type<tc>, window_params = [{transform_indices = @transform_0, window_bounds = array<i64: 1, 16, 16, 64>}, {pipeline_mode = #tpu.pipeline_mode<synchronous>, transform_indices = @transform_1, window_bounds = array<i64: 1, 64>}, {pipeline_mode = #tpu.pipeline_mode<synchronous>, transform_indices = @transform_2, window_bounds = array<i64: 1, 64>}, {pipeline_mode = #tpu.pipeline_mode<synchronous>, transform_indices = @transform_3, window_bounds = array<i64: 9, 64, 64>}, {transform_indices = @transform_4, window_bounds = array<i64: 1, 16, 16, 64>}, {transform_indices = @transform_5, window_bounds = array<i64: 1, 2, 64>}]} {
    %c0 = arith.constant 0 : index
    %c0_0 = arith.constant 0 : index
    %c0_1 = arith.constant 0 : index
    %c0_2 = arith.constant 0 : index
    %0 = vector.load %arg1[%c0, %c0_0, %c0_1, %c0_2] : memref<1x16x16x64xbf16, #tpu.memory_space<vmem>>, vector<1x16x16x64xbf16>
    %1 = vector.shape_cast %0 : vector<1x16x16x64xbf16> to vector<16x16x64xbf16>
    %2 = arith.extf %1 : vector<16x16x64xbf16> to vector<16x16x64xf32>
    %c0_3 = arith.constant 0 : index
    %c0_4 = arith.constant 0 : index
    %3 = vector.load %arg2[%c0_3, %c0_4] : memref<1x64xf32, #tpu.memory_space<vmem>>, vector<1x64xf32>
    %4 = vector.shape_cast %3 : vector<1x64xf32> to vector<1x1x64xf32>
    %c0_5 = arith.constant 0 : index
    %c0_6 = arith.constant 0 : index
    %5 = vector.load %arg3[%c0_5, %c0_6] : memref<1x64xf32, #tpu.memory_space<vmem>>, vector<1x64xf32>
    %6 = vector.shape_cast %5 : vector<1x64xf32> to vector<1x1x64xf32>
    %7 = vector.broadcast %4 : vector<1x1x64xf32> to vector<16x16x64xf32>
    %8 = arith.mulf %2, %7 : vector<16x16x64xf32>
    %9 = vector.broadcast %6 : vector<1x1x64xf32> to vector<16x16x64xf32>
    %10 = arith.addf %8, %9 : vector<16x16x64xf32>
    %cst = arith.constant 0.000000e+00 : f32
    %11 = vector.broadcast %cst : f32 to vector<16x16x64xf32>
    %12 = arith.maximumf %10, %11 : vector<16x16x64xf32>
    %cst_7 = arith.constant 0.000000e+00 : bf16
    %13 = vector.broadcast %cst_7 : bf16 to vector<1x18x64xbf16>
    %cst_8 = arith.constant 0.000000e+00 : bf16
    %14 = vector.broadcast %cst_8 : bf16 to vector<18x1x64xbf16>
    %c0_9 = arith.constant 0 : index
    %c0_10 = arith.constant 0 : index
    %c0_11 = arith.constant 0 : index
    %15 = vector.load %arg7[%c0_9, %c0_10, %c0_11] : memref<18x18x64xbf16, #tpu.memory_space<vmem>>, vector<1x18x64xbf16>
    tpu.vector_store %arg7[%c0_9, %c0_10, %c0_11], %13 {strides = array<i32>} : memref<18x18x64xbf16, #tpu.memory_space<vmem>>, vector<1x18x64xbf16>,
    %c17 = arith.constant 17 : index
    %c0_12 = arith.constant 0 : index
    %c0_13 = arith.constant 0 : index
    %16 = vector.load %arg7[%c17, %c0_12, %c0_13] : memref<18x18x64xbf16, #tpu.memory_space<vmem>>, vector<1x18x64xbf16>
    tpu.vector_store %arg7[%c17, %c0_12, %c0_13], %13 {strides = array<i32>} : memref<18x18x64xbf16, #tpu.memory_space<vmem>>, vector<1x18x64xbf16>,
    %c0_14 = arith.constant 0 : index
    %c0_15 = arith.constant 0 : index
    %c0_16 = arith.constant 0 : index
    %17 = vector.load %arg7[%c0_14, %c0_15, %c0_16] : memref<18x18x64xbf16, #tpu.memory_space<vmem>>, vector<18x1x64xbf16>
    tpu.vector_store %arg7[%c0_14, %c0_15, %c0_16], %14 {strides = array<i32>} : memref<18x18x64xbf16, #tpu.memory_space<vmem>>, vector<18x1x64xbf16>,
    %c0_17 = arith.constant 0 : index
    %c17_18 = arith.constant 17 : index
    %c0_19 = arith.constant 0 : index
    %18 = vector.load %arg7[%c0_17, %c17_18, %c0_19] : memref<18x18x64xbf16, #tpu.memory_space<vmem>>, vector<18x1x64xbf16>
    tpu.vector_store %arg7[%c0_17, %c17_18, %c0_19], %14 {strides = array<i32>} : memref<18x18x64xbf16, #tpu.memory_space<vmem>>, vector<18x1x64xbf16>,
    %19 = arith.truncf %12 : vector<16x16x64xf32> to vector<16x16x64xbf16>
    %c1 = arith.constant 1 : index
    %c1_20 = arith.constant 1 : index
    %c0_21 = arith.constant 0 : index
    %20 = vector.load %arg7[%c1, %c1_20, %c0_21] : memref<18x18x64xbf16, #tpu.memory_space<vmem>>, vector<16x16x64xbf16>
    tpu.vector_store %arg7[%c1, %c1_20, %c0_21], %19 {strides = array<i32>} : memref<18x18x64xbf16, #tpu.memory_space<vmem>>, vector<16x16x64xbf16>,
    %c0_22 = arith.constant 0 : index
    %c0_23 = arith.constant 0 : index
    %c0_24 = arith.constant 0 : index
    %21 = vector.load %arg7[%c0_22, %c0_23, %c0_24] : memref<18x18x64xbf16, #tpu.memory_space<vmem>>, vector<16x16x64xbf16>
    %22 = vector.shape_cast %21 : vector<16x16x64xbf16> to vector<256x64xbf16>
    %c0_25 = arith.constant 0 : index
    %c0_26 = arith.constant 0 : index
    %c0_27 = arith.constant 0 : index
    %23 = vector.load %arg4[%c0_25, %c0_26, %c0_27] : memref<9x64x64xbf16, #tpu.memory_space<vmem>>, vector<1x64x64xbf16>
    %24 = vector.shape_cast %23 : vector<1x64x64xbf16> to vector<64x64xbf16>
    %cst_28 = arith.constant dense<0.000000e+00> : vector<256x64xf32>
    %25 = tpu.matmul %22, %24, %cst_28 {dimension_numbers = #tpu.dot_dimension_numbers<[1], [0], [0], [1], [0, 0, 1, 1], [], []>} : vector<256x64xbf16>, vector<64x64xbf16>, vector<256x64xf32> -> vector<256x64xf32>
    %c0_29 = arith.constant 0 : index
    %c1_30 = arith.constant 1 : index
    %c0_31 = arith.constant 0 : index
    %26 = vector.load %arg7[%c0_29, %c1_30, %c0_31] : memref<18x18x64xbf16, #tpu.memory_space<vmem>>, vector<16x16x64xbf16>
    %27 = vector.shape_cast %26 : vector<16x16x64xbf16> to vector<256x64xbf16>
    %c1_32 = arith.constant 1 : index
    %c0_33 = arith.constant 0 : index
    %c0_34 = arith.constant 0 : index
    %28 = vector.load %arg4[%c1_32, %c0_33, %c0_34] : memref<9x64x64xbf16, #tpu.memory_space<vmem>>, vector<1x64x64xbf16>
    %29 = vector.shape_cast %28 : vector<1x64x64xbf16> to vector<64x64xbf16>
    %cst_35 = arith.constant dense<0.000000e+00> : vector<256x64xf32>
    %30 = tpu.matmul %27, %29, %cst_35 {dimension_numbers = #tpu.dot_dimension_numbers<[1], [0], [0], [1], [0, 0, 1, 1], [], []>} : vector<256x64xbf16>, vector<64x64xbf16>, vector<256x64xf32> -> vector<256x64xf32>
    %31 = arith.addf %25, %30 : vector<256x64xf32>
    %c0_36 = arith.constant 0 : index
    %c2 = arith.constant 2 : index
    %c0_37 = arith.constant 0 : index
    %32 = vector.load %arg7[%c0_36, %c2, %c0_37] : memref<18x18x64xbf16, #tpu.memory_space<vmem>>, vector<16x16x64xbf16>
    %33 = vector.shape_cast %32 : vector<16x16x64xbf16> to vector<256x64xbf16>
    %c2_38 = arith.constant 2 : index
    %c0_39 = arith.constant 0 : index
    %c0_40 = arith.constant 0 : index
    %34 = vector.load %arg4[%c2_38, %c0_39, %c0_40] : memref<9x64x64xbf16, #tpu.memory_space<vmem>>, vector<1x64x64xbf16>
    %35 = vector.shape_cast %34 : vector<1x64x64xbf16> to vector<64x64xbf16>
    %cst_41 = arith.constant dense<0.000000e+00> : vector<256x64xf32>
    %36 = tpu.matmul %33, %35, %cst_41 {dimension_numbers = #tpu.dot_dimension_numbers<[1], [0], [0], [1], [0, 0, 1, 1], [], []>} : vector<256x64xbf16>, vector<64x64xbf16>, vector<256x64xf32> -> vector<256x64xf32>
    %37 = arith.addf %31, %36 : vector<256x64xf32>
    %c1_42 = arith.constant 1 : index
    %c0_43 = arith.constant 0 : index
    %c0_44 = arith.constant 0 : index
    %38 = vector.load %arg7[%c1_42, %c0_43, %c0_44] : memref<18x18x64xbf16, #tpu.memory_space<vmem>>, vector<16x16x64xbf16>
    %39 = vector.shape_cast %38 : vector<16x16x64xbf16> to vector<256x64xbf16>
    %c3 = arith.constant 3 : index
    %c0_45 = arith.constant 0 : index
    %c0_46 = arith.constant 0 : index
    %40 = vector.load %arg4[%c3, %c0_45, %c0_46] : memref<9x64x64xbf16, #tpu.memory_space<vmem>>, vector<1x64x64xbf16>
    %41 = vector.shape_cast %40 : vector<1x64x64xbf16> to vector<64x64xbf16>
    %cst_47 = arith.constant dense<0.000000e+00> : vector<256x64xf32>
    %42 = tpu.matmul %39, %41, %cst_47 {dimension_numbers = #tpu.dot_dimension_numbers<[1], [0], [0], [1], [0, 0, 1, 1], [], []>} : vector<256x64xbf16>, vector<64x64xbf16>, vector<256x64xf32> -> vector<256x64xf32>
    %43 = arith.addf %37, %42 : vector<256x64xf32>
    %c1_48 = arith.constant 1 : index
    %c1_49 = arith.constant 1 : index
    %c0_50 = arith.constant 0 : index
    %44 = vector.load %arg7[%c1_48, %c1_49, %c0_50] : memref<18x18x64xbf16, #tpu.memory_space<vmem>>, vector<16x16x64xbf16>
    %45 = vector.shape_cast %44 : vector<16x16x64xbf16> to vector<256x64xbf16>
    %c4 = arith.constant 4 : index
    %c0_51 = arith.constant 0 : index
    %c0_52 = arith.constant 0 : index
    %46 = vector.load %arg4[%c4, %c0_51, %c0_52] : memref<9x64x64xbf16, #tpu.memory_space<vmem>>, vector<1x64x64xbf16>
    %47 = vector.shape_cast %46 : vector<1x64x64xbf16> to vector<64x64xbf16>
    %cst_53 = arith.constant dense<0.000000e+00> : vector<256x64xf32>
    %48 = tpu.matmul %45, %47, %cst_53 {dimension_numbers = #tpu.dot_dimension_numbers<[1], [0], [0], [1], [0, 0, 1, 1], [], []>} : vector<256x64xbf16>, vector<64x64xbf16>, vector<256x64xf32> -> vector<256x64xf32>
    %49 = arith.addf %43, %48 : vector<256x64xf32>
    %c1_54 = arith.constant 1 : index
    %c2_55 = arith.constant 2 : index
    %c0_56 = arith.constant 0 : index
    %50 = vector.load %arg7[%c1_54, %c2_55, %c0_56] : memref<18x18x64xbf16, #tpu.memory_space<vmem>>, vector<16x16x64xbf16>
    %51 = vector.shape_cast %50 : vector<16x16x64xbf16> to vector<256x64xbf16>
    %c5 = arith.constant 5 : index
    %c0_57 = arith.constant 0 : index
    %c0_58 = arith.constant 0 : index
    %52 = vector.load %arg4[%c5, %c0_57, %c0_58] : memref<9x64x64xbf16, #tpu.memory_space<vmem>>, vector<1x64x64xbf16>
    %53 = vector.shape_cast %52 : vector<1x64x64xbf16> to vector<64x64xbf16>
    %cst_59 = arith.constant dense<0.000000e+00> : vector<256x64xf32>
    %54 = tpu.matmul %51, %53, %cst_59 {dimension_numbers = #tpu.dot_dimension_numbers<[1], [0], [0], [1], [0, 0, 1, 1], [], []>} : vector<256x64xbf16>, vector<64x64xbf16>, vector<256x64xf32> -> vector<256x64xf32>
    %55 = arith.addf %49, %54 : vector<256x64xf32>
    %c2_60 = arith.constant 2 : index
    %c0_61 = arith.constant 0 : index
    %c0_62 = arith.constant 0 : index
    %56 = vector.load %arg7[%c2_60, %c0_61, %c0_62] : memref<18x18x64xbf16, #tpu.memory_space<vmem>>, vector<16x16x64xbf16>
    %57 = vector.shape_cast %56 : vector<16x16x64xbf16> to vector<256x64xbf16>
    %c6 = arith.constant 6 : index
    %c0_63 = arith.constant 0 : index
    %c0_64 = arith.constant 0 : index
    %58 = vector.load %arg4[%c6, %c0_63, %c0_64] : memref<9x64x64xbf16, #tpu.memory_space<vmem>>, vector<1x64x64xbf16>
    %59 = vector.shape_cast %58 : vector<1x64x64xbf16> to vector<64x64xbf16>
    %cst_65 = arith.constant dense<0.000000e+00> : vector<256x64xf32>
    %60 = tpu.matmul %57, %59, %cst_65 {dimension_numbers = #tpu.dot_dimension_numbers<[1], [0], [0], [1], [0, 0, 1, 1], [], []>} : vector<256x64xbf16>, vector<64x64xbf16>, vector<256x64xf32> -> vector<256x64xf32>
    %61 = arith.addf %55, %60 : vector<256x64xf32>
    %c2_66 = arith.constant 2 : index
    %c1_67 = arith.constant 1 : index
    %c0_68 = arith.constant 0 : index
    %62 = vector.load %arg7[%c2_66, %c1_67, %c0_68] : memref<18x18x64xbf16, #tpu.memory_space<vmem>>, vector<16x16x64xbf16>
    %63 = vector.shape_cast %62 : vector<16x16x64xbf16> to vector<256x64xbf16>
    %c7 = arith.constant 7 : index
    %c0_69 = arith.constant 0 : index
    %c0_70 = arith.constant 0 : index
    %64 = vector.load %arg4[%c7, %c0_69, %c0_70] : memref<9x64x64xbf16, #tpu.memory_space<vmem>>, vector<1x64x64xbf16>
    %65 = vector.shape_cast %64 : vector<1x64x64xbf16> to vector<64x64xbf16>
    %cst_71 = arith.constant dense<0.000000e+00> : vector<256x64xf32>
    %66 = tpu.matmul %63, %65, %cst_71 {dimension_numbers = #tpu.dot_dimension_numbers<[1], [0], [0], [1], [0, 0, 1, 1], [], []>} : vector<256x64xbf16>, vector<64x64xbf16>, vector<256x64xf32> -> vector<256x64xf32>
    %67 = arith.addf %61, %66 : vector<256x64xf32>
    %c2_72 = arith.constant 2 : index
    %c2_73 = arith.constant 2 : index
    %c0_74 = arith.constant 0 : index
    %68 = vector.load %arg7[%c2_72, %c2_73, %c0_74] : memref<18x18x64xbf16, #tpu.memory_space<vmem>>, vector<16x16x64xbf16>
    %69 = vector.shape_cast %68 : vector<16x16x64xbf16> to vector<256x64xbf16>
    %c8 = arith.constant 8 : index
    %c0_75 = arith.constant 0 : index
    %c0_76 = arith.constant 0 : index
    %70 = vector.load %arg4[%c8, %c0_75, %c0_76] : memref<9x64x64xbf16, #tpu.memory_space<vmem>>, vector<1x64x64xbf16>
    %71 = vector.shape_cast %70 : vector<1x64x64xbf16> to vector<64x64xbf16>
    %cst_77 = arith.constant dense<0.000000e+00> : vector<256x64xf32>
    %72 = tpu.matmul %69, %71, %cst_77 {dimension_numbers = #tpu.dot_dimension_numbers<[1], [0], [0], [1], [0, 0, 1, 1], [], []>} : vector<256x64xbf16>, vector<64x64xbf16>, vector<256x64xf32> -> vector<256x64xf32>
    %73 = arith.addf %67, %72 : vector<256x64xf32>
    %74 = vector.shape_cast %73 : vector<256x64xf32> to vector<16x16x64xf32>
    %75 = arith.truncf %74 : vector<16x16x64xf32> to vector<16x16x64xbf16>
    %c0_78 = arith.constant 0 : index
    %c0_79 = arith.constant 0 : index
    %c0_80 = arith.constant 0 : index
    %c0_81 = arith.constant 0 : index
    %76 = vector.load %arg5[%c0_78, %c0_79, %c0_80, %c0_81] : memref<1x16x16x64xbf16, #tpu.memory_space<vmem>>, vector<1x16x16x64xbf16>
    %77 = vector.shape_cast %76 : vector<1x16x16x64xbf16> to vector<16x16x64xbf16>
    %78 = vector.shape_cast %75 : vector<16x16x64xbf16> to vector<1x16x16x64xbf16>
    tpu.vector_store %arg5[%c0_78, %c0_79, %c0_80, %c0_81], %78 {strides = array<i32>} : memref<1x16x16x64xbf16, #tpu.memory_space<vmem>>, vector<1x16x16x64xbf16>,
    %cst_82 = arith.constant 1.000000e+00 : f32
    %79 = vector.broadcast %cst_82 : f32 to vector<8x256xf32>
    %cst_83 = arith.constant dense<0.000000e+00> : vector<8x64xf32>
    %80 = tpu.matmul %79, %73, %cst_83 {dimension_numbers = #tpu.dot_dimension_numbers<[1], [0], [0], [1], [0, 0, 1, 1], [], []>} : vector<8x256xf32>, vector<256x64xf32>, vector<8x64xf32> -> vector<8x64xf32>
    %81 = vector.extract_strided_slice %80 {offsets = [0, 0], sizes = [1, 64], strides = [1, 1]} : vector<8x64xf32> to vector<1x64xf32>
    %82 = arith.mulf %73, %73 : vector<256x64xf32>
    %cst_84 = arith.constant dense<0.000000e+00> : vector<8x64xf32>
    %83 = tpu.matmul %79, %82, %cst_84 {dimension_numbers = #tpu.dot_dimension_numbers<[1], [0], [0], [1], [0, 0, 1, 1], [], []>} : vector<8x256xf32>, vector<256x64xf32>, vector<8x64xf32> -> vector<8x64xf32>
    %84 = vector.extract_strided_slice %83 {offsets = [0, 0], sizes = [1, 64], strides = [1, 1]} : vector<8x64xf32> to vector<1x64xf32>
    %85 = tpu.concatenate %81, %84 in 0 : vector<1x64xf32>, vector<1x64xf32> -> vector<2x64xf32>
    %c0_85 = arith.constant 0 : index
    %c0_86 = arith.constant 0 : index
    %c0_87 = arith.constant 0 : index
    %86 = vector.load %arg6[%c0_85, %c0_86, %c0_87] : memref<1x2x64xf32, #tpu.memory_space<vmem>>, vector<1x2x64xf32>
    %87 = vector.shape_cast %86 : vector<1x2x64xf32> to vector<2x64xf32>
    %88 = vector.shape_cast %85 : vector<2x64xf32> to vector<1x2x64xf32>
    tpu.vector_store %arg6[%c0_85, %c0_86, %c0_87], %88 {strides = array<i32>} : memref<1x2x64xf32, #tpu.memory_space<vmem>>, vector<1x2x64xf32>,
    return
  }
  func.func @transform_0(%arg0: i32) -> (i32, i32, i32, i32) {
    %c0_i32 = arith.constant 0 : i32
    %c0_i32_0 = arith.constant 0 : i32
    %c0_i32_1 = arith.constant 0 : i32
    %c0_i32_2 = arith.constant 0 : i32
    return %arg0, %c0_i32, %c0_i32_0, %c0_i32_1 : i32, i32, i32, i32
  }
  func.func @transform_1(%arg0: i32) -> (i32, i32) {
    %c0_i32 = arith.constant 0 : i32
    %c0_i32_0 = arith.constant 0 : i32
    %c0_i32_1 = arith.constant 0 : i32
    return %c0_i32, %c0_i32_0 : i32, i32
  }
  func.func @transform_2(%arg0: i32) -> (i32, i32) {
    %c0_i32 = arith.constant 0 : i32
    %c0_i32_0 = arith.constant 0 : i32
    %c0_i32_1 = arith.constant 0 : i32
    return %c0_i32, %c0_i32_0 : i32, i32
  }
  func.func @transform_3(%arg0: i32) -> (i32, i32, i32) {
    %c0_i32 = arith.constant 0 : i32
    %c0_i32_0 = arith.constant 0 : i32
    %c0_i32_1 = arith.constant 0 : i32
    %c0_i32_2 = arith.constant 0 : i32
    return %c0_i32, %c0_i32_0, %c0_i32_1 : i32, i32, i32
  }
  func.func @transform_4(%arg0: i32) -> (i32, i32, i32, i32) {
    %c0_i32 = arith.constant 0 : i32
    %c0_i32_0 = arith.constant 0 : i32
    %c0_i32_1 = arith.constant 0 : i32
    %c0_i32_2 = arith.constant 0 : i32
    return %arg0, %c0_i32, %c0_i32_0, %c0_i32_1 : i32, i32, i32, i32
  }
  func.func @transform_5(%arg0: i32) -> (i32, i32, i32) {
    %c0_i32 = arith.constant 0 : i32
    %c0_i32_0 = arith.constant 0 : i32
    %c0_i32_1 = arith.constant 0 : i32
    return %arg0, %c0_i32, %c0_i32_0 : i32, i32, i32
  }
}

module attributes {stable_mosaic.version = 11 : i64} {
  func.func @_bn_res_relu_kernel(%arg0: i32, %arg1: memref<1x16x1024xbf16, #tpu.memory_space<vmem>>, %arg2: memref<1x16x1024xf32, #tpu.memory_space<vmem>>, %arg3: memref<1x1024xf32, #tpu.memory_space<vmem>>, %arg4: memref<1x1024xf32, #tpu.memory_space<vmem>>, %arg5: memref<1x16x1024xf32, #tpu.memory_space<vmem>>) attributes {dimension_semantics = [#tpu.dimension_semantics<parallel>], iteration_bounds = array<i64: 2>, scalar_prefetch = 0 : i64, scratch_operands = 0 : i64, tpu.core_type = #tpu.core_type<tc>, window_params = [{transform_indices = @transform_0, window_bounds = array<i64: 1, 16, 1024>}, {transform_indices = @transform_1, window_bounds = array<i64: 1, 16, 1024>}, {pipeline_mode = #tpu.pipeline_mode<synchronous>, transform_indices = @transform_2, window_bounds = array<i64: 1, 1024>}, {pipeline_mode = #tpu.pipeline_mode<synchronous>, transform_indices = @transform_3, window_bounds = array<i64: 1, 1024>}, {transform_indices = @transform_4, window_bounds = array<i64: 1, 16, 1024>}]} {
    %c0 = arith.constant 0 : index
    %c0_0 = arith.constant 0 : index
    %0 = vector.load %arg3[%c0, %c0_0] : memref<1x1024xf32, #tpu.memory_space<vmem>>, vector<1x1024xf32>
    %c0_1 = arith.constant 0 : index
    %c0_2 = arith.constant 0 : index
    %1 = vector.load %arg4[%c0_1, %c0_2] : memref<1x1024xf32, #tpu.memory_space<vmem>>, vector<1x1024xf32>
    %c0_3 = arith.constant 0 : index
    %c0_4 = arith.constant 0 : index
    %c0_5 = arith.constant 0 : index
    %2 = vector.load %arg1[%c0_3, %c0_4, %c0_5] : memref<1x16x1024xbf16, #tpu.memory_space<vmem>>, vector<1x16x1024xbf16>
    %3 = vector.shape_cast %2 : vector<1x16x1024xbf16> to vector<16x1024xbf16>
    %4 = arith.extf %3 : vector<16x1024xbf16> to vector<16x1024xf32>
    %5 = vector.broadcast %0 : vector<1x1024xf32> to vector<16x1024xf32>
    %6 = arith.mulf %4, %5 : vector<16x1024xf32>
    %7 = vector.broadcast %1 : vector<1x1024xf32> to vector<16x1024xf32>
    %8 = arith.addf %6, %7 : vector<16x1024xf32>
    %c0_6 = arith.constant 0 : index
    %c0_7 = arith.constant 0 : index
    %c0_8 = arith.constant 0 : index
    %9 = vector.load %arg2[%c0_6, %c0_7, %c0_8] : memref<1x16x1024xf32, #tpu.memory_space<vmem>>, vector<1x16x1024xf32>
    %10 = vector.shape_cast %9 : vector<1x16x1024xf32> to vector<16x1024xf32>
    %11 = arith.addf %8, %10 : vector<16x1024xf32>
    %cst = arith.constant 0.000000e+00 : f32
    %12 = vector.broadcast %cst : f32 to vector<16x1024xf32>
    %13 = arith.maximumf %11, %12 : vector<16x1024xf32>
    %c0_9 = arith.constant 0 : index
    %c0_10 = arith.constant 0 : index
    %c0_11 = arith.constant 0 : index
    %14 = vector.load %arg5[%c0_9, %c0_10, %c0_11] : memref<1x16x1024xf32, #tpu.memory_space<vmem>>, vector<1x16x1024xf32>
    %15 = vector.shape_cast %14 : vector<1x16x1024xf32> to vector<16x1024xf32>
    %16 = vector.shape_cast %13 : vector<16x1024xf32> to vector<1x16x1024xf32>
    tpu.vector_store %arg5[%c0_9, %c0_10, %c0_11], %16 {strides = array<i32>} : memref<1x16x1024xf32, #tpu.memory_space<vmem>>, vector<1x16x1024xf32>,
    return
  }
  func.func @transform_0(%arg0: i32) -> (i32, i32, i32) {
    %c0_i32 = arith.constant 0 : i32
    %c0_i32_0 = arith.constant 0 : i32
    %c0_i32_1 = arith.constant 0 : i32
    return %arg0, %c0_i32, %c0_i32_0 : i32, i32, i32
  }
  func.func @transform_1(%arg0: i32) -> (i32, i32, i32) {
    %c0_i32 = arith.constant 0 : i32
    %c0_i32_0 = arith.constant 0 : i32
    %c0_i32_1 = arith.constant 0 : i32
    return %arg0, %c0_i32, %c0_i32_0 : i32, i32, i32
  }
  func.func @transform_2(%arg0: i32) -> (i32, i32) {
    %c0_i32 = arith.constant 0 : i32
    %c0_i32_0 = arith.constant 0 : i32
    %c0_i32_1 = arith.constant 0 : i32
    return %c0_i32, %c0_i32_0 : i32, i32
  }
  func.func @transform_3(%arg0: i32) -> (i32, i32) {
    %c0_i32 = arith.constant 0 : i32
    %c0_i32_0 = arith.constant 0 : i32
    %c0_i32_1 = arith.constant 0 : i32
    return %c0_i32, %c0_i32_0 : i32, i32
  }
  func.func @transform_4(%arg0: i32) -> (i32, i32, i32) {
    %c0_i32 = arith.constant 0 : i32
    %c0_i32_0 = arith.constant 0 : i32
    %c0_i32_1 = arith.constant 0 : i32
    return %arg0, %c0_i32, %c0_i32_0 : i32, i32, i32
  }
}

</mosaic_0001>

<bundles_post_ra>
// kernel: basic_block.5
= control target key start
LH: loop header
LB: loop body
LE: loop exit
PB: predicated region body
PF: predicated region fallthrough
CT: control target
= control target key end

     0   :  { %s498_s15 = smov 0   ;;  %s662_s0 = inlined_call_operand.vmem [shape: bf16[2,16,1024], index: 0, kind: input, shape index: {}]   ;;  %s663_s1 = inlined_call_operand.vmem [shape: f32[2,16,1024], index: 1, kind: input, shape index: {}]   ;;  %s664_s2 = inlined_call_operand.vmem [shape: f32[1,1024], index: 2, kind: input, shape index: {}]   ;;  %s665_s3 = inlined_call_operand.vmem [shape: f32[1,1024], index: 3, kind: input, shape index: {}]   ;;  %s666_s4 = inlined_call_operand.vmem [shape: f32[2,16,1024], index: 4, kind: output, shape index: {}]  }
   0x1 LB: > { %s441_s16 = sadd.s32 4294967295, %s471_s15   ;;  %p445_p0 = scmp.ge.s32.totalorder %s471_s15, 1  ;;  %s471_s15 = sphi %s498_s15, %s14_s15  }
   0x2   : > { %p172_p1 = scmp.lt.s32.totalorder %s471_s15, 3 }
   0x4   : > { %p173_p2 = pnand %p445_p0, %p172_p1 }
   0x5   : > { %p203_p3 = scmp.lt.s32.totalorder (!%p173_p2), %s441_s16, 1 }
   0x6   : > { %176 = sbr.rel (%p173_p2) target bundleno = 43 (0x2b), region = 36 }
   0xb   : > { %v509_v0 = vld [vmem:[%s664_s2] sm:$0xff]  ;;  %s668_s16 = smov (!%p203_p3, %s441_s16), 1 }
   0xc   : > { %v514_v1 = vld [vmem:[%s665_s3] sm:$0xff]  ;;  %s454_s21 = sshll.u32 %s668_s16, 6  ;;  %s455_s22 = sshll.u32 %s668_s16, 7  ;;  %v245_v2 = vperm.slane %v509_v0, 0  ;;  %v246_v4 = vperm.slane %v509_v0, 1  ;;  %v247_v6 = vperm.slane %v509_v0, 2 }
   0xd   : > { %v278_v3 = vperm.slane %v514_v1, 0  ;;  %v279_v5 = vperm.slane %v514_v1, 1  ;;  %s527_s25 = scalar_lea.vmem %s662_s0, %s454_s21  ;;  %v280_v7 = vperm.slane %v514_v1, 2  ;;  %v248_v8 = vperm.slane %v509_v0, 3  ;;  %s543_s28 = scalar_lea.vmem %s663_s1, %s455_s22 }
   0xe   : > { %v281_v9 = vperm.slane %v514_v1, 3  ;;  %v220_v10 = vld [vmem:[%s527_s25] sm:$0xff]  ;;  %v249_v11 = vperm.slane %v509_v0, 4  ;;  %v282_v12 = vperm.slane %v514_v1, 4  ;;  %v250_v13 = vperm.slane %v509_v0, 5  ;;  %v221_v17 = vld [vmem:[%s527_s25 + $0x8] sm:$0xff]  ;;  %s593_s5 = scalar_lea.vmem %s666_s4, %s455_s22 }
   0xf   : > { %v283_v14 = vperm.slane %v514_v1, 5  ;;  %v228_v15 = vunpack.c.l.bf16 %v220_v10  ;;  %v229_v16 = vunpack.c.h.bf16 %v220_v10  ;;  %v251_v18 = vperm.slane %v509_v0, 6  ;;  %v222_v22 = vld [vmem:[%s527_s25 + $0x10] sm:$0xff]  ;;  %v223_v29 = vld [vmem:[%s527_s25 + $0x18] sm:$0xff]  ;;  %v310_v30 = vld [vmem:[%s543_s28] sm:$0xff] }
  0x10   : > { %v284_v19 = vperm.slane %v514_v1, 6  ;;  %v230_v20 = vunpack.c.l.bf16 %v221_v17  ;;  %v231_v21 = vunpack.c.h.bf16 %v221_v17  ;;  %v252_v23 = vperm.slane %v509_v0, 7  ;;  %v311_v31 = vld [vmem:[%s543_s28 + $0x8] sm:$0xff]  ;;  %v312_v38 = vld [vmem:[%s543_s28 + $0x10] sm:$0xff]  ;;  %v313_v39 = vld [vmem:[%s543_s28 + $0x18] sm:$0xff] }
  0x11   : > { %v285_v24 = vperm.slane %v514_v1, 7  ;;  %v261_v25 = vmul.f32 %v245_v2, %v228_v15  ;;  %v262_v26 = vmul.f32 %v246_v4, %v229_v16  ;;  %v232_v27 = vunpack.c.l.bf16 %v222_v22  ;;  %v314_v44 = vld [vmem:[%s543_s28 + $0x20] sm:$0xff]  ;;  %v315_v45 = vld [vmem:[%s543_s28 + $0x28] sm:$0xff]  ;;  %v316_v52 = vld [vmem:[%s543_s28 + $0x30] sm:$0xff] }
  0x12   : > { %v233_v28 = vunpack.c.h.bf16 %v222_v22  ;;  %v263_v32 = vmul.f32 %v247_v6, %v230_v20  ;;  %v264_v33 = vmul.f32 %v248_v8, %v231_v21  ;;  %v234_v34 = vunpack.c.l.bf16 %v223_v29  ;;  %v317_v53 = vld [vmem:[%s543_s28 + $0x38] sm:$0xff]  ;;  %v224_v58 = vld [vmem:[%s527_s25 + $0x20] sm:$0xff]  ;;  %v225_v63 = vld [vmem:[%s527_s25 + $0x28] sm:$0xff] }
  0x13   : > { %v235_v35 = vunpack.c.h.bf16 %v223_v29  ;;  %v294_v36 = vadd.f32 %v278_v3, %v261_v25  ;;  %v295_v37 = vadd.f32 %v279_v5, %v262_v26  ;;  %v265_v40 = vmul.f32 %v249_v11, %v232_v27  ;;  %v226_v20 = vld [vmem:[%s527_s25 + $0x30] sm:$0xff]  ;;  %v227_v27 = vld [vmem:[%s527_s25 + $0x38] sm:$0xff] }
  0x14   : > { %v266_v41 = vmul.f32 %v250_v13, %v233_v28  ;;  %v296_v42 = vadd.f32 %v280_v7, %v263_v32  ;;  %v297_v43 = vadd.f32 %v281_v9, %v264_v33  ;;  %v267_v46 = vmul.f32 %v251_v18, %v234_v34 }
  0x15   : > { %v268_v47 = vmul.f32 %v252_v23, %v235_v35  ;;  %v326_v48 = vadd.f32 %v310_v30, %v294_v36  ;;  %v327_v49 = vadd.f32 %v311_v31, %v295_v37  ;;  %v298_v50 = vadd.f32 %v282_v12, %v265_v40  ;;  %v318_v36 = vld [vmem:[%s543_s28 + $0x40] sm:$0xff]  ;;  %v319_v37 = vld [vmem:[%s543_s28 + $0x48] sm:$0xff] }
  0x16   : > { %v299_v51 = vadd.f32 %v283_v14, %v266_v41  ;;  %v328_v54 = vadd.f32 %v312_v38, %v296_v42  ;;  %v329_v55 = vadd.f32 %v313_v39, %v297_v43  ;;  %v300_v56 = vadd.f32 %v284_v19, %v267_v46  ;;  %v320_v42 = vld [vmem:[%s543_s28 + $0x50] sm:$0xff]  ;;  %v321_v43 = vld [vmem:[%s543_s28 + $0x58] sm:$0xff] }
  0x17   : > { %v301_v57 = vadd.f32 %v285_v24, %v268_v47  ;;  %v342_v59 = vmax.f32 %v326_v48, 0.0  ;;  %v343_v60 = vmax.f32 %v327_v49, 0.0  ;;  %v330_v61 = vadd.f32 %v314_v44, %v298_v50  ;;  %v324_v49 = vld [vmem:[%s543_s28 + $0x70] sm:$0xff] }
  0x18   : > { %v331_v62 = vadd.f32 %v315_v45, %v299_v51  ;;  %v344_v10 = vmax.f32 %v328_v54, 0.0  ;;  %v345_v15 = vmax.f32 %v329_v55, 0.0  ;;  %v332_v16 = vadd.f32 %v316_v52, %v300_v56  ;;  %v322_v45 = vld [vmem:[%s543_s28 + $0x60] sm:$0xff] }
  0x19   : > { %v333_v17 = vadd.f32 %v317_v53, %v301_v57  ;;  %358 = vst [vmem:[%s593_s5] sm:$0xff] %v342_v59  ;;  %v346_v21 = vmax.f32 %v330_v61, 0.0  ;;  %v236_v25 = vunpack.c.l.bf16 %v224_v58  ;;  %v237_v26 = vunpack.c.h.bf16 %v224_v58 }
  0x1a   : > { %v347_v22 = vmax.f32 %v331_v62, 0.0  ;;  %359 = vst [vmem:[%s593_s5 + $0x8] sm:$0xff] %v343_v60  ;;  %v348_v28 = vmax.f32 %v332_v16, 0.0  ;;  %v238_v30 = vunpack.c.l.bf16 %v225_v63  ;;  %v239_v31 = vunpack.c.h.bf16 %v225_v63 }
  0x1b   : > { %v349_v29 = vmax.f32 %v333_v17, 0.0  ;;  %360 = vst [vmem:[%s593_s5 + $0x10] sm:$0xff] %v344_v10  ;;  %v269_v32 = vmul.f32 %v245_v2, %v236_v25  ;;  %v270_v33 = vmul.f32 %v246_v4, %v237_v26  ;;  %v240_v34 = vunpack.c.l.bf16 %v226_v20 }
  0x1c   : > { %v241_v35 = vunpack.c.h.bf16 %v226_v20  ;;  %361 = vst [vmem:[%s593_s5 + $0x18] sm:$0xff] %v345_v15  ;;  %v271_v38 = vmul.f32 %v247_v6, %v238_v30  ;;  %v272_v39 = vmul.f32 %v248_v8, %v239_v31  ;;  %v242_v40 = vunpack.c.l.bf16 %v227_v27 }
  0x1d   : > { %v243_v2 = vunpack.c.h.bf16 %v227_v27  ;;  %362 = vst [vmem:[%s593_s5 + $0x20] sm:$0xff] %v346_v21  ;;  %v302_v4 = vadd.f32 %v278_v3, %v269_v32  ;;  %v303_v41 = vadd.f32 %v279_v5, %v270_v33  ;;  %v273_v6 = vmul.f32 %v249_v11, %v240_v34  ;;  %v323_v5 = vld [vmem:[%s543_s28 + $0x68] sm:$0xff] }
  0x1e   : > { %v274_v8 = vmul.f32 %v250_v13, %v241_v35  ;;  %363 = vst [vmem:[%s593_s5 + $0x28] sm:$0xff] %v347_v22  ;;  %v304_v44 = vadd.f32 %v280_v7, %v271_v38  ;;  %v305_v3 = vadd.f32 %v281_v9, %v272_v39  ;;  %v275_v46 = vmul.f32 %v251_v18, %v242_v40  ;;  %v325_v9 = vld [vmem:[%s543_s28 + $0x78] sm:$0xff] }
  0x1f   : > { %v276_v47 = vmul.f32 %v252_v23, %v243_v2  ;;  %364 = vst [vmem:[%s593_s5 + $0x30] sm:$0xff] %v348_v28  ;;  %v334_v11 = vadd.f32 %v318_v36, %v302_v4  ;;  %v335_v48 = vadd.f32 %v319_v37, %v303_v41  ;;  %v306_v13 = vadd.f32 %v282_v12, %v273_v6 }
  0x20   : > { %v307_v7 = vadd.f32 %v283_v14, %v274_v8  ;;  %365 = vst [vmem:[%s593_s5 + $0x38] sm:$0xff] %v349_v29  ;;  %v336_v50 = vadd.f32 %v320_v42, %v304_v44  ;;  %v337_v18 = vadd.f32 %v321_v43, %v305_v3  ;;  %v308_v0 = vadd.f32 %v284_v19, %v275_v46 }
  0x21   : > { %v309_v23 = vadd.f32 %v285_v24, %v276_v47  ;;  %v350_v51 = vmax.f32 %v334_v11, 0.0  ;;  %v351_v12 = vmax.f32 %v335_v48, 0.0  ;;  %v338_v14 = vadd.f32 %v322_v45, %v306_v13 }
  0x22   : > { %v339_v52 = vadd.f32 %v323_v5, %v307_v7  ;;  %v352_v53 = vmax.f32 %v336_v50, 0.0  ;;  %v353_v54 = vmax.f32 %v337_v18, 0.0  ;;  %v340_v55 = vadd.f32 %v324_v49, %v308_v0 }
  0x23   : > { %v341_v56 = vadd.f32 %v325_v9, %v309_v23  ;;  %366 = vst [vmem:[%s593_s5 + $0x40] sm:$0xff] %v350_v51  ;;  %v354_v57 = vmax.f32 %v338_v14, 0.0 }
  0x24   : > { %367 = vst [vmem:[%s593_s5 + $0x48] sm:$0xff] %v351_v12  ;;  %v355_v19 = vmax.f32 %v339_v52, 0.0  ;;  %v356_v1 = vmax.f32 %v340_v55, 0.0 }
  0x25   : > { %368 = vst [vmem:[%s593_s5 + $0x50] sm:$0xff] %v352_v53  ;;  %v357_v24 = vmax.f32 %v341_v56, 0.0 }
  0x26   : > { %369 = vst [vmem:[%s593_s5 + $0x58] sm:$0xff] %v353_v54 }
  0x27   : > { %370 = vst [vmem:[%s593_s5 + $0x60] sm:$0xff] %v354_v57 }
  0x28   : > { %371 = vst [vmem:[%s593_s5 + $0x68] sm:$0xff] %v355_v19 }
  0x29   : > { %372 = vst [vmem:[%s593_s5 + $0x70] sm:$0xff] %v356_v1 }
  0x2a   : > { %373 = vst [vmem:[%s593_s5 + $0x78] sm:$0xff] %v357_v24 }
  0x2b PF: > { %s14_s15 = sadd.s32 1, %s471_s15  }
  0x2c   : > { %p11_p4 = scmp.ge.s32.totalorder %s14_s15, 4  }
  0x2e   :  { %13 = sbr.rel (!%p11_p4) target bundleno = 1 (0x1), region = 69 }

// kernel: basic_block.4
= control target key start
LH: loop header
LB: loop body
LE: loop exit
PB: predicated region body
PF: predicated region fallthrough
CT: control target
= control target key end

     0   :  { %s6319_s18 = smov 0   ;;  %s8156_s0 = inlined_call_operand.vmem [shape: bf16[2,16,16,64], index: 0, kind: input, shape index: {}]   ;;  %s8157_s1 = inlined_call_operand.vmem [shape: f32[1,64], index: 1, kind: input, shape index: {}]   ;;  %s8158_s2 = inlined_call_operand.vmem [shape: f32[1,64], index: 2, kind: input, shape index: {}]   ;;  %s8159_s3 = inlined_call_operand.vmem [shape: bf16[9,64,64], index: 3, kind: input, shape index: {}]   ;;  %s8160_s4 = inlined_call_operand.vmem [shape: bf16[2,16,16,64], index: 4, kind: output, shape index: {0}]   ;;  %s8161_s5 = inlined_call_operand.vmem [shape: f32[2,2,64], index: 5, kind: output, shape index: {1}]  }
   0x1 LB: > { %s5426_s19 = sadd.s32 4294967295, %s6285_s18   ;;  %p5430_p0 = scmp.ge.s32.totalorder %s6285_s18, 1  ;;  %s6285_s18 = sphi %s6319_s18, %s16_s18  }
   0x2   : > { %p190_p1 = scmp.lt.s32.totalorder %s6285_s18, 3 }
   0x4   : > { %p191_p2 = pnand %p5430_p0, %p190_p1 }
   0x6   : > { %194 = sbr.rel (%p191_p2) target bundleno = 1020 (0x3fc), region = 36 }
   0xb   : > { %v6055_v0 = vld [vmem:[%s8159_s3 + $0x38] sm:$0xff]  ;;  %p222_p3 = scmp.lt.s32.totalorder %s5426_s19, 1  ;;  %vm408_vm0 = vcmask 516096   ;;  %v6054_v1 = vld [vmem:[%s8159_s3 + $0x30] sm:$0xff]  ;;  %vm415_vm1 = vsmask.f32 256 }
   0xc   : > { %6195 = vmatpush.bf16.msra.mxu1 %v6055_v0  ;;  %6196 = vmatpush.bf16.msra.mxu2 %v6055_v0  ;;  %v432_v2 = vld [vmem:[#allocation2 + $0x3c] sm:$0x1]  ;;  %vm471_vm2 = vsmask.f32 7938  ;;  %vm6338_vm3 = vmand %vm408_vm0, %vm415_vm1  ;;  %v488_v4 = vld [vmem:[#allocation2 + $0x44] sm:$0x1] }
   0xd   : > { %s8215_s19 = smov (!%p222_p3, %s5426_s19), 1  ;;  %6197 = vmatpush.bf16.msra.mxu3 %v6055_v0  ;;  %1573 = vmatpush.bf16.msra.mxu0 %v6055_v0  ;;  %v6352_v5 = vld [vmem:[%s8157_s1] ss:$0 sm:$0xff]  ;;  %v433_v7 = vsel %vm6338_vm3, 0, %v432_v2  ;;  %vm6363_vm4 = vmand %vm408_vm0, %vm471_vm2  ;;  %v6053_v9 = vld [vmem:[%s8159_s3 + $0x28] sm:$0xff]  ;;  %vm405_vm5 = vcmask 519168  }
   0xe   : > { %s6030_s24 = sshll.u32 %s8215_s19, 7  ;;  %v6357_v6 = vld [vmem:[%s8158_s2] ss:$0 sm:$0xff]  ;;  %434 = vst [vmem:[#allocation2 + $0x3c] sm:$0x1] %v433_v7  ;;  %v489_v11 = vsel %vm6363_vm4, 0, %v488_v4  ;;  %vm6412_vm8 = vmand %vm405_vm5, %vm471_vm2 }
   0xf   : > { %s6347_s27 = scalar_lea.vmem %s8156_s0, %s6030_s24  ;;  %490 = vst [vmem:[#allocation2 + $0x44] sm:$0x1] %v489_v11  ;;  %v435_v17 = vld [vmem:[#allocation2 + $0x48] sm:$0x1]  ;;  %v491_v18 = vld [vmem:[#allocation2 + $0x50] sm:$0x1]  ;;  %s7723_s22 = scalar_lea.vmem %s8160_s4, %s6030_s24 }
  0x10   : > { %6198 = vmatpush.bf16.msra.mxu1 %v6054_v1  ;;  %6199 = vmatpush.bf16.msra.mxu2 %v6054_v1  ;;  %v6183_v10 = vld [vmem:[%s6347_s27 + $0x20] sm:$0xff]   ;;  %v6184_v12 = vld [vmem:[%s6347_s27 + $0x28] sm:$0xff]   ;;  %v436_v19 = vsel %vm6338_vm3, 0, %v435_v17  ;;  %v492_v20 = vsel %vm6363_vm4, 0, %v491_v18  ;;  %v6189_v21 = vld [vmem:[%s6347_s27 + $0x50] sm:$0xff]   ;;  %v6287_v46 = vmov 0  }
  0x11   : > { %6200 = vmatpush.bf16.msra.mxu3 %v6054_v1  ;;  %1574 = vmatpush.bf16.msra.mxu0 %v6054_v1  ;;  %v6134_v13 = vunpack.c.l.bf16 %v6183_v10  ;;  %v6135_v14 = vunpack.c.h.bf16 %v6183_v10  ;;  %v6138_v15 = vunpack.c.l.bf16 %v6184_v12  ;;  %v6139_v16 = vunpack.c.h.bf16 %v6184_v12  ;;  %v450_v22 = vld [vmem:[#allocation2 + $0x84] sm:$0x1]  ;;  %437 = vst [vmem:[#allocation2 + $0x48] sm:$0x1] %v436_v19  ;;  %v506_v27 = vld [vmem:[#allocation2 + $0x8c] sm:$0x1] }
  0x12   : > { %v6052_v28 = vld [vmem:[%s8159_s3 + $0x20] sm:$0xff]  ;;  %493 = vst [vmem:[#allocation2 + $0x50] sm:$0x1] %v492_v20  ;;  %v6158_v29 = vunpack.c.l.bf16 %v6189_v21  ;;  %v6159_v30 = vunpack.c.h.bf16 %v6189_v21  ;;  %v451_v31 = vsel %vm6338_vm3, 0, %v450_v22  ;;  %v507_v32 = vsel %vm6363_vm4, 0, %v506_v27  ;;  %v6185_v36 = vld [vmem:[%s6347_s27 + $0x30] sm:$0xff]  }
  0x13   : > { %v314_v23 = vmul.f32 %v6352_v5, %v6134_v13  ;;  %v315_v24 = vmul.f32 %v6352_v5, %v6135_v14  ;;  %v316_v25 = vmul.f32 %v6352_v5, %v6138_v15  ;;  %v317_v26 = vmul.f32 %v6352_v5, %v6139_v16  ;;  %452 = vst [vmem:[#allocation2 + $0x84] sm:$0x1] %v451_v31  ;;  %s5435_s24 = sshll.u32 %s8215_s19, 1 }
  0x14   : > { %6201 = vmatpush.bf16.msra.mxu1 %v6053_v9  ;;  %6202 = vmatpush.bf16.msra.mxu2 %v6053_v9  ;;  %v326_v38 = vmul.f32 %v6352_v5, %v6158_v29  ;;  %v327_v39 = vmul.f32 %v6352_v5, %v6159_v30  ;;  %508 = vst [vmem:[#allocation2 + $0x8c] sm:$0x1] %v507_v32  ;;  %v6142_v47 = vunpack.c.l.bf16 %v6185_v36  ;;  %vm559_vm6 = vsmask.f32 4368  ;;  %s235_s26 = scalar_lea.vmem %s8161_s5, %s5435_s24 }
  0x15   : > { %6203 = vmatpush.bf16.msra.mxu3 %v6053_v9  ;;  %1575 = vmatpush.bf16.msra.mxu0 %v6053_v9  ;;  %v349_v33 = vadd.f32 %v6357_v6, %v314_v23  ;;  %v350_v34 = vadd.f32 %v6357_v6, %v315_v24  ;;  %v351_v35 = vadd.f32 %v6357_v6, %v316_v25  ;;  %v6143_v54 = vunpack.c.h.bf16 %v6185_v36  ;;  %vm6404_vm7 = vmor %vm415_vm1, %vm559_vm6  ;;  %v912_v2 = vld [vmem:[#allocation2 + $0x3c] sm:$0xf] }
  0x16   : > { %v352_v37 = vadd.f32 %v6357_v6, %v317_v26  ;;  %v361_v44 = vadd.f32 %v6357_v6, %v326_v38  ;;  %v362_v45 = vadd.f32 %v6357_v6, %v327_v39  ;;  %406 = vst.msk [vmem:[#allocation2] sm:$0xf] %vm405_vm5, %v6287_v46  ;;  %v318_v7 = vmul.f32 %v6352_v5, %v6142_v47  ;;  %v916_v10 = vld [vmem:[#allocation2 + $0x44] sm:$0x1]  ;;  %v6051_v25 = vld [vmem:[%s8159_s3 + $0x18] sm:$0xff] }
  0x17   : > { %v381_v40 = vmax.f32 %v349_v33, 0.0  ;;  %v382_v41 = vmax.f32 %v350_v34, 0.0  ;;  %v383_v42 = vmax.f32 %v351_v35, 0.0  ;;  %407 = vst.msk [vmem:[#allocation2 + $0x4] sm:$0xf] %vm405_vm5, %v6287_v46  ;;  %v319_v14 = vmul.f32 %v6352_v5, %v6143_v54 }
  0x18   : > { %6204 = vmatpush.bf16.msra.mxu1 %v6052_v28  ;;  %6205 = vmatpush.bf16.msra.mxu2 %v6052_v28  ;;  %v384_v43 = vmax.f32 %v352_v37, 0.0  ;;  %v393_v52 = vmax.f32 %v361_v44, 0.0  ;;  %v394_v53 = vmax.f32 %v362_v45, 0.0  ;;  %409 = vst.msk [vmem:[#allocation2 + $0x8] sm:$0x1] %vm408_vm0, %v6287_v46  ;;  %v353_v36 = vadd.f32 %v6357_v6, %v318_v7  ;;  %v6190_v37 = vld [vmem:[%s6347_s27 + $0x58] sm:$0xff]  }
  0x19   : > { %6206 = vmatpush.bf16.msra.mxu3 %v6052_v28  ;;  %1576 = vmatpush.bf16.msra.mxu0 %v6052_v28  ;;  %v535_v48 = vpack.c.bf16 %v381_v40, %v381_v40  ;;  %v536_v49 = vpack.c.bf16 %v382_v41, %v382_v41  ;;  %v537_v50 = vpack.c.bf16 %v383_v42, %v383_v42  ;;  %v919_v19 = vld [vmem:[#allocation2 + $0x48] sm:$0xf]  ;;  %v923_v24 = vld [vmem:[#allocation2 + $0x50] sm:$0x1]  ;;  %vm1052_vm9 = vsmask.f32 3328 }
  0x1a   : > { %v538_v51 = vpack.c.bf16 %v384_v43, %v384_v43  ;;  %v547_v4 = vpack.c.bf16 %v393_v52, %v393_v52  ;;  %411 = vst.msk [vmem:[#allocation2 + $0xcc] sm:$0xf] %vm405_vm5, %v6287_v46  ;;  %v548_v13 = vpack.c.bf16 %v394_v53, %v394_v53  ;;  %v954_v35 = vld [vmem:[#allocation2 + $0x84] sm:$0xf]  ;;  %v6439_v43 = vld [vmem:[#allocation2 + $0x54] sm:$0x1]  ;;  %v6162_v54 = vunpack.c.l.bf16 %v6190_v37 }
  0x1b   : > { %v630_v55 = vshrl.u32 %v535_v48, 16  ;;  %v633_v56 = vshll.u32 %v535_v48, 16  ;;  %v638_v57 = vshrl.u32 %v536_v49, 16  ;;  %v641_v58 = vshll.u32 %v536_v49, 16  ;;  %412 = vst.msk [vmem:[#allocation2 + $0xd0] sm:$0xf] %vm405_vm5, %v6287_v46 }
  0x1c   : > { %v647_v59 = vshrl.u32 %v537_v50, 16  ;;  %v650_v60 = vshll.u32 %v537_v50, 16  ;;  %v655_v61 = vshrl.u32 %v538_v51, 16  ;;  %v658_v62 = vshll.u32 %v538_v51, 16  ;;  %413 = vst.msk [vmem:[#allocation2 + $0xd4] sm:$0x1] %vm408_vm0, %v6287_v46  ;;  %1814 = vmatpush.bf16.msrb.mxu1 %v6051_v25 }
  0x1d   : > { %v632_v0 = vrot.slane %v630_v55, 7  ;;  %v640_v1 = vrot.slane %v638_v57, 7  ;;  %v732_v29 = vshrl.u32 %v547_v4, 16  ;;  %v417_v30 = vld [vmem:[#allocation2] sm:$0x1]  ;;  %v735_v34 = vshll.u32 %v547_v4, 16 }
  0x1e   : > { %v649_v11 = vrot.slane %v647_v59, 7  ;;  %v657_v12 = vrot.slane %v655_v61, 7  ;;  %v997_v31 = vld [vmem:[#allocation2 + $0x4] sm:$0xf]  ;;  %v740_v40 = vshrl.u32 %v548_v13, 16  ;;  %v743_v41 = vshll.u32 %v548_v13, 16 }
  0x1f   : > { %v635_v15 = vor.u32 %v633_v56, %v632_v0  ;;  %v636_v16 = vrot.slane %v632_v0, 4  ;;  %v643_v17 = vor.u32 %v641_v58, %v640_v1  ;;  %v645_v18 = vrot.slane %v640_v1, 4  ;;  %v6437_v42 = vld [vmem:[#allocation2 + $0x8] sm:$0x1]  ;;  %v958_v44 = vld [vmem:[#allocation2 + $0x8c] sm:$0x1] }
  0x20   : > { %v652_v20 = vor.u32 %v650_v60, %v649_v11  ;;  %v653_v21 = vrot.slane %v649_v11, 4  ;;  %v660_v22 = vor.u32 %v658_v62, %v657_v12  ;;  %v662_v23 = vrot.slane %v657_v12, 4  ;;  %v6444_v49 = vld [vmem:[#allocation2 + $0x5c] sm:$0x1]  ;;  %v6050_v53 = vld [vmem:[%s8159_s3 + $0x10] sm:$0xff]  ;;  %v6049_v62 = vld [vmem:[%s8159_s3 + $0x8] sm:$0xff] }
  0x21   : > { %v644_v26 = vsel %vm6404_vm7, %v636_v16, %v643_v17  ;;  %v913_v27 = vsel %vm6412_vm8, %v635_v15, %v912_v2  ;;  %v917_v28 = vsel %vm6338_vm3, %v645_v18, %v916_v10  ;;  %v734_v39 = vrot.slane %v732_v29, 7  ;;  %1815 = vmatpush.bf16.msrb.mxu1 %v6050_v53  ;;  %v6468_v7 = vld [vmem:[%s6347_s27] sm:$0xff]  }
  0x22   : > { %914 = vst [vmem:[#allocation2 + $0x3c] sm:$0xf] %v913_v27  ;;  %v661_v32 = vsel %vm6404_vm7, %v653_v21, %v660_v22  ;;  %v920_v33 = vsel %vm6412_vm8, %v652_v20, %v919_v19  ;;  %v924_v38 = vsel %vm6338_vm3, %v662_v23, %v923_v24  ;;  %vm1053_vm10 = vsmask.f32 7440  ;;  %v6048_v13 = vld [vmem:[%s8159_s3] sm:$0xff] }
  0x23   : > { %915 = vst.msk [vmem:[#allocation2 + $0x40] sm:$0xf] %vm405_vm5, %v644_v26  ;;  %v418_v45 = vsel %vm6338_vm3, 0, %v417_v30  ;;  %v1065_v46 = vshll.u32 %v997_v31, 16  ;;  %v1069_v47 = vshrl.u32 %v997_v31, 16  ;;  %v354_v48 = vadd.f32 %v6357_v6, %v319_v14  ;;  %vm6495_vm12 = vmor %vm1052_vm9, %vm1053_vm10 }
  0x24   : > { %918 = vst [vmem:[#allocation2 + $0x44] sm:$0x1] %v917_v28  ;;  %v737_v50 = vor.u32 %v735_v34, %v734_v39  ;;  %v738_v51 = vrot.slane %v734_v39, 4  ;;  %v742_v52 = vrot.slane %v740_v40, 7  ;;  %v385_v57 = vmax.f32 %v353_v36, 0.0 }
  0x25   : > { %921 = vst [vmem:[#allocation2 + $0x48] sm:$0xf] %v920_v33  ;;  %v6450_v55 = vrot.slane %v1065_v46, 5  ;;  %v6452_v56 = vrot.slane %v1069_v47, 4  ;;  %v6163_v58 = vunpack.c.h.bf16 %v6190_v37  ;;  %v386_v0 = vmax.f32 %v354_v48, 0.0  ;;  %1816 = vmatpush.bf16.msrb.mxu1 %v6049_v62 }
  0x26   : > { %922 = vst.msk [vmem:[#allocation2 + $0x4c] sm:$0xf] %vm405_vm5, %v661_v32  ;;  %v745_v59 = vor.u32 %v743_v41, %v742_v52  ;;  %v747_v60 = vrot.slane %v742_v52, 4  ;;  %v955_v61 = vsel %vm6412_vm8, %v737_v50, %v954_v35  ;;  %v474_v1 = vsel %vm6363_vm4, 0, %v6437_v42 }
  0x27   : > { %925 = vst [vmem:[#allocation2 + $0x50] sm:$0x1] %v924_v38  ;;  %v1072_v2 = vor.u32 %v6452_v56, %v6450_v55  ;;  %v439_v4 = vsel %vm6338_vm3, 0, %v6439_v43  ;;  %v495_v14 = vsel %vm6363_vm4, 0, %v6444_v49  ;;  %v328_v15 = vmul.f32 %v6352_v5, %v6162_v54 }
  0x28   : > { %956 = vst [vmem:[#allocation2 + $0x84] sm:$0xf] %v955_v61  ;;  %v746_v11 = vsel %vm6404_vm7, %v738_v51, %v745_v59  ;;  %v959_v12 = vsel %vm6338_vm3, %v747_v60, %v958_v44  ;;  %v6482_v19 = vpack.c.bf16 %v385_v57, %v385_v57  ;;  %v6484_v20 = vpack.c.bf16 %v386_v0, %v386_v0 }
  0x29   : > { %v1006_v10 = vld [vmem:[#allocation2 + $0x3c] sm:$0xf]  ;;  %419 = vst [vmem:[#allocation2] sm:$0x1] %v418_v45  ;;  %v6487_v24 = vmul.f32 %v6352_v5, %v6163_v58  ;;  %v6118_v25 = vunpack.c.l.bf16 %v6468_v7  ;;  %v6491_v30 = vadd.f32 %v6357_v6, %v328_v15  ;;  %vm1520_vm11 = vcmask 523264   ;;  %1817 = vmatpush.bf16.msrb.mxu1 %v6048_v13 }
  0x2a   : > { %v1007_v16 = vld [vmem:[#allocation2 + $0x40] sm:$0xf]  ;;  %v1176_v17 = vshrl.u32 %v1006_v10, 16  ;;  %v1179_v18 = vshll.u32 %v1006_v10, 16  ;;  %957 = vst.msk [vmem:[#allocation2 + $0x88] sm:$0xf] %vm405_vm5, %v746_v11 }
  0x2b   : > { %v1041_v21 = vld [vmem:[#allocation2 + $0x44] sm:$0x1]  ;;  %v1185_v22 = vshll.u32 %v1007_v16, 16  ;;  %v1189_v23 = vshrl.u32 %v1007_v16, 16  ;;  %960 = vst [vmem:[#allocation2 + $0x8c] sm:$0x1] %v959_v12 }
  0x2c   : > { %v1178_v26 = vrot.slane %v1176_v17, 4  ;;  %v1181_v27 = vrot.slane %v1179_v18, 5  ;;  %v1195_v28 = vshll.u32 %v1041_v21, 16  ;;  %v1008_v29 = vld [vmem:[#allocation2 + $0x48] sm:$0xf]  ;;  %vm1947_vm13 = vcmask 1042432  }
  0x2d   : > { %v1187_v31 = vrot.slane %v1185_v22, 5  ;;  %v1191_v32 = vrot.slane %v1189_v23, 4  ;;  %v1009_v33 = vld [vmem:[#allocation2 + $0x4c] sm:$0xf]  ;;  %v1200_v34 = vshrl.u32 %v1008_v29, 16  ;;  %v1203_v35 = vshll.u32 %v1008_v29, 16 }
  0x2e   : > { %v1182_v36 = vor.u32 %v1181_v27, %v1178_v26  ;;  %v1197_v37 = vrot.slane %v1195_v28, 5  ;;  %v1042_v38 = vld [vmem:[#allocation2 + $0x50] sm:$0x1]  ;;  %v1209_v39 = vshll.u32 %v1009_v33, 16  ;;  %v1213_v40 = vshrl.u32 %v1009_v33, 16 }
  0x2f   : > { %v1192_v42 = vor.u32 %v1191_v32, %v1187_v31  ;;  %v1202_v44 = vrot.slane %v1200_v34, 4  ;;  %v1205_v45 = vrot.slane %v1203_v35, 5  ;;  %v1219_v46 = vshll.u32 %v1042_v38, 16  ;;  %v1018_v47 = vld [vmem:[#allocation2 + $0x84] sm:$0xf] }
  0x30   : > { %v1183_v48 = vrot.slane %v1182_v36, 4  ;;  %v1211_v49 = vrot.slane %v1209_v39, 5  ;;  %v1215_v50 = vrot.slane %v1213_v40, 4  ;;  %v1320_v51 = vshrl.u32 %v1018_v47, 16  ;;  %475 = vst [vmem:[#allocation2 + $0x8] sm:$0x1] %v474_v1 }
  0x31   : > { %v1193_v52 = vrot.slane %v1192_v42, 4  ;;  %v1206_v53 = vor.u32 %v1205_v45, %v1202_v44  ;;  %v1221_v54 = vrot.slane %v1219_v46, 5  ;;  %v1019_v57 = vld [vmem:[#allocation2 + $0x88] sm:$0xf]  ;;  %v1323_v58 = vshll.u32 %v1018_v47, 16 }
  0x32   : > { %v1188_v59 = vsel %vm6495_vm12, %v1183_v48, %v1187_v31  ;;  %v1216_v60 = vor.u32 %v1215_v50, %v1211_v49  ;;  %v1047_v61 = vld [vmem:[#allocation2 + $0x8c] sm:$0x1]  ;;  %v1322_v62 = vrot.slane %v1320_v51, 4  ;;  %v1329_v0 = vshll.u32 %v1019_v57, 16  ;;  %v996_v15 = vld [vmem:[#allocation2] sm:$0xf] }
  0x33   : > { %v1198_v10 = vsel %vm6495_vm12, %v1193_v52, %v1197_v37  ;;  %v1458_v11 = vunpack.c.l.b16 %v1188_v59  ;;  %v1207_v12 = vrot.slane %v1206_v53, 4  ;;  %v1325_v13 = vrot.slane %v1323_v58, 5  ;;  %440 = vst [vmem:[#allocation2 + $0x54] sm:$0x1] %v439_v4  ;;  %v509_v58 = vld [vmem:[#allocation2 + $0x98] sm:$0x1] }
  0x34   : > { %v1459_v1 = vunpack.c.l.b16 %v1198_v10  ;;  %v1217_v16 = vrot.slane %v1216_v60, 4  ;;  %v1331_v17 = vrot.slane %v1329_v0, 5  ;;  %v1333_v18 = vshrl.u32 %v1019_v57, 16  ;;  %496 = vst [vmem:[#allocation2 + $0x5c] sm:$0x1] %v495_v14 }
  0x35   : > { %v1212_v21 = vsel %vm6495_vm12, %v1207_v12, %v1211_v49  ;;  %v1326_v22 = vor.u32 %v1325_v13, %v1322_v62  ;;  %v1339_v23 = vshll.u32 %v1047_v61, 16  ;;  %v6119_v26 = vunpack.c.h.bf16 %v6468_v7  ;;  %v453_v57 = vld [vmem:[#allocation2 + $0x90] sm:$0x1] }
  0x36   : > { %v1485_v27 = vpack.c.b16 %v1459_v1, %v1458_v11  ;;  %v1222_v28 = vsel %vm6495_vm12, %v1217_v16, %v1221_v54  ;;  %v1460_v29 = vunpack.c.l.b16 %v1212_v21  ;;  %v1335_v31 = vrot.slane %v1333_v18, 4 }
  0x37   : > { %v1461_v43 = vunpack.c.l.b16 %v1222_v28  ;;  %v1327_v4 = vrot.slane %v1326_v22, 4  ;;  %v1036_v32 = vld [vmem:[#allocation2 + $0x8] sm:$0x1]  ;;  %v1056_v33 = vshrl.u32 %v996_v15, 16  ;;  %v1073_v14 = vrot.slane %v1072_v2, 4 }
  0x38   : > { %5465 = vmatmul.msk.bf16.vlgmr.msra.gmra.mxu1 %vm1520_vm11, %v1485_v27  ;;  %v1336_v34 = vor.u32 %v1335_v31, %v1331_v17  ;;  %v1341_v35 = vrot.slane %v1339_v23, 5  ;;  %v1059_v36 = vshll.u32 %v996_v15, 16  ;;  %v1075_v37 = vshll.u32 %v1036_v32, 16  ;;  %v420_v27 = vld [vmem:[#allocation2 + $0xc] sm:$0x1] }
  0x39   : > { %v1486_v38 = vpack.c.b16 %v1461_v43, %v1460_v29  ;;  %v1332_v39 = vsel %vm6495_vm12, %v1327_v4, %v1331_v17  ;;  %v1058_v40 = vrot.slane %v1056_v33, 4  ;;  %v664_v42 = vshrl.u32 %v6482_v19, 16  ;;  %v476_v28 = vld [vmem:[#allocation2 + $0x14] sm:$0x1]  ;;  %v6186_v4 = vld [vmem:[%s6347_s27 + $0x38] sm:$0xff]  }
  0x3a   : > { %v1337_v44 = vrot.slane %v1336_v34, 4  ;;  %v1470_v45 = vunpack.c.l.b16 %v1332_v39  ;;  %v1061_v46 = vrot.slane %v1059_v36, 5  ;;  %v1077_v47 = vrot.slane %v1075_v37, 5  ;;  %v926_v53 = vld [vmem:[#allocation2 + $0x54] sm:$0xf]  ;;  %v6032_v34 = vld [vmem:[#allocation2] sm:$0xff] }
  0x3b   : > { %5466 = vmatmul.msk.bf16.vlgmr.msra.gmra.mxu2 %vm1520_vm11, %v1486_v38  ;;  %v666_v56 = vrot.slane %v664_v42, 7  ;;  %v667_v2 = vshll.u32 %v6482_v19, 16  ;;  %v672_v48 = vshrl.u32 %v6484_v20, 16  ;;  %v675_v49 = vshll.u32 %v6484_v20, 16  ;;  %v930_v13 = vld [vmem:[#allocation2 + $0x5c] sm:$0x1] }
  0x3c   : > { %v1342_v50 = vsel %vm6495_vm12, %v1337_v44, %v1341_v35  ;;  %v1062_v51 = vor.u32 %v1061_v46, %v1058_v40  ;;  %v1078_v52 = vsel %vm6495_vm12, %v1073_v14, %v1077_v47  ;;  %v364_v54 = vadd.f32 %v6357_v6, %v6487_v24 }
  0x3d   : > { %v1471_v59 = vunpack.c.l.b16 %v1342_v50  ;;  %v1449_v60 = vunpack.c.l.b16 %v1078_v52  ;;  %v669_v19 = vor.u32 %v667_v2, %v666_v56  ;;  %v670_v61 = vrot.slane %v666_v56, 4 }
  0x3e   : > { %v1063_v62 = vrot.slane %v1062_v51, 4  ;;  %v674_v0 = vrot.slane %v672_v48, 7  ;;  %v395_v20 = vmax.f32 %v6491_v30, 0.0  ;;  %v396_v10 = vmax.f32 %v364_v54, 0.0 }
  0x3f   : > { %v1491_v11 = vpack.c.b16 %v1471_v59, %v1470_v45  ;;  %v927_v12 = vsel %vm6412_vm8, %v669_v19, %v926_v53  ;;  %v454_v15 = vsel %vm6338_vm3, 0, %v453_v57  ;;  %v510_v24 = vsel %vm6363_vm4, 0, %v509_v58 }
  0x40   : > { %v1068_v1 = vsel %vm6495_vm12, %v1063_v62, %v6450_v55  ;;  %v677_v16 = vor.u32 %v675_v49, %v674_v0  ;;  %v679_v17 = vrot.slane %v674_v0, 4  ;;  %928 = vst [vmem:[#allocation2 + $0x54] sm:$0xf] %v927_v12  ;;  %v549_v30 = vpack.c.bf16 %v395_v20, %v395_v20  ;;  %v6567_v62 = vld [vmem:[%s6347_s27 + $0x60] sm:$0xff]  }
  0x41   : > { %5471 = vmatmul.msk.bf16.vlgmr.msra.gmra.mxu3 %vm1520_vm11, %v1491_v11  ;;  %v1448_v18 = vunpack.c.l.b16 %v1068_v1  ;;  %455 = vst [vmem:[#allocation2 + $0x90] sm:$0x1] %v454_v15  ;;  %v550_v21 = vpack.c.bf16 %v396_v10, %v396_v10  ;;  %v306_v22 = vmul.f32 %v6352_v5, %v6118_v25  ;;  %v307_v23 = vmul.f32 %v6352_v5, %v6119_v26  ;;  %v441_v26 = vld [vmem:[#allocation2 + $0x60] sm:$0x1] }
  0x42   : > { %v678_v55 = vsel %vm6404_vm7, %v670_v61, %v677_v16  ;;  %v931_v29 = vsel %vm6338_vm3, %v679_v17, %v930_v13  ;;  %511 = vst [vmem:[#allocation2 + $0x98] sm:$0x1] %v510_v24  ;;  %v749_v31 = vshrl.u32 %v549_v30, 16  ;;  %v752_v43 = vshll.u32 %v549_v30, 16 }
  0x43   : > { %v1480_v32 = vpack.c.b16 %v1449_v60, %v1448_v18  ;;  %929 = vst.msk [vmem:[#allocation2 + $0x58] sm:$0xf] %vm405_vm5, %v678_v55  ;;  %v757_v7 = vshrl.u32 %v550_v21, 16  ;;  %v760_v33 = vshll.u32 %v550_v21, 16  ;;  %v341_v25 = vadd.f32 %v6357_v6, %v306_v22  ;;  %v497_v18 = vld [vmem:[#allocation2 + $0x68] sm:$0x1] }
  0x44   : > { %932 = vst [vmem:[#allocation2 + $0x5c] sm:$0x1] %v931_v29  ;;  %v751_v14 = vrot.slane %v749_v31, 7  ;;  %v342_v35 = vadd.f32 %v6357_v6, %v307_v23  ;;  %v421_v36 = vsel %vm6338_vm3, 0, %v420_v27  ;;  %v477_v37 = vsel %vm6363_vm4, 0, %v476_v28 }
  0x45   : > { %5460 = vmatmul.msk.bf16.vlgmr.msra.gmra.mxu0 %vm1520_vm11, %v1480_v32  ;;  %v759_v38 = vrot.slane %v757_v7, 7  ;;  %v373_v39 = vmax.f32 %v341_v25, 0.0  ;;  %422 = vst [vmem:[#allocation2 + $0xc] sm:$0x1] %v421_v36  ;;  %v6146_v40 = vunpack.c.l.bf16 %v6186_v4  ;;  %v6147_v42 = vunpack.c.h.bf16 %v6186_v4 }
  0x46   : > { %v754_v44 = vor.u32 %v752_v43, %v751_v14  ;;  %v755_v45 = vrot.slane %v751_v14, 4  ;;  %v374_v46 = vmax.f32 %v342_v35, 0.0  ;;  %478 = vst [vmem:[#allocation2 + $0x14] sm:$0x1] %v477_v37  ;;  %v442_v47 = vsel %vm6338_vm3, 0, %v441_v26 }
  0x47   : > { %v1010_v56 = vld [vmem:[#allocation2 + $0x54] sm:$0xf]  ;;  %v762_v2 = vor.u32 %v760_v33, %v759_v38  ;;  %v764_v48 = vrot.slane %v759_v38, 4  ;;  %v527_v49 = vpack.c.bf16 %v373_v39, %v373_v39  ;;  %v320_v50 = vmul.f32 %v6352_v5, %v6146_v40  ;;  %443 = vst [vmem:[#allocation2 + $0x60] sm:$0x1] %v442_v47 }
  0x48   : > { %v1224_v51 = vshrl.u32 %v1010_v56, 16  ;;  %v1227_v52 = vshll.u32 %v1010_v56, 16  ;;  %v961_v53 = vld [vmem:[#allocation2 + $0x90] sm:$0xf]  ;;  %5556 = vmatmul.msk.bf16.vlgmr.msrb.gmra.mxu1 %vm1520_vm11, %v6032_v34  ;;  %v528_v54 = vpack.c.bf16 %v374_v46, %v374_v46  ;;  %v321_v57 = vmul.f32 %v6352_v5, %v6147_v42 }
  0x49   : > { %v763_v58 = vsel %vm6404_vm7, %v755_v45, %v762_v2  ;;  %v962_v59 = vsel %vm6412_vm8, %v754_v44, %v961_v53  ;;  %v965_v60 = vld [vmem:[#allocation2 + $0x98] sm:$0x1]  ;;  %v562_v19 = vshrl.u32 %v527_v49, 16  ;;  %v565_v61 = vshll.u32 %v527_v49, 16 }
  0x4a   : > { %v1011_v0 = vld [vmem:[#allocation2 + $0x58] sm:$0xf]  ;;  %v1226_v20 = vrot.slane %v1224_v51, 4  ;;  %v1229_v10 = vrot.slane %v1227_v52, 5  ;;  %963 = vst [vmem:[#allocation2 + $0x90] sm:$0xf] %v962_v59  ;;  %v966_v11 = vsel %vm6338_vm3, %v764_v48, %v965_v60  ;;  %v355_v24 = vadd.f32 %v6357_v6, %v320_v50 }
  0x4b   : > { %v1043_v12 = vld [vmem:[#allocation2 + $0x5c] sm:$0x1]  ;;  %v1233_v13 = vshll.u32 %v1011_v0, 16  ;;  %v1237_v15 = vshrl.u32 %v1011_v0, 16  ;;  %964 = vst.msk [vmem:[#allocation2 + $0x94] sm:$0xf] %vm405_vm5, %v763_v58  ;;  %v356_v1 = vadd.f32 %v6357_v6, %v321_v57  ;;  %v6166_v21 = vunpack.c.l.bf16 %v6567_v62 }
  0x4c   : > { %v1230_v16 = vor.u32 %v1229_v10, %v1226_v20  ;;  %v1243_v17 = vshll.u32 %v1043_v12, 16  ;;  %967 = vst [vmem:[#allocation2 + $0x98] sm:$0x1] %v966_v11  ;;  %v564_v30 = vrot.slane %v562_v19, 7  ;;  %v570_v27 = vshrl.u32 %v528_v54, 16 }
  0x4d   : > { %v1235_v22 = vrot.slane %v1233_v13, 5  ;;  %v1239_v23 = vrot.slane %v1237_v15, 4  ;;  %v573_v28 = vshll.u32 %v528_v54, 16  ;;  %v884_v55 = vld [vmem:[#allocation2 + $0xc] sm:$0xf]  ;;  %v387_v33 = vmax.f32 %v355_v24, 0.0 }
  0x4e   : > { %v1231_v29 = vrot.slane %v1230_v16, 4  ;;  %v1245_v31 = vrot.slane %v1243_v17, 5  ;;  %v567_v43 = vor.u32 %v565_v61, %v564_v30  ;;  %v568_v4 = vrot.slane %v564_v30, 4  ;;  %v888_v34 = vld [vmem:[#allocation2 + $0x14] sm:$0x1] }
  0x4f   : > { %v1240_v32 = vor.u32 %v1239_v23, %v1235_v22  ;;  %v572_v7 = vrot.slane %v570_v27, 7  ;;  %v388_v25 = vmax.f32 %v356_v1, 0.0  ;;  %v498_v35 = vsel %vm6363_vm4, 0, %v497_v18 }
  0x50   : > { %v1236_v26 = vsel %vm6495_vm12, %v1231_v29, %v1235_v22  ;;  %v885_v14 = vsel %vm6412_vm8, %v567_v43, %v884_v55  ;;  %v6167_v36 = vunpack.c.h.bf16 %v6567_v62  ;;  %499 = vst [vmem:[#allocation2 + $0x68] sm:$0x1] %v498_v35  ;;  %v541_v47 = vpack.c.bf16 %v387_v33, %v387_v33  ;;  %v933_v55 = vld [vmem:[#allocation2 + $0x60] sm:$0xf] }
  0x51   : > { %v1241_v37 = vrot.slane %v1240_v32, 4  ;;  %v1462_v38 = vunpack.c.l.b16 %v1236_v26  ;;  %v1020_v39 = vld [vmem:[#allocation2 + $0x90] sm:$0xf]  ;;  %v575_v40 = vor.u32 %v573_v28, %v572_v7  ;;  %v577_v42 = vrot.slane %v572_v7, 4  ;;  %886 = vst [vmem:[#allocation2 + $0xc] sm:$0xf] %v885_v14 }
  0x52   : > { %v1021_v44 = vld [vmem:[#allocation2 + $0x94] sm:$0xf]  ;;  %v1344_v45 = vshrl.u32 %v1020_v39, 16  ;;  %v1347_v46 = vshll.u32 %v1020_v39, 16  ;;  %v542_v56 = vpack.c.bf16 %v388_v25, %v388_v25  ;;  %v681_v0 = vshrl.u32 %v541_v47, 16 }
  0x53   : > { %v1246_v2 = vsel %vm6495_vm12, %v1241_v37, %v1245_v31  ;;  %v1048_v48 = vld [vmem:[#allocation2 + $0x98] sm:$0x1]  ;;  %v1353_v49 = vshll.u32 %v1021_v44, 16  ;;  %v1357_v50 = vshrl.u32 %v1021_v44, 16  ;;  %v576_v51 = vsel %vm6404_vm7, %v568_v4, %v575_v40  ;;  %v512_v40 = vld [vmem:[#allocation2 + $0xa4] sm:$0x1] }
  0x54   : > { %v1463_v52 = vunpack.c.l.b16 %v1246_v2  ;;  %v1346_v53 = vrot.slane %v1344_v45, 4  ;;  %v1349_v54 = vrot.slane %v1347_v46, 5  ;;  %v1363_v57 = vshll.u32 %v1048_v48, 16  ;;  %887 = vst.msk [vmem:[#allocation2 + $0x10] sm:$0xf] %vm405_vm5, %v576_v51 }
  0x55   : > { %v1355_v58 = vrot.slane %v1353_v49, 5  ;;  %v1359_v59 = vrot.slane %v1357_v50, 4  ;;  %v889_v60 = vsel %vm6338_vm3, %v577_v42, %v888_v34  ;;  %v684_v10 = vshll.u32 %v541_v47, 16  ;;  %v456_v34 = vld [vmem:[#allocation2 + $0x9c] sm:$0x1]  ;;  %v6180_v47 = vld [vmem:[%s6347_s27 + $0x8] sm:$0xff]  }
  0x56   : > { %v1487_v19 = vpack.c.b16 %v1463_v52, %v1462_v38  ;;  %v1350_v61 = vor.u32 %v1349_v54, %v1346_v53  ;;  %v1365_v62 = vrot.slane %v1363_v57, 5  ;;  %890 = vst [vmem:[#allocation2 + $0x14] sm:$0x1] %v889_v60  ;;  %v689_v11 = vshrl.u32 %v542_v56, 16  ;;  %v423_v51 = vld [vmem:[#allocation2 + $0x18] sm:$0x1] }
  0x57   : > { %v1360_v20 = vor.u32 %v1359_v59, %v1355_v58  ;;  %v692_v12 = vshll.u32 %v542_v56, 16  ;;  %v683_v24 = vrot.slane %v681_v0, 7  ;;  %v330_v1 = vmul.f32 %v6352_v5, %v6166_v21  ;;  %v937_v14 = vld [vmem:[#allocation2 + $0x68] sm:$0x1] }
  0x58   : > { %5467 = vmatmul.msk.bf16.gmra.mxu2 %vm1520_vm11, %v1487_v19  ;;  %v1351_v13 = vrot.slane %v1350_v61, 4  ;;  %v998_v15 = vld [vmem:[#allocation2 + $0xc] sm:$0xf]  ;;  %v331_v16 = vmul.f32 %v6352_v5, %v6167_v36  ;;  %v691_v22 = vrot.slane %v689_v11, 7  ;;  %v457_v57 = vsel %vm6338_vm3, 0, %v456_v34 }
  0x59   : > { %v1361_v17 = vrot.slane %v1360_v20, 4  ;;  %v1080_v30 = vshrl.u32 %v998_v15, 16  ;;  %v1083_v18 = vshll.u32 %v998_v15, 16  ;;  %v686_v27 = vor.u32 %v684_v10, %v683_v24  ;;  %458 = vst [vmem:[#allocation2 + $0x9c] sm:$0x1] %v457_v57 }
  0x5a   : > { %v1356_v23 = vsel %vm6495_vm12, %v1351_v13, %v1355_v58  ;;  %v687_v28 = vrot.slane %v683_v24, 4  ;;  %v365_v29 = vadd.f32 %v6357_v6, %v330_v1  ;;  %v694_v26 = vor.u32 %v692_v12, %v691_v22  ;;  %v479_v10 = vld [vmem:[#allocation2 + $0x20] sm:$0x1] }
  0x5b   : > { %v1366_v31 = vsel %vm6495_vm12, %v1361_v17, %v1365_v62  ;;  %v1472_v43 = vunpack.c.l.b16 %v1356_v23  ;;  %v999_v4 = vld [vmem:[#allocation2 + $0x10] sm:$0xf]  ;;  %v1082_v21 = vrot.slane %v1080_v30, 4  ;;  %v1085_v32 = vrot.slane %v1083_v18, 5 }
  0x5c   : > { %v1473_v7 = vunpack.c.l.b16 %v1366_v31  ;;  %v1089_v33 = vshll.u32 %v999_v4, 16  ;;  %v1093_v25 = vshrl.u32 %v999_v4, 16  ;;  %v696_v37 = vrot.slane %v691_v22, 4  ;;  %v6033_v50 = vld [vmem:[#allocation2 + $0xc] sm:$0xff] }
  0x5d   : > { %v1037_v35 = vld [vmem:[#allocation2 + $0x14] sm:$0x1]  ;;  %v1086_v36 = vor.u32 %v1085_v32, %v1082_v21  ;;  %v934_v38 = vsel %vm6412_vm8, %v686_v27, %v933_v55  ;;  %v366_v39 = vadd.f32 %v6357_v6, %v331_v16  ;;  %v695_v2 = vsel %vm6404_vm7, %v687_v28, %v694_v26  ;;  %5557 = vmatmul.msk.bf16.gmra.mxu1 %vm1520_vm11, %v6033_v50 }
  0x5e   : > { %v1492_v42 = vpack.c.b16 %v1473_v7, %v1472_v43  ;;  %v1091_v44 = vrot.slane %v1089_v33, 5  ;;  %v1095_v45 = vrot.slane %v1093_v25, 4  ;;  %v1099_v46 = vshll.u32 %v1037_v35, 16  ;;  %935 = vst [vmem:[#allocation2 + $0x60] sm:$0xf] %v934_v38  ;;  %v6187_v7 = vld [vmem:[%s6347_s27 + $0x40] sm:$0xff]  }
  0x5f   : > { %v1087_v56 = vrot.slane %v1086_v36, 4  ;;  %v938_v48 = vsel %vm6338_vm3, %v696_v37, %v937_v14  ;;  %v397_v49 = vmax.f32 %v365_v29, 0.0  ;;  %936 = vst.msk [vmem:[#allocation2 + $0x64] sm:$0xf] %vm405_vm5, %v695_v2  ;;  %v398_v54 = vmax.f32 %v366_v39, 0.0 }
  0x60   : > { %5472 = vmatmul.msk.bf16.gmra.mxu3 %vm1520_vm11, %v1492_v42  ;;  %v1096_v52 = vor.u32 %v1095_v45, %v1091_v44  ;;  %v1101_v53 = vrot.slane %v1099_v46, 5  ;;  %939 = vst [vmem:[#allocation2 + $0x68] sm:$0x1] %v938_v48  ;;  %v513_v59 = vsel %vm6363_vm4, 0, %v512_v40  ;;  %v6122_v19 = vunpack.c.l.bf16 %v6180_v47  ;;  %v968_v38 = vld [vmem:[#allocation2 + $0x9c] sm:$0xf] }
  0x61   : > { %v1092_v58 = vsel %vm6495_vm12, %v1087_v56, %v1091_v44  ;;  %v551_v60 = vpack.c.bf16 %v397_v49, %v397_v49  ;;  %v552_v0 = vpack.c.bf16 %v398_v54, %v398_v54  ;;  %v6123_v20 = vunpack.c.h.bf16 %v6180_v47  ;;  %514 = vst [vmem:[#allocation2 + $0xa4] sm:$0x1] %v513_v59  ;;  %v444_v39 = vld [vmem:[#allocation2 + $0x6c] sm:$0x1]  ;;  %v500_v46 = vld [vmem:[#allocation2 + $0x74] sm:$0x1] }
  0x62   : > { %v1097_v61 = vrot.slane %v1096_v52, 4  ;;  %v1450_v62 = vunpack.c.l.b16 %v1092_v58  ;;  %v308_v13 = vmul.f32 %v6352_v5, %v6122_v19  ;;  %v424_v15 = vsel %vm6338_vm3, 0, %v423_v51  ;;  %v6192_v59 = vld [vmem:[%s6347_s27 + $0x68] sm:$0xff]  }
  0x63   : > { %v766_v11 = vshrl.u32 %v551_v60, 16  ;;  %v769_v12 = vshll.u32 %v551_v60, 16  ;;  %v774_v1 = vshrl.u32 %v552_v0, 16  ;;  %v777_v16 = vshll.u32 %v552_v0, 16  ;;  %425 = vst [vmem:[#allocation2 + $0x18] sm:$0x1] %v424_v15 }
  0x64   : > { %v1102_v24 = vsel %vm6495_vm12, %v1097_v61, %v1101_v53  ;;  %v309_v17 = vmul.f32 %v6352_v5, %v6123_v20  ;;  %v343_v23 = vadd.f32 %v6357_v6, %v308_v13  ;;  %v480_v27 = vsel %vm6363_vm4, 0, %v479_v10 }
  0x65   : > { %v1451_v30 = vunpack.c.l.b16 %v1102_v24  ;;  %v1012_v18 = vld [vmem:[#allocation2 + $0x60] sm:$0xf]  ;;  %v768_v22 = vrot.slane %v766_v11, 7  ;;  %v776_v29 = vrot.slane %v774_v1, 7  ;;  %481 = vst [vmem:[#allocation2 + $0x20] sm:$0x1] %v480_v27  ;;  %v6150_v52 = vunpack.c.l.bf16 %v6187_v7 }
  0x66   : > { %v1248_v28 = vshrl.u32 %v1012_v18, 16  ;;  %v1251_v55 = vshll.u32 %v1012_v18, 16  ;;  %v344_v31 = vadd.f32 %v6357_v6, %v309_v17  ;;  %v1013_v4 = vld [vmem:[#allocation2 + $0x64] sm:$0xf]  ;;  %v375_v32 = vmax.f32 %v343_v23, 0.0 }
  0x67   : > { %v1481_v43 = vpack.c.b16 %v1451_v30, %v1450_v62  ;;  %v771_v21 = vor.u32 %v769_v12, %v768_v22  ;;  %v772_v5 = vrot.slane %v768_v22, 4  ;;  %v1044_v33 = vld [vmem:[#allocation2 + $0x68] sm:$0x1]  ;;  %v1257_v14 = vshll.u32 %v1013_v4, 16  ;;  %v6643_v11 = vld [vmem:[%s8157_s1] ss:$0 sm:$0xff] }
  0x68   : > { %v1250_v25 = vrot.slane %v1248_v28, 4  ;;  %v1253_v26 = vrot.slane %v1251_v55, 5  ;;  %v1261_v34 = vshrl.u32 %v1013_v4, 16  ;;  %v1267_v35 = vshll.u32 %v1044_v33, 16  ;;  %v972_v45 = vld [vmem:[#allocation2 + $0xa4] sm:$0x1] }
  0x69   : > { %5461 = vmatmul.msk.bf16.gmra.mxu0 %vm1520_vm11, %v1481_v43  ;;  %v779_v36 = vor.u32 %v777_v16, %v776_v29  ;;  %v781_v37 = vrot.slane %v776_v29, 4  ;;  %v1259_v40 = vrot.slane %v1257_v14, 5  ;;  %v969_v44 = vsel %vm6412_vm8, %v771_v21, %v968_v38  ;;  %v6652_v18 = vld [vmem:[%s8158_s2] ss:$0 sm:$0xff]  ;;  %v459_v33 = vld [vmem:[#allocation2 + $0xa8] sm:$0x1] }
  0x6a   : > { %v1254_v6 = vor.u32 %v1253_v26, %v1250_v25  ;;  %v1263_v42 = vrot.slane %v1261_v34, 4  ;;  %v1269_v47 = vrot.slane %v1267_v35, 5  ;;  %970 = vst [vmem:[#allocation2 + $0x9c] sm:$0xf] %v969_v44  ;;  %v376_v48 = vmax.f32 %v344_v31, 0.0 }
  0x6b   : > { %v780_v56 = vsel %vm6404_vm7, %v772_v5, %v779_v36  ;;  %v973_v2 = vsel %vm6338_vm3, %v781_v37, %v972_v45  ;;  %v529_v51 = vpack.c.bf16 %v375_v32, %v375_v32  ;;  %v6151_v54 = vunpack.c.h.bf16 %v6187_v7  ;;  %v891_v30 = vld [vmem:[#allocation2 + $0x18] sm:$0xf]  ;;  %v515_v44 = vld [vmem:[#allocation2 + $0xb0] sm:$0x1] }
  0x6c   : > { %v1255_v49 = vrot.slane %v1254_v6, 4  ;;  %v1264_v50 = vor.u32 %v1263_v42, %v1259_v40  ;;  %971 = vst.msk [vmem:[#allocation2 + $0xa0] sm:$0xf] %vm405_vm5, %v780_v56  ;;  %v530_v53 = vpack.c.bf16 %v376_v48, %v376_v48  ;;  %v445_v57 = vsel %vm6338_vm3, 0, %v444_v39  ;;  %v895_v7 = vld [vmem:[#allocation2 + $0x20] sm:$0x1] }
  0x6d   : > { %974 = vst [vmem:[#allocation2 + $0xa4] sm:$0x1] %v973_v2  ;;  %v501_v58 = vsel %vm6363_vm4, 0, %v500_v46  ;;  %v579_v61 = vshrl.u32 %v529_v51, 16  ;;  %v582_v62 = vshll.u32 %v529_v51, 16  ;;  %v322_v12 = vmul.f32 %v6643_v11, %v6150_v52  ;;  %v6666_v2 = vld [vmem:[%s6347_s27 + $0x10] sm:$0xff]  }
  0x6e   : > { %v1260_v60 = vsel %vm6495_vm12, %v1255_v49, %v1259_v40  ;;  %v1265_v19 = vrot.slane %v1264_v50, 4  ;;  %446 = vst [vmem:[#allocation2 + $0x6c] sm:$0x1] %v445_v57  ;;  %v587_v20 = vshrl.u32 %v530_v53, 16  ;;  %v590_v10 = vshll.u32 %v530_v53, 16 }
  0x6f   : > { %v1464_v0 = vunpack.c.l.b16 %v1260_v60  ;;  %502 = vst [vmem:[#allocation2 + $0x74] sm:$0x1] %v501_v58  ;;  %v581_v15 = vrot.slane %v579_v61, 7  ;;  %v323_v24 = vmul.f32 %v6643_v11, %v6151_v54  ;;  %v6170_v1 = vunpack.c.l.bf16 %v6192_v59 }
  0x70   : > { %v1270_v13 = vsel %vm6495_vm12, %v1265_v19, %v1269_v47  ;;  %v589_v17 = vrot.slane %v587_v20, 7  ;;  %v357_v22 = vadd.f32 %v6652_v18, %v322_v12  ;;  %v6171_v23 = vunpack.c.h.bf16 %v6192_v59 }
  0x71   : > { %v1465_v16 = vunpack.c.l.b16 %v1270_v13  ;;  %v1022_v27 = vld [vmem:[#allocation2 + $0x9c] sm:$0xf]  ;;  %v584_v28 = vor.u32 %v582_v62, %v581_v15  ;;  %v585_v55 = vrot.slane %v581_v15, 4  ;;  %v358_v29 = vadd.f32 %v6652_v18, %v323_v24 }
  0x72   : > { %v332_v31 = vmul.f32 %v6643_v11, %v6170_v1  ;;  %v1368_v21 = vshrl.u32 %v1022_v27, 16  ;;  %v1371_v5 = vshll.u32 %v1022_v27, 16  ;;  %v592_v32 = vor.u32 %v590_v10, %v589_v17 }
  0x73   : > { %v1488_v43 = vpack.c.b16 %v1465_v16, %v1464_v0  ;;  %v1023_v4 = vld [vmem:[#allocation2 + $0xa0] sm:$0xf]  ;;  %v594_v34 = vrot.slane %v589_v17, 4  ;;  %v892_v35 = vsel %vm6412_vm8, %v584_v28, %v891_v30  ;;  %v389_v47 = vmax.f32 %v357_v22, 0.0 }
  0x74   : > { %v1049_v25 = vld [vmem:[#allocation2 + $0xa4] sm:$0x1]  ;;  %v1377_v26 = vshll.u32 %v1023_v4, 16  ;;  %v1381_v14 = vshrl.u32 %v1023_v4, 16  ;;  %v1370_v36 = vrot.slane %v1368_v21, 4  ;;  %v1373_v37 = vrot.slane %v1371_v5, 5 }
  0x75   : > { %5468 = vmatmul.msk.bf16.gmra.mxu2 %vm1520_vm11, %v1488_v43  ;;  %v1387_v38 = vshll.u32 %v1049_v25, 16  ;;  %893 = vst [vmem:[#allocation2 + $0x18] sm:$0xf] %v892_v35  ;;  %v593_v40 = vsel %vm6404_vm7, %v585_v55, %v592_v32  ;;  %v896_v42 = vsel %vm6338_vm3, %v594_v34, %v895_v7  ;;  %v390_v56 = vmax.f32 %v358_v29, 0.0  ;;  %v940_v27 = vld [vmem:[#allocation2 + $0x6c] sm:$0xf] }
  0x76   : > { %v1379_v39 = vrot.slane %v1377_v26, 5  ;;  %v1383_v6 = vrot.slane %v1381_v14, 4  ;;  %v1374_v45 = vor.u32 %v1373_v37, %v1370_v36  ;;  %894 = vst.msk [vmem:[#allocation2 + $0x1c] sm:$0xf] %vm405_vm5, %v593_v40  ;;  %v333_v49 = vmul.f32 %v6643_v11, %v6171_v23  ;;  %v944_v14 = vld [vmem:[#allocation2 + $0x74] sm:$0x1] }
  0x77   : > { %v1389_v46 = vrot.slane %v1387_v38, 5  ;;  %897 = vst [vmem:[#allocation2 + $0x20] sm:$0x1] %v896_v42  ;;  %v367_v50 = vadd.f32 %v6652_v18, %v332_v31  ;;  %v460_v51 = vsel %vm6338_vm3, 0, %v459_v33  ;;  %v543_v53 = vpack.c.bf16 %v389_v47, %v389_v47  ;;  %v426_v42 = vld [vmem:[#allocation2 + $0x24] sm:$0x1] }
  0x78   : > { %v1384_v48 = vor.u32 %v1383_v6, %v1379_v39  ;;  %v1375_v52 = vrot.slane %v1374_v45, 4  ;;  %v544_v54 = vpack.c.bf16 %v390_v56, %v390_v56  ;;  %461 = vst [vmem:[#allocation2 + $0xa8] sm:$0x1] %v460_v51  ;;  %v516_v57 = vsel %vm6363_vm4, 0, %v515_v44  ;;  %v482_v56 = vld [vmem:[#allocation2 + $0x2c] sm:$0x1] }
  0x79   : > { %v368_v59 = vadd.f32 %v6652_v18, %v333_v49  ;;  %v399_v60 = vmax.f32 %v367_v50, 0.0  ;;  %517 = vst [vmem:[#allocation2 + $0xb0] sm:$0x1] %v516_v57  ;;  %v6126_v19 = vunpack.c.l.bf16 %v6666_v2  ;;  %v698_v62 = vshrl.u32 %v543_v53, 16 }
  0x7a   : > { %v1385_v58 = vrot.slane %v1384_v48, 4  ;;  %v1380_v61 = vsel %vm6495_vm12, %v1375_v52, %v1379_v39  ;;  %v701_v0 = vshll.u32 %v543_v53, 16  ;;  %v706_v20 = vshrl.u32 %v544_v54, 16 }
  0x7b   : > { %v1474_v12 = vunpack.c.l.b16 %v1380_v61  ;;  %v709_v15 = vshll.u32 %v544_v54, 16  ;;  %v400_v24 = vmax.f32 %v368_v59, 0.0  ;;  %v700_v30 = vrot.slane %v698_v62, 7 }
  0x7c   : > { %v1390_v10 = vsel %vm6495_vm12, %v1385_v58, %v1389_v46  ;;  %v1000_v13 = vld [vmem:[#allocation2 + $0x18] sm:$0xf]  ;;  %v708_v23 = vrot.slane %v706_v20, 7  ;;  %v553_v28 = vpack.c.bf16 %v399_v60, %v399_v60  ;;  %v6127_v29 = vunpack.c.h.bf16 %v6666_v2  ;;  %v6188_v58 = vld [vmem:[%s6347_s27 + $0x48] sm:$0xff]  }
  0x7d   : > { %v1475_v1 = vunpack.c.l.b16 %v1390_v10  ;;  %v1104_v16 = vshrl.u32 %v1000_v13, 16  ;;  %v1107_v17 = vshll.u32 %v1000_v13, 16  ;;  %v6680_v22 = vld [vmem:[#allocation2 + $0x1c] sm:$0xf]  ;;  %v554_v55 = vpack.c.bf16 %v400_v24, %v400_v24 }
  0x7e   : > { %v6683_v43 = vld [vmem:[#allocation2 + $0x20] sm:$0x1]  ;;  %v1113_v5 = vshll.u32 %v6680_v22, 16  ;;  %v6034_v32 = vld [vmem:[#allocation2 + $0x18] sm:$0xff]  ;;  %v1117_v7 = vshrl.u32 %v6680_v22, 16  ;;  %v703_v25 = vor.u32 %v701_v0, %v700_v30  ;;  %v704_v26 = vrot.slane %v700_v30, 4 }
  0x7f   : > { %v1493_v31 = vpack.c.b16 %v1475_v1, %v1474_v12  ;;  %v1106_v4 = vrot.slane %v1104_v16, 4  ;;  %v1109_v21 = vrot.slane %v1107_v17, 5  ;;  %v1123_v33 = vshll.u32 %v6683_v43, 16  ;;  %5558 = vmatmul.msk.bf16.gmra.mxu1 %vm1520_vm11, %v6034_v32  ;;  %v975_v52 = vld [vmem:[#allocation2 + $0xa8] sm:$0xf] }
  0x80   : > { %v1115_v35 = vrot.slane %v1113_v5, 5  ;;  %v711_v36 = vor.u32 %v709_v15, %v708_v23  ;;  %v713_v37 = vrot.slane %v708_v23, 4  ;;  %v1119_v38 = vrot.slane %v1117_v7, 4  ;;  %v979_v23 = vld [vmem:[#allocation2 + $0xb0] sm:$0x1] }
  0x81   : > { %5473 = vmatmul.msk.bf16.gmra.mxu3 %vm1520_vm11, %v1493_v31  ;;  %v1110_v34 = vor.u32 %v1109_v21, %v1106_v4  ;;  %v1125_v39 = vrot.slane %v1123_v33, 5  ;;  %v941_v6 = vsel %vm6412_vm8, %v703_v25, %v940_v27  ;;  %v783_v40 = vshrl.u32 %v553_v28, 16 }
  0x82   : > { %v712_v45 = vsel %vm6404_vm7, %v704_v26, %v711_v36  ;;  %942 = vst [vmem:[#allocation2 + $0x6c] sm:$0xf] %v941_v6  ;;  %v945_v46 = vsel %vm6338_vm3, %v713_v37, %v944_v14  ;;  %v786_v47 = vshll.u32 %v553_v28, 16  ;;  %v1120_v2 = vor.u32 %v1119_v38, %v1115_v35 }
  0x83   : > { %v1111_v44 = vrot.slane %v1110_v34, 4  ;;  %943 = vst.msk [vmem:[#allocation2 + $0x70] sm:$0xf] %vm405_vm5, %v712_v45  ;;  %v785_v48 = vrot.slane %v783_v40, 7  ;;  %v791_v49 = vshrl.u32 %v554_v55, 16  ;;  %v794_v50 = vshll.u32 %v554_v55, 16 }
  0x84   : > { %946 = vst [vmem:[#allocation2 + $0x74] sm:$0x1] %v945_v46  ;;  %v310_v53 = vmul.f32 %v6643_v11, %v6126_v19  ;;  %v311_v54 = vmul.f32 %v6643_v11, %v6127_v29  ;;  %v427_v57 = vsel %vm6338_vm3, 0, %v426_v42  ;;  %v1121_v59 = vrot.slane %v1120_v2, 4  ;;  %v447_v19 = vld [vmem:[#allocation2 + $0x78] sm:$0x1] }
  0x85   : > { %v1116_v51 = vsel %vm6495_vm12, %v1111_v44, %v1115_v35  ;;  %v788_v61 = vor.u32 %v786_v47, %v785_v48  ;;  %v789_v62 = vrot.slane %v785_v48, 4  ;;  %428 = vst [vmem:[#allocation2 + $0x24] sm:$0x1] %v427_v57  ;;  %v793_v0 = vrot.slane %v791_v49, 7 }
  0x86   : > { %v1452_v60 = vunpack.c.l.b16 %v1116_v51  ;;  %v345_v20 = vadd.f32 %v6652_v18, %v310_v53  ;;  %v346_v10 = vadd.f32 %v6652_v18, %v311_v54  ;;  %v483_v12 = vsel %vm6363_vm4, 0, %v482_v56 }
  0x87   : > { %v1126_v13 = vsel %vm6495_vm12, %v1121_v59, %v1125_v39  ;;  %v976_v15 = vsel %vm6412_vm8, %v788_v61, %v975_v52  ;;  %484 = vst [vmem:[#allocation2 + $0x2c] sm:$0x1] %v483_v12  ;;  %v6154_v24 = vunpack.c.l.bf16 %v6188_v58  ;;  %v6155_v1 = vunpack.c.h.bf16 %v6188_v58 }
  0x88   : > { %v1453_v16 = vunpack.c.l.b16 %v1126_v13  ;;  %v796_v17 = vor.u32 %v794_v50, %v793_v0  ;;  %v798_v30 = vrot.slane %v793_v0, 4  ;;  %977 = vst [vmem:[#allocation2 + $0xa8] sm:$0xf] %v976_v15  ;;  %v377_v27 = vmax.f32 %v345_v20, 0.0 }
  0x89   : > { %v1014_v28 = vld [vmem:[#allocation2 + $0x6c] sm:$0xf]  ;;  %v378_v55 = vmax.f32 %v346_v10, 0.0  ;;  %v324_v29 = vmul.f32 %v6643_v11, %v6154_v24  ;;  %v448_v31 = vsel %vm6338_vm3, 0, %v447_v19  ;;  %v325_v38 = vmul.f32 %v6643_v11, %v6155_v1 }
  0x8a   : > { %v1482_v4 = vpack.c.b16 %v1453_v16, %v1452_v60  ;;  %v1015_v21 = vld [vmem:[#allocation2 + $0x70] sm:$0xf]  ;;  %v1272_v5 = vshrl.u32 %v1014_v28, 16  ;;  %v1275_v32 = vshll.u32 %v1014_v28, 16  ;;  %v797_v7 = vsel %vm6404_vm7, %v789_v62, %v796_v17  ;;  %449 = vst [vmem:[#allocation2 + $0x78] sm:$0x1] %v448_v31 }
  0x8b   : > { %v1045_v33 = vld [vmem:[#allocation2 + $0x74] sm:$0x1]  ;;  %v1281_v25 = vshll.u32 %v1015_v21, 16  ;;  %v1285_v26 = vshrl.u32 %v1015_v21, 16  ;;  %978 = vst.msk [vmem:[#allocation2 + $0xac] sm:$0xf] %vm405_vm5, %v797_v7  ;;  %v980_v14 = vsel %vm6338_vm3, %v798_v30, %v979_v23  ;;  %v531_v34 = vpack.c.bf16 %v377_v27, %v377_v27 }
  0x8c   : > { %5462 = vmatmul.msk.bf16.gmra.mxu0 %vm1520_vm11, %v1482_v4  ;;  %v1274_v35 = vrot.slane %v1272_v5, 4  ;;  %v1277_v36 = vrot.slane %v1275_v32, 5  ;;  %v1291_v37 = vshll.u32 %v1045_v33, 16  ;;  %981 = vst [vmem:[#allocation2 + $0xb0] sm:$0x1] %v980_v14  ;;  %v532_v40 = vpack.c.bf16 %v378_v55, %v378_v55  ;;  %v6193_v4 = vld [vmem:[%s6347_s27 + $0x70] sm:$0xff]  }
  0x8d   : > { %v1283_v39 = vrot.slane %v1281_v25, 5  ;;  %v1287_v6 = vrot.slane %v1285_v26, 4  ;;  %v596_v42 = vshrl.u32 %v531_v34, 16  ;;  %v599_v46 = vshll.u32 %v531_v34, 16  ;;  %v898_v24 = vld [vmem:[#allocation2 + $0x24] sm:$0xf] }
  0x8e   : > { %v1278_v44 = vor.u32 %v1277_v36, %v1274_v35  ;;  %v1293_v45 = vrot.slane %v1291_v37, 5  ;;  %v604_v48 = vshrl.u32 %v532_v40, 16  ;;  %v359_v49 = vadd.f32 %v6652_v18, %v324_v29  ;;  %v902_v30 = vld [vmem:[#allocation2 + $0x2c] sm:$0x1]  ;;  %v503_v31 = vld [vmem:[#allocation2 + $0x80] sm:$0x1] }
  0x8f   : > { %v1288_v47 = vor.u32 %v1287_v6, %v1283_v39  ;;  %v1024_v56 = vld [vmem:[#allocation2 + $0xa8] sm:$0xf]  ;;  %v598_v2 = vrot.slane %v596_v42, 7  ;;  %v607_v53 = vshll.u32 %v532_v40, 16  ;;  %v360_v59 = vadd.f32 %v6652_v18, %v325_v38  ;;  %v462_v34 = vld [vmem:[#allocation2 + $0xb4] sm:$0x1] }
  0x90   : > { %v1279_v50 = vrot.slane %v1278_v44, 4  ;;  %v1392_v51 = vshrl.u32 %v1024_v56, 16  ;;  %v1395_v52 = vshll.u32 %v1024_v56, 16  ;;  %v606_v58 = vrot.slane %v604_v48, 7  ;;  %v518_v44 = vld [vmem:[#allocation2 + $0xbc] sm:$0x1] }
  0x91   : > { %v1289_v54 = vrot.slane %v1288_v47, 4  ;;  %v601_v57 = vor.u32 %v599_v46, %v598_v2  ;;  %v602_v20 = vrot.slane %v598_v2, 4  ;;  %v391_v23 = vmax.f32 %v359_v49, 0.0  ;;  %v6745_v2 = vld [vmem:[%s6347_s27 + $0x18] sm:$0xff]  }
  0x92   : > { %v1284_v60 = vsel %vm6495_vm12, %v1279_v50, %v1283_v39  ;;  %v1025_v61 = vld [vmem:[#allocation2 + $0xac] sm:$0xf]  ;;  %v1394_v62 = vrot.slane %v1392_v51, 4  ;;  %v1397_v0 = vrot.slane %v1395_v52, 5  ;;  %v609_v55 = vor.u32 %v607_v53, %v606_v58 }
  0x93   : > { %v1294_v10 = vsel %vm6495_vm12, %v1289_v54, %v1293_v45  ;;  %v1466_v12 = vunpack.c.l.b16 %v1284_v60  ;;  %v1050_v19 = vld [vmem:[#allocation2 + $0xb0] sm:$0x1]  ;;  %v1401_v13 = vshll.u32 %v1025_v61, 16  ;;  %v1405_v15 = vshrl.u32 %v1025_v61, 16 }
  0x94   : > { %v1467_v1 = vunpack.c.l.b16 %v1294_v10  ;;  %v1398_v16 = vor.u32 %v1397_v0, %v1394_v62  ;;  %v1411_v17 = vshll.u32 %v1050_v19, 16  ;;  %v611_v29 = vrot.slane %v606_v58, 4 }
  0x95   : > { %v1403_v27 = vrot.slane %v1401_v13, 5  ;;  %v1407_v28 = vrot.slane %v1405_v15, 4  ;;  %v899_v7 = vsel %vm6412_vm8, %v601_v57, %v898_v24  ;;  %v610_v25 = vsel %vm6404_vm7, %v602_v20, %v609_v55 }
  0x96   : > { %v1489_v21 = vpack.c.b16 %v1467_v1, %v1466_v12  ;;  %v1399_v5 = vrot.slane %v1398_v16, 4  ;;  %v1413_v32 = vrot.slane %v1411_v17, 5  ;;  %900 = vst [vmem:[#allocation2 + $0x24] sm:$0xf] %v899_v7  ;;  %v903_v26 = vsel %vm6338_vm3, %v611_v29, %v902_v30  ;;  %v6059_v29 = vld [vmem:[%s8159_s3 + $0x58] sm:$0xff] }
  0x97   : > { %v1408_v33 = vor.u32 %v1407_v28, %v1403_v27  ;;  %v392_v14 = vmax.f32 %v360_v59, 0.0  ;;  %901 = vst.msk [vmem:[#allocation2 + $0x28] sm:$0xf] %vm405_vm5, %v610_v25  ;;  %v504_v36 = vsel %vm6363_vm4, 0, %v503_v31  ;;  %v545_v37 = vpack.c.bf16 %v391_v23, %v391_v23  ;;  %v947_v59 = vld [vmem:[#allocation2 + $0x78] sm:$0xf]  ;;  %2195 = vmatpush.bf16.msrb.mxu2 %v6059_v29 }
  0x98   : > { %5469 = vmatmul.msk.bf16.gmra.mxu2 %vm1520_vm11, %v1489_v21  ;;  %v1404_v35 = vsel %vm6495_vm12, %v1399_v5, %v1403_v27  ;;  %v6174_v38 = vunpack.c.l.bf16 %v6193_v4  ;;  %904 = vst [vmem:[#allocation2 + $0x2c] sm:$0x1] %v903_v26  ;;  %v6175_v42 = vunpack.c.h.bf16 %v6193_v4  ;;  %v463_v56 = vsel %vm6338_vm3, 0, %v462_v34 }
  0x99   : > { %v1409_v39 = vrot.slane %v1408_v33, 4  ;;  %v1476_v6 = vunpack.c.l.b16 %v1404_v35  ;;  %v546_v40 = vpack.c.bf16 %v392_v14, %v392_v14  ;;  %505 = vst [vmem:[#allocation2 + $0x80] sm:$0x1] %v504_v36  ;;  %v715_v45 = vshrl.u32 %v545_v37, 16 }
  0x9a   : > { %v718_v46 = vshll.u32 %v545_v37, 16  ;;  %v334_v47 = vmul.f32 %v6643_v11, %v6174_v38  ;;  %v335_v51 = vmul.f32 %v6643_v11, %v6175_v42  ;;  %464 = vst [vmem:[#allocation2 + $0xb4] sm:$0x1] %v463_v56  ;;  %v519_v57 = vsel %vm6363_vm4, 0, %v518_v44  ;;  %v429_v38 = vld [vmem:[#allocation2 + $0x30] sm:$0x1] }
  0x9b   : > { %v1414_v48 = vsel %vm6495_vm12, %v1409_v39, %v1413_v32  ;;  %v723_v49 = vshrl.u32 %v546_v40, 16  ;;  %v726_v50 = vshll.u32 %v546_v40, 16  ;;  %v717_v53 = vrot.slane %v715_v45, 7  ;;  %520 = vst [vmem:[#allocation2 + $0xbc] sm:$0x1] %v519_v57  ;;  %v6079_v32 = vld [vmem:[%s8159_s3 + $0x78] sm:$0xff] }
  0x9c   : > { %v1477_v52 = vunpack.c.l.b16 %v1414_v48  ;;  %v369_v54 = vadd.f32 %v6652_v18, %v334_v47  ;;  %v370_v60 = vadd.f32 %v6652_v18, %v335_v51  ;;  %v6130_v61 = vunpack.c.l.bf16 %v6745_v2  ;;  %2509 = vmatpush.bf16.msrb.mxu3 %v6079_v32  ;;  %v485_v39 = vld [vmem:[#allocation2 + $0x38] sm:$0x1] }
  0x9d   : > { %v725_v58 = vrot.slane %v723_v49, 7  ;;  %v6131_v62 = vunpack.c.h.bf16 %v6745_v2  ;;  %v1002_v20 = vld [vmem:[#allocation2 + $0x24] sm:$0xf]  ;;  %v720_v10 = vor.u32 %v718_v46, %v717_v53  ;;  %v721_v12 = vrot.slane %v717_v53, 4 }
  0x9e   : > { %v1494_v0 = vpack.c.b16 %v1477_v52, %v1476_v6  ;;  %v401_v19 = vmax.f32 %v369_v54, 0.0  ;;  %v6756_v13 = vld [vmem:[#allocation2 + $0x28] sm:$0xf]  ;;  %v1128_v15 = vshrl.u32 %v1002_v20, 16  ;;  %v1131_v24 = vshll.u32 %v1002_v20, 16 }
  0x9f   : > { %v728_v1 = vor.u32 %v726_v50, %v725_v58  ;;  %v730_v16 = vrot.slane %v725_v58, 4  ;;  %v6035_v17 = vld [vmem:[#allocation2 + $0x24] sm:$0xff]  ;;  %v6759_v30 = vld [vmem:[#allocation2 + $0x2c] sm:$0x1]  ;;  %v1137_v23 = vshll.u32 %v6756_v13, 16  ;;  %v1141_v27 = vshrl.u32 %v6756_v13, 16 }
  0xa0   : > { %5474 = vmatmul.msk.bf16.gmra.mxu3 %vm1520_vm11, %v1494_v0  ;;  %v948_v28 = vsel %vm6412_vm8, %v720_v10, %v947_v59  ;;  %v402_v55 = vmax.f32 %v370_v60, 0.0  ;;  %v1130_v31 = vrot.slane %v1128_v15, 4  ;;  %v1133_v4 = vrot.slane %v1131_v24, 5  ;;  %5559 = vmatmul.msk.bf16.gmra.mxu1 %vm1520_vm11, %v6035_v17  ;;  %v951_v25 = vld [vmem:[#allocation2 + $0x80] sm:$0x1] }
  0xa1   : > { %v1147_v21 = vshll.u32 %v6759_v30, 16  ;;  %v729_v5 = vsel %vm6404_vm7, %v721_v12, %v728_v1  ;;  %949 = vst [vmem:[#allocation2 + $0x78] sm:$0xf] %v948_v28  ;;  %v1139_v7 = vrot.slane %v1137_v23, 5  ;;  %v1143_v33 = vrot.slane %v1141_v27, 4 }
  0xa2   : > { %950 = vst.msk [vmem:[#allocation2 + $0x7c] sm:$0xf] %vm405_vm5, %v729_v5  ;;  %v555_v26 = vpack.c.bf16 %v401_v19, %v401_v19  ;;  %v556_v14 = vpack.c.bf16 %v402_v55, %v402_v55  ;;  %v1134_v34 = vor.u32 %v1133_v4, %v1130_v31  ;;  %v952_v36 = vsel %vm6338_vm3, %v730_v16, %v951_v25  ;;  %v982_v52 = vld [vmem:[#allocation2 + $0xb4] sm:$0xf]  ;;  %v986_v1 = vld [vmem:[#allocation2 + $0xbc] sm:$0x1] }
  0xa3   : > { %v1149_v35 = vrot.slane %v1147_v21, 5  ;;  %v312_v37 = vmul.f32 %v6643_v11, %v6130_v61  ;;  %v1144_v6 = vor.u32 %v1143_v33, %v1139_v7  ;;  %953 = vst [vmem:[#allocation2 + $0x80] sm:$0x1] %v952_v36  ;;  %v313_v47 = vmul.f32 %v6643_v11, %v6131_v62  ;;  %v6083_v25 = vld [vmem:[%s8159_s3 + $0x98] sm:$0xff]  ;;  %v6058_v36 = vld [vmem:[%s8159_s3 + $0x50] sm:$0xff] }
  0xa4   : > { %v800_v40 = vshrl.u32 %v555_v26, 16  ;;  %v803_v42 = vshll.u32 %v555_v26, 16  ;;  %v808_v44 = vshrl.u32 %v556_v14, 16  ;;  %v1135_v45 = vrot.slane %v1134_v34, 4  ;;  %3191 = vmatpush.bf16.msrb.mxu0 %v6083_v25  ;;  %2196 = vmatpush.bf16.msrb.mxu2 %v6058_v36 }
  0xa5   : > { %v811_v46 = vshll.u32 %v556_v14, 16  ;;  %v347_v56 = vadd.f32 %v6652_v18, %v312_v37  ;;  %v1145_v2 = vrot.slane %v1144_v6, 4  ;;  %v430_v50 = vsel %vm6338_vm3, 0, %v429_v38  ;;  %v6078_v38 = vld [vmem:[%s8159_s3 + $0x70] sm:$0xff] }
  0xa6   : > { %v802_v48 = vrot.slane %v800_v40, 7  ;;  %v810_v49 = vrot.slane %v808_v44, 7  ;;  %v1140_v51 = vsel %vm6495_vm12, %v1135_v45, %v1139_v7  ;;  %v348_v53 = vadd.f32 %v6652_v18, %v313_v47  ;;  %431 = vst [vmem:[#allocation2 + $0x30] sm:$0x1] %v430_v50  ;;  %v6057_v45 = vld [vmem:[%s8159_s3 + $0x48] sm:$0xff]  ;;  %2510 = vmatpush.bf16.msrb.mxu3 %v6078_v38 }
  0xa7   : > { %v379_v54 = vmax.f32 %v347_v56, 0.0  ;;  %v486_v57 = vsel %vm6363_vm4, 0, %v485_v39  ;;  %v1150_v11 = vsel %vm6495_vm12, %v1145_v2, %v1149_v35  ;;  %v1454_v58 = vunpack.c.l.b16 %v1140_v51  ;;  %v6082_v39 = vld [vmem:[%s8159_s3 + $0x90] sm:$0xff] }
  0xa8   : > { %v1016_v59 = vld [vmem:[#allocation2 + $0x78] sm:$0xf]  ;;  %v805_v60 = vor.u32 %v803_v42, %v802_v48  ;;  %v806_v61 = vrot.slane %v802_v48, 4  ;;  %487 = vst [vmem:[#allocation2 + $0x38] sm:$0x1] %v486_v57  ;;  %v1455_v62 = vunpack.c.l.b16 %v1150_v11  ;;  %v813_v12 = vor.u32 %v811_v46, %v810_v49  ;;  %v6077_v48 = vld [vmem:[%s8159_s3 + $0x68] sm:$0xff]  ;;  %3192 = vmatpush.bf16.msrb.mxu0 %v6082_v39  ;;  %2197 = vmatpush.bf16.msrb.mxu2 %v6057_v45 }
  0xa9   : > { %v1017_v0 = vld [vmem:[#allocation2 + $0x7c] sm:$0xf]  ;;  %v1296_v20 = vshrl.u32 %v1016_v59, 16  ;;  %v1299_v10 = vshll.u32 %v1016_v59, 16  ;;  %v815_v15 = vrot.slane %v810_v49, 4  ;;  %v380_v5 = vmax.f32 %v348_v53, 0.0 }
  0xaa   : > { %v1305_v19 = vshll.u32 %v1017_v0, 16  ;;  %v1309_v18 = vshrl.u32 %v1017_v0, 16  ;;  %v983_v24 = vsel %vm6412_vm8, %v805_v60, %v982_v52  ;;  %v1483_v16 = vpack.c.b16 %v1455_v62, %v1454_v58  ;;  %v1046_v17 = vld [vmem:[#allocation2 + $0x80] sm:$0x1]  ;;  %v6221_v49 = vld [vmem:[#allocation2 + $0x4] sm:$0xf]  ;;  %2511 = vmatpush.bf16.msrb.mxu3 %v6077_v48 }
  0xab   : > { %v1298_v23 = vrot.slane %v1296_v20, 4  ;;  %v1301_v27 = vrot.slane %v1299_v10, 5  ;;  %v814_v28 = vsel %vm6404_vm7, %v806_v61, %v813_v12  ;;  %984 = vst [vmem:[#allocation2 + $0xb4] sm:$0xf] %v983_v24  ;;  %v1315_v31 = vshll.u32 %v1046_v17, 16  ;;  %v6081_v62 = vld [vmem:[%s8159_s3 + $0x88] sm:$0xff] }
  0xac   : > { %v1307_v55 = vrot.slane %v1305_v19, 5  ;;  %v1311_v29 = vrot.slane %v1309_v18, 4  ;;  %985 = vst.msk [vmem:[#allocation2 + $0xb8] sm:$0xf] %vm405_vm5, %v814_v28  ;;  %5463 = vmatmul.msk.bf16.gmra.mxu0 %vm1520_vm11, %v1483_v16  ;;  %v987_v21 = vsel %vm6338_vm3, %v815_v15, %v986_v1  ;;  %v533_v32 = vpack.c.bf16 %v379_v54, %v379_v54  ;;  %v6056_v0 = vld [vmem:[%s8159_s3 + $0x40] sm:$0xff] }
  0xad   : > { %v1302_v4 = vor.u32 %v1301_v27, %v1298_v23  ;;  %v1317_v33 = vrot.slane %v1315_v31, 5  ;;  %988 = vst [vmem:[#allocation2 + $0xbc] sm:$0x1] %v987_v21  ;;  %v534_v14 = vpack.c.bf16 %v380_v5, %v380_v5  ;;  %v905_v44 = vld [vmem:[#allocation2 + $0x30] sm:$0xf]  ;;  %vm1948_vm14 = vcmask 1046532   ;;  %3193 = vmatpush.bf16.msrb.mxu0 %v6081_v62  ;;  %2198 = vmatpush.bf16.msrb.mxu2 %v6056_v0 }
  0xae   : > { %v1312_v7 = vor.u32 %v1311_v29, %v1307_v55  ;;  %v613_v34 = vshrl.u32 %v533_v32, 16  ;;  %v616_v35 = vshll.u32 %v533_v32, 16  ;;  %v1952_v50 = vrot.slane %v6221_v49, 5  ;;  %v1899_v15 = vld [vmem:[#allocation2] sm:$0xe]  ;;  %vm6841_vm15 = vmor %vm1947_vm13, %vm1948_vm14 }
  0xaf   : > { %v1303_v26 = vrot.slane %v1302_v4, 4  ;;  %v621_v42 = vshrl.u32 %v534_v14, 16  ;;  %v624_v2 = vshll.u32 %v534_v14, 16  ;;  %v909_v61 = vld [vmem:[#allocation2 + $0x38] sm:$0x1]  ;;  %v6076_v17 = vld [vmem:[%s8159_s3 + $0x60] sm:$0xff] }
  0xb0   : > { %v1313_v37 = vrot.slane %v1312_v7, 4  ;;  %v615_v40 = vrot.slane %v613_v34, 7  ;;  %v6222_v23 = vld [vmem:[#allocation2 + $0x8] sm:$0x1]  ;;  %v6080_v21 = vld [vmem:[%s8159_s3 + $0x80] sm:$0xff]  ;;  %v5572_v5 = vrot.slane %v1899_v15, 9  ;;  %2512 = vmatpush.bf16.msrb.mxu3 %v6076_v17 }
  0xb1   : > { %v1308_v6 = vsel %vm6495_vm12, %v1303_v26, %v1307_v55  ;;  %v623_v60 = vrot.slane %v621_v42, 7  ;;  %v1955_v27 = vrot.slane %v6222_v23, 5  ;;  %v1954_v32 = vrot.slane %v1952_v50, 4  ;;  %3194 = vmatpush.bf16.msrb.mxu0 %v6080_v21  ;;  %v6854_v48 = vld [vmem:[#allocation2 + $0x10] sm:$0xf] }
  0xb2   : > { %v1318_v46 = vsel %vm6495_vm12, %v1313_v37, %v1317_v33  ;;  %v1468_v47 = vunpack.c.l.b16 %v1308_v6  ;;  %v1026_v56 = vld [vmem:[#allocation2 + $0xb4] sm:$0xf]  ;;  %v618_v57 = vor.u32 %v616_v35, %v615_v40  ;;  %v619_v59 = vrot.slane %v615_v40, 4 }
  0xb3   : > { %v1469_v51 = vunpack.c.l.b16 %v1318_v46  ;;  %v1027_v52 = vld [vmem:[#allocation2 + $0xb8] sm:$0xf]  ;;  %v1416_v53 = vshrl.u32 %v1026_v56, 16  ;;  %v1419_v54 = vshll.u32 %v1026_v56, 16  ;;  %v626_v55 = vor.u32 %v624_v2, %v623_v60 }
  0xb4   : > { %v1425_v11 = vshll.u32 %v1027_v52, 16  ;;  %v1429_v58 = vshrl.u32 %v1027_v52, 16  ;;  %v1051_v10 = vld [vmem:[#allocation2 + $0xbc] sm:$0x1]  ;;  %v906_v18 = vsel %vm6412_vm8, %v618_v57, %v905_v44  ;;  %v628_v29 = vrot.slane %v623_v60, 4 }
  0xb5   : > { %v1490_v20 = vpack.c.b16 %v1469_v51, %v1468_v47  ;;  %v1418_v12 = vrot.slane %v1416_v53, 4  ;;  %v1421_v19 = vrot.slane %v1419_v54, 5  ;;  %v1435_v16 = vshll.u32 %v1051_v10, 16  ;;  %907 = vst [vmem:[#allocation2 + $0x30] sm:$0xf] %v906_v18 }
  0xb6   : > { %v1427_v24 = vrot.slane %v1425_v11, 5  ;;  %v1431_v1 = vrot.slane %v1429_v58, 4  ;;  %v627_v33 = vsel %vm6404_vm7, %v619_v59, %v626_v55  ;;  %v910_v25 = vsel %vm6338_vm3, %v628_v29, %v909_v61  ;;  %v2626_v44 = vld [vmem:[#allocation2 + $0xc] sm:$0xf]  ;;  %v6223_v10 = vld [vmem:[#allocation2 + $0x10] sm:$0xf] }
  0xb7   : > { %5470 = vmatmul.msk.bf16.gmra.mxu2 %vm1520_vm11, %v1490_v20  ;;  %v1422_v28 = vor.u32 %v1421_v19, %v1418_v12  ;;  %v1437_v4 = vrot.slane %v1435_v16, 5  ;;  %908 = vst.msk [vmem:[#allocation2 + $0x34] sm:$0xf] %vm405_vm5, %v627_v33  ;;  %v1953_v37 = vsel %vm6841_vm15, %v5572_v5, %v1952_v50  ;;  %v1956_v38 = vsel %vm6841_vm15, %v1954_v32, %v1955_v27  ;;  %v1900_v19 = vld [vmem:[#allocation2 + $0xc] sm:$0xe] }
  0xb8   : > { %v1432_v31 = vor.u32 %v1431_v1, %v1427_v24  ;;  %911 = vst [vmem:[#allocation2 + $0x38] sm:$0x1] %v910_v25  ;;  %v2071_v46 = vunpack.c.l.b16 %v1953_v37  ;;  %v2072_v47 = vunpack.c.l.b16 %v1956_v38  ;;  %v2675_v51 = vshrl.u32 %v2626_v44, 16  ;;  %v6037_v37 = vld [vmem:[#allocation2 + $0x3c] sm:$0xff] }
  0xb9   : > { %v1423_v7 = vrot.slane %v1422_v28, 4  ;;  %v2678_v11 = vshll.u32 %v2626_v44, 16  ;;  %v2684_v60 = vshll.u32 %v6854_v48, 16  ;;  %v2688_v61 = vshrl.u32 %v6854_v48, 16  ;;  %v6870_v28 = vld [vmem:[#allocation2 + $0x14] sm:$0x1] }
  0xba   : > { %v1433_v14 = vrot.slane %v1432_v31, 4  ;;  %v2103_v59 = vpack.c.b16 %v2072_v47, %v2071_v46  ;;  %v1959_v12 = vrot.slane %v6223_v10, 5  ;;  %v2677_v1 = vrot.slane %v2675_v51, 4  ;;  %v6224_v31 = vld [vmem:[#allocation2 + $0x14] sm:$0x1] }
  0xbb   : > { %v1428_v34 = vsel %vm6495_vm12, %v1423_v7, %v1427_v24  ;;  %v2680_v16 = vrot.slane %v2678_v11, 5  ;;  %v2686_v17 = vrot.slane %v2684_v60, 5  ;;  %v2690_v23 = vrot.slane %v2688_v61, 4 }
  0xbc   : > { %v1438_v35 = vsel %vm6495_vm12, %v1433_v14, %v1437_v4  ;;  %v1478_v36 = vunpack.c.l.b16 %v1428_v34  ;;  %v1004_v6 = vld [vmem:[#allocation2 + $0x30] sm:$0xf]  ;;  %v5573_v55 = vrot.slane %v1900_v19, 9  ;;  %v1961_v29 = vrot.slane %v1959_v12, 4 }
  0xbd   : > { %v1479_v39 = vunpack.c.l.b16 %v1438_v35  ;;  %v1152_v40 = vshrl.u32 %v1004_v6, 16  ;;  %v1155_v42 = vshll.u32 %v1004_v6, 16  ;;  %v1962_v4 = vrot.slane %v6224_v31, 5  ;;  %v2629_v6 = vld [vmem:[#allocation2 + $0x18] sm:$0xf] }
  0xbe   : > { %v6857_v49 = vld [vmem:[#allocation2 + $0x34] sm:$0xf]  ;;  %v2694_v7 = vshll.u32 %v6870_v28, 16  ;;  %v2681_v33 = vor.u32 %v2680_v16, %v2677_v1  ;;  %v2691_v25 = vor.u32 %v2690_v23, %v2686_v17  ;;  %v1960_v14 = vsel %vm6841_vm15, %v5573_v55, %v1959_v12  ;;  %v2631_v12 = vld [vmem:[#allocation2 + $0x20] sm:$0x1]  ;;  %v6061_v16 = vld [vmem:[#allocation2 + $0x18] sm:$0xff] }
  0xbf   : > { %v1495_v45 = vpack.c.b16 %v1479_v39, %v1478_v36  ;;  %v1154_v56 = vrot.slane %v1152_v40, 4  ;;  %v1157_v2 = vrot.slane %v1155_v42, 5  ;;  %v6036_v50 = vld [vmem:[#allocation2 + $0x30] sm:$0xff]  ;;  %v6859_v52 = vld [vmem:[#allocation2 + $0x38] sm:$0x1]  ;;  %v1161_v54 = vshll.u32 %v6857_v49, 16 }
  0xc0   : > { %v1165_v57 = vshrl.u32 %v6857_v49, 16  ;;  %v1171_v58 = vshll.u32 %v6859_v52, 16  ;;  %5560 = vmatmul.msk.bf16.gmra.mxu1 %vm1520_vm11, %v6036_v50  ;;  %v1963_v34 = vsel %vm6841_vm15, %v1961_v29, %v1962_v4  ;;  %v6060_v36 = vld [vmem:[#allocation2 + $0xc] sm:$0xff]  ;;  %v2073_v38 = vunpack.c.l.b16 %v1960_v14  ;;  %v2632_v29 = vld [vmem:[#allocation2 + $0x24] sm:$0xf] }
  0xc1   : > { %5475 = vmatmul.msk.bf16.gmra.mxu3 %vm1520_vm11, %v1495_v45  ;;  %v1158_v53 = vor.u32 %v1157_v2, %v1154_v56  ;;  %v1163_v0 = vrot.slane %v1161_v54, 5  ;;  %v2074_v39 = vunpack.c.l.b16 %v1963_v34  ;;  %v2682_v40 = vrot.slane %v2681_v33, 4  ;;  %v2630_v45 = vld [vmem:[#allocation2 + $0x1c] sm:$0xf]  ;;  %v6038_v23 = vld [vmem:[#allocation2 + $0x48] sm:$0xff] }
  0xc2   : > { %v1167_v20 = vrot.slane %v1165_v57, 4  ;;  %v1173_v24 = vrot.slane %v1171_v58, 5  ;;  %v2692_v42 = vrot.slane %v2691_v25, 4  ;;  %v2696_v44 = vrot.slane %v2694_v7, 5  ;;  %v1901_v57 = vld [vmem:[#allocation2 + $0x18] sm:$0xe] }
  0xc3   : > { %v1159_v62 = vrot.slane %v1158_v53, 4  ;;  %v2699_v46 = vshrl.u32 %v2629_v6, 16  ;;  %v2702_v47 = vshll.u32 %v2629_v6, 16  ;;  %v2104_v56 = vpack.c.b16 %v2074_v39, %v2073_v38  ;;  %v2633_v7 = vld [vmem:[#allocation2 + $0x28] sm:$0xf] }
  0xc4   : > { %v1168_v15 = vor.u32 %v1167_v20, %v1163_v0  ;;  %v2708_v2 = vshll.u32 %v2630_v45, 16  ;;  %v2687_v50 = vsel %vm6495_vm12, %v2682_v40, %v2686_v17  ;;  %v2697_v51 = vsel %vm6495_vm12, %v2692_v42, %v2696_v44  ;;  %v6906_v40 = vpop.f32.mrf.mxu1 }
  0xc5   : > { %v1164_v18 = vsel %vm6495_vm12, %v1159_v62, %v1163_v0  ;;  %v2712_v53 = vshrl.u32 %v2630_v45, 16  ;;  %v1966_v54 = vrot.slane %v6680_v22, 5  ;;  %v2701_v11 = vrot.slane %v2699_v46, 4 }
  0xc6   : > { %v1169_v27 = vrot.slane %v1168_v15, 4  ;;  %v1456_v21 = vunpack.c.l.b16 %v1164_v18  ;;  %v2704_v58 = vrot.slane %v2702_v47, 5  ;;  %v3068_v60 = vunpack.c.l.b16 %v2697_v51 }
  0xc7   : > { %5612 = vmatmul.msk.bf16.vlgmr.msrb.gmra.mxu2 %vm1520_vm11, %v2103_v59  ;;  %v3067_v59 = vunpack.c.l.b16 %v2687_v50  ;;  %v2710_v61 = vrot.slane %v2708_v2, 5  ;;  %v2714_v62 = vrot.slane %v2712_v53, 4  ;;  %v5574_v0 = vrot.slane %v1901_v57, 9  ;;  %v2634_v50 = vld [vmem:[#allocation2 + $0x2c] sm:$0x1] }
  0xc8   : > { %v1174_v5 = vsel %vm6495_vm12, %v1169_v27, %v1173_v24  ;;  %v1968_v20 = vrot.slane %v1966_v54, 4  ;;  %v1969_v10 = vrot.slane %v6683_v43, 5  ;;  %v2705_v19 = vor.u32 %v2704_v58, %v2701_v11  ;;  %v1902_v43 = vld [vmem:[#allocation2 + $0x24] sm:$0xe]  ;;  %v1578_v58 = vpop.f32.mrf.mxu0 }
  0xc9   : > { %v1457_v32 = vunpack.c.l.b16 %v1174_v5  ;;  %v3099_v18 = vpack.c.b16 %v3068_v60, %v3067_v59  ;;  %v2715_v15 = vor.u32 %v2714_v62, %v2710_v61  ;;  %v2718_v24 = vshll.u32 %v2631_v12, 16  ;;  %v6062_v11 = vld [vmem:[#allocation2 + $0x24] sm:$0xff]  ;;  %v6039_v60 = vld [vmem:[#allocation2 + $0x54] sm:$0xff] }
  0xca   : > { %v1967_v22 = vsel %vm6841_vm15, %v5574_v0, %v1966_v54  ;;  %v1970_v1 = vsel %vm6841_vm15, %v1968_v20, %v1969_v10  ;;  %v2706_v17 = vrot.slane %v2705_v19, 4  ;;  %v1973_v31 = vrot.slane %v6756_v13, 5  ;;  %v2635_v20 = vld [vmem:[#allocation2 + $0x30] sm:$0xf]  ;;  %v2636_v10 = vld [vmem:[#allocation2 + $0x34] sm:$0xf] }
  0xcb   : > { %v1484_v35 = vpack.c.b16 %v1457_v32, %v1456_v21  ;;  %v2075_v27 = vunpack.c.l.b16 %v1967_v22  ;;  %v2076_v55 = vunpack.c.l.b16 %v1970_v1  ;;  %v1976_v4 = vrot.slane %v6759_v30, 5  ;;  %v6918_v22 = vpop.f32.mrf.mxu3 }
  0xcc   : > { %v2716_v21 = vrot.slane %v2715_v15, 4  ;;  %v2720_v5 = vrot.slane %v2718_v24, 5  ;;  %v5575_v32 = vrot.slane %v1902_v43, 9  ;;  %v1975_v33 = vrot.slane %v1973_v31, 4  ;;  %v6912_v12 = vpop.f32.mrf.mxu1 }
  0xcd   : > { %5464 = vmatmul.msk.bf16.gmra.mxu0 %vm1520_vm11, %v1484_v35  ;;  %v2711_v25 = vsel %vm6495_vm12, %v2706_v17, %v2710_v61  ;;  %v2723_v14 = vshrl.u32 %v2632_v29, 16  ;;  %v2105_v35 = vpack.c.b16 %v2076_v55, %v2075_v27  ;;  %v2726_v13 = vshll.u32 %v2632_v29, 16  ;;  %v6910_v61 = vpop.f32.mrf.mxu2 }
  0xce   : > { %v1974_v34 = vsel %vm6841_vm15, %v5575_v32, %v1973_v31  ;;  %v1977_v30 = vsel %vm6841_vm15, %v1975_v33, %v1976_v4  ;;  %v2732_v38 = vshll.u32 %v2633_v7, 16  ;;  %v2736_v39 = vshrl.u32 %v2633_v7, 16 }
  0xcf   : > { %v2078_v6 = vunpack.c.l.b16 %v1977_v30  ;;  %v3069_v44 = vunpack.c.l.b16 %v2711_v25  ;;  %v2725_v46 = vrot.slane %v2723_v14, 4  ;;  %v2728_v47 = vrot.slane %v2726_v13, 5 }
  0xd0   : > { %5561 = vmatmul.msk.bf16.gmra.mxu1 %vm1520_vm11, %v6037_v37  ;;  %v2721_v37 = vsel %vm6495_vm12, %v2716_v21, %v2720_v5  ;;  %v2738_v2 = vrot.slane %v2736_v39, 4  ;;  %v2742_v57 = vshll.u32 %v2634_v50, 16  ;;  %v2750_v15 = vshll.u32 %v2635_v20, 16  ;;  %v2637_v21 = vld [vmem:[#allocation2 + $0x38] sm:$0x1]  ;;  %v6926_v32 = vpop.f32.mrf.mxu0 }
  0xd1   : > { %5716 = vmatmul.msk.bf16.vlgmr.msrb.gmra.mxu3 %vm1520_vm11, %v6060_v36  ;;  %v2077_v36 = vunpack.c.l.b16 %v1974_v34  ;;  %v3070_v45 = vunpack.c.l.b16 %v2721_v37  ;;  %v2729_v53 = vor.u32 %v2728_v47, %v2725_v46  ;;  %v2756_v24 = vshll.u32 %v2636_v10, 16 }
  0xd2   : > { %v2744_v0 = vrot.slane %v2742_v57, 5  ;;  %v1980_v17 = vrot.slane %v6857_v49, 5  ;;  %v2752_v43 = vrot.slane %v2750_v15, 5  ;;  %v1983_v14 = vrot.slane %v6859_v52, 5 }
  0xd3   : > { %v2106_v42 = vpack.c.b16 %v2078_v6, %v2077_v36  ;;  %v3100_v51 = vpack.c.b16 %v3070_v45, %v3069_v44  ;;  %v2730_v59 = vrot.slane %v2729_v53, 4  ;;  %v2758_v31 = vrot.slane %v2756_v24, 5  ;;  %v6935_v39 = vpop.f32.mrf.mxu3  ;;  %v6040_v6 = vld [vmem:[#allocation2 + $0x60] sm:$0xff]  ;;  %v2638_v44 = vld [vmem:[#allocation2 + $0x3c] sm:$0xf] }
  0xd4   : > { %v1819_v7 = vpop.f32.mrf.mxu1  ;;  %v1982_v25 = vrot.slane %v1980_v17, 4  ;;  %v2771_v53 = vshrl.u32 %v2638_v44, 16  ;;  %vm5336_vm0 = vcmask 1040384   ;;  %vm5338_vm1 = vcmask 517120  }
  0xd5   : > { %v6924_v4 = vpop.f32.mrf.mxu2  ;;  %v6929_v49 = vadd.f32 %v1819_v7, %v1578_v58 }
  0xd6   : > { %v1984_v37 = vsel %vm6841_vm15, %v1982_v25, %v1983_v14 }
  0xd7   : > { %5613 = vmatmul.msk.bf16.gmra.mxu2 %vm1520_vm11, %v2104_v56  ;;  %v2734_v56 = vrot.slane %v2732_v38, 5  ;;  %v6063_v38 = vld [vmem:[#allocation2 + $0x30] sm:$0xff]  ;;  %v2080_v52 = vunpack.c.l.b16 %v1984_v37 }
  0xd9   : > { %v2739_v54 = vor.u32 %v2738_v2, %v2734_v56  ;;  %v2735_v19 = vsel %vm6495_vm12, %v2730_v59, %v2734_v56  ;;  %v2639_v2 = vld [vmem:[#allocation2 + $0x40] sm:$0xf] }
  0xda   : > { %v3071_v27 = vunpack.c.l.b16 %v2735_v19 }
  0xdb   : > { %v2740_v62 = vrot.slane %v2739_v54, 4  ;;  %v2774_v54 = vshll.u32 %v2638_v44, 16  ;;  %v2642_v44 = vld [vmem:[#allocation2 + $0x4c] sm:$0xf] }
  0xdc   : > { %v6940_v50 = vpop.f32.mrf.mxu1 }
  0xdd   : > { %5756 = vmatmul.msk.bf16.vlgmr.msrb.gmra.mxu0 %vm1520_vm11, %v3099_v18  ;;  %v2747_v18 = vshrl.u32 %v2635_v20, 16  ;;  %v2745_v1 = vsel %vm6495_vm12, %v2740_v62, %v2744_v0  ;;  %v6938_v45 = vpop.f32.mrf.mxu2  ;;  %v6225_v62 = vld [vmem:[#allocation2 + $0x40] sm:$0xf]  ;;  %v1904_v20 = vld [vmem:[#allocation2 + $0x3c] sm:$0xe]  ;;  %v2776_v19 = vrot.slane %v2774_v54, 5 }
  0xde   : > { %v3072_v55 = vunpack.c.l.b16 %v2745_v1  ;;  %v1987_v0 = vrot.slane %v6225_v62, 5  ;;  %v1905_v62 = vld [vmem:[#allocation2 + $0x48] sm:$0xe] }
  0xdf   : > { %v2749_v29 = vrot.slane %v2747_v18, 4 }
  0xe0   : > { %5562 = vmatmul.msk.bf16.gmra.mxu1 %vm1520_vm11, %v6038_v23  ;;  %v1903_v23 = vld [vmem:[#allocation2 + $0x30] sm:$0xe]  ;;  %v3101_v34 = vpack.c.b16 %v3072_v55, %v3071_v27  ;;  %v5577_v27 = vrot.slane %v1904_v20, 9  ;;  %v1989_v55 = vrot.slane %v1987_v0, 4 }
  0xe1   : > { %5717 = vmatmul.msk.bf16.gmra.mxu3 %vm1520_vm11, %v6061_v16  ;;  %v2760_v16 = vshrl.u32 %v2636_v10, 16  ;;  %v5576_v33 = vrot.slane %v1903_v23, 9  ;;  %v2753_v13 = vor.u32 %v2752_v43, %v2749_v29  ;;  %v2773_v10 = vrot.slane %v2771_v53, 4  ;;  %v6226_v29 = vld [vmem:[#allocation2 + $0x44] sm:$0x1] }
  0xe2   : > { %v1990_v43 = vrot.slane %v6226_v29, 5 }
  0xe3   : > { %v2762_v5 = vrot.slane %v2760_v16, 4  ;;  %v1981_v36 = vsel %vm6841_vm15, %v5576_v33, %v1980_v17  ;;  %v2754_v46 = vrot.slane %v2753_v13, 4  ;;  %v6949_v1 = vpop.f32.mrf.mxu3  ;;  %v6064_v13 = vld [vmem:[#allocation2 + $0x3c] sm:$0xff] }
  0xe4   : > { %8174 = vst [vmem:[#allocation3_spill] sm:$0xff] %v6949_v1  ;;  %v1824_v23 = vpop.f32.mrf.mxu1 }
  0xe5   : > { %v2763_v30 = vor.u32 %v2762_v5, %v2758_v31  ;;  %v2759_v58 = vsel %vm6495_vm12, %v2754_v46, %v2758_v31  ;;  %v6951_v17 = vpop.f32.mrf.mxu2  ;;  %v2640_v31 = vld [vmem:[#allocation2 + $0x44] sm:$0x1]  ;;  %v2777_v5 = vor.u32 %v2776_v19, %v2773_v10 }
  0xe6   : > { %v3073_v18 = vunpack.c.l.b16 %v2759_v58  ;;  %v2790_v25 = vshll.u32 %v2640_v31, 16  ;;  %v2808_v58 = vshrl.u32 %v2642_v44, 16 }
  0xe7   : > { %5614 = vmatmul.msk.bf16.gmra.mxu2 %vm1520_vm11, %v2105_v35  ;;  %v2766_v35 = vshll.u32 %v2637_v21, 16  ;;  %v2764_v47 = vrot.slane %v2763_v30, 4  ;;  %v2778_v30 = vrot.slane %v2777_v5, 4 }
  0xe9   : > { %v2768_v56 = vrot.slane %v2766_v35, 5  ;;  %v1991_v35 = vsel %vm6841_vm15, %v1989_v55, %v1990_v43  ;;  %v6228_v55 = vld [vmem:[#allocation2 + $0x50] sm:$0x1] }
  0xea   : > { %v1997_v29 = vrot.slane %v6228_v55, 5  ;;  %v2643_v43 = vld [vmem:[#allocation2 + $0x50] sm:$0x1] }
  0xeb   : > { %v2769_v59 = vsel %vm6495_vm12, %v2764_v47, %v2768_v56  ;;  %v6967_v56 = vpop.f32.mrf.mxu3 }
  0xec   : > { %v3074_v15 = vunpack.c.l.b16 %v2769_v59  ;;  %v6962_v46 = vpop.f32.mrf.mxu1  ;;  %8175 = vst [vmem:[#allocation4_spill] sm:$0xff] %v6967_v56  ;;  %v6227_v59 = vld [vmem:[#allocation2 + $0x4c] sm:$0xf] }
  0xed   : > { %5757 = vmatmul.msk.bf16.gmra.mxu0 %vm1520_vm11, %v3100_v51  ;;  %v1583_v51 = vpop.f32.mrf.mxu0 }
  0xee   : > { %v6953_v21 = vadd.f32 %v1824_v23, %v1583_v51  ;;  %v3102_v7 = vpack.c.b16 %v3074_v15, %v3073_v18  ;;  %v5578_v23 = vrot.slane %v1905_v62, 9 }
  0xf0   : > { %5563 = vmatmul.msk.bf16.gmra.mxu1 %vm1520_vm11, %v6039_v60  ;;  %v2784_v60 = vshrl.u32 %v2639_v2, 16 }
  0xf1   : > { %5718 = vmatmul.msk.bf16.gmra.mxu3 %vm1520_vm11, %v6062_v11  ;;  %v2780_v11 = vshll.u32 %v2639_v2, 16 }
  0xf2   : > { %v2786_v16 = vrot.slane %v2784_v60, 4  ;;  %v1994_v60 = vrot.slane %v6227_v59, 5 }
  0xf3   : > { %v2782_v24 = vrot.slane %v2780_v11, 5 }
  0xf5   : > { %v2787_v33 = vor.u32 %v2786_v16, %v2782_v24  ;;  %v6955_v14 = vpop.f32.mrf.mxu0  ;;  %v2783_v47 = vsel %vm6495_vm12, %v2778_v30, %v2782_v24  ;;  %v2810_v24 = vrot.slane %v2808_v58, 4 }
  0xf7   : > { %5615 = vmatmul.msk.bf16.gmra.mxu2 %vm1520_vm11, %v2106_v42  ;;  %v2079_v42 = vunpack.c.l.b16 %v1981_v36  ;;  %v6041_v36 = vld [vmem:[#allocation2 + $0x6c] sm:$0xff] }
  0xf8   : > { %v6969_v2 = vpop.f32.mrf.mxu2 }
  0xf9   : > { %v2107_v57 = vpack.c.b16 %v2080_v52, %v2079_v42  ;;  %v2792_v42 = vrot.slane %v2790_v25, 5  ;;  %v2641_v52 = vld [vmem:[#allocation2 + $0x48] sm:$0xf]  ;;  %v2814_v25 = vshll.u32 %v2643_v43, 16 }
  0xfa   : > { %v2795_v53 = vshrl.u32 %v2641_v52, 16  ;;  %v2798_v54 = vshll.u32 %v2641_v52, 16 }
  0xfc   : > { %v2797_v19 = vrot.slane %v2795_v53, 4  ;;  %v2800_v18 = vrot.slane %v2798_v54, 5  ;;  %v1829_v16 = vpop.f32.mrf.mxu1  ;;  %v2645_v54 = vld [vmem:[#allocation2 + $0x58] sm:$0xf] }
  0xfd   : > { %5758 = vmatmul.msk.bf16.gmra.mxu0 %vm1520_vm11, %v3101_v34  ;;  %v1988_v34 = vsel %vm6841_vm15, %v5577_v27, %v1987_v0  ;;  %v3075_v0 = vunpack.c.l.b16 %v2783_v47  ;;  %v1996_v27 = vrot.slane %v1994_v60, 4  ;;  %v2828_v62 = vshll.u32 %v2645_v54, 16 }
  0xfe   : > { %v2081_v37 = vunpack.c.l.b16 %v1988_v34 }
  0xff   : > { %v1998_v30 = vsel %vm6841_vm15, %v1996_v27, %v1997_v29  ;;  %v2830_v43 = vrot.slane %v2828_v62, 5 }
 0x100   : > { %5564 = vmatmul.msk.bf16.gmra.mxu1 %vm1520_vm11, %v6040_v6  ;;  %v2788_v6 = vrot.slane %v2787_v33, 4 }
 0x101   : > { %5719 = vmatmul.msk.bf16.gmra.mxu3 %vm1520_vm11, %v6063_v38  ;;  %v2082_v38 = vunpack.c.l.b16 %v1991_v35  ;;  %v6979_v35 = vpop.f32.mrf.mxu2 }
 0x102   : > { %v2793_v11 = vsel %vm6495_vm12, %v2788_v6, %v2792_v42  ;;  %v2084_v42 = vunpack.c.l.b16 %v1998_v30 }
 0x103   : > { %v2108_v51 = vpack.c.b16 %v2082_v38, %v2081_v37  ;;  %v3076_v10 = vunpack.c.l.b16 %v2793_v11  ;;  %v6042_v38 = vld [vmem:[#allocation2 + $0x78] sm:$0xff] }
 0x104   : > { %v6977_v34 = vpop.f32.mrf.mxu3  ;;  %v6988_v53 = vpop.f32.mrf.mxu1 }
 0x105   : > { %v3103_v5 = vpack.c.b16 %v3076_v10, %v3075_v0  ;;  %8176 = vst [vmem:[#allocation5_spill] sm:$0xff] %v6977_v34  ;;  %v2832_v0 = vshrl.u32 %v2645_v54, 16 }
 0x107   : > { %5616 = vmatmul.msk.bf16.gmra.mxu2 %vm1520_vm11, %v2107_v57  ;;  %v2804_v57 = vshll.u32 %v2642_v44, 16  ;;  %v2816_v44 = vrot.slane %v2814_v25, 5 }
 0x109   : > { %v1588_v20 = vpop.f32.mrf.mxu0  ;;  %v2806_v15 = vrot.slane %v2804_v57, 5 }
 0x10a   : > { %v6975_v31 = vadd.f32 %v1829_v16, %v1588_v20  ;;  %v6229_v20 = vld [vmem:[#allocation2 + $0x58] sm:$0xf] }
 0x10b   : > { %v2811_v33 = vor.u32 %v2810_v24, %v2806_v15  ;;  %v2001_v10 = vrot.slane %v6229_v20, 5  ;;  %v2647_v20 = vld [vmem:[#allocation2 + $0x60] sm:$0xf] }
 0x10c   : > { %v6996_v16 = vpop.f32.mrf.mxu3 }
 0x10d   : > { %5759 = vmatmul.msk.bf16.gmra.mxu0 %vm1520_vm11, %v3102_v7  ;;  %v2801_v7 = vor.u32 %v2800_v18, %v2797_v19  ;;  %v2812_v52 = vrot.slane %v2811_v33, 4  ;;  %v1906_v19 = vld [vmem:[#allocation2 + $0x54] sm:$0xe]  ;;  %v6230_v18 = vld [vmem:[#allocation2 + $0x5c] sm:$0x1]  ;;  %8177 = vst [vmem:[#allocation6_spill] sm:$0xff] %v6996_v16 }
 0x10e   : > { %v2004_v24 = vrot.slane %v6230_v18, 5  ;;  %v5579_v33 = vrot.slane %v1906_v19, 9  ;;  %v2003_v25 = vrot.slane %v2001_v10, 4 }
 0x10f   : > { %v2802_v37 = vrot.slane %v2801_v7, 4 }
 0x110   : > { %5565 = vmatmul.msk.bf16.gmra.mxu1 %vm1520_vm11, %v6041_v36  ;;  %v6065_v36 = vld [vmem:[#allocation2 + $0x48] sm:$0xff] }
 0x111   : > { %5720 = vmatmul.msk.bf16.gmra.mxu3 %vm1520_vm11, %v6064_v13  ;;  %v1995_v13 = vsel %vm6841_vm15, %v5578_v23, %v1994_v60  ;;  %v6986_v47 = vpop.f32.mrf.mxu0  ;;  %v2807_v57 = vsel %vm6495_vm12, %v2802_v37, %v2806_v15  ;;  %v2817_v60 = vsel %vm6495_vm12, %v2812_v52, %v2816_v44  ;;  %v2002_v52 = vsel %vm6841_vm15, %v5579_v33, %v2001_v10  ;;  %v2648_v10 = vld [vmem:[#allocation2 + $0x64] sm:$0xf]  ;;  %v1907_v33 = vld [vmem:[#allocation2 + $0x60] sm:$0xe] }
 0x112   : > { %v2083_v6 = vunpack.c.l.b16 %v1995_v13  ;;  %v3077_v15 = vunpack.c.l.b16 %v2807_v57  ;;  %v3078_v27 = vunpack.c.l.b16 %v2817_v60  ;;  %v2646_v13 = vld [vmem:[#allocation2 + $0x5c] sm:$0x1]  ;;  %v2005_v44 = vsel %vm6841_vm15, %v2003_v25, %v2004_v24  ;;  %v6043_v57 = vld [vmem:[#allocation2 + $0x84] sm:$0xff] }
 0x113   : > { %v2843_v24 = vshrl.u32 %v2647_v20, 16  ;;  %v6232_v25 = vld [vmem:[#allocation2 + $0x68] sm:$0x1] }
 0x114   : > { %v2109_v11 = vpack.c.b16 %v2084_v42, %v2083_v6  ;;  %v2838_v42 = vshll.u32 %v2646_v13, 16  ;;  %v2011_v13 = vrot.slane %v6232_v25, 5  ;;  %v2650_v25 = vld [vmem:[#allocation2 + $0x6c] sm:$0xf] }
 0x116   : > { %v2840_v60 = vrot.slane %v2838_v42, 5 }
 0x117   : > { %5617 = vmatmul.msk.bf16.gmra.mxu2 %vm1520_vm11, %v2108_v51  ;;  %v2644_v51 = vld [vmem:[#allocation2 + $0x54] sm:$0xf] }
 0x118   : > { %v2819_v58 = vshrl.u32 %v2644_v51, 16  ;;  %v2822_v59 = vshll.u32 %v2644_v51, 16  ;;  %v6066_v51 = vld [vmem:[#allocation2 + $0x54] sm:$0xff] }
 0x11a   : > { %v2821_v55 = vrot.slane %v2819_v58, 4  ;;  %v2824_v29 = vrot.slane %v2822_v59, 5  ;;  %v2086_v58 = vunpack.c.l.b16 %v2005_v44  ;;  %v5580_v44 = vrot.slane %v1907_v33, 9 }
 0x11b   : > { %v6998_v23 = vpop.f32.mrf.mxu2 }
 0x11c   : > { %v2825_v37 = vor.u32 %v2824_v29, %v2821_v55  ;;  %v2852_v55 = vshll.u32 %v2648_v10, 16  ;;  %v2856_v29 = vshrl.u32 %v2648_v10, 16 }
 0x11d   : > { %5760 = vmatmul.msk.bf16.gmra.mxu0 %vm1520_vm11, %v3103_v5  ;;  %v2834_v5 = vrot.slane %v2832_v0, 4  ;;  %v1834_v7 = vpop.f32.mrf.mxu1 }
 0x11e   : > { %v2826_v54 = vrot.slane %v2825_v37, 4  ;;  %v2854_v42 = vrot.slane %v2852_v55, 5 }
 0x11f   : > { %v2835_v6 = vor.u32 %v2834_v5, %v2830_v43  ;;  %v6231_v5 = vld [vmem:[#allocation2 + $0x64] sm:$0xf] }
 0x120   : > { %5566 = vmatmul.msk.bf16.gmra.mxu1 %vm1520_vm11, %v6042_v38  ;;  %v2831_v19 = vsel %vm6495_vm12, %v2826_v54, %v2830_v43  ;;  %v2845_v43 = vrot.slane %v2843_v24, 4  ;;  %v2649_v54 = vld [vmem:[#allocation2 + $0x68] sm:$0x1] }
 0x121   : > { %5721 = vmatmul.msk.bf16.gmra.mxu3 %vm1520_vm11, %v6065_v36  ;;  %v3104_v36 = vpack.c.b16 %v3078_v27, %v3077_v15  ;;  %v2836_v59 = vrot.slane %v2835_v6, 4  ;;  %v2846_v15 = vshll.u32 %v2647_v20, 16  ;;  %v2862_v20 = vshll.u32 %v2649_v54, 16 }
 0x123   : > { %v7008_v62 = vpop.f32.mrf.mxu3  ;;  %v7010_v0 = vpop.f32.mrf.mxu2  ;;  %v2841_v27 = vsel %vm6495_vm12, %v2836_v59, %v2840_v60  ;;  %v2848_v6 = vrot.slane %v2846_v15, 5  ;;  %v6044_v15 = vld [vmem:[#allocation2 + $0x90] sm:$0xff] }
 0x124   : > { %8178 = vst [vmem:[#allocation7_spill] sm:$0xff] %v7008_v62  ;;  %v3080_v37 = vunpack.c.l.b16 %v2841_v27 }
 0x125   : > { %v2849_v59 = vor.u32 %v2848_v6, %v2845_v43  ;;  %v2867_v6 = vshrl.u32 %v2650_v25, 16 }
 0x127   : > { %5618 = vmatmul.msk.bf16.gmra.mxu2 %vm1520_vm11, %v2109_v11  ;;  %v2085_v11 = vunpack.c.l.b16 %v2002_v52  ;;  %v2858_v52 = vrot.slane %v2856_v29, 4  ;;  %v2850_v24 = vrot.slane %v2849_v59, 4  ;;  %v6233_v59 = vld [vmem:[#allocation2 + $0x70] sm:$0xf] }
 0x129   : > { %v1593_v30 = vpop.f32.mrf.mxu0  ;;  %v2110_v18 = vpack.c.b16 %v2086_v58, %v2085_v11  ;;  %v2859_v60 = vor.u32 %v2858_v52, %v2854_v42  ;;  %v2870_v52 = vshll.u32 %v2650_v25, 16 }
 0x12a   : > { %v7001_v38 = vadd.f32 %v1834_v7, %v1593_v30  ;;  %v2008_v7 = vrot.slane %v6231_v5, 5  ;;  %v7018_v30 = vpop.f32.mrf.mxu1  ;;  %v2864_v5 = vrot.slane %v2862_v20, 5  ;;  %v1908_v20 = vld [vmem:[#allocation2 + $0x6c] sm:$0xe] }
 0x12b   : > { %v2860_v29 = vrot.slane %v2859_v60, 4  ;;  %v2015_v60 = vrot.slane %v6233_v59, 5  ;;  %v5581_v25 = vrot.slane %v1908_v20, 9 }
 0x12c   : > { %v2009_v10 = vsel %vm6841_vm15, %v5580_v44, %v2008_v7 }
 0x12d   : > { %5761 = vmatmul.msk.bf16.gmra.mxu0 %vm1520_vm11, %v3104_v36  ;;  %v3079_v36 = vunpack.c.l.b16 %v2831_v19  ;;  %v2087_v27 = vunpack.c.l.b16 %v2009_v10  ;;  %v2865_v44 = vsel %vm6495_vm12, %v2860_v29, %v2864_v5  ;;  %v6234_v10 = vld [vmem:[#allocation2 + $0x74] sm:$0x1]  ;;  %v2017_v29 = vrot.slane %v2015_v60, 4 }
 0x12e   : > { %v2652_v5 = vld [vmem:[#allocation2 + $0x74] sm:$0x1] }
 0x12f   : > { %v3105_v58 = vpack.c.b16 %v3080_v37, %v3079_v36  ;;  %v2651_v36 = vld [vmem:[#allocation2 + $0x70] sm:$0xf] }
 0x130   : > { %5567 = vmatmul.msk.bf16.gmra.mxu1 %vm1520_vm11, %v6043_v57  ;;  %v7021_v57 = vpop.f32.mrf.mxu3  ;;  %v2876_v54 = vshll.u32 %v2651_v36, 16 }
 0x131   : > { %5722 = vmatmul.msk.bf16.gmra.mxu3 %vm1520_vm11, %v6066_v51  ;;  %v2010_v51 = vrot.slane %v2008_v7, 4  ;;  %8179 = vst [vmem:[#allocation8_spill] sm:$0xff] %v7021_v57  ;;  %v7031_v37 = vpop.f32.mrf.mxu0  ;;  %v3082_v57 = vunpack.c.l.b16 %v2865_v44  ;;  %v2886_v44 = vshll.u32 %v2652_v5, 16 }
 0x133   : > { %v2012_v19 = vsel %vm6841_vm15, %v2010_v51, %v2011_v13  ;;  %v2855_v13 = vsel %vm6495_vm12, %v2850_v24, %v2854_v42  ;;  %v2869_v42 = vrot.slane %v2867_v6, 4  ;;  %v2872_v24 = vrot.slane %v2870_v52, 5 }
 0x134   : > { %v2088_v55 = vunpack.c.l.b16 %v2012_v19  ;;  %v2018_v19 = vrot.slane %v6234_v10, 5  ;;  %v2888_v10 = vrot.slane %v2886_v44, 5 }
 0x136   : > { %v2111_v43 = vpack.c.b16 %v2088_v55, %v2087_v27  ;;  %v2019_v6 = vsel %vm6841_vm15, %v2017_v29, %v2018_v19 }
 0x137   : > { %5619 = vmatmul.msk.bf16.gmra.mxu2 %vm1520_vm11, %v2110_v18  ;;  %v6067_v18 = vld [vmem:[#allocation2 + $0x60] sm:$0xff] }
 0x13a   : > { %v7023_v11 = vpop.f32.mrf.mxu2 }
 0x13d   : > { %5762 = vmatmul.msk.bf16.gmra.mxu0 %vm1520_vm11, %v3105_v58  ;;  %v1839_v33 = vpop.f32.mrf.mxu1  ;;  %v2880_v58 = vshrl.u32 %v2651_v36, 16  ;;  %v2873_v36 = vor.u32 %v2872_v24, %v2869_v42  ;;  %v2653_v42 = vld [vmem:[#allocation2 + $0x78] sm:$0xf] }
 0x13e   : > { %v2894_v19 = vshll.u32 %v2653_v42, 16 }
 0x13f   : > { %v2882_v27 = vrot.slane %v2880_v58, 4  ;;  %v6045_v58 = vld [vmem:[#allocation2 + $0x9c] sm:$0xff] }
 0x140   : > { %5568 = vmatmul.msk.bf16.gmra.mxu1 %vm1520_vm11, %v6044_v15  ;;  %v2878_v15 = vrot.slane %v2876_v54, 5  ;;  %v6068_v54 = vld [vmem:[#allocation2 + $0x6c] sm:$0xff] }
 0x141   : > { %5723 = vmatmul.msk.bf16.gmra.mxu3 %vm1520_vm11, %v6067_v18  ;;  %v3081_v18 = vunpack.c.l.b16 %v2855_v13 }
 0x142   : > { %v7033_v7 = vpop.f32.mrf.mxu2  ;;  %v2883_v13 = vor.u32 %v2882_v27, %v2878_v15 }
 0x143   : > { %v3106_v62 = vpack.c.b16 %v3082_v57, %v3081_v18  ;;  %v2874_v57 = vrot.slane %v2873_v36, 4 }
 0x144   : > { %v7040_v51 = vpop.f32.mrf.mxu3 }
 0x145   : > { %8180 = vst [vmem:[#allocation9_spill] sm:$0xff] %v7040_v51  ;;  %v1841_v55 = vpop.f32.mrf.mxu1 }
 0x147   : > { %5620 = vmatmul.msk.bf16.gmra.mxu2 %vm1520_vm11, %v2111_v43  ;;  %v2016_v43 = vsel %vm6841_vm15, %v5581_v25, %v2015_v60  ;;  %v2654_v60 = vld [vmem:[#allocation2 + $0x7c] sm:$0xf] }
 0x148   : > { %v2089_v20 = vunpack.c.l.b16 %v2016_v43  ;;  %v2900_v5 = vshll.u32 %v2654_v60, 16  ;;  %v2904_v36 = vshrl.u32 %v2654_v60, 16 }
 0x14a   : > { %v2200_v51 = vpop.f32.mrf.mxu2  ;;  %v1598_v16 = vpop.f32.mrf.mxu0 }
 0x14b   : > { %v2280_v59 = vadd.f32 %v2200_v51, %v6929_v49  ;;  %v7050_v52 = vadd.f32 %v1839_v33, %v1598_v16  ;;  %v2090_v49 = vunpack.c.l.b16 %v2019_v6  ;;  %v2884_v51 = vrot.slane %v2883_v13, 4  ;;  %v6235_v13 = vld [vmem:[#allocation2 + $0x7c] sm:$0xf] }
 0x14c   : > { %v7044_v34 = vpop.f32.mrf.mxu3  ;;  %v2879_v16 = vsel %vm6495_vm12, %v2874_v57, %v2878_v15  ;;  %v2022_v44 = vrot.slane %v6235_v13, 5  ;;  %v1822_v57 = vadd.f32 %v6940_v50, %v6926_v32 }
 0x14d   : > { %8181 = vst [vmem:[#allocation10_spill] sm:$0xff] %v7044_v34  ;;  %5763 = vmatmul.msk.bf16.gmra.mxu0 %vm1520_vm11, %v3106_v62  ;;  %v7053_v18 = vpop.f32.mrf.mxu1  ;;  %v2112_v33 = vpack.c.b16 %v2090_v49, %v2089_v20  ;;  %v2891_v62 = vshrl.u32 %v2653_v42, 16  ;;  %v2889_v25 = vsel %vm6495_vm12, %v2884_v51, %v2888_v10  ;;  %v6236_v34 = vld [vmem:[#allocation2 + $0x80] sm:$0x1]  ;;  %v2896_v51 = vrot.slane %v2894_v19, 5 }
 0x14e   : > { %v2025_v15 = vrot.slane %v6236_v34, 5  ;;  %v3084_v20 = vunpack.c.l.b16 %v2889_v25  ;;  %v2902_v10 = vrot.slane %v2900_v5, 5  ;;  %v2906_v42 = vrot.slane %v2904_v36, 4  ;;  %v6069_v5 = vld [vmem:[#allocation2 + $0x78] sm:$0xff] }
 0x14f   : > { %v2893_v49 = vrot.slane %v2891_v62, 4 }
 0x150   : > { %5569 = vmatmul.msk.bf16.gmra.mxu1 %vm1520_vm11, %v6045_v58  ;;  %v3083_v58 = vunpack.c.l.b16 %v2879_v16  ;;  %v2907_v16 = vor.u32 %v2906_v42, %v2902_v10 }
 0x151   : > { %5724 = vmatmul.msk.bf16.gmra.mxu3 %vm1520_vm11, %v6068_v54  ;;  %v1909_v54 = vld [vmem:[#allocation2 + $0x78] sm:$0xe]  ;;  %v2897_v34 = vor.u32 %v2896_v51, %v2893_v49  ;;  %v2656_v51 = vld [vmem:[#allocation2 + $0x84] sm:$0xf] }
 0x152   : > { %v2202_v24 = vpop.f32.mrf.mxu2  ;;  %v1600_v27 = vpop.f32.mrf.mxu0  ;;  %v5582_v13 = vrot.slane %v1909_v54, 9  ;;  %v3107_v56 = vpack.c.b16 %v3084_v20, %v3083_v58  ;;  %v6046_v54 = vld [vmem:[#allocation2 + $0xa8] sm:$0xff]  ;;  %v2908_v58 = vrot.slane %v2907_v16, 4 }
 0x153   : > { %v7061_v6 = vadd.f32 %v1841_v55, %v1600_v27  ;;  %v2281_v55 = vadd.f32 %v2202_v24, %v1822_v57  ;;  %v2655_v27 = vld [vmem:[#allocation2 + $0x80] sm:$0x1]  ;;  %v2898_v24 = vrot.slane %v2897_v34, 4 }
 0x154   : > { %v2514_v29 = vpop.f32.mrf.mxu3  ;;  %v2910_v25 = vshll.u32 %v2655_v27, 16 }
 0x155   : > { %v2594_v43 = vadd.f32 %v2514_v29, %v2280_v59  ;;  %v7066_v60 = vpop.f32.mrf.mxu1  ;;  %v2024_v59 = vrot.slane %v2022_v44, 4 }
 0x156   : > { %v2912_v20 = vrot.slane %v2910_v25, 5  ;;  %v1910_v25 = vld [vmem:[#allocation2 + $0x84] sm:$0xe] }
 0x157   : > { %5621 = vmatmul.msk.bf16.gmra.mxu2 %vm1520_vm11, %v2112_v33  ;;  %v2023_v33 = vsel %vm6841_vm15, %v5582_v13, %v2022_v44  ;;  %v2026_v62 = vsel %vm6841_vm15, %v2024_v59, %v2025_v15  ;;  %v2657_v44 = vld [vmem:[#allocation2 + $0x88] sm:$0xf]  ;;  %v2903_v15 = vsel %vm6495_vm12, %v2898_v24, %v2902_v10  ;;  %v2918_v13 = vshll.u32 %v2656_v51, 16 }
 0x158   : > { %v2091_v57 = vunpack.c.l.b16 %v2023_v33  ;;  %v2928_v34 = vshrl.u32 %v2657_v44, 16  ;;  %v3085_v24 = vunpack.c.l.b16 %v2903_v15 }
 0x15a   : > { %v2205_v29 = vpop.f32.mrf.mxu2  ;;  %v3196_v32 = vpop.f32.mrf.mxu0 }
 0x15b   : > { %v2282_v1 = vadd.f32 %v2205_v29, %v6953_v21  ;;  %v7073_v36 = vadd.f32 %v3196_v32, %v2594_v43  ;;  %v2092_v21 = vunpack.c.l.b16 %v2026_v62  ;;  %v2924_v29 = vshll.u32 %v2657_v44, 16  ;;  %v6237_v32 = vld [vmem:[#allocation2 + $0x88] sm:$0xf]  ;;  %v6238_v62 = vld [vmem:[#allocation2 + $0x8c] sm:$0x1] }
 0x15c   : > { %v2516_v50 = vpop.f32.mrf.mxu3  ;;  %v2032_v10 = vrot.slane %v6238_v62, 5 }
 0x15d   : > { %v2595_v19 = vadd.f32 %v2516_v50, %v2281_v55  ;;  %5764 = vmatmul.msk.bf16.gmra.mxu0 %vm1520_vm11, %v3107_v56  ;;  %v7076_v49 = vpop.f32.mrf.mxu1  ;;  %v2113_v43 = vpack.c.b16 %v2092_v21, %v2091_v57  ;;  %v2915_v56 = vshrl.u32 %v2656_v51, 16  ;;  %v2913_v55 = vsel %vm6495_vm12, %v2908_v58, %v2912_v20 }
 0x15e   : > { %v2029_v50 = vrot.slane %v6237_v32, 5  ;;  %v2920_v21 = vrot.slane %v2918_v13, 5  ;;  %v7089_v58 = vrot.slane %v2924_v29, 5  ;;  %v2930_v20 = vrot.slane %v2928_v34, 4  ;;  %v6070_v34 = vld [vmem:[#allocation2 + $0x84] sm:$0xff] }
 0x15f   : > { %v2917_v57 = vrot.slane %v2915_v56, 4 }
 0x160   : > { %5570 = vmatmul.msk.bf16.gmra.mxu1 %vm1520_vm11, %v6046_v54  ;;  %v3086_v54 = vunpack.c.l.b16 %v2913_v55  ;;  %v2031_v44 = vrot.slane %v2029_v50, 4 }
 0x161   : > { %5725 = vmatmul.msk.bf16.gmra.mxu3 %vm1520_vm11, %v6069_v5  ;;  %v1827_v5 = vadd.f32 %v6962_v46, %v6955_v14  ;;  %v2921_v62 = vor.u32 %v2920_v21, %v2917_v57  ;;  %v2660_v57 = vld [vmem:[#allocation2 + $0x94] sm:$0xf] }
 0x162   : > { %v2207_v42 = vpop.f32.mrf.mxu2  ;;  %v3198_v59 = vpop.f32.mrf.mxu0  ;;  %v3108_v32 = vpack.c.b16 %v3086_v54, %v3085_v24  ;;  %v2033_v55 = vsel %vm6841_vm15, %v2031_v44, %v2032_v10  ;;  %v3374_v10 = vrot.slane %v6854_v48, 5 }
 0x163   : > { %v7084_v33 = vadd.f32 %v3198_v59, %v2595_v19  ;;  %v2283_v19 = vadd.f32 %v2207_v42, %v1827_v5  ;;  %v2658_v59 = vld [vmem:[#allocation2 + $0x8c] sm:$0x1]  ;;  %v6087_v42 = vld [vmem:[%s8159_s3 + $0xb8] sm:$0xff]  ;;  %v2094_v54 = vunpack.c.l.b16 %v2033_v55  ;;  %v2922_v21 = vrot.slane %v2921_v62, 4 }
 0x164   : > { %v2519_v27 = vpop.f32.mrf.mxu3  ;;  %v2934_v56 = vshll.u32 %v2658_v59, 16  ;;  %3617 = vmatpush.bf16.msra.mxu1 %v6087_v42  ;;  %v6047_v5 = vld [vmem:[#allocation2 + $0xb4] sm:$0xff]  ;;  %v6085_v55 = vld [vmem:[%s8159_s3 + $0xa8] sm:$0xff] }
 0x165   : > { %v2596_v16 = vadd.f32 %v2519_v27, %v2282_v1  ;;  %8182 = vst [vmem:[#allocation11_spill] sm:$0xff] %v7084_v33  ;;  %v7091_v51 = vpop.f32.mrf.mxu1  ;;  %v5583_v1 = vrot.slane %v1910_v25, 9  ;;  %v2927_v62 = vsel %vm6495_vm12, %v2922_v21, %v7089_v58  ;;  %v6239_v42 = vld [vmem:[#allocation2 + $0x94] sm:$0xf]  ;;  %v6084_v21 = vld [vmem:[%s8159_s3 + $0xa0] sm:$0xff] }
 0x167   : > { %5622 = vmatmul.msk.bf16.gmra.mxu2 %vm1520_vm11, %v2113_v43  ;;  %v2931_v43 = vor.u32 %v2930_v20, %v7089_v58  ;;  %v2030_v13 = vsel %vm6841_vm15, %v5583_v1, %v2029_v50  ;;  %v6086_v50 = vld [vmem:[%s8159_s3 + $0xb0] sm:$0xff]  ;;  %v2936_v1 = vrot.slane %v2934_v56, 5 }
 0x168   : > { %v2093_v24 = vunpack.c.l.b16 %v2030_v13  ;;  %3618 = vmatpush.bf16.msra.mxu1 %v6086_v50  ;;  %v3376_v13 = vrot.slane %v3374_v10, 4 }
 0x169   : > { %v2932_v20 = vrot.slane %v2931_v43, 4 }
 0x16a   : > { %v2210_v27 = vpop.f32.mrf.mxu2  ;;  %v3201_v46 = vpop.f32.mrf.mxu0 }
 0x16b   : > { %v2284_v14 = vadd.f32 %v2210_v27, %v6975_v31  ;;  %v7102_v25 = vadd.f32 %v3201_v46, %v2596_v16  ;;  %v2659_v31 = vld [vmem:[#allocation2 + $0x90] sm:$0xf]  ;;  %v2948_v27 = vshll.u32 %v2660_v57, 16  ;;  %v3377_v46 = vrot.slane %v6870_v28, 5 }
 0x16c   : > { %v2521_v15 = vpop.f32.mrf.mxu3  ;;  %v2939_v16 = vshrl.u32 %v2659_v31, 16  ;;  %v2942_v59 = vshll.u32 %v2659_v31, 16  ;;  %v2937_v43 = vsel %vm6495_vm12, %v2932_v20, %v2936_v1  ;;  %3619 = vmatpush.bf16.msra.mxu1 %v6085_v55  ;;  %v6240_v1 = vld [vmem:[#allocation2 + $0x98] sm:$0x1] }
 0x16d   : > { %v2597_v29 = vadd.f32 %v2521_v15, %v2283_v19  ;;  %8183 = vst [vmem:[#allocation12_spill] sm:$0xff] %v7102_v25  ;;  %5765 = vmatmul.msk.bf16.gmra.mxu0 %vm1520_vm11, %v3108_v32  ;;  %v7109_v44 = vpop.f32.mrf.mxu1  ;;  %v2952_v32 = vshrl.u32 %v2660_v57, 16  ;;  %v2114_v15 = vpack.c.b16 %v2094_v54, %v2093_v24  ;;  %v3308_v24 = vld [vmem:[#allocation2 + $0xc] sm:$0xe]  ;;  %v7124_v50 = vrot.slane %v2948_v27, 5 }
 0x16e   : > { %v2941_v31 = vrot.slane %v2939_v16, 4  ;;  %v2944_v57 = vrot.slane %v2942_v59, 5  ;;  %v5772_v20 = vrot.slane %v3308_v24, 9  ;;  %v2039_v25 = vrot.slane %v6240_v1, 5 }
 0x16f   : > { %v2954_v58 = vrot.slane %v2952_v32, 4  ;;  %v3087_v16 = vunpack.c.l.b16 %v2927_v62  ;;  %v3378_v55 = vsel %vm6841_vm15, %v3376_v13, %v3377_v46  ;;  %v2662_v13 = vld [vmem:[#allocation2 + $0x9c] sm:$0xf] }
 0x170   : > { %5571 = vmatmul.msk.bf16.gmra.mxu1 %vm1520_vm11, %v6047_v5  ;;  %v1911_v5 = vld [vmem:[#allocation2 + $0x90] sm:$0xe]  ;;  %v2945_v1 = vor.u32 %v2944_v57, %v2941_v31 }
 0x171   : > { %5726 = vmatmul.msk.bf16.gmra.mxu3 %vm1520_vm11, %v6070_v34  ;;  %v2036_v34 = vrot.slane %v6239_v42, 5  ;;  %v5584_v27 = vrot.slane %v1911_v5, 9  ;;  %3620 = vmatpush.bf16.msra.mxu1 %v6084_v21  ;;  %v6071_v57 = vld [vmem:[#allocation2 + $0x90] sm:$0xff] }
 0x172   : > { %v2212_v19 = vpop.f32.mrf.mxu2  ;;  %v3203_v48 = vpop.f32.mrf.mxu0 }
 0x173   : > { %v7122_v54 = vadd.f32 %v3203_v48, %v2597_v29  ;;  %v2661_v29 = vld [vmem:[#allocation2 + $0x98] sm:$0x1]  ;;  %v2038_v32 = vrot.slane %v2036_v34, 4  ;;  %v3375_v48 = vsel %vm6841_vm15, %v5772_v20, %v3374_v10  ;;  %v2037_v10 = vsel %vm6841_vm15, %v5584_v27, %v2036_v34 }
 0x174   : > { %v2524_v56 = vpop.f32.mrf.mxu3  ;;  %v3493_v24 = vunpack.c.l.b16 %v3375_v48  ;;  %v2946_v20 = vrot.slane %v2945_v1, 4  ;;  %v2966_v48 = vshll.u32 %v2662_v13, 16 }
 0x175   : > { %v2598_v28 = vadd.f32 %v2524_v56, %v2284_v14  ;;  %8184 = vst [vmem:[#allocation13_spill] sm:$0xff] %v7122_v54  ;;  %v1832_v14 = vadd.f32 %v6988_v53, %v6986_v47  ;;  %v3088_v56 = vunpack.c.l.b16 %v2937_v43  ;;  %v7132_v59 = vpop.f32.mrf.mxu1  ;;  %v2955_v47 = vor.u32 %v2954_v58, %v7124_v50 }
 0x176   : > { %v2958_v53 = vshll.u32 %v2661_v29, 16  ;;  %v2040_v46 = vsel %vm6841_vm15, %v2038_v32, %v2039_v25  ;;  %v2963_v29 = vshrl.u32 %v2662_v13, 16  ;;  %v1837_v25 = vadd.f32 %v7018_v30, %v7031_v37 }
 0x177   : > { %5623 = vmatmul.msk.bf16.gmra.mxu2 %vm1520_vm11, %v2114_v15  ;;  %v2285_v42 = vadd.f32 %v2212_v19, %v1832_v14  ;;  %v3494_v15 = vunpack.c.l.b16 %v3378_v55  ;;  %v3109_v43 = vpack.c.b16 %v3088_v56, %v3087_v16  ;;  %v2956_v21 = vrot.slane %v2955_v47, 4  ;;  %v2663_v56 = vld [vmem:[#allocation2 + $0xa0] sm:$0xf] }
 0x178   : > { %v2960_v14 = vrot.slane %v2958_v53, 5  ;;  %v2096_v16 = vunpack.c.l.b16 %v2040_v46  ;;  %v2972_v32 = vshll.u32 %v2663_v56, 16  ;;  %v2976_v55 = vshrl.u32 %v2663_v56, 16  ;;  %v6241_v53 = vld [vmem:[#allocation2 + $0x20] sm:$0x1] }
 0x179   : > { %v3525_v19 = vpack.c.b16 %v3494_v15, %v3493_v24  ;;  %v2965_v1 = vrot.slane %v2963_v29, 4  ;;  %v2968_v47 = vrot.slane %v2966_v48, 5  ;;  %v3384_v30 = vrot.slane %v6241_v53, 5  ;;  %v6242_v15 = vld [vmem:[#allocation2 + $0xa0] sm:$0xf] }
 0x17a   : > { %v2215_v62 = vpop.f32.mrf.mxu2  ;;  %v3206_v5 = vpop.f32.mrf.mxu0  ;;  %v6244_v29 = vld [vmem:[#allocation2 + $0xa4] sm:$0x1] }
 0x17b   : > { %v2286_v54 = vadd.f32 %v2215_v62, %v7001_v38  ;;  %v7144_v58 = vadd.f32 %v3206_v5, %v2598_v28  ;;  %v2095_v38 = vunpack.c.l.b16 %v2037_v10  ;;  %v2961_v28 = vsel %vm6495_vm12, %v2956_v21, %v2960_v14  ;;  %v6243_v5 = vld [vmem:[#allocation2 + $0x1c] sm:$0xf]  ;;  %v2664_v14 = vld [vmem:[#allocation2 + $0xa4] sm:$0x1] }
 0x17c   : > { %v2526_v33 = vpop.f32.mrf.mxu3  ;;  %v3090_v46 = vunpack.c.l.b16 %v2961_v28  ;;  %v2046_v48 = vrot.slane %v6244_v29, 5  ;;  %v2982_v53 = vshll.u32 %v2664_v14, 16 }
 0x17d   : > { %v2599_v31 = vadd.f32 %v2526_v33, %v2285_v42  ;;  %8185 = vst [vmem:[#allocation14_spill] sm:$0xff] %v7144_v58  ;;  %5766 = vmatmul.msk.bf16.gmra.mxu0 %vm1520_vm11, %v3109_v43  ;;  %v7147_v34 = vpop.f32.mrf.mxu1  ;;  %v2951_v33 = vsel %vm6495_vm12, %v2946_v20, %v7124_v50  ;;  %v2115_v24 = vpack.c.b16 %v2096_v16, %v2095_v38  ;;  %v2043_v43 = vrot.slane %v6242_v15, 5  ;;  %v3309_v20 = vld [vmem:[#allocation2 + $0x18] sm:$0xe] }
 0x17e   : > { %v3381_v50 = vrot.slane %v6243_v5, 5  ;;  %v3089_v10 = vunpack.c.l.b16 %v2951_v33  ;;  %v2978_v38 = vrot.slane %v2976_v55, 4  ;;  %v5773_v16 = vrot.slane %v3309_v20, 9 }
 0x17f   : > { %v2984_v14 = vrot.slane %v2982_v53, 5  ;;  %v465_v53 = vld [vmem:[#allocation2 + $0xc0] sm:$0x1] }
 0x180   : > { %5812 = vmatmul.msk.bf16.vlgmr.msra.gmra.mxu1 %vm1520_vm11, %v3525_v19  ;;  %v7160_v19 = vrot.slane %v2972_v32, 5  ;;  %v3383_v56 = vrot.slane %v3381_v50, 4  ;;  %v3382_v28 = vsel %vm6841_vm15, %v5773_v16, %v3381_v50  ;;  %v6194_v32 = vld [vmem:[%s6347_s27 + $0x78] sm:$0xff]   ;;  %v3110_v55 = vpack.c.b16 %v3090_v46, %v3089_v10 }
 0x181   : > { %5727 = vmatmul.msk.bf16.gmra.mxu3 %vm1520_vm11, %v6071_v57  ;;  %v1912_v57 = vld [vmem:[#allocation2 + $0x9c] sm:$0xe]  ;;  %v3495_v15 = vunpack.c.l.b16 %v3382_v28  ;;  %v6178_v5 = vunpack.c.l.bf16 %v6194_v32  ;;  %v2666_v28 = vld [vmem:[#allocation2 + $0xac] sm:$0xf] }
 0x182   : > { %v2217_v27 = vpop.f32.mrf.mxu2  ;;  %v3208_v37 = vpop.f32.mrf.mxu0  ;;  %v5585_v33 = vrot.slane %v1912_v57, 9  ;;  %v6179_v57 = vunpack.c.h.bf16 %v6194_v32  ;;  %v6072_v46 = vld [vmem:[#allocation2 + $0x9c] sm:$0xff] }
 0x183   : > { %v2287_v42 = vadd.f32 %v2217_v27, %v1837_v25  ;;  %v7158_v21 = vadd.f32 %v3208_v37, %v2599_v31  ;;  %v2969_v25 = vor.u32 %v2968_v47, %v2965_v1  ;;  %v3385_v31 = vsel %vm6841_vm15, %v3383_v56, %v3384_v30  ;;  %v2665_v47 = vld [vmem:[#allocation2 + $0xa8] sm:$0xf] }
 0x184   : > { %v2529_v62 = vpop.f32.mrf.mxu3  ;;  %v2979_v37 = vor.u32 %v2978_v38, %v7160_v19  ;;  %v3496_v1 = vunpack.c.l.b16 %v3385_v31  ;;  %v2044_v50 = vsel %vm6841_vm15, %v5585_v33, %v2043_v43  ;;  %v2987_v31 = vshrl.u32 %v2665_v47, 16 }
 0x185   : > { %v2600_v13 = vadd.f32 %v2529_v62, %v2286_v54  ;;  %8186 = vst [vmem:[#allocation15_spill] sm:$0xff] %v7158_v21  ;;  %v7163_v27 = vpop.f32.mrf.mxu1  ;;  %v2045_v54 = vrot.slane %v2043_v43, 4  ;;  %v2970_v21 = vrot.slane %v2969_v25, 4  ;;  %v2990_v32 = vshll.u32 %v2665_v47, 16 }
 0x186   : > { %v2980_v56 = vrot.slane %v2979_v37, 4  ;;  %v2097_v43 = vunpack.c.l.b16 %v2044_v50  ;;  %v466_v37 = vsel %vm6338_vm3, 0, %v465_v53  ;;  %v6249_v53 = vld [vmem:[#allocation2 + $0x28] sm:$0xf] }
 0x187   : > { %5624 = vmatmul.msk.bf16.gmra.mxu2 %vm1520_vm11, %v2115_v24  ;;  %v2047_v30 = vsel %vm6841_vm15, %v2045_v54, %v2046_v48  ;;  %v3526_v48 = vpack.c.b16 %v3496_v1, %v3495_v15  ;;  %v3000_v15 = vshrl.u32 %v2666_v28, 16  ;;  %v6247_v1 = vld [vmem:[#allocation2 + $0x2c] sm:$0x1]  ;;  %467 = vst [vmem:[#allocation2 + $0xc0] sm:$0x1] %v466_v37 }
 0x188   : > { %v2098_v33 = vunpack.c.l.b16 %v2047_v30  ;;  %v3391_v47 = vrot.slane %v6247_v1, 5  ;;  %v3388_v1 = vrot.slane %v6249_v53, 5  ;;  %v1913_v37 = vld [vmem:[#allocation2 + $0xa8] sm:$0xe] }
 0x18a   : > { %v2220_v62 = vpop.f32.mrf.mxu2  ;;  %v3211_v20 = vpop.f32.mrf.mxu0  ;;  %v2116_v30 = vpack.c.b16 %v2098_v33, %v2097_v43 }
 0x18b   : > { %v2288_v24 = vadd.f32 %v2220_v62, %v7050_v52  ;;  %v6245_v52 = vld [vmem:[%s8157_s1] ss:$0 sm:$0xff]  ;;  %v7179_v25 = vadd.f32 %v3211_v20, %v2600_v13  ;;  %v2975_v13 = vsel %vm6495_vm12, %v2970_v21, %v7160_v19  ;;  %v2667_v19 = vld [vmem:[#allocation2 + $0xb0] sm:$0x1] }
 0x18c   : > { %v2531_v29 = vpop.f32.mrf.mxu3  ;;  %v336_v38 = vmul.f32 %v6245_v52, %v6178_v5  ;;  %v337_v16 = vmul.f32 %v6245_v52, %v6179_v57  ;;  %v2985_v57 = vsel %vm6495_vm12, %v2980_v56, %v2984_v14  ;;  %v3006_v58 = vshll.u32 %v2667_v19, 16 }
 0x18d   : > { %v2601_v10 = vadd.f32 %v2531_v29, %v2287_v42  ;;  %8187 = vst [vmem:[#allocation16_spill] sm:$0xff] %v7179_v25  ;;  %5767 = vmatmul.msk.bf16.gmra.mxu0 %vm1520_vm11, %v3110_v55  ;;  %v6246_v42 = vld [vmem:[%s8158_s2] ss:$0 sm:$0xff]  ;;  %v7185_v62 = vpop.f32.mrf.mxu1  ;;  %v2996_v55 = vshll.u32 %v2666_v28, 16  ;;  %v2989_v29 = vrot.slane %v2987_v31, 4  ;;  %v3002_v31 = vrot.slane %v3000_v15, 4 }
 0x18e   : > { %v371_v54 = vadd.f32 %v6246_v42, %v336_v38  ;;  %v372_v5 = vadd.f32 %v6246_v42, %v337_v16  ;;  %v3091_v16 = vunpack.c.l.b16 %v2975_v13  ;;  %v6248_v28 = vld [vmem:[#allocation2 + $0xac] sm:$0xf]  ;;  %v3092_v33 = vunpack.c.l.b16 %v2985_v57  ;;  %v6250_v13 = vld [vmem:[#allocation2 + $0xb0] sm:$0x1] }
 0x18f   : > { %v2050_v42 = vrot.slane %v6248_v28, 5  ;;  %v7197_v56 = vrot.slane %v2996_v55, 5  ;;  %v1845_v57 = vadd.f32 %v7053_v18, %v6906_v40  ;;  %v6107_v18 = vld [vmem:[%s8159_s3 + $0xd8] sm:$0xff] }
 0x190   : > { %5813 = vmatmul.msk.bf16.gmra.mxu1 %vm1520_vm11, %v3526_v48  ;;  %v403_v52 = vmax.f32 %v371_v54, 0.0  ;;  %v404_v25 = vmax.f32 %v372_v5, 0.0  ;;  %v3390_v54 = vrot.slane %v3388_v1, 4  ;;  %3932 = vmatpush.bf16.msra.mxu2 %v6107_v18 }
 0x191   : > { %5728 = vmatmul.msk.bf16.gmra.mxu3 %vm1520_vm11, %v6072_v46  ;;  %v2992_v46 = vrot.slane %v2990_v32, 5  ;;  %v5586_v32 = vrot.slane %v1913_v37, 9 }
 0x192   : > { %v2222_v20 = vpop.f32.mrf.mxu2  ;;  %v3213_v38 = vpop.f32.mrf.mxu0  ;;  %v557_v53 = vpack.c.bf16 %v403_v52, %v403_v52  ;;  %v558_v15 = vpack.c.bf16 %v404_v25, %v404_v25  ;;  %v6073_v25 = vld [vmem:[#allocation2 + $0xa8] sm:$0xff] }
 0x193   : > { %v2289_v50 = vadd.f32 %v2222_v20, %v7061_v6  ;;  %v3310_v6 = vld [vmem:[#allocation2 + $0x24] sm:$0xe]  ;;  %v7199_v43 = vadd.f32 %v3213_v38, %v2601_v10  ;;  %v2053_v20 = vrot.slane %v6250_v13, 5  ;;  %v2993_v28 = vor.u32 %v2992_v46, %v2989_v29 }
 0x194   : > { %v2534_v21 = vpop.f32.mrf.mxu3  ;;  %v5774_v48 = vrot.slane %v3310_v6, 9  ;;  %v3392_v10 = vsel %vm6841_vm15, %v3390_v54, %v3391_v47  ;;  %v3003_v38 = vor.u32 %v3002_v31, %v7197_v56  ;;  %v2051_v29 = vsel %vm6841_vm15, %v5586_v32, %v2050_v42  ;;  %v521_v6 = vld [vmem:[#allocation2 + $0xc8] sm:$0x1]  ;;  %v2668_v32 = vld [vmem:[#allocation2 + $0xb4] sm:$0xf] }
 0x195   : > { %v2602_v14 = vadd.f32 %v2534_v21, %v2288_v24  ;;  %v7202_v5 = vpop.f32.mrf.mxu1  ;;  %v2052_v24 = vrot.slane %v2050_v42, 4  ;;  %v3111_v21 = vpack.c.b16 %v3092_v33, %v3091_v16  ;;  %v3498_v19 = vunpack.c.l.b16 %v3392_v10 }
 0x196   : > { %v3389_v55 = vsel %vm6841_vm15, %v5774_v48, %v3388_v1  ;;  %v817_v37 = vshrl.u32 %v557_v53, 16  ;;  %v820_v1 = vshll.u32 %v557_v53, 16  ;;  %v2994_v54 = vrot.slane %v2993_v28, 4  ;;  %v2669_v53 = vld [vmem:[#allocation2 + $0xb8] sm:$0xf] }
 0x197   : > { %5625 = vmatmul.msk.bf16.gmra.mxu2 %vm1520_vm11, %v2116_v30  ;;  %v3497_v46 = vunpack.c.l.b16 %v3389_v55  ;;  %v3008_v13 = vrot.slane %v3006_v58, 5  ;;  %v2054_v40 = vsel %vm6841_vm15, %v2052_v24, %v2053_v20  ;;  %v825_v16 = vshrl.u32 %v558_v15, 16  ;;  %v989_v58 = vld [vmem:[#allocation2 + $0xc0] sm:$0xf] }
 0x198   : > { %v3004_v33 = vrot.slane %v3003_v38, 4  ;;  %v819_v55 = vrot.slane %v817_v37, 7  ;;  %v2099_v10 = vunpack.c.l.b16 %v2051_v29  ;;  %v828_v28 = vshll.u32 %v558_v15, 16 }
 0x199   : > { %v522_v20 = vsel %vm6363_vm4, 0, %v521_v6  ;;  %v2100_v24 = vunpack.c.l.b16 %v2054_v40  ;;  %v1847_v29 = vadd.f32 %v7066_v60, %v6912_v12  ;;  %v2999_v15 = vsel %vm6495_vm12, %v2994_v54, %v7197_v56 }
 0x19a   : > { %v2225_v30 = vpop.f32.mrf.mxu2  ;;  %v3216_v48 = vpop.f32.mrf.mxu0  ;;  %v823_v38 = vrot.slane %v819_v55, 4  ;;  %523 = vst [vmem:[#allocation2 + $0xc8] sm:$0x1] %v522_v20  ;;  %v3011_v6 = vshrl.u32 %v2668_v32, 16  ;;  %v3024_v40 = vshrl.u32 %v2669_v53, 16  ;;  %v3093_v54 = vunpack.c.l.b16 %v2999_v15 }
 0x19b   : > { %v7213_v52 = vadd.f32 %v2225_v30, %v1845_v57  ;;  %v7220_v42 = vadd.f32 %v3216_v48, %v2602_v14  ;;  %v827_v57 = vrot.slane %v825_v16, 7  ;;  %v3527_v30 = vpack.c.b16 %v3498_v19, %v3497_v46 }
 0x19c   : > { %v2536_v47 = vpop.f32.mrf.mxu3  ;;  %v822_v14 = vor.u32 %v820_v1, %v819_v55  ;;  %v3009_v46 = vsel %vm6495_vm12, %v3004_v33, %v3008_v13  ;;  %v3014_v19 = vshll.u32 %v2668_v32, 16  ;;  %v3020_v1 = vshll.u32 %v2669_v53, 16  ;;  %v6115_v53 = vld [vmem:[%s8159_s3 + $0x118] sm:$0xff] }
 0x19d   : > { %v2603_v31 = vadd.f32 %v2536_v47, %v2289_v50  ;;  %5768 = vmatmul.msk.bf16.gmra.mxu0 %vm1520_vm11, %v3111_v21  ;;  %v6111_v50 = vld [vmem:[%s8159_s3 + $0xf8] sm:$0xff]  ;;  %v7233_v37 = vpop.f32.mrf.mxu1  ;;  %v830_v21 = vor.u32 %v828_v28, %v827_v57  ;;  %v832_v13 = vrot.slane %v827_v57, 4  ;;  %v3094_v9 = vunpack.c.l.b16 %v3009_v46  ;;  %v6253_v28 = vld [vmem:[#allocation2 + $0x34] sm:$0xf] }
 0x19e   : > { %v990_v48 = vsel %vm6412_vm8, %v822_v14, %v989_v58  ;;  %v6251_v47 = vld [vmem:[#allocation2 + $0x38] sm:$0x1]  ;;  %4614 = vmatpush.bf16.msra.mxu3 %v6111_v50  ;;  %v3013_v32 = vrot.slane %v3011_v6, 4  ;;  %v3395_v58 = vrot.slane %v6253_v28, 5  ;;  %v1914_v57 = vld [vmem:[#allocation2 + $0xb4] sm:$0xe]  ;;  %5040 = vmatpush.bf16.msra.mxu0 %v6115_v53 }
 0x19f   : > { %v3398_v12 = vrot.slane %v6251_v47, 5  ;;  %v831_v56 = vsel %vm6404_vm7, %v823_v38, %v830_v21  ;;  %991 = vst [vmem:[#allocation2 + $0xc0] sm:$0xf] %v990_v48  ;;  %v6252_v55 = vld [vmem:[#allocation2 + $0xb8] sm:$0xf]  ;;  %v3026_v14 = vrot.slane %v3024_v40, 4 }
 0x1a0   : > { %5814 = vmatmul.msk.bf16.gmra.mxu1 %vm1520_vm11, %v3527_v30  ;;  %992 = vst.msk [vmem:[#allocation2 + $0xc4] sm:$0xf] %vm405_vm5, %v831_v56  ;;  %v2057_v63 = vrot.slane %v6252_v55, 5  ;;  %v3311_v30 = vld [vmem:[#allocation2 + $0x30] sm:$0xe]  ;;  %v5587_v38 = vrot.slane %v1914_v57, 9  ;;  %v3112_v56 = vpack.c.b16 %v3094_v9, %v3093_v54 }
 0x1a1   : > { %5729 = vmatmul.msk.bf16.gmra.mxu3 %vm1520_vm11, %v6073_v25  ;;  %v2117_v25 = vpack.c.b16 %v2100_v24, %v2099_v10  ;;  %v3016_v10 = vrot.slane %v3014_v19, 5  ;;  %v7248_v24 = vrot.slane %v3020_v1, 5  ;;  %v3397_v15 = vrot.slane %v3395_v58, 4  ;;  %v993_v6 = vld [vmem:[#allocation2 + $0xc8] sm:$0x1] }
 0x1a2   : > { %v2227_v60 = vpop.f32.mrf.mxu2  ;;  %v3218_v16 = vpop.f32.mrf.mxu0  ;;  %v6254_v21 = vld [vmem:[#allocation2 + $0xbc] sm:$0x1]  ;;  %v2059_v47 = vrot.slane %v2057_v63, 4 }
 0x1a3   : > { %v2291_v18 = vadd.f32 %v2227_v60, %v1847_v29  ;;  %v7250_v50 = vadd.f32 %v3218_v16, %v2603_v31  ;;  %v5775_v29 = vrot.slane %v3311_v30, 9  ;;  %v2060_v46 = vrot.slane %v6254_v21, 5  ;;  %v2670_v48 = vld [vmem:[#allocation2 + $0xbc] sm:$0x1]  ;;  %v6255_v21 = vld [vmem:[#allocation2 + $0x44] sm:$0x1] }
 0x1a4   : > { %v2539_v33 = vpop.f32.mrf.mxu3  ;;  %v3399_v1 = vsel %vm6841_vm15, %v3397_v15, %v3398_v12  ;;  %v1850_v60 = vadd.f32 %v7076_v49, %v6910_v61  ;;  %v3017_v40 = vor.u32 %v3016_v10, %v3013_v32  ;;  %v3030_v16 = vshll.u32 %v2670_v48, 16  ;;  %v6074_v61 = vld [vmem:[#allocation2 + $0xb4] sm:$0xff] }
 0x1a5   : > { %v2604_v20 = vadd.f32 %v2539_v33, %v7213_v52  ;;  %v994_v52 = vsel %vm6338_vm3, %v832_v13, %v993_v6  ;;  %v7255_v19 = vpop.f32.mrf.mxu1  ;;  %v3396_v31 = vsel %vm6841_vm15, %v5775_v29, %v3395_v58  ;;  %v2058_v13 = vsel %vm6841_vm15, %v5587_v38, %v2057_v63  ;;  %v6106_v15 = vld [vmem:[%s8159_s3 + $0xd0] sm:$0xff] }
 0x1a6   : > { %995 = vst [vmem:[#allocation2 + $0xc8] sm:$0x1] %v994_v52  ;;  %v2061_v55 = vsel %vm6841_vm15, %v2059_v47, %v2060_v46  ;;  %v3499_v28 = vunpack.c.l.b16 %v3396_v31  ;;  %v3500_v58 = vunpack.c.l.b16 %v3399_v1  ;;  %v3018_v49 = vrot.slane %v3017_v40, 4  ;;  %v2671_v29 = vld [vmem:[#allocation2 + $0xc0] sm:$0xf]  ;;  %3933 = vmatpush.bf16.msra.mxu2 %v6106_v15 }
 0x1a7   : > { %5626 = vmatmul.msk.bf16.gmra.mxu2 %vm1520_vm11, %v2117_v25  ;;  %v3027_v25 = vor.u32 %v3026_v14, %v7248_v24  ;;  %v3032_v32 = vrot.slane %v3030_v16, 5  ;;  %v2101_v10 = vunpack.c.l.b16 %v2058_v13  ;;  %v2102_v14 = vunpack.c.l.b16 %v2061_v55  ;;  %v2672_v38 = vld [vmem:[#allocation2 + $0xc4] sm:$0xf]  ;;  %v7287_v31 = vld [vmem:[#allocation2 + $0x1c] sm:$0xf] }
 0x1a8   : > { %v3528_v63 = vpack.c.b16 %v3500_v58, %v3499_v28  ;;  %v3405_v46 = vrot.slane %v6255_v21, 5  ;;  %v1852_v48 = vadd.f32 %v7091_v51, %v6924_v4  ;;  %v3023_v47 = vsel %vm6495_vm12, %v3018_v49, %v7248_v24  ;;  %v6114_v4 = vld [vmem:[%s8159_s3 + $0x110] sm:$0xff]  ;;  %v6105_v28 = vld [vmem:[%s8159_s3 + $0xc8] sm:$0xff] }
 0x1a9   : > { %v3028_v9 = vrot.slane %v3027_v25, 4  ;;  %v3035_v52 = vshrl.u32 %v2671_v29, 16  ;;  %v2118_v40 = vpack.c.b16 %v2102_v14, %v2101_v10  ;;  %v3044_v25 = vshll.u32 %v2672_v38, 16  ;;  %5041 = vmatpush.bf16.msra.mxu0 %v6114_v4  ;;  %v6109_v58 = vld [vmem:[%s8159_s3 + $0xe8] sm:$0xff] }
 0x1aa   : > { %v2230_v33 = vpop.f32.mrf.mxu2  ;;  %v3221_v12 = vpop.f32.mrf.mxu0  ;;  %v3048_v24 = vshrl.u32 %v2672_v38, 16  ;;  %v4107_v49 = vshll.u32 %v7287_v31, 16  ;;  %3934 = vmatpush.bf16.msra.mxu2 %v6105_v28  ;;  %v6112_v28 = vld [vmem:[%s8159_s3 + $0x100] sm:$0xff] }
 0x1ab   : > { %v2292_v53 = vadd.f32 %v2230_v33, %v1850_v60  ;;  %v7270_v54 = vadd.f32 %v3221_v12, %v2604_v20  ;;  %v4049_v20 = vld [vmem:[#allocation2 + $0x18] sm:$0xf]  ;;  %v3033_v1 = vsel %vm6495_vm12, %v3028_v9, %v3032_v32  ;;  %v6113_v12 = vld [vmem:[%s8159_s3 + $0x108] sm:$0xff]  ;;  %v4111_v9 = vshrl.u32 %v7287_v31, 16 }
 0x1ac   : > { %v2541_v57 = vpop.f32.mrf.mxu3  ;;  %v4098_v16 = vshrl.u32 %v4049_v20, 16  ;;  %v4101_v33 = vshll.u32 %v4049_v20, 16  ;;  %v3095_v32 = vunpack.c.l.b16 %v3023_v47  ;;  %v3096_v10 = vunpack.c.l.b16 %v3033_v1  ;;  %v6108_v20 = vld [vmem:[%s8159_s3 + $0xe0] sm:$0xff] }
 0x1ad   : > { %v7268_v30 = vadd.f32 %v2541_v57, %v2291_v18  ;;  %5769 = vmatmul.msk.bf16.gmra.mxu0 %vm1520_vm11, %v3112_v56  ;;  %v6110_v18 = vld [vmem:[%s8159_s3 + $0xf0] sm:$0xff]  ;;  %v7279_v6 = vpop.f32.mrf.mxu1  ;;  %v3038_v56 = vshll.u32 %v2671_v29, 16  ;;  %v6256_v57 = vld [vmem:[#allocation2 + $0x40] sm:$0xf]  ;;  %v3037_v29 = vrot.slane %v3035_v52, 4  ;;  %v7306_v15 = vrot.slane %v3044_v25, 5 }
 0x1ae   : > { %4615 = vmatpush.bf16.msra.mxu3 %v6110_v18  ;;  %v6104_v18 = vld [vmem:[%s8159_s3 + $0xc0] sm:$0xff]  ;;  %v4100_v47 = vrot.slane %v4098_v16, 4  ;;  %v4103_v52 = vrot.slane %v4101_v33, 5  ;;  %5042 = vmatpush.bf16.msra.mxu0 %v6113_v12  ;;  %v7324_v4 = vrot.slane %v4107_v49, 5 }
 0x1af   : > { %v3040_v38 = vrot.slane %v3038_v56, 5  ;;  %v7328_v16 = vld [vmem:[#allocation2 + $0x20] sm:$0x1]  ;;  %3935 = vmatpush.bf16.msra.mxu2 %v6104_v18 }
 0x1b0   : > { %5815 = vmatmul.msk.bf16.gmra.mxu1 %vm1520_vm11, %v3528_v63  ;;  %v3312_v63 = vld [vmem:[#allocation2 + $0x3c] sm:$0xe] }
 0x1b1   : > { %5730 = vmatmul.msk.bf16.gmra.mxu3 %vm1520_vm11, %v6074_v61  ;;  %v3402_v61 = vrot.slane %v6256_v57, 5  ;;  %v5776_v21 = vrot.slane %v3312_v63, 9  ;;  %v3041_v33 = vor.u32 %v3040_v38, %v3037_v29  ;;  %v6075_v29 = vld [vmem:[#allocation2 + $0xc0] sm:$0xff] }
 0x1b2   : > { %v2232_v60 = vpop.f32.mrf.mxu2  ;;  %v3223_v13 = vpop.f32.mrf.mxu0  ;;  %4616 = vmatpush.bf16.msra.mxu3 %v6109_v58  ;;  %5043 = vmatpush.bf16.msra.mxu0 %v6112_v28 }
 0x1b3   : > { %v2293_v51 = vadd.f32 %v2232_v60, %v1852_v48  ;;  %v3404_v48 = vrot.slane %v3402_v61, 4  ;;  %v7316_v1 = vadd.f32 %v3223_v13, %v7268_v30  ;;  %v3403_v56 = vsel %vm6841_vm15, %v5776_v21, %v3402_v61 }
 0x1b4   : > { %v2544_v55 = vpop.f32.mrf.mxu3  ;;  %v3113_v30 = vpack.c.b16 %v3096_v10, %v3095_v32  ;;  %v3501_v12 = vunpack.c.l.b16 %v3403_v56  ;;  %v4117_v32 = vshll.u32 %v7328_v16, 16  ;;  %v3042_v38 = vrot.slane %v3041_v33, 4  ;;  %v7348_v33 = vld [vmem:[#allocation2 + $0x28] sm:$0xf] }
 0x1b5   : > { %v2606_v14 = vadd.f32 %v2544_v55, %v2292_v53  ;;  %v3050_v53 = vrot.slane %v3048_v24, 4  ;;  %v7318_v60 = vpop.f32.mrf.mxu1  ;;  %v3406_v25 = vsel %vm6841_vm15, %v3404_v48, %v3405_v46  ;;  %v4113_v55 = vrot.slane %v4111_v9, 4  ;;  %v2673_v24 = vld [vmem:[#allocation2 + $0xc8] sm:$0x1] }
 0x1b6   : > { %4617 = vmatpush.bf16.msra.mxu3 %v6108_v20  ;;  %v3502_v57 = vunpack.c.l.b16 %v3406_v25  ;;  %v4119_v56 = vrot.slane %v4117_v32, 5  ;;  %v4052_v25 = vld [vmem:[#allocation2 + $0x24] sm:$0xf] }
 0x1b7   : > { %5627 = vmatmul.msk.bf16.gmra.mxu2 %vm1520_vm11, %v2118_v40  ;;  %v1855_v40 = vadd.f32 %v7109_v44, %v6938_v45  ;;  %v3051_v46 = vor.u32 %v3050_v53, %v7306_v15  ;;  %v3054_v45 = vshll.u32 %v2673_v24, 16  ;;  %v4104_v44 = vor.u32 %v4103_v52, %v4100_v47 }
 0x1b8   : > { %v4114_v9 = vor.u32 %v4113_v55, %v7324_v4  ;;  %v3529_v20 = vpack.c.b16 %v3502_v57, %v3501_v12  ;;  %v1857_v47 = vadd.f32 %v7132_v59, %v6951_v17  ;;  %v6258_v12 = vld [vmem:[#allocation2 + $0x4c] sm:$0xf] }
 0x1b9   : > { %v3052_v18 = vrot.slane %v3051_v46, 4  ;;  %v3056_v21 = vrot.slane %v3054_v45, 5  ;;  %v4105_v48 = vrot.slane %v4104_v44, 4  ;;  %v4125_v45 = vshll.u32 %v4052_v25, 16 }
 0x1ba   : > { %v2235_v13 = vpop.f32.mrf.mxu2  ;;  %v3226_v61 = vpop.f32.mrf.mxu0  ;;  %v4115_v53 = vrot.slane %v4114_v9, 4 }
 0x1bb   : > { %v2294_v58 = vadd.f32 %v2235_v13, %v1855_v40  ;;  %v7336_v63 = vadd.f32 %v3226_v61, %v2606_v14  ;;  %v6257_v14 = vld [vmem:[#allocation2 + $0x50] sm:$0x1]  ;;  %v3047_v40 = vsel %vm6495_vm12, %v3042_v38, %v7306_v15  ;;  %v3057_v17 = vsel %vm6495_vm12, %v3052_v18, %v3056_v21  ;;  %v3313_v61 = vld [vmem:[#allocation2 + $0x48] sm:$0xe] }
 0x1bc   : > { %v2546_v49 = vpop.f32.mrf.mxu3  ;;  %v3412_v55 = vrot.slane %v6257_v14, 5  ;;  %v4110_v28 = vsel %vm6495_vm12, %v4105_v48, %v7324_v4  ;;  %v4120_v46 = vsel %vm6495_vm12, %v4115_v53, %v4119_v56  ;;  %v3409_v15 = vrot.slane %v6258_v12, 5  ;;  %v4731_v53 = vld [vmem:[#allocation2 + $0x18] sm:$0xe] }
 0x1bd   : > { %v2607_v10 = vadd.f32 %v2546_v49, %v2293_v51  ;;  %5770 = vmatmul.msk.bf16.gmra.mxu0 %vm1520_vm11, %v3113_v30  ;;  %v7342_v52 = vpop.f32.mrf.mxu1  ;;  %v6088_v30 = vld [vmem:[#allocation2 + $0x18] sm:$0xff]  ;;  %v4122_v49 = vshrl.u32 %v4052_v25, 16  ;;  %v5777_v9 = vrot.slane %v3313_v61, 9  ;;  %v4135_v38 = vshrl.u32 %v7348_v33, 16 }
 0x1be   : > { %v3411_v32 = vrot.slane %v3409_v15, 4  ;;  %v3097_v18 = vunpack.c.l.b16 %v3047_v40  ;;  %v4490_v21 = vunpack.c.l.b16 %v4110_v28  ;;  %v4491_v48 = vunpack.c.l.b16 %v4120_v46 }
 0x1bf   : > { %v3410_v4 = vsel %vm6841_vm15, %v5777_v9, %v3409_v15  ;;  %v4797_v56 = vrot.slane %v7287_v31, 5  ;;  %v4127_v25 = vrot.slane %v4125_v45, 5  ;;  %v4137_v40 = vrot.slane %v4135_v38, 4  ;;  %v4055_v38 = vld [vmem:[#allocation2 + $0x30] sm:$0xf] }
 0x1c0   : > { %5816 = vmatmul.msk.bf16.gmra.mxu1 %vm1520_vm11, %v3529_v20  ;;  %v3098_v20 = vunpack.c.l.b16 %v3057_v17  ;;  %v4522_v46 = vpack.c.b16 %v4491_v48, %v4490_v21  ;;  %v6089_v48 = vld [vmem:[#allocation2 + $0x24] sm:$0xff] }
 0x1c1   : > { %5731 = vmatmul.msk.bf16.gmra.mxu3 %vm1520_vm11, %v6075_v29  ;;  %v4131_v29 = vshll.u32 %v7348_v33, 16  ;;  %v4799_v61 = vrot.slane %v4797_v56, 4 }
 0x1c2   : > { %v2237_v51 = vpop.f32.mrf.mxu2  ;;  %v3228_v13 = vpop.f32.mrf.mxu0 }
 0x1c3   : > { %v2295_v24 = vadd.f32 %v2237_v51, %v1857_v47  ;;  %v7357_v44 = vadd.f32 %v3228_v13, %v2607_v10  ;;  %v1860_v10 = vadd.f32 %v7147_v34, %v6969_v2  ;;  %v4124_v51 = vrot.slane %v4122_v49, 4 }
 0x1c4   : > { %v2549_v59 = vpop.f32.mrf.mxu3  ;;  %v4133_v14 = vrot.slane %v4131_v29, 5  ;;  %v5972_v34 = vrot.slane %v4731_v53, 9  ;;  %v4800_v49 = vrot.slane %v7328_v16, 5  ;;  %v4146_v53 = vshrl.u32 %v4055_v38, 16 }
 0x1c5   : > { %v2608_v57 = vadd.f32 %v2549_v59, %v2294_v58  ;;  %v3413_v58 = vsel %vm6841_vm15, %v3411_v32, %v3412_v55  ;;  %v7369_v17 = vpop.f32.mrf.mxu1  ;;  %v3503_v59 = vunpack.c.l.b16 %v3410_v4  ;;  %v7371_v55 = vld [vmem:[#allocation2 + $0x2c] sm:$0x1]  ;;  %v4128_v45 = vor.u32 %v4127_v25, %v4124_v51 }
 0x1c6   : > { %v3504_v12 = vunpack.c.l.b16 %v3413_v58  ;;  %v4138_v9 = vor.u32 %v4137_v40, %v4133_v14  ;;  %v4141_v32 = vshll.u32 %v7371_v55, 16  ;;  %v4801_v16 = vsel %vm6841_vm15, %v4799_v61, %v4800_v49 }
 0x1c7   : > { %5916 = vmatmul.msk.bf16.vlgmr.msra.gmra.mxu2 %vm1520_vm11, %v6088_v30  ;;  %v3114_v30 = vpack.c.b16 %v3098_v20, %v3097_v18  ;;  %v1862_v18 = vadd.f32 %v7163_v27, %v6979_v35  ;;  %v4129_v4 = vrot.slane %v4128_v45, 4  ;;  %v4149_v35 = vshll.u32 %v4055_v38, 16  ;;  %v6259_v27 = vld [vmem:[#allocation2 + $0x5c] sm:$0x1] }
 0x1c8   : > { %v3530_v29 = vpack.c.b16 %v3504_v12, %v3503_v59  ;;  %v4139_v58 = vrot.slane %v4138_v9, 4 }
 0x1c9   : > { %v4134_v49 = vsel %vm6495_vm12, %v4129_v4, %v4133_v14  ;;  %v4151_v38 = vrot.slane %v4149_v35, 5  ;;  %v1865_v14 = vadd.f32 %v7185_v62, %v6998_v23  ;;  %v7407_v4 = vld [vmem:[#allocation2 + $0x38] sm:$0x1] }
 0x1ca   : > { %v2240_v47 = vpop.f32.mrf.mxu2  ;;  %v3231_v15 = vpop.f32.mrf.mxu0 }
 0x1cb   : > { %v2296_v13 = vadd.f32 %v2240_v47, %v1860_v10  ;;  %v7373_v31 = vadd.f32 %v3231_v15, %v2608_v57  ;;  %v7383_v57 = vld [vmem:[#allocation2 + $0x34] sm:$0xf]  ;;  %v4143_v10 = vrot.slane %v4141_v32, 5  ;;  %v3419_v47 = vrot.slane %v6259_v27, 5 }
 0x1cc   : > { %v2551_v2 = vpop.f32.mrf.mxu3  ;;  %v4159_v59 = vshrl.u32 %v7383_v57, 16  ;;  %v4917_v15 = vunpack.c.l.b16 %v4801_v16  ;;  %v4492_v16 = vunpack.c.l.b16 %v4134_v49 }
 0x1cd   : > { %v2609_v28 = vadd.f32 %v2551_v2, %v2295_v24  ;;  %5771 = vmatmul.msk.bf16.gmra.mxu0 %vm1520_vm11, %v3114_v30  ;;  %v4798_v24 = vsel %vm6841_vm15, %v5972_v34, %v4797_v56  ;;  %v6260_v56 = vld [vmem:[#allocation2 + $0x58] sm:$0xf]  ;;  %v4155_v30 = vshll.u32 %v7383_v57, 16  ;;  %v7390_v34 = vpop.f32.mrf.mxu1  ;;  %v4144_v45 = vsel %vm6495_vm12, %v4139_v58, %v4143_v10 }
 0x1ce   : > { %v3416_v40 = vrot.slane %v6260_v56, 5  ;;  %v4916_v12 = vunpack.c.l.b16 %v4798_v24  ;;  %v4161_v24 = vrot.slane %v4159_v59, 4 }
 0x1d0   : > { %5817 = vmatmul.msk.bf16.gmra.mxu1 %vm1520_vm11, %v3530_v29  ;;  %v3418_v32 = vrot.slane %v3416_v40, 4  ;;  %v4148_v29 = vrot.slane %v4146_v53, 4  ;;  %v4948_v58 = vpack.c.b16 %v4917_v15, %v4916_v12 }
 0x1d1   : > { %5956 = vmatmul.msk.bf16.vlgmr.msra.gmra.mxu3 %vm1520_vm11, %v4522_v46  ;;  %v3314_v46 = vld [vmem:[#allocation2 + $0x54] sm:$0xe] }
 0x1d2   : > { %v2242_v20 = vpop.f32.mrf.mxu2  ;;  %v3233_v51 = vpop.f32.mrf.mxu0  ;;  %v5778_v9 = vrot.slane %v3314_v46, 9  ;;  %v4152_v56 = vor.u32 %v4151_v38, %v4148_v29  ;;  %v1867_v29 = vadd.f32 %v7202_v5, %v7010_v0  ;;  %v7421_v38 = vld [vmem:[#allocation2 + $0x40] sm:$0xf] }
 0x1d3   : > { %v2297_v21 = vadd.f32 %v2242_v20, %v1862_v18  ;;  %v7392_v61 = vadd.f32 %v3233_v51, %v2609_v28  ;;  %v3420_v18 = vsel %vm6841_vm15, %v3418_v32, %v3419_v47  ;;  %v7403_v28 = vrot.slane %v4155_v30, 5  ;;  %v4732_v47 = vld [vmem:[#allocation2 + $0x24] sm:$0xe] }
 0x1d4   : > { %v2554_v25 = vpop.f32.mrf.mxu3  ;;  %v4493_v20 = vunpack.c.l.b16 %v4144_v45  ;;  %v3506_v27 = vunpack.c.l.b16 %v3420_v18  ;;  %v4165_v30 = vshll.u32 %v7407_v4, 16  ;;  %v5973_v12 = vrot.slane %v4732_v47, 9 }
 0x1d5   : > { %v2610_v2 = vadd.f32 %v2554_v25, %v2296_v13  ;;  %v3417_v13 = vsel %vm6841_vm15, %v5778_v9, %v3416_v40  ;;  %v4162_v40 = vor.u32 %v4161_v24, %v7403_v28  ;;  %v7416_v46 = vpop.f32.mrf.mxu1  ;;  %v4153_v45 = vrot.slane %v4152_v56, 4  ;;  %v6090_v24 = vld [vmem:[#allocation2 + $0x30] sm:$0xff] }
 0x1d6   : > { %v3505_v35 = vunpack.c.l.b16 %v3417_v13  ;;  %v4523_v62 = vpack.c.b16 %v4493_v20, %v4492_v16  ;;  %v4167_v32 = vrot.slane %v4165_v30, 5  ;;  %v6261_v20 = vld [vmem:[#allocation2 + $0x64] sm:$0xf] }
 0x1d7   : > { %5917 = vmatmul.msk.bf16.gmra.mxu2 %vm1520_vm11, %v6089_v48  ;;  %v4804_v48 = vrot.slane %v7348_v33, 5  ;;  %v4807_v33 = vrot.slane %v7371_v55, 5  ;;  %v4163_v9 = vrot.slane %v4162_v40, 4  ;;  %v4158_v0 = vsel %vm6495_vm12, %v4153_v45, %v7403_v28  ;;  %v6262_v40 = vld [vmem:[#allocation2 + $0x68] sm:$0x1] }
 0x1d8   : > { %v3531_v49 = vpack.c.b16 %v3506_v27, %v3505_v35  ;;  %v3315_v35 = vld [vmem:[#allocation2 + $0x60] sm:$0xe]  ;;  %v3426_v30 = vrot.slane %v6262_v40, 5 }
 0x1d9   : > { %v4806_v15 = vrot.slane %v4804_v48, 4  ;;  %v4805_v13 = vsel %vm6841_vm15, %v5973_v12, %v4804_v48  ;;  %v4168_v5 = vsel %vm6495_vm12, %v4163_v9, %v4167_v32  ;;  %v5779_v47 = vrot.slane %v3315_v35, 9  ;;  %v4733_v9 = vld [vmem:[#allocation2 + $0x30] sm:$0xe] }
 0x1da   : > { %v2245_v10 = vpop.f32.mrf.mxu2  ;;  %v3236_v51 = vpop.f32.mrf.mxu0  ;;  %v4918_v28 = vunpack.c.l.b16 %v4805_v13  ;;  %v4495_v45 = vunpack.c.l.b16 %v4168_v5  ;;  %v5974_v35 = vrot.slane %v4733_v9, 9 }
 0x1db   : > { %v2298_v53 = vadd.f32 %v2245_v10, %v1865_v14  ;;  %v7412_v59 = vadd.f32 %v3236_v51, %v2610_v2  ;;  %v4808_v55 = vsel %vm6841_vm15, %v4806_v15, %v4807_v33  ;;  %v4179_v51 = vshll.u32 %v7421_v38, 16 }
 0x1dc   : > { %v2556_v25 = vpop.f32.mrf.mxu3  ;;  %v4919_v12 = vunpack.c.l.b16 %v4808_v55  ;;  %v1870_v15 = vadd.f32 %v7233_v37, %v7023_v11 }
 0x1dd   : > { %v2611_v23 = vadd.f32 %v2556_v25, %v2297_v21  ;;  %6012 = vmatmul.msk.bf16.vlgmr.msra.gmra.mxu0 %vm1520_vm11, %v4948_v58  ;;  %v4058_v21 = vld [vmem:[#allocation2 + $0x3c] sm:$0xf]  ;;  %v3423_v58 = vrot.slane %v6261_v20, 5  ;;  %v7444_v33 = vpop.f32.mrf.mxu1  ;;  %v4181_v13 = vrot.slane %v4179_v51, 5 }
 0x1de   : > { %v4170_v10 = vshrl.u32 %v4058_v21, 16  ;;  %v4173_v27 = vshll.u32 %v4058_v21, 16  ;;  %v4811_v21 = vrot.slane %v7383_v57, 5  ;;  %v4814_v57 = vrot.slane %v7407_v4, 5 }
 0x1df   : > { %v3425_v56 = vrot.slane %v3423_v58, 4 }
 0x1e0   : > { %5818 = vmatmul.msk.bf16.gmra.mxu1 %vm1520_vm11, %v3531_v49  ;;  %v4494_v49 = vunpack.c.l.b16 %v4158_v0  ;;  %v4172_v32 = vrot.slane %v4170_v10, 4  ;;  %v4813_v10 = vrot.slane %v4811_v21, 4 }
 0x1e1   : > { %5957 = vmatmul.msk.bf16.gmra.mxu3 %vm1520_vm11, %v4523_v62  ;;  %v4183_v62 = vshrl.u32 %v7421_v38, 16 }
 0x1e2   : > { %v2247_v2 = vpop.f32.mrf.mxu2  ;;  %v3238_v14 = vpop.f32.mrf.mxu0  ;;  %v4524_v0 = vpack.c.b16 %v4495_v45, %v4494_v49  ;;  %v4815_v4 = vsel %vm6841_vm15, %v4813_v10, %v4814_v57  ;;  %v6264_v57 = vld [vmem:[#allocation2 + $0x74] sm:$0x1] }
 0x1e3   : > { %v2299_v18 = vadd.f32 %v2247_v2, %v1867_v29  ;;  %v7434_v25 = vadd.f32 %v3238_v14, %v2611_v23  ;;  %v3427_v23 = vsel %vm6841_vm15, %v3425_v56, %v3426_v30  ;;  %v4175_v29 = vrot.slane %v4173_v27, 5  ;;  %v4061_v30 = vld [vmem:[#allocation2 + $0x48] sm:$0xf] }
 0x1e4   : > { %v2559_v16 = vpop.f32.mrf.mxu3  ;;  %v4185_v55 = vrot.slane %v4183_v62, 4  ;;  %v3508_v14 = vunpack.c.l.b16 %v3427_v23  ;;  %v1872_v62 = vadd.f32 %v7255_v19, %v7033_v7  ;;  %v6091_v7 = vld [vmem:[#allocation2 + $0x3c] sm:$0xff]  ;;  %v4194_v19 = vshrl.u32 %v4061_v30, 16 }
 0x1e5   : > { %v2612_v48 = vadd.f32 %v2559_v16, %v2298_v53  ;;  %v3424_v53 = vsel %vm6841_vm15, %v5779_v47, %v3423_v58  ;;  %v7447_v16 = vld [vmem:[#allocation2 + $0x44] sm:$0x1]  ;;  %v4176_v5 = vor.u32 %v4175_v29, %v4172_v32  ;;  %v7463_v23 = vpop.f32.mrf.mxu1  ;;  %v4197_v45 = vshll.u32 %v4061_v30, 16 }
 0x1e6   : > { %v3507_v37 = vunpack.c.l.b16 %v3424_v53  ;;  %v4186_v27 = vor.u32 %v4185_v55, %v4181_v13  ;;  %v4189_v51 = vshll.u32 %v7447_v16, 16 }
 0x1e7   : > { %5918 = vmatmul.msk.bf16.gmra.mxu2 %vm1520_vm11, %v6090_v24  ;;  %v4949_v24 = vpack.c.b16 %v4919_v12, %v4918_v28  ;;  %v7459_v28 = vld [vmem:[#allocation2 + $0x4c] sm:$0xf] }
 0x1e8   : > { %v3532_v40 = vpack.c.b16 %v3508_v14, %v3507_v37  ;;  %v4191_v53 = vrot.slane %v4189_v51, 5  ;;  %v4203_v55 = vshll.u32 %v7459_v28, 16  ;;  %v4921_v37 = vunpack.c.l.b16 %v4815_v4  ;;  %v7483_v4 = vld [vmem:[#allocation2 + $0x50] sm:$0x1] }
 0x1e9   : > { %v4196_v51 = vrot.slane %v4194_v19, 4 }
 0x1ea   : > { %v2250_v2 = vpop.f32.mrf.mxu2  ;;  %v3241_v20 = vpop.f32.mrf.mxu0  ;;  %v7479_v30 = vrot.slane %v4203_v55, 5 }
 0x1eb   : > { %v2300_v11 = vadd.f32 %v2250_v2, %v1870_v15  ;;  %v7449_v56 = vadd.f32 %v3241_v20, %v2612_v48  ;;  %v4177_v48 = vrot.slane %v4176_v5, 4  ;;  %v4187_v15 = vrot.slane %v4186_v27, 4 }
 0x1ec   : > { %v2561_v58 = vpop.f32.mrf.mxu3  ;;  %v3433_v27 = vrot.slane %v6264_v57, 5 }
 0x1ed   : > { %v2613_v47 = vadd.f32 %v2561_v58, %v2299_v18  ;;  %6013 = vmatmul.msk.bf16.gmra.mxu0 %vm1520_vm11, %v4949_v24  ;;  %v4812_v18 = vsel %vm6841_vm15, %v5974_v35, %v4811_v21  ;;  %v6263_v21 = vld [vmem:[#allocation2 + $0x70] sm:$0xf]  ;;  %v4207_v24 = vshrl.u32 %v7459_v28, 16  ;;  %v4182_v20 = vsel %vm6495_vm12, %v4177_v48, %v4181_v13  ;;  %v3316_v58 = vld [vmem:[#allocation2 + $0x6c] sm:$0xe] }
 0x1ee   : > { %v4920_v32 = vunpack.c.l.b16 %v4812_v18  ;;  %v3430_v2 = vrot.slane %v6263_v21, 5  ;;  %v5780_v5 = vrot.slane %v3316_v58, 9  ;;  %v4496_v18 = vunpack.c.l.b16 %v4182_v20  ;;  %v4734_v21 = vld [vmem:[#allocation2 + $0x3c] sm:$0xe] }
 0x1f0   : > { %5819 = vmatmul.msk.bf16.gmra.mxu1 %vm1520_vm11, %v3532_v40  ;;  %v3432_v10 = vrot.slane %v3430_v2, 4  ;;  %v4199_v40 = vrot.slane %v4197_v45, 5 }
 0x1f1   : > { %5958 = vmatmul.msk.bf16.gmra.mxu3 %vm1520_vm11, %v4524_v0  ;;  %v4192_v0 = vsel %vm6495_vm12, %v4187_v15, %v4191_v53  ;;  %v4818_v53 = vrot.slane %v7421_v38, 5  ;;  %v5975_v38 = vrot.slane %v4734_v21, 9 }
 0x1f2   : > { %v2252_v12 = vpop.f32.mrf.mxu2  ;;  %v3243_v9 = vpop.f32.mrf.mxu0  ;;  %v3434_v13 = vsel %vm6841_vm15, %v3432_v10, %v3433_v27  ;;  %v4497_v48 = vunpack.c.l.b16 %v4192_v0  ;;  %v1877_v27 = vadd.f32 %v7318_v60, %v6935_v39 }
 0x1f3   : > { %v2301_v49 = vadd.f32 %v2252_v12, %v1872_v62  ;;  %v7470_v35 = vadd.f32 %v3243_v9, %v2613_v47  ;;  %v4209_v47 = vrot.slane %v4207_v24, 4  ;;  %v1875_v62 = vadd.f32 %v7279_v6, %v6918_v22  ;;  %v7488_v6 = vpop.f32.mrf.mxu1 }
 0x1f4   : > { %v2564_v29 = vpop.f32.mrf.mxu3  ;;  %v4950_v12 = vpack.c.b16 %v4921_v37, %v4920_v32  ;;  %v3510_v45 = vunpack.c.l.b16 %v3434_v13  ;;  %v4213_v24 = vshll.u32 %v7483_v4, 16  ;;  %v4525_v20 = vpack.c.b16 %v4497_v48, %v4496_v18  ;;  %v6092_v13 = vld [vmem:[#allocation2 + $0x48] sm:$0xff]  ;;  %v6265_v18 = vld [vmem:[#allocation2 + $0x7c] sm:$0xf] }
 0x1f5   : > { %v2614_v14 = vadd.f32 %v2564_v29, %v2300_v11  ;;  %v3431_v11 = vsel %vm6841_vm15, %v5780_v5, %v3430_v2  ;;  %v4200_v2 = vor.u32 %v4199_v40, %v4196_v51  ;;  %v4210_v55 = vor.u32 %v4209_v47, %v7479_v30  ;;  %v7497_v40 = vld [vmem:[#allocation2 + $0x58] sm:$0xf] }
 0x1f6   : > { %v3509_v19 = vunpack.c.l.b16 %v3431_v11  ;;  %v4820_v32 = vrot.slane %v4818_v53, 4  ;;  %v4821_v37 = vrot.slane %v7447_v16, 5  ;;  %v4215_v57 = vrot.slane %v4213_v24, 5 }
 0x1f7   : > { %5919 = vmatmul.msk.bf16.gmra.mxu2 %vm1520_vm11, %v6091_v7  ;;  %v4201_v5 = vrot.slane %v4200_v2, 4  ;;  %v4211_v10 = vrot.slane %v4210_v55, 4  ;;  %v3437_v48 = vrot.slane %v6265_v18, 5  ;;  %v6266_v2 = vld [vmem:[#allocation2 + $0x80] sm:$0x1]  ;;  %v4231_v24 = vshrl.u32 %v7497_v40, 16 }
 0x1f8   : > { %v3533_v0 = vpack.c.b16 %v3510_v45, %v3509_v19  ;;  %v4822_v11 = vsel %vm6841_vm15, %v4820_v32, %v4821_v37  ;;  %v4227_v45 = vshll.u32 %v7497_v40, 16  ;;  %v3440_v55 = vrot.slane %v6266_v2, 5  ;;  %v8188_v32 = vld [vmem:[#allocation3_spill] sm:$0xff] }
 0x1f9   : > { %v4206_v39 = vsel %vm6495_vm12, %v4201_v5, %v7479_v30  ;;  %v4216_v60 = vsel %vm6495_vm12, %v4211_v10, %v4215_v57  ;;  %v3439_v21 = vrot.slane %v3437_v48, 4  ;;  %v4735_v10 = vld [vmem:[#allocation2 + $0x48] sm:$0xe]  ;;  %v7523_v18 = vld [vmem:[#allocation2 + $0x5c] sm:$0x1] }
 0x1fa   : > { %v2255_v15 = vpop.f32.mrf.mxu2  ;;  %v3246_v9 = vpop.f32.mrf.mxu0  ;;  %v4499_v5 = vunpack.c.l.b16 %v4216_v60 }
 0x1fb   : > { %v2302_v7 = vadd.f32 %v2255_v15, %v1875_v62  ;;  %v7490_v58 = vadd.f32 %v3246_v9, %v2614_v14  ;;  %v4819_v14 = vsel %vm6841_vm15, %v5975_v38, %v4818_v53  ;;  %v3317_v53 = vld [vmem:[#allocation2 + $0x78] sm:$0xe]  ;;  %v7513_v38 = vpop.f32.mrf.mxu1 }
 0x1fc   : > { %v2566_v29 = vpop.f32.mrf.mxu3  ;;  %v4922_v30 = vunpack.c.l.b16 %v4819_v14  ;;  %v4229_v14 = vrot.slane %v4227_v45, 5  ;;  %v4237_v45 = vshll.u32 %v7523_v18, 16 }
 0x1fd   : > { %v2615_v22 = vadd.f32 %v2566_v29, %v2301_v49  ;;  %6014 = vmatmul.msk.bf16.gmra.mxu0 %vm1520_vm11, %v4950_v12  ;;  %v4064_v49 = vld [vmem:[#allocation2 + $0x54] sm:$0xf]  ;;  %v5781_v29 = vrot.slane %v3317_v53, 9 }
 0x1fe   : > { %v4218_v12 = vshrl.u32 %v4064_v49, 16  ;;  %v4221_v19 = vshll.u32 %v4064_v49, 16  ;;  %v4825_v49 = vrot.slane %v7459_v28, 5  ;;  %v4828_v28 = vrot.slane %v7483_v4, 5 }
 0x1ff   : > { %v3438_v37 = vsel %vm6841_vm15, %v5781_v29, %v3437_v48  ;;  %v5976_v29 = vrot.slane %v4735_v10, 9 }
 0x200   : > { %5820 = vmatmul.msk.bf16.gmra.mxu1 %vm1520_vm11, %v3533_v0  ;;  %v4498_v0 = vunpack.c.l.b16 %v4206_v39  ;;  %v4220_v57 = vrot.slane %v4218_v12, 4  ;;  %v4827_v12 = vrot.slane %v4825_v49, 4 }
 0x201   : > { %5959 = vmatmul.msk.bf16.gmra.mxu3 %vm1520_vm11, %v4525_v20  ;;  %v4923_v20 = vunpack.c.l.b16 %v4822_v11  ;;  %v4233_v11 = vrot.slane %v4231_v24, 4  ;;  %v4067_v24 = vld [vmem:[#allocation2 + $0x60] sm:$0xf] }
 0x202   : > { %v2257_v51 = vpop.f32.mrf.mxu2  ;;  %v3248_v47 = vpop.f32.mrf.mxu0  ;;  %v4526_v39 = vpack.c.b16 %v4499_v5, %v4498_v0  ;;  %v4829_v4 = vsel %vm6841_vm15, %v4827_v12, %v4828_v28  ;;  %v4239_v0 = vrot.slane %v4237_v45, 5  ;;  %v4242_v10 = vshrl.u32 %v4067_v24, 16  ;;  %v6268_v45 = vld [vmem:[#allocation2 + $0x8c] sm:$0x1] }
 0x203   : > { %v2303_v16 = vadd.f32 %v2257_v51, %v1877_v27  ;;  %v7510_v9 = vadd.f32 %v3248_v47, %v2615_v22  ;;  %v3441_v22 = vsel %vm6841_vm15, %v3439_v21, %v3440_v55  ;;  %v4223_v27 = vrot.slane %v4221_v19, 5 }
 0x204   : > { %v2569_v62 = vpop.f32.mrf.mxu3  ;;  %v4234_v19 = vor.u32 %v4233_v11, %v4229_v14 }
 0x205   : > { %v2616_v15 = vadd.f32 %v2569_v62, %v2302_v7  ;;  %v1880_v7 = vadd.f32 %v7342_v52, %v8188_v32  ;;  %v3511_v62 = vunpack.c.l.b16 %v3438_v37  ;;  %v3512_v52 = vunpack.c.l.b16 %v3441_v22  ;;  %v7532_v32 = vpop.f32.mrf.mxu1 }
 0x206   : > { %v4224_v60 = vor.u32 %v4223_v27, %v4220_v57  ;;  %v4235_v22 = vrot.slane %v4234_v19, 4  ;;  %v4245_v57 = vshll.u32 %v4067_v24, 16  ;;  %v4244_v24 = vrot.slane %v4242_v10, 4 }
 0x207   : > { %5920 = vmatmul.msk.bf16.gmra.mxu2 %vm1520_vm11, %v6092_v13  ;;  %v4951_v13 = vpack.c.b16 %v4923_v20, %v4922_v30  ;;  %v3534_v55 = vpack.c.b16 %v3512_v52, %v3511_v62  ;;  %v8189_v30 = vld [vmem:[#allocation4_spill] sm:$0xff] }
 0x208   : > { %v1882_v20 = vadd.f32 %v7369_v17, %v8189_v30  ;;  %v6093_v17 = vld [vmem:[#allocation2 + $0x54] sm:$0xff]  ;;  %v4240_v12 = vsel %vm6495_vm12, %v4235_v22, %v4239_v0  ;;  %v4247_v30 = vrot.slane %v4245_v57, 5  ;;  %v7559_v22 = vld [vmem:[#allocation2 + $0x68] sm:$0x1]  ;;  %v4832_v57 = vrot.slane %v7497_v40, 5 }
 0x209   : > { %v4835_v40 = vrot.slane %v7523_v18, 5 }
 0x20a   : > { %v2260_v51 = vpop.f32.mrf.mxu2  ;;  %v3251_v48 = vpop.f32.mrf.mxu0 }
 0x20b   : > { %v2304_v47 = vadd.f32 %v2260_v51, %v1880_v7  ;;  %v7525_v2 = vadd.f32 %v3251_v48, %v2616_v15  ;;  %v4225_v15 = vrot.slane %v4224_v60, 4  ;;  %v7537_v7 = vld [vmem:[#allocation2 + $0x64] sm:$0xf]  ;;  %v4925_v48 = vunpack.c.l.b16 %v4829_v4 }
 0x20c   : > { %v2571_v53 = vpop.f32.mrf.mxu3  ;;  %v4251_v62 = vshll.u32 %v7537_v7, 16  ;;  %v4255_v52 = vshrl.u32 %v7537_v7, 16 }
 0x20d   : > { %v2617_v21 = vadd.f32 %v2571_v53, %v2303_v16  ;;  %6015 = vmatmul.msk.bf16.gmra.mxu0 %vm1520_vm11, %v4951_v13  ;;  %v4826_v16 = vsel %vm6841_vm15, %v5976_v29, %v4825_v49  ;;  %v6267_v13 = vld [vmem:[#allocation2 + $0x88] sm:$0xf]  ;;  %v4230_v29 = vsel %vm6495_vm12, %v4225_v15, %v4229_v14  ;;  %v7561_v10 = vpop.f32.mrf.mxu1 }
 0x20e   : > { %v4924_v51 = vunpack.c.l.b16 %v4826_v16  ;;  %v3444_v49 = vrot.slane %v6267_v13, 5  ;;  %v8190_v16 = vld [vmem:[#allocation5_spill] sm:$0xff]  ;;  %v4500_v4 = vunpack.c.l.b16 %v4230_v29 }
 0x20f   : > { %v1885_v15 = vadd.f32 %v7390_v34, %v8190_v16  ;;  %v4261_v34 = vshll.u32 %v7559_v22, 16  ;;  %v8191_v16 = vld [vmem:[#allocation6_spill] sm:$0xff] }
 0x210   : > { %5821 = vmatmul.msk.bf16.gmra.mxu1 %vm1520_vm11, %v3534_v55  ;;  %v3446_v19 = vrot.slane %v3444_v49, 4  ;;  %v3447_v55 = vrot.slane %v6268_v45, 5  ;;  %v4952_v0 = vpack.c.b16 %v4925_v48, %v4924_v51  ;;  %v4834_v48 = vrot.slane %v4832_v57, 4 }
 0x211   : > { %5960 = vmatmul.msk.bf16.gmra.mxu3 %vm1520_vm11, %v4526_v39  ;;  %v3318_v39 = vld [vmem:[#allocation2 + $0x84] sm:$0xe] }
 0x212   : > { %v2262_v37 = vpop.f32.mrf.mxu2  ;;  %v3253_v27 = vpop.f32.mrf.mxu0  ;;  %v5782_v28 = vrot.slane %v3318_v39, 9  ;;  %v3448_v14 = vsel %vm6841_vm15, %v3446_v19, %v3447_v55  ;;  %v4736_v39 = vld [vmem:[#allocation2 + $0x54] sm:$0xe] }
 0x213   : > { %v2305_v5 = vadd.f32 %v2262_v37, %v1882_v20  ;;  %v7546_v60 = vadd.f32 %v3253_v27, %v2617_v21  ;;  %v7555_v20 = vrot.slane %v4251_v62, 5  ;;  %v4257_v21 = vrot.slane %v4255_v52, 4 }
 0x214   : > { %v2574_v11 = vpop.f32.mrf.mxu3  ;;  %v4501_v37 = vunpack.c.l.b16 %v4240_v12  ;;  %v3514_v13 = vunpack.c.l.b16 %v3448_v14  ;;  %v4248_v52 = vor.u32 %v4247_v30, %v4244_v24  ;;  %v5977_v51 = vrot.slane %v4736_v39, 9  ;;  %v4070_v30 = vld [vmem:[#allocation2 + $0x6c] sm:$0xf]  ;;  %v3319_v39 = vld [vmem:[#allocation2 + $0x90] sm:$0xe] }
 0x215   : > { %v2618_v53 = vadd.f32 %v2574_v11, %v2304_v47  ;;  %v3445_v47 = vsel %vm6841_vm15, %v5782_v28, %v3444_v49  ;;  %v4258_v28 = vor.u32 %v4257_v21, %v7555_v20  ;;  %v4263_v14 = vrot.slane %v4261_v34, 5  ;;  %v7573_v21 = vld [vmem:[#allocation2 + $0x70] sm:$0xf] }
 0x216   : > { %v3513_v11 = vunpack.c.l.b16 %v3445_v47  ;;  %v4527_v12 = vpack.c.b16 %v4501_v37, %v4500_v4  ;;  %v4249_v55 = vrot.slane %v4248_v52, 4  ;;  %v1887_v24 = vadd.f32 %v7416_v46, %v8191_v16  ;;  %v6094_v4 = vld [vmem:[#allocation2 + $0x60] sm:$0xff] }
 0x217   : > { %5921 = vmatmul.msk.bf16.gmra.mxu2 %vm1520_vm11, %v6093_v17  ;;  %v4259_v47 = vrot.slane %v4258_v28, 4  ;;  %v4269_v52 = vshll.u32 %v4070_v30, 16  ;;  %v4275_v28 = vshll.u32 %v7573_v21, 16 }
 0x218   : > { %v3535_v45 = vpack.c.b16 %v3514_v13, %v3513_v11  ;;  %v4254_v46 = vsel %vm6495_vm12, %v4249_v55, %v7555_v20  ;;  %v6269_v11 = vld [vmem:[#allocation2 + $0x94] sm:$0xf]  ;;  %v4279_v20 = vshrl.u32 %v7573_v21, 16 }
 0x219   : > { %v3451_v13 = vrot.slane %v6269_v11, 5  ;;  %v4502_v16 = vunpack.c.l.b16 %v4254_v46 }
 0x21a   : > { %v2265_v17 = vpop.f32.mrf.mxu2  ;;  %v3256_v49 = vpop.f32.mrf.mxu0  ;;  %v4281_v11 = vrot.slane %v4279_v20, 4 }
 0x21b   : > { %v2306_v27 = vadd.f32 %v2265_v17, %v1885_v15  ;;  %v7566_v19 = vadd.f32 %v3256_v49, %v2618_v53  ;;  %v4833_v53 = vsel %vm6841_vm15, %v5977_v51, %v4832_v57  ;;  %v4836_v15 = vsel %vm6841_vm15, %v4834_v48, %v4835_v40  ;;  %v7585_v57 = vpop.f32.mrf.mxu1  ;;  %v6270_v48 = vld [vmem:[#allocation2 + $0x98] sm:$0x1] }
 0x21c   : > { %v2576_v62 = vpop.f32.mrf.mxu3  ;;  %v4264_v17 = vsel %vm6495_vm12, %v4259_v47, %v4263_v14  ;;  %v4266_v49 = vshrl.u32 %v4070_v30, 16  ;;  %v3453_v51 = vrot.slane %v3451_v13, 4  ;;  %v3454_v40 = vrot.slane %v6270_v48, 5  ;;  %v8193_v47 = vld [vmem:[#allocation7_spill] sm:$0xff]  ;;  %v4737_v30 = vld [vmem:[#allocation2 + $0x60] sm:$0xe] }
 0x21d   : > { %v2619_v29 = vadd.f32 %v2576_v62, %v2305_v5  ;;  %6016 = vmatmul.msk.bf16.gmra.mxu0 %vm1520_vm11, %v4952_v0  ;;  %v4927_v55 = vunpack.c.l.b16 %v4836_v15  ;;  %v1890_v14 = vadd.f32 %v7444_v33, %v8193_v47  ;;  %v4277_v15 = vrot.slane %v4275_v28, 5  ;;  %v7599_v47 = vld [vmem:[#allocation2 + $0x74] sm:$0x1] }
 0x21e   : > { %v4285_v28 = vshll.u32 %v7599_v47, 16 }
 0x220   : > { %5822 = vmatmul.msk.bf16.gmra.mxu1 %vm1520_vm11, %v3535_v45  ;;  %v4926_v45 = vunpack.c.l.b16 %v4833_v53 }
 0x221   : > { %5961 = vmatmul.msk.bf16.gmra.mxu3 %vm1520_vm11, %v4527_v12  ;;  %v5783_v12 = vrot.slane %v3319_v39, 9 }
 0x222   : > { %v2267_v5 = vpop.f32.mrf.mxu2  ;;  %v3258_v37 = vpop.f32.mrf.mxu0 }
 0x223   : > { %v2307_v18 = vadd.f32 %v2267_v5, %v1887_v24  ;;  %v7588_v34 = vadd.f32 %v3258_v37, %v2619_v29  ;;  %v3455_v29 = vsel %vm6841_vm15, %v3453_v51, %v3454_v40  ;;  %v4503_v24 = vunpack.c.l.b16 %v4264_v17  ;;  %v7606_v20 = vpop.f32.mrf.mxu1 }
 0x224   : > { %v2579_v0 = vpop.f32.mrf.mxu3  ;;  %v4268_v5 = vrot.slane %v4266_v49, 4  ;;  %v4271_v37 = vrot.slane %v4269_v52, 5  ;;  %v3516_v33 = vunpack.c.l.b16 %v3455_v29  ;;  %v4282_v52 = vor.u32 %v4281_v11, %v4277_v15  ;;  %v7613_v29 = vld [vmem:[#allocation2 + $0x7c] sm:$0xf] }
 0x225   : > { %v2620_v62 = vadd.f32 %v2579_v0, %v2306_v27  ;;  %8192 = vst [vmem:[#allocation3_spill] sm:$0xff] %v7588_v34  ;;  %v3452_v27 = vsel %vm6841_vm15, %v5783_v12, %v3451_v13  ;;  %v4839_v0 = vrot.slane %v7537_v7, 5  ;;  %v5978_v34 = vrot.slane %v4737_v30, 9 }
 0x226   : > { %v3515_v48 = vunpack.c.l.b16 %v3452_v27  ;;  %v4528_v46 = vpack.c.b16 %v4503_v24, %v4502_v16  ;;  %v4272_v17 = vor.u32 %v4271_v37, %v4268_v5  ;;  %v4842_v7 = vrot.slane %v7559_v22, 5  ;;  %v6095_v37 = vld [vmem:[#allocation2 + $0x6c] sm:$0xff] }
 0x227   : > { %5922 = vmatmul.msk.bf16.gmra.mxu2 %vm1520_vm11, %v6094_v4  ;;  %v4953_v4 = vpack.c.b16 %v4927_v55, %v4926_v45  ;;  %v4841_v49 = vrot.slane %v4839_v0, 4  ;;  %v4073_v55 = vld [vmem:[#allocation2 + $0x78] sm:$0xf]  ;;  %v4283_v24 = vrot.slane %v4282_v52, 4  ;;  %v4287_v30 = vrot.slane %v4285_v28, 5 }
 0x228   : > { %v3536_v45 = vpack.c.b16 %v3516_v33, %v3515_v48  ;;  %v6271_v33 = vld [vmem:[#allocation2 + $0xa0] sm:$0xf] }
 0x229   : > { %v4843_v22 = vsel %vm6841_vm15, %v4841_v49, %v4842_v7  ;;  %v3320_v49 = vld [vmem:[#allocation2 + $0x9c] sm:$0xe]  ;;  %v4288_v52 = vsel %vm6495_vm12, %v4283_v24, %v4287_v30 }
 0x22a   : > { %v2270_v53 = vpop.f32.mrf.mxu2  ;;  %v3261_v13 = vpop.f32.mrf.mxu0  ;;  %v5784_v28 = vrot.slane %v3320_v49, 9 }
 0x22b   : > { %v2308_v39 = vadd.f32 %v2270_v53, %v1890_v14  ;;  %v7601_v40 = vadd.f32 %v3261_v13, %v2620_v62  ;;  %v8194_v14 = vld [vmem:[#allocation8_spill] sm:$0xff]  ;;  %v4273_v62 = vrot.slane %v4272_v17, 4  ;;  %v4290_v53 = vshrl.u32 %v4073_v55, 16  ;;  %v7635_v24 = vpop.f32.mrf.mxu1 }
 0x22c   : > { %v2581_v12 = vpop.f32.mrf.mxu3  ;;  %v1892_v27 = vadd.f32 %v7463_v23, %v8194_v14  ;;  %v4293_v23 = vshll.u32 %v4073_v55, 16  ;;  %v4303_v13 = vshrl.u32 %v7613_v29, 16  ;;  %v6272_v55 = vld [vmem:[#allocation2 + $0xa4] sm:$0x1] }
 0x22d   : > { %v2621_v51 = vadd.f32 %v2581_v12, %v2307_v18  ;;  %6017 = vmatmul.msk.bf16.gmra.mxu0 %vm1520_vm11, %v4953_v4  ;;  %v4840_v18 = vsel %vm6841_vm15, %v5978_v34, %v4839_v0  ;;  %v3458_v34 = vrot.slane %v6271_v33, 5  ;;  %v4299_v0 = vshll.u32 %v7613_v29, 16 }
 0x22e   : > { %v4928_v4 = vunpack.c.l.b16 %v4840_v18  ;;  %v4929_v12 = vunpack.c.l.b16 %v4843_v22  ;;  %v4278_v17 = vsel %vm6495_vm12, %v4273_v62, %v4277_v15  ;;  %v3461_v14 = vrot.slane %v6272_v55, 5  ;;  %v8196_v22 = vld [vmem:[#allocation9_spill] sm:$0xff] }
 0x22f   : > { %v4295_v18 = vrot.slane %v4293_v23, 5  ;;  %v7631_v62 = vrot.slane %v4299_v0, 5  ;;  %v4504_v30 = vunpack.c.l.b16 %v4278_v17  ;;  %v4846_v23 = vrot.slane %v7573_v21, 5 }
 0x230   : > { %5823 = vmatmul.msk.bf16.gmra.mxu1 %vm1520_vm11, %v3536_v45  ;;  %v3460_v45 = vrot.slane %v3458_v34, 4  ;;  %v4849_v21 = vrot.slane %v7599_v47, 5 }
 0x231   : > { %5962 = vmatmul.msk.bf16.gmra.mxu3 %vm1520_vm11, %v4528_v46 }
 0x232   : > { %v2272_v16 = vpop.f32.mrf.mxu2  ;;  %v3263_v11 = vpop.f32.mrf.mxu0  ;;  %v3462_v15 = vsel %vm6841_vm15, %v3460_v45, %v3461_v14  ;;  %v4738_v45 = vld [vmem:[#allocation2 + $0x6c] sm:$0xe] }
 0x233   : > { %v2309_v5 = vadd.f32 %v2272_v16, %v1892_v27  ;;  %v7622_v7 = vadd.f32 %v3263_v11, %v2621_v51  ;;  %v4292_v27 = vrot.slane %v4290_v53, 4  ;;  %v4305_v51 = vrot.slane %v4303_v13, 4 }
 0x234   : > { %v2584_v48 = vpop.f32.mrf.mxu3  ;;  %v1895_v16 = vadd.f32 %v7488_v6, %v8196_v22  ;;  %v4505_v11 = vunpack.c.l.b16 %v4288_v52  ;;  %v3518_v49 = vunpack.c.l.b16 %v3462_v15 }
 0x235   : > { %v2622_v46 = vadd.f32 %v2584_v48, %v2308_v39  ;;  %8195 = vst [vmem:[#allocation4_spill] sm:$0xff] %v7622_v7  ;;  %v3459_v39 = vsel %vm6841_vm15, %v5784_v28, %v3458_v34  ;;  %v7637_v48 = vld [vmem:[#allocation2 + $0x80] sm:$0x1]  ;;  %v4296_v13 = vor.u32 %v4295_v18, %v4292_v27  ;;  %v4306_v55 = vor.u32 %v4305_v51, %v7631_v62  ;;  %v4076_v18 = vld [vmem:[#allocation2 + $0x84] sm:$0xf] }
 0x236   : > { %v3517_v34 = vunpack.c.l.b16 %v3459_v39  ;;  %v4309_v6 = vshll.u32 %v7637_v48, 16  ;;  %v4529_v17 = vpack.c.b16 %v4505_v11, %v4504_v30  ;;  %v7649_v51 = vld [vmem:[#allocation2 + $0x88] sm:$0xf] }
 0x237   : > { %5923 = vmatmul.msk.bf16.gmra.mxu2 %vm1520_vm11, %v6095_v37  ;;  %v4954_v37 = vpack.c.b16 %v4929_v12, %v4928_v4  ;;  %v5979_v4 = vrot.slane %v4738_v45, 9  ;;  %v4848_v12 = vrot.slane %v4846_v23, 4  ;;  %v4297_v15 = vrot.slane %v4296_v13, 4 }
 0x238   : > { %v3537_v39 = vpack.c.b16 %v3518_v49, %v3517_v34  ;;  %v4307_v22 = vrot.slane %v4306_v55, 4  ;;  %v4314_v13 = vshrl.u32 %v4076_v18, 16  ;;  %v3321_v55 = vld [vmem:[#allocation2 + $0xa8] sm:$0xe] }
 0x239   : > { %v4847_v30 = vsel %vm6841_vm15, %v5979_v4, %v4846_v23  ;;  %v4850_v47 = vsel %vm6841_vm15, %v4848_v12, %v4849_v21  ;;  %v4302_v49 = vsel %vm6495_vm12, %v4297_v15, %v7631_v62  ;;  %v5785_v12 = vrot.slane %v3321_v55, 9 }
 0x23a   : > { %v2275_v53 = vpop.f32.mrf.mxu2  ;;  %v3266_v28 = vpop.f32.mrf.mxu0  ;;  %v4930_v62 = vunpack.c.l.b16 %v4847_v30  ;;  %v4931_v15 = vunpack.c.l.b16 %v4850_v47  ;;  %v7672_v30 = vld [vmem:[#allocation2 + $0x8c] sm:$0x1] }
 0x23b   : > { %v2310_v33 = vadd.f32 %v2275_v53, %v1895_v16  ;;  %v7642_v52 = vadd.f32 %v3266_v28, %v2622_v46  ;;  %v4311_v16 = vrot.slane %v4309_v6, 5  ;;  %v8198_v53 = vld [vmem:[#allocation10_spill] sm:$0xff]  ;;  %v7651_v46 = vpop.f32.mrf.mxu1  ;;  %v4317_v6 = vshll.u32 %v4076_v18, 16 }
 0x23c   : > { %v2586_v0 = vpop.f32.mrf.mxu3  ;;  %v1897_v27 = vadd.f32 %v7513_v38, %v8198_v53  ;;  %v4955_v55 = vpack.c.b16 %v4931_v15, %v4930_v62  ;;  %v4856_v15 = vrot.slane %v7637_v48, 5 }
 0x23d   : > { %v2623_v14 = vadd.f32 %v2586_v0, %v2309_v5  ;;  %8197 = vst [vmem:[#allocation5_spill] sm:$0xff] %v7642_v52  ;;  %6018 = vmatmul.msk.bf16.gmra.mxu0 %vm1520_vm11, %v4954_v37  ;;  %v6096_v37 = vld [vmem:[#allocation2 + $0x78] sm:$0xff]  ;;  %v4312_v28 = vsel %vm6495_vm12, %v4307_v22, %v4311_v16  ;;  %v6273_v0 = vld [vmem:[#allocation2 + $0xac] sm:$0xf]  ;;  %v4506_v16 = vunpack.c.l.b16 %v4302_v49 }
 0x23e   : > { %v3465_v45 = vrot.slane %v6273_v0, 5  ;;  %v4507_v18 = vunpack.c.l.b16 %v4312_v28  ;;  %v4739_v52 = vld [vmem:[#allocation2 + $0x78] sm:$0xe] }
 0x240   : > { %5824 = vmatmul.msk.bf16.gmra.mxu1 %vm1520_vm11, %v3537_v39  ;;  %v3467_v21 = vrot.slane %v3465_v45, 4  ;;  %v6274_v39 = vld [vmem:[#allocation2 + $0xb0] sm:$0x1]  ;;  %v3466_v22 = vsel %vm6841_vm15, %v5785_v12, %v3465_v45  ;;  %v4853_v45 = vrot.slane %v7613_v29, 5  ;;  %v4530_v49 = vpack.c.b16 %v4507_v18, %v4506_v16 }
 0x241   : > { %5963 = vmatmul.msk.bf16.gmra.mxu3 %vm1520_vm11, %v4529_v17  ;;  %v4323_v17 = vshll.u32 %v7649_v51, 16  ;;  %v3468_v53 = vrot.slane %v6274_v39, 5  ;;  %v3519_v39 = vunpack.c.l.b16 %v3466_v22  ;;  %v4079_v22 = vld [vmem:[#allocation2 + $0x90] sm:$0xf]  ;;  %v3702_v18 = vadd.f32 %v7532_v32, %v7073_v36 }
 0x242   : > { %v2277_v5 = vpop.f32.mrf.mxu2  ;;  %v3268_v34 = vpop.f32.mrf.mxu0  ;;  %v4855_v62 = vrot.slane %v4853_v45, 4  ;;  %v4341_v48 = vshll.u32 %v4079_v22, 16 }
 0x243   : > { %v2311_v11 = vadd.f32 %v2277_v5, %v1897_v27  ;;  %v7664_v4 = vadd.f32 %v3268_v34, %v2623_v14  ;;  %v4327_v27 = vshrl.u32 %v7649_v51, 16  ;;  %v4316_v14 = vrot.slane %v4314_v13, 4  ;;  %v7675_v12 = vpop.f32.mrf.mxu1 }
 0x244   : > { %v2589_v38 = vpop.f32.mrf.mxu3  ;;  %v4319_v5 = vrot.slane %v4317_v6, 5 }
 0x245   : > { %v2624_v23 = vadd.f32 %v2589_v38, %v2310_v33  ;;  %8199 = vst [vmem:[#allocation6_spill] sm:$0xff] %v7664_v4  ;;  %v3469_v33 = vsel %vm6841_vm15, %v3467_v21, %v3468_v53  ;;  %v4325_v38 = vrot.slane %v4323_v17, 5  ;;  %v4329_v0 = vrot.slane %v4327_v27, 4 }
 0x246   : > { %v3520_v4 = vunpack.c.l.b16 %v3469_v33  ;;  %v4320_v28 = vor.u32 %v4319_v5, %v4316_v14  ;;  %v4333_v17 = vshll.u32 %v7672_v30, 16  ;;  %v5980_v53 = vrot.slane %v4739_v52, 9  ;;  %v7683_v33 = vld [vmem:[#allocation2 + $0x94] sm:$0xf]  ;;  %v6097_v52 = vld [vmem:[#allocation2 + $0x84] sm:$0xff] }
 0x247   : > { %5924 = vmatmul.msk.bf16.gmra.mxu2 %vm1520_vm11, %v6096_v37  ;;  %v4330_v6 = vor.u32 %v4329_v0, %v4325_v38  ;;  %v4857_v0 = vsel %vm6841_vm15, %v4855_v62, %v4856_v15 }
 0x248   : > { %v3538_v27 = vpack.c.b16 %v3520_v4, %v3519_v39  ;;  %v4321_v29 = vrot.slane %v4320_v28, 4  ;;  %v4854_v14 = vsel %vm6841_vm15, %v5980_v53, %v4853_v45  ;;  %v4338_v4 = vshrl.u32 %v4079_v22, 16  ;;  %v6275_v39 = vld [vmem:[#allocation2 + $0xb8] sm:$0xf]  ;;  %v3322_v45 = vld [vmem:[#allocation2 + $0xb4] sm:$0xe] }
 0x249   : > { %v4331_v16 = vrot.slane %v4330_v6, 4  ;;  %v4932_v22 = vunpack.c.l.b16 %v4854_v14  ;;  %v8202_v14 = vld [vmem:[#allocation11_spill] sm:$0xff] }
 0x24a   : > { %v3937_v34 = vpop.f32.mrf.mxu2  ;;  %v3271_v47 = vpop.f32.mrf.mxu0  ;;  %v4326_v32 = vsel %vm6495_vm12, %v4321_v29, %v4325_v38 }
 0x24b   : > { %v7677_v13 = vadd.f32 %v3271_v47, %v2624_v23  ;;  %v4335_v23 = vrot.slane %v4333_v17, 5  ;;  %v3472_v47 = vrot.slane %v6275_v39, 5  ;;  %v4017_v36 = vadd.f32 %v3937_v34, %v3702_v18  ;;  %v7700_v15 = vpop.f32.mrf.mxu1 }
 0x24c   : > { %v2591_v37 = vpop.f32.mrf.mxu3  ;;  %v5786_v17 = vrot.slane %v3322_v45, 9  ;;  %v4933_v39 = vunpack.c.l.b16 %v4857_v0  ;;  %v4340_v34 = vrot.slane %v4338_v4, 4  ;;  %v4343_v18 = vrot.slane %v4341_v48, 5 }
 0x24d   : > { %v2625_v21 = vadd.f32 %v2591_v37, %v2311_v11  ;;  %8200 = vst [vmem:[#allocation7_spill] sm:$0xff] %v7677_v13  ;;  %6019 = vmatmul.msk.bf16.gmra.mxu0 %vm1520_vm11, %v4955_v55  ;;  %v4347_v37 = vshll.u32 %v7683_v33, 16  ;;  %v4336_v6 = vsel %vm6495_vm12, %v4331_v16, %v4335_v23  ;;  %v3474_v53 = vrot.slane %v3472_v47, 4  ;;  %v8204_v13 = vld [vmem:[#allocation13_spill] sm:$0xff] }
 0x24e   : > { %v3473_v38 = vsel %vm6841_vm15, %v5786_v17, %v3472_v47  ;;  %v4509_v45 = vunpack.c.l.b16 %v4336_v6  ;;  %v4860_v4 = vrot.slane %v7649_v51, 5  ;;  %v4956_v0 = vpack.c.b16 %v4933_v39, %v4932_v22  ;;  %v4740_v47 = vld [vmem:[#allocation2 + $0x84] sm:$0xe] }
 0x24f   : > { %v7707_v29 = vrot.slane %v4347_v37, 5  ;;  %v3521_v17 = vunpack.c.l.b16 %v3473_v38  ;;  %v4863_v39 = vrot.slane %v7672_v30, 5 }
 0x250   : > { %5825 = vmatmul.msk.bf16.gmra.mxu1 %vm1520_vm11, %v3538_v27  ;;  %v6276_v27 = vld [vmem:[#allocation2 + $0xbc] sm:$0x1]  ;;  %v4862_v51 = vrot.slane %v4860_v4, 4 }
 0x251   : > { %5964 = vmatmul.msk.bf16.gmra.mxu3 %vm1520_vm11, %v4530_v49  ;;  %v4351_v49 = vshrl.u32 %v7683_v33, 16  ;;  %v3475_v62 = vrot.slane %v6276_v27, 5  ;;  %v7709_v27 = vld [vmem:[#allocation2 + $0x98] sm:$0x1] }
 0x252   : > { %v3939_v11 = vpop.f32.mrf.mxu2  ;;  %v3273_v5 = vpop.f32.mrf.mxu0 }
 0x253   : > { %v7696_v28 = vadd.f32 %v3273_v5, %v2625_v21  ;;  %v3476_v21 = vsel %vm6841_vm15, %v3474_v53, %v3475_v62  ;;  %v4353_v16 = vrot.slane %v4351_v49, 4  ;;  %v4508_v5 = vunpack.c.l.b16 %v4326_v32 }
 0x254   : > { %v4619_v55 = vpop.f32.mrf.mxu3  ;;  %v4344_v53 = vor.u32 %v4343_v18, %v4340_v34  ;;  %v4357_v49 = vshll.u32 %v7709_v27, 16 }
 0x255   : > { %8201 = vst [vmem:[#allocation8_spill] sm:$0xff] %v7696_v28  ;;  %v4699_v23 = vadd.f32 %v4619_v55, %v4017_v36  ;;  %v3522_v28 = vunpack.c.l.b16 %v3476_v21  ;;  %v4354_v55 = vor.u32 %v4353_v16, %v7707_v29  ;;  %v4531_v6 = vpack.c.b16 %v4509_v45, %v4508_v5  ;;  %v7729_v21 = vpop.f32.mrf.mxu1  ;;  %v8203_v5 = vld [vmem:[#allocation12_spill] sm:$0xff] }
 0x256   : > { %v4345_v18 = vrot.slane %v4344_v53, 4  ;;  %v4359_v38 = vrot.slane %v4357_v49, 5  ;;  %v3704_v45 = vadd.f32 %v7585_v57, %v8203_v5 }
 0x257   : > { %5925 = vmatmul.msk.bf16.gmra.mxu2 %vm1520_vm11, %v6097_v52  ;;  %v3703_v52 = vadd.f32 %v7561_v10, %v8202_v14  ;;  %v5981_v10 = vrot.slane %v4740_v47, 9  ;;  %v3539_v34 = vpack.c.b16 %v3522_v28, %v3521_v17  ;;  %v4864_v28 = vsel %vm6841_vm15, %v4862_v51, %v4863_v39  ;;  %v6278_v39 = vld [vmem:[#allocation2 + $0xc8] sm:$0x1] }
 0x258   : > { %v4350_v47 = vsel %vm6495_vm12, %v4345_v18, %v7707_v29 }
 0x259   : > { %v4018_v32 = vadd.f32 %v3939_v11, %v3703_v52  ;;  %v4355_v11 = vrot.slane %v4354_v55, 4  ;;  %v7736_v52 = vld [vmem:[#allocation2 + $0xa0] sm:$0xf]  ;;  %v4861_v30 = vsel %vm6841_vm15, %v5981_v10, %v4860_v4 }
 0x25a   : > { %v3942_v48 = vpop.f32.mrf.mxu2  ;;  %v5045_v37 = vpop.f32.mrf.mxu0  ;;  %v4371_v10 = vshll.u32 %v7736_v52, 16  ;;  %v4375_v51 = vshrl.u32 %v7736_v52, 16  ;;  %v4934_v18 = vunpack.c.l.b16 %v4861_v30  ;;  %v3705_v30 = vadd.f32 %v7606_v20, %v8204_v13 }
 0x25b   : > { %v7716_v36 = vadd.f32 %v5045_v37, %v4699_v23  ;;  %v4082_v23 = vld [vmem:[#allocation2 + $0x9c] sm:$0xf]  ;;  %v4019_v53 = vadd.f32 %v3942_v48, %v3704_v45  ;;  %v4360_v57 = vsel %vm6495_vm12, %v4355_v11, %v4359_v38  ;;  %v3482_v48 = vrot.slane %v6278_v39, 5 }
 0x25c   : > { %v4621_v62 = vpop.f32.mrf.mxu3  ;;  %v4362_v49 = vshrl.u32 %v4082_v23, 16  ;;  %v4935_v11 = vunpack.c.l.b16 %v4864_v28  ;;  %v4510_v38 = vunpack.c.l.b16 %v4350_v47  ;;  %v4377_v39 = vrot.slane %v4375_v51, 4 }
 0x25d   : > { %6020 = vmatmul.msk.bf16.gmra.mxu0 %vm1520_vm11, %v4956_v0  ;;  %v5157_v22 = vpack.c.bf16 %v7716_v36, %v7716_v36  ;;  %v4700_v16 = vadd.f32 %v4621_v62, %v4018_v32  ;;  %v6098_v0 = vld [vmem:[#allocation2 + $0x90] sm:$0xff]  ;;  %v6277_v62 = vld [vmem:[#allocation2 + $0xc4] sm:$0xf]  ;;  %v3323_v32 = vld [vmem:[#allocation2 + $0xc0] sm:$0xe]  ;;  %v7765_v47 = vpop.f32.mrf.mxu1 }
 0x25e   : > { %v3479_v55 = vrot.slane %v6277_v62, 5  ;;  %v4364_v45 = vrot.slane %v4362_v49, 4 }
 0x25f   : > { %5189 = vst.msk [vmem:[%s7723_s22] sm:$0xf] %vm405_vm5, %v5157_v22  ;;  %v5787_v22 = vrot.slane %v3323_v32, 9  ;;  %v4373_v32 = vrot.slane %v4371_v10, 5 }
 0x260   : > { %5826 = vmatmul.msk.bf16.gmra.mxu1 %vm1520_vm11, %v3539_v34  ;;  %v3481_v29 = vrot.slane %v3479_v55, 4 }
 0x261   : > { %5965 = vmatmul.msk.bf16.gmra.mxu3 %vm1520_vm11, %v4531_v6  ;;  %v4365_v6 = vshll.u32 %v4082_v23, 16  ;;  %v3480_v23 = vsel %vm6841_vm15, %v5787_v22, %v3479_v55  ;;  %v4378_v20 = vor.u32 %v4377_v39, %v4373_v32  ;;  %v7781_v39 = vld [vmem:[#allocation2 + $0xac] sm:$0xf] }
 0x262   : > { %v3944_v14 = vpop.f32.mrf.mxu2  ;;  %v5047_v17 = vpop.f32.mrf.mxu0  ;;  %v3483_v5 = vsel %vm6841_vm15, %v3481_v29, %v3482_v48  ;;  %v3523_v55 = vunpack.c.l.b16 %v3480_v23 }
 0x263   : > { %v7748_v4 = vadd.f32 %v5047_v17, %v4700_v16  ;;  %v4511_v16 = vunpack.c.l.b16 %v4360_v57  ;;  %v4367_v62 = vrot.slane %v4365_v6, 5  ;;  %v4957_v57 = vpack.c.b16 %v4935_v11, %v4934_v18  ;;  %v4741_v6 = vld [vmem:[#allocation2 + $0x90] sm:$0xe] }
 0x264   : > { %v4624_v37 = vpop.f32.mrf.mxu3  ;;  %v3524_v22 = vunpack.c.l.b16 %v3483_v5  ;;  %v4020_v49 = vadd.f32 %v3944_v14, %v3705_v30  ;;  %v5982_v18 = vrot.slane %v4741_v6, 9  ;;  %v4870_v14 = vrot.slane %v7709_v27, 5  ;;  %v8205_v5 = vld [vmem:[#allocation14_spill] sm:$0xff] }
 0x265   : > { %v5158_v34 = vpack.c.bf16 %v7748_v4, %v7748_v4  ;;  %v4701_v17 = vadd.f32 %v4624_v37, %v4019_v53  ;;  %v4532_v48 = vpack.c.b16 %v4511_v16, %v4510_v38  ;;  %v4867_v53 = vrot.slane %v7683_v33, 5 }
 0x266   : > { %v4368_v10 = vor.u32 %v4367_v62, %v4364_v45  ;;  %v4379_v38 = vrot.slane %v4378_v20, 4  ;;  %v3706_v45 = vadd.f32 %v7635_v24, %v8205_v5  ;;  %v4085_v62 = vld [vmem:[#allocation2 + $0xa8] sm:$0xf]  ;;  %v4399_v20 = vshrl.u32 %v7781_v39, 16 }
 0x267   : > { %5926 = vmatmul.msk.bf16.gmra.mxu2 %vm1520_vm11, %v6098_v0  ;;  %5190 = vst.msk [vmem:[%s7723_s22 + $0x4] sm:$0xf] %vm405_vm5, %v5158_v34  ;;  %v7763_v0 = vld [vmem:[#allocation2 + $0xa4] sm:$0x1]  ;;  %v3540_v34 = vpack.c.b16 %v3524_v22, %v3523_v55  ;;  %v4869_v11 = vrot.slane %v4867_v53, 4  ;;  %v4868_v27 = vsel %vm6841_vm15, %v5982_v18, %v4867_v53  ;;  %v7787_v22 = vpop.f32.mrf.mxu1  ;;  %v4386_v6 = vshrl.u32 %v4085_v62, 16 }
 0x268   : > { %v4381_v13 = vshll.u32 %v7763_v0, 16  ;;  %v4395_v53 = vshll.u32 %v7781_v39, 16 }
 0x26a   : > { %v3947_v28 = vpop.f32.mrf.mxu2  ;;  %v5050_v7 = vpop.f32.mrf.mxu0  ;;  %v4383_v16 = vrot.slane %v4381_v13, 5 }
 0x26b   : > { %v7768_v37 = vadd.f32 %v5050_v7, %v4701_v17  ;;  %v4369_v7 = vrot.slane %v4368_v10, 4  ;;  %v6099_v17 = vld [vmem:[#allocation2 + $0x9c] sm:$0xff]  ;;  %v4021_v24 = vadd.f32 %v3947_v28, %v3706_v45  ;;  %v4389_v10 = vshll.u32 %v4085_v62, 16 }
 0x26c   : > { %v4626_v29 = vpop.f32.mrf.mxu3  ;;  %v4874_v62 = vrot.slane %v7736_v52, 5 }
 0x26d   : > { %6021 = vmatmul.msk.bf16.gmra.mxu0 %vm1520_vm11, %v4957_v57  ;;  %v5159_v51 = vpack.c.bf16 %v7768_v37, %v7768_v37  ;;  %v4702_v33 = vadd.f32 %v4626_v29, %v4020_v49  ;;  %v4871_v57 = vsel %vm6841_vm15, %v4869_v11, %v4870_v14  ;;  %v4374_v29 = vsel %vm6495_vm12, %v4369_v7, %v4373_v32 }
 0x26e   : > { %v4512_v32 = vunpack.c.l.b16 %v4374_v29  ;;  %v4388_v14 = vrot.slane %v4386_v6, 4  ;;  %v4397_v7 = vrot.slane %v4395_v53, 5 }
 0x26f   : > { %5191 = vst.msk [vmem:[%s7723_s22 + $0x8] sm:$0xf] %vm405_vm5, %v5159_v51  ;;  %v4936_v51 = vunpack.c.l.b16 %v4868_v27  ;;  %v7810_v53 = vpop.f32.mrf.mxu1 }
 0x270   : > { %5827 = vmatmul.msk.bf16.gmra.mxu1 %vm1520_vm11, %v3540_v34  ;;  %v4937_v34 = vunpack.c.l.b16 %v4871_v57  ;;  %v4742_v57 = vld [vmem:[#allocation2 + $0x9c] sm:$0xe] }
 0x271   : > { %5966 = vmatmul.msk.bf16.gmra.mxu3 %vm1520_vm11, %v4532_v48  ;;  %v4384_v48 = vsel %vm6495_vm12, %v4379_v38, %v4383_v16  ;;  %v4401_v38 = vrot.slane %v4399_v20, 4  ;;  %v8206_v16 = vld [vmem:[#allocation15_spill] sm:$0xff]  ;;  %v5983_v52 = vrot.slane %v4742_v57, 9  ;;  %v4876_v20 = vrot.slane %v4874_v62, 4 }
 0x272   : > { %v3949_v23 = vpop.f32.mrf.mxu2  ;;  %v5052_v30 = vpop.f32.mrf.mxu0  ;;  %v4513_v18 = vunpack.c.l.b16 %v4384_v48  ;;  %v3707_v5 = vadd.f32 %v7651_v46, %v8206_v16  ;;  %v4958_v45 = vpack.c.b16 %v4937_v34, %v4936_v51  ;;  %v7819_v34 = vld [vmem:[#allocation2 + $0xb8] sm:$0xf] }
 0x273   : > { %v7789_v49 = vadd.f32 %v5052_v30, %v4702_v33  ;;  %v4391_v33 = vrot.slane %v4389_v10, 5  ;;  %v7805_v30 = vld [vmem:[#allocation2 + $0xb0] sm:$0x1]  ;;  %v4402_v6 = vor.u32 %v4401_v38, %v4397_v7  ;;  %v4875_v16 = vsel %vm6841_vm15, %v5983_v52, %v4874_v62 }
 0x274   : > { %v4629_v55 = vpop.f32.mrf.mxu3  ;;  %v4533_v29 = vpack.c.b16 %v4513_v18, %v4512_v32  ;;  %v4405_v10 = vshll.u32 %v7805_v30, 16 }
 0x275   : > { %v5160_v13 = vpack.c.bf16 %v7789_v49, %v7789_v49  ;;  %v4703_v28 = vadd.f32 %v4629_v55, %v4021_v24  ;;  %v4022_v24 = vadd.f32 %v3949_v23, %v3707_v5  ;;  %v4392_v48 = vor.u32 %v4391_v33, %v4388_v14  ;;  %v4088_v23 = vld [vmem:[#allocation2 + $0xb4] sm:$0xf]  ;;  %v8207_v33 = vld [vmem:[#allocation16_spill] sm:$0xff]  ;;  %v6100_v5 = vld [vmem:[#allocation2 + $0xa8] sm:$0xff] }
 0x276   : > { %v4403_v18 = vrot.slane %v4402_v6, 4  ;;  %v4407_v14 = vrot.slane %v4405_v10, 5  ;;  %v3708_v38 = vadd.f32 %v7675_v12, %v8207_v33  ;;  %v4413_v57 = vshll.u32 %v4088_v23, 16 }
 0x277   : > { %5927 = vmatmul.msk.bf16.gmra.mxu2 %vm1520_vm11, %v6099_v17  ;;  %5192 = vst.msk [vmem:[%s7723_s22 + $0xc] sm:$0xf] %vm405_vm5, %v5160_v13  ;;  %v4877_v13 = vrot.slane %v7763_v0, 5  ;;  %v4393_v32 = vrot.slane %v4392_v48, 4 }
 0x278   : > { %v4408_v62 = vsel %vm6495_vm12, %v4403_v18, %v4407_v14  ;;  %v3709_v14 = vadd.f32 %v7700_v15, %v7199_v43 }
 0x279   : > { %v4878_v0 = vsel %vm6841_vm15, %v4876_v20, %v4877_v13  ;;  %v4398_v12 = vsel %vm6495_vm12, %v4393_v32, %v4397_v7  ;;  %v4415_v13 = vrot.slane %v4413_v57, 5  ;;  %v4515_v32 = vunpack.c.l.b16 %v4408_v62 }
 0x27a   : > { %v3952_v11 = vpop.f32.mrf.mxu2  ;;  %v5055_v17 = vpop.f32.mrf.mxu0  ;;  %v4939_v52 = vunpack.c.l.b16 %v4878_v0  ;;  %v4514_v7 = vunpack.c.l.b16 %v4398_v12  ;;  %v4881_v0 = vrot.slane %v7781_v39, 5  ;;  %v4884_v39 = vrot.slane %v7805_v30, 5 }
 0x27b   : > { %v7807_v55 = vadd.f32 %v5055_v17, %v4703_v28  ;;  %v4023_v6 = vadd.f32 %v3952_v11, %v3708_v38  ;;  %v7842_v38 = vld [vmem:[#allocation2 + $0xbc] sm:$0x1] }
 0x27c   : > { %v4631_v27 = vpop.f32.mrf.mxu3  ;;  %v4534_v12 = vpack.c.b16 %v4515_v32, %v4514_v7  ;;  %v4883_v62 = vrot.slane %v4881_v0, 4  ;;  %v4891_v8 = vrot.slane %v7842_v38, 5 }
 0x27d   : > { %6022 = vmatmul.msk.bf16.gmra.mxu0 %vm1520_vm11, %v4958_v45  ;;  %v5161_v46 = vpack.c.bf16 %v7807_v55, %v7807_v55  ;;  %v4704_v51 = vadd.f32 %v4631_v27, %v4022_v24  ;;  %v4410_v27 = vshrl.u32 %v4088_v23, 16  ;;  %v4419_v24 = vshll.u32 %v7819_v34, 16 }
 0x27e   : > { %v4885_v32 = vsel %vm6841_vm15, %v4883_v62, %v4884_v39 }
 0x27f   : > { %5193 = vst.msk [vmem:[%s7723_s22 + $0x10] sm:$0xf] %vm405_vm5, %v5161_v46  ;;  %v4938_v46 = vunpack.c.l.b16 %v4875_v16  ;;  %v4412_v20 = vrot.slane %v4410_v27, 4  ;;  %v4421_v23 = vrot.slane %v4419_v24, 5  ;;  %v4743_v27 = vld [vmem:[#allocation2 + $0xa8] sm:$0xe] }
 0x280   : > { %v5984_v15 = vrot.slane %v4743_v27, 9 }
 0x281   : > { %5967 = vmatmul.msk.bf16.gmra.mxu3 %vm1520_vm11, %v4533_v29  ;;  %v4423_v29 = vshrl.u32 %v7819_v34, 16  ;;  %v4959_v16 = vpack.c.b16 %v4939_v52, %v4938_v46  ;;  %v4416_v57 = vor.u32 %v4415_v13, %v4412_v20  ;;  %v4091_v13 = vld [vmem:[#allocation2 + $0xc0] sm:$0xf] }
 0x282   : > { %v3954_v28 = vpop.f32.mrf.mxu2  ;;  %v5057_v45 = vpop.f32.mrf.mxu0  ;;  %v4882_v30 = vsel %vm6841_vm15, %v5984_v15, %v4881_v0 }
 0x283   : > { %v7829_v48 = vadd.f32 %v5057_v45, %v4704_v51  ;;  %v4425_v33 = vrot.slane %v4423_v29, 4  ;;  %v7838_v51 = vpop.f32.mrf.mxu1  ;;  %v4429_v29 = vshll.u32 %v7842_v38, 16 }
 0x284   : > { %v4634_v17 = vpop.f32.mrf.mxu3 }
 0x285   : > { %v5162_v10 = vpack.c.bf16 %v7829_v48, %v7829_v48  ;;  %v4705_v11 = vadd.f32 %v4634_v17, %v4023_v6  ;;  %v4426_v24 = vor.u32 %v4425_v33, %v4421_v23  ;;  %v4024_v6 = vadd.f32 %v3954_v28, %v3709_v14  ;;  %v6101_v14 = vld [vmem:[#allocation2 + $0xb4] sm:$0xff] }
 0x286   : > { %v4431_v52 = vrot.slane %v4429_v29, 5  ;;  %v3710_v28 = vadd.f32 %v7729_v21, %v7220_v42  ;;  %v4434_v21 = vshrl.u32 %v4091_v13, 16 }
 0x287   : > { %5928 = vmatmul.msk.bf16.gmra.mxu2 %vm1520_vm11, %v6100_v5  ;;  %5194 = vst.msk [vmem:[%s7723_s22 + $0x14] sm:$0xf] %vm405_vm5, %v5162_v10  ;;  %v4417_v10 = vrot.slane %v4416_v57, 4  ;;  %v4427_v46 = vrot.slane %v4426_v24, 4  ;;  %v4437_v24 = vshll.u32 %v4091_v13, 16  ;;  %v3711_v13 = vadd.f32 %v7765_v47, %v7250_v50 }
 0x288   : > { %v4436_v39 = vrot.slane %v4434_v21, 4  ;;  %v4888_v21 = vrot.slane %v7819_v34, 5  ;;  %v4744_v50 = vld [vmem:[#allocation2 + $0xb4] sm:$0xe] }
 0x289   : > { %v4422_v27 = vsel %vm6495_vm12, %v4417_v10, %v4421_v23  ;;  %v4432_v42 = vsel %vm6495_vm12, %v4427_v46, %v4431_v52  ;;  %v4439_v46 = vrot.slane %v4437_v24, 5 }
 0x28a   : > { %v3957_v18 = vpop.f32.mrf.mxu2  ;;  %v5060_v5 = vpop.f32.mrf.mxu0  ;;  %v4516_v15 = vunpack.c.l.b16 %v4422_v27  ;;  %v4517_v62 = vunpack.c.l.b16 %v4432_v42  ;;  %v4890_v34 = vrot.slane %v4888_v21, 4 }
 0x28b   : > { %v7848_v17 = vadd.f32 %v5060_v5, %v4705_v11  ;;  %v7859_v11 = vld [vmem:[#allocation2 + $0xc4] sm:$0xf]  ;;  %v7861_v7 = vpop.f32.mrf.mxu1  ;;  %v4025_v5 = vadd.f32 %v3957_v18, %v3710_v28  ;;  %v4440_v47 = vor.u32 %v4439_v46, %v4436_v39  ;;  %v7903_v46 = vld [vmem:[#allocation2 + $0xd0] sm:$0xf] }
 0x28c   : > { %v4636_v45 = vpop.f32.mrf.mxu3  ;;  %v4443_v0 = vshll.u32 %v7859_v11, 16  ;;  %v4447_v29 = vshrl.u32 %v7859_v11, 16  ;;  %v4535_v42 = vpack.c.b16 %v4517_v62, %v4516_v15  ;;  %v3712_v62 = vadd.f32 %v7787_v22, %v7270_v54  ;;  %v6102_v39 = vld [vmem:[#allocation2 + $0xc0] sm:$0xff] }
 0x28d   : > { %6023 = vmatmul.msk.bf16.gmra.mxu0 %vm1520_vm11, %v4959_v16  ;;  %v5163_v43 = vpack.c.bf16 %v7848_v17, %v7848_v17  ;;  %v4706_v20 = vadd.f32 %v4636_v45, %v4024_v6  ;;  %v468_v6 = vld [vmem:[#allocation2 + $0xcc] sm:$0x1] }
 0x28e   : > { %v469_v23 = vsel %vm6338_vm3, 0, %v468_v6  ;;  %v4445_v52 = vrot.slane %v4443_v0, 5  ;;  %v5985_v6 = vrot.slane %v4744_v50, 9 }
 0x28f   : > { %5195 = vst.msk [vmem:[%s7723_s22 + $0x18] sm:$0xf] %vm405_vm5, %v5163_v43  ;;  %v4941_v43 = vunpack.c.l.b16 %v4885_v32  ;;  %v524_v32 = vld [vmem:[#allocation2 + $0xd4] sm:$0x1] }
 0x290   : > { %470 = vst [vmem:[#allocation2 + $0xcc] sm:$0x1] %v469_v23  ;;  %v4889_v38 = vsel %vm6841_vm15, %v5985_v6, %v4888_v21  ;;  %v4471_v21 = vshrl.u32 %v7903_v46, 16 }
 0x291   : > { %5968 = vmatmul.msk.bf16.gmra.mxu3 %vm1520_vm11, %v4534_v12  ;;  %v4940_v12 = vunpack.c.l.b16 %v4882_v30  ;;  %v7884_v30 = vld [vmem:[#allocation2 + $0xc8] sm:$0x1] }
 0x292   : > { %v3959_v33 = vpop.f32.mrf.mxu2  ;;  %v5062_v16 = vpop.f32.mrf.mxu0 }
 0x293   : > { %v7871_v57 = vadd.f32 %v5062_v16, %v4706_v20  ;;  %v4449_v20 = vrot.slane %v4447_v29, 4  ;;  %v4026_v16 = vadd.f32 %v3959_v33, %v3711_v13  ;;  %v4453_v29 = vshll.u32 %v7884_v30, 16 }
 0x294   : > { %v4639_v45 = vpop.f32.mrf.mxu3  ;;  %v4892_v13 = vsel %vm6841_vm15, %v4890_v34, %v4891_v8 }
 0x295   : > { %v5164_v18 = vpack.c.bf16 %v7871_v57, %v7871_v57  ;;  %v4707_v10 = vadd.f32 %v4639_v45, %v4025_v5  ;;  %v525_v5 = vsel %vm6363_vm4, 0, %v524_v32  ;;  %v7889_v45 = vpop.f32.mrf.mxu1  ;;  %v4450_v0 = vor.u32 %v4449_v20, %v4445_v52 }
 0x296   : > { %526 = vst [vmem:[#allocation2 + $0xd4] sm:$0x1] %v525_v5  ;;  %v4455_v23 = vrot.slane %v4453_v29, 5 }
 0x297   : > { %5929 = vmatmul.msk.bf16.gmra.mxu2 %vm1520_vm11, %v6101_v14  ;;  %5196 = vst.msk [vmem:[%s7723_s22 + $0x1c] sm:$0xf] %vm405_vm5, %v5164_v18  ;;  %v4960_v14 = vpack.c.b16 %v4941_v43, %v4940_v12  ;;  %v4441_v12 = vrot.slane %v4440_v47, 4  ;;  %v4451_v43 = vrot.slane %v4450_v0, 4  ;;  %v4942_v47 = vunpack.c.l.b16 %v4889_v38 }
 0x298   : > { %v4943_v0 = vunpack.c.l.b16 %v4892_v13 }
 0x299   : > { %v4456_v54 = vsel %vm6495_vm12, %v4451_v43, %v4455_v23 }
 0x29a   : > { %v3962_v28 = vpop.f32.mrf.mxu2  ;;  %v5065_v3 = vpop.f32.mrf.mxu0  ;;  %v4519_v29 = vunpack.c.l.b16 %v4456_v54  ;;  %v4961_v43 = vpack.c.b16 %v4943_v0, %v4942_v47  ;;  %v3714_v0 = vadd.f32 %v7838_v51, %v7336_v63 }
 0x29b   : > { %v7891_v24 = vadd.f32 %v5065_v3, %v4707_v10  ;;  %v4094_v10 = vld [vmem:[#allocation2 + $0xcc] sm:$0xf]  ;;  %v4027_v3 = vadd.f32 %v3962_v28, %v3712_v62 }
 0x29c   : > { %v4641_v27 = vpop.f32.mrf.mxu3  ;;  %v4458_v22 = vshrl.u32 %v4094_v10, 16 }
 0x29d   : > { %6024 = vmatmul.msk.bf16.gmra.mxu0 %vm1520_vm11, %v4960_v14  ;;  %v5165_v33 = vpack.c.bf16 %v7891_v24, %v7891_v24  ;;  %v4708_v18 = vadd.f32 %v4641_v27, %v4026_v16  ;;  %v4446_v16 = vsel %vm6495_vm12, %v4441_v12, %v4445_v52  ;;  %v4461_v27 = vshll.u32 %v4094_v10, 16  ;;  %v7917_v5 = vpop.f32.mrf.mxu1  ;;  %v7926_v23 = vld [vmem:[#allocation2 + $0xd4] sm:$0x1] }
 0x29e   : > { %v4518_v28 = vunpack.c.l.b16 %v4446_v16  ;;  %v4460_v6 = vrot.slane %v4458_v22, 4  ;;  %v3713_v12 = vadd.f32 %v7810_v53, %v7316_v1  ;;  %v4477_v54 = vshll.u32 %v7926_v23, 16 }
 0x29f   : > { %5197 = vst.msk [vmem:[%s7723_s22 + $0x20] sm:$0xf] %vm405_vm5, %v5165_v33  ;;  %v4463_v34 = vrot.slane %v4461_v27, 5  ;;  %v4898_v27 = vrot.slane %v7884_v30, 5 }
 0x2a0   : > { %v4536_v13 = vpack.c.b16 %v4519_v29, %v4518_v28  ;;  %v4479_v47 = vrot.slane %v4477_v54, 5 }
 0x2a1   : > { %5969 = vmatmul.msk.bf16.gmra.mxu3 %vm1520_vm11, %v4535_v42  ;;  %v4467_v42 = vshll.u32 %v7903_v46, 16 }
 0x2a2   : > { %v3964_v15 = vpop.f32.mrf.mxu2  ;;  %v5067_v20 = vpop.f32.mrf.mxu0 }
 0x2a3   : > { %v7909_v14 = vadd.f32 %v5067_v20, %v4708_v18  ;;  %v4469_v8 = vrot.slane %v4467_v42, 5  ;;  %v4473_v18 = vrot.slane %v4471_v21, 4  ;;  %v4028_v38 = vadd.f32 %v3964_v15, %v3713_v12 }
 0x2a4   : > { %v4644_v32 = vpop.f32.mrf.mxu3 }
 0x2a5   : > { %v5166_v50 = vpack.c.bf16 %v7909_v14, %v7909_v14  ;;  %v4709_v52 = vadd.f32 %v4644_v32, %v4027_v3  ;;  %v4745_v32 = vld [vmem:[#allocation2 + $0xc0] sm:$0xe]  ;;  %v4464_v3 = vor.u32 %v4463_v34, %v4460_v6  ;;  %v4474_v16 = vor.u32 %v4473_v18, %v4469_v8  ;;  %v7936_v42 = vpop.f32.mrf.mxu1 }
 0x2a6   : > { %v5986_v53 = vrot.slane %v4745_v32, 9 }
 0x2a7   : > { %5930 = vmatmul.msk.bf16.gmra.mxu2 %vm1520_vm11, %v6102_v39  ;;  %5198 = vst.msk [vmem:[%s7723_s22 + $0x24] sm:$0xf] %vm405_vm5, %v5166_v50  ;;  %v4895_v39 = vrot.slane %v7859_v11, 5  ;;  %v4465_v21 = vrot.slane %v4464_v3, 4  ;;  %v4475_v50 = vrot.slane %v4474_v16, 4  ;;  %v4902_v16 = vrot.slane %v7903_v46, 5 }
 0x2a8   : > { %v3716_v46 = vadd.f32 %v7889_v45, %v7373_v31  ;;  %v3717_v31 = vadd.f32 %v7917_v5, %v7392_v61 }
 0x2a9   : > { %v4897_v22 = vrot.slane %v4895_v39, 4  ;;  %v4896_v30 = vsel %vm6841_vm15, %v5986_v53, %v4895_v39  ;;  %v4470_v12 = vsel %vm6495_vm12, %v4465_v21, %v4469_v8  ;;  %v4904_v21 = vrot.slane %v4902_v16, 4 }
 0x2aa   : > { %v3967_v33 = vpop.f32.mrf.mxu2  ;;  %v5070_v62 = vpop.f32.mrf.mxu0  ;;  %v4944_v51 = vunpack.c.l.b16 %v4896_v30  ;;  %v4520_v39 = vunpack.c.l.b16 %v4470_v12 }
 0x2ab   : > { %v7929_v20 = vadd.f32 %v5070_v62, %v4709_v52  ;;  %v6103_v52 = vld [vmem:[#allocation2 + $0xcc] sm:$0xff]  ;;  %v4899_v29 = vsel %vm6841_vm15, %v4897_v22, %v4898_v27  ;;  %v4029_v18 = vadd.f32 %v3967_v33, %v3714_v0  ;;  %v3715_v33 = vadd.f32 %v7861_v7, %v7357_v44 }
 0x2ac   : > { %v4646_v10 = vpop.f32.mrf.mxu3  ;;  %v4945_v62 = vunpack.c.l.b16 %v4899_v29  ;;  %v4746_v22 = vld [vmem:[#allocation2 + $0xcc] sm:$0xe] }
 0x2ad   : > { %6025 = vmatmul.msk.bf16.gmra.mxu0 %vm1520_vm11, %v4961_v43  ;;  %v5167_v1 = vpack.c.bf16 %v7929_v20, %v7929_v20  ;;  %v4710_v11 = vadd.f32 %v4646_v10, %v4028_v38  ;;  %v4480_v43 = vsel %vm6495_vm12, %v4475_v50, %v4479_v47  ;;  %v3664_v8 = vpop.f32.mrf.mxu1  ;;  %v4905_v50 = vrot.slane %v7926_v23, 5 }
 0x2ae   : > { %v4521_v38 = vunpack.c.l.b16 %v4480_v43  ;;  %v4962_v41 = vpack.c.b16 %v4945_v62, %v4944_v51 }
 0x2af   : > { %5199 = vst.msk [vmem:[%s7723_s22 + $0x28] sm:$0xf] %vm405_vm5, %v5167_v1  ;;  %v4906_v0 = vsel %vm6841_vm15, %v4904_v21, %v4905_v50 }
 0x2b0   : > { %v4537_v53 = vpack.c.b16 %v4521_v38, %v4520_v39 }
 0x2b1   : > { %5970 = vmatmul.msk.bf16.gmra.mxu3 %vm1520_vm11, %v4536_v13 }
 0x2b2   : > { %v3969_v15 = vpop.f32.mrf.mxu2  ;;  %v5072_v28 = vpop.f32.mrf.mxu0 }
 0x2b3   : > { %v7947_v34 = vadd.f32 %v5072_v28, %v4710_v11  ;;  %v4030_v1 = vadd.f32 %v3969_v15, %v3715_v33  ;;  %v5987_v11 = vrot.slane %v4746_v22, 9  ;;  %v3718_v33 = vadd.f32 %v7936_v42, %v7412_v59 }
 0x2b4   : > { %v4649_v6 = vpop.f32.mrf.mxu3 }
 0x2b5   : > { %v5168_v63 = vpack.c.bf16 %v7947_v34, %v7947_v34  ;;  %v4711_v10 = vadd.f32 %v4649_v6, %v4029_v18  ;;  %v4903_v47 = vsel %vm6841_vm15, %v5987_v11, %v4902_v16  ;;  %v3667_v28 = vpop.f32.mrf.mxu1  ;;  %v4947_v18 = vunpack.c.l.b16 %v4906_v0 }
 0x2b6   : > { %v4946_v6 = vunpack.c.l.b16 %v4903_v47  ;;  %v3719_v11 = vadd.f32 %v3664_v8, %v7434_v25  ;;  %v5272_v25 = vmul.f32 %v7947_v34, %v7947_v34  ;;  %v3720_v47 = vadd.f32 %v3667_v28, %v7449_v56 }
 0x2b7   : > { %5931 = vmatmul.msk.bf16.gmra.mxu2 %vm1520_vm11, %v6103_v52  ;;  %5200 = vst.msk [vmem:[%s7723_s22 + $0x2c] sm:$0xf] %vm405_vm5, %v5168_v63 }
 0x2b8   : > { %v4963_v45 = vpack.c.b16 %v4947_v18, %v4946_v6  ;;  %v5267_v6 = vmul.f32 %v7848_v17, %v7848_v17 }
 0x2ba   : > { %v3972_v13 = vpop.f32.mrf.mxu2  ;;  %v5075_v32 = vpop.f32.mrf.mxu0 }
 0x2bb   : > { %v5137_v54 = vadd.f32 %v5075_v32, %v4711_v10  ;;  %v4031_v30 = vadd.f32 %v3972_v13, %v3716_v46 }
 0x2bc   : > { %v4651_v3 = vpop.f32.mrf.mxu3 }
 0x2bd   : > { %6026 = vmatmul.msk.bf16.gmra.mxu0 %vm1520_vm11, %v4962_v41  ;;  %v5169_v27 = vpack.c.bf16 %v5137_v54, %v5137_v54  ;;  %v4712_v44 = vadd.f32 %v4651_v3, %v4030_v1  ;;  %v7976_v10 = vpop.f32.mrf.mxu1 }
 0x2be   : > { %v3721_v18 = vadd.f32 %v7976_v10, %v7470_v35 }
 0x2bf   : > { %5201 = vst.msk [vmem:[%s7723_s22 + $0x30] sm:$0xf] %vm405_vm5, %v5169_v27 }
 0x2c1   : > { %5971 = vmatmul.msk.bf16.gmra.mxu3 %vm1520_vm11, %v4537_v53 }
 0x2c2   : > { %v3974_v7 = vpop.f32.mrf.mxu2  ;;  %v5077_v15 = vpop.f32.mrf.mxu0 }
 0x2c3   : > { %v5138_v23 = vadd.f32 %v5077_v15, %v4712_v44  ;;  %v4032_v62 = vadd.f32 %v3974_v7, %v3717_v31  ;;  %v5273_v44 = vmul.f32 %v5137_v54, %v5137_v54  ;;  %v5271_v15 = vmul.f32 %v7929_v20, %v7929_v20 }
 0x2c4   : > { %v4654_v52 = vpop.f32.mrf.mxu3 }
 0x2c5   : > { %v5170_v29 = vpack.c.bf16 %v5138_v23, %v5138_v23  ;;  %v4713_v12 = vadd.f32 %v4654_v52, %v4031_v30  ;;  %v7983_v1 = vpop.f32.mrf.mxu1  ;;  %v5274_v59 = vmul.f32 %v5138_v23, %v5138_v23 }
 0x2c7   : > { %5202 = vst.msk [vmem:[%s7723_s22 + $0x34] sm:$0xf] %vm405_vm5, %v5170_v29 }
 0x2ca   : > { %v3977_v43 = vpop.f32.mrf.mxu2  ;;  %v5080_v63 = vpop.f32.mrf.mxu0 }
 0x2cb   : > { %v5139_v26 = vadd.f32 %v5080_v63, %v4713_v12  ;;  %v4033_v32 = vadd.f32 %v3977_v43, %v3718_v33 }
 0x2cc   : > { %v4656_v51 = vpop.f32.mrf.mxu3 }
 0x2cd   : > { %6027 = vmatmul.msk.bf16.gmra.mxu0 %vm1520_vm11, %v4963_v45  ;;  %v5171_v39 = vpack.c.bf16 %v5139_v26, %v5139_v26  ;;  %v4714_v38 = vadd.f32 %v4656_v51, %v4032_v62  ;;  %v5275_v22 = vmul.f32 %v5139_v26, %v5139_v26  ;;  %v3674_v0 = vpop.f32.mrf.mxu1  ;;  %v3722_v62 = vadd.f32 %v7983_v1, %v7490_v58 }
 0x2cf   : > { %5203 = vst.msk [vmem:[%s7723_s22 + $0x38] sm:$0xf] %vm405_vm5, %v5171_v39 }
 0x2d2   : > { %v3979_v13 = vpop.f32.mrf.mxu2  ;;  %v5082_v41 = vpop.f32.mrf.mxu0 }
 0x2d3   : > { %v5140_v5 = vadd.f32 %v5082_v41, %v4714_v38  ;;  %v4034_v7 = vadd.f32 %v3979_v13, %v3719_v11 }
 0x2d4   : > { %v4659_v61 = vpop.f32.mrf.mxu3 }
 0x2d5   : > { %v5172_v3 = vpack.c.bf16 %v5140_v5, %v5140_v5  ;;  %v5276_v16 = vmul.f32 %v5140_v5, %v5140_v5  ;;  %5221 = vmatpush.msrb.mxu1 %v5140_v5  ;;  %v4715_v53 = vadd.f32 %v4659_v61, %v4033_v32  ;;  %v3677_v31 = vpop.f32.mrf.mxu1  ;;  %v3723_v61 = vadd.f32 %v3674_v0, %v7510_v9 }
 0x2d7   : > { %5204 = vst.msk [vmem:[%s7723_s22 + $0x3c] sm:$0xf] %vm405_vm5, %v5172_v3  ;;  %5222 = vmatpush.msrb.mxu1 %v5139_v26  ;;  %5293 = vmatpush.msrb.mxu3 %v5276_v16  ;;  %v5263_v26 = vmul.f32 %v7768_v37, %v7768_v37 }
 0x2d9   : > { %5223 = vmatpush.msrb.mxu1 %v5138_v23  ;;  %5294 = vmatpush.msrb.mxu3 %v5275_v22 }
 0x2da   : > { %v3982_v27 = vpop.f32.mrf.mxu2  ;;  %v5085_v42 = vpop.f32.mrf.mxu0 }
 0x2db   : > { %v7988_v50 = vadd.f32 %v5085_v42, %v4715_v53  ;;  %5224 = vmatpush.msrb.mxu1 %v5137_v54  ;;  %5295 = vmatpush.msrb.mxu3 %v5274_v59  ;;  %v4035_v29 = vadd.f32 %v3982_v27, %v3720_v47  ;;  %v3724_v27 = vadd.f32 %v3677_v31, %v7525_v2 }
 0x2dc   : > { %v4661_v21 = vpop.f32.mrf.mxu3 }
 0x2dd   : > { %v5173_v46 = vpack.c.bf16 %v7988_v50, %v7988_v50  ;;  %5225 = vmatpush.msrb.mxu1 %v7947_v34  ;;  %5296 = vmatpush.msrb.mxu3 %v5273_v44  ;;  %v4716_v8 = vadd.f32 %v4661_v21, %v4034_v7  ;;  %v5270_v34 = vmul.f32 %v7909_v14, %v7909_v14  ;;  %v3679_v33 = vpop.f32.mrf.mxu1 }
 0x2df   : > { %5205 = vst.msk [vmem:[%s7723_s22 + $0x40] sm:$0xf] %vm405_vm5, %v5173_v46  ;;  %5226 = vmatpush.msrb.mxu1 %v7929_v20  ;;  %5297 = vmatpush.msrb.mxu3 %v5272_v25  ;;  %v5269_v20 = vmul.f32 %v7891_v24, %v7891_v24  ;;  %v3725_v46 = vadd.f32 %v3679_v33, %v7546_v60 }
 0x2e1   : > { %5227 = vmatpush.msrb.mxu1 %v7909_v14  ;;  %5298 = vmatpush.msrb.mxu3 %v5271_v15  ;;  %v5268_v14 = vmul.f32 %v7871_v57, %v7871_v57 }
 0x2e2   : > { %v3984_v54 = vpop.f32.mrf.mxu2  ;;  %v5087_v52 = vpop.f32.mrf.mxu0 }
 0x2e3   : > { %v8004_v30 = vadd.f32 %v5087_v52, %v4716_v8  ;;  %5228 = vmatpush.msrb.mxu1 %v7891_v24  ;;  %5299 = vmatpush.msrb.mxu3 %v5270_v34  ;;  %v4036_v63 = vadd.f32 %v3984_v54, %v3721_v18 }
 0x2e4   : > { %v4664_v23 = vpop.f32.mrf.mxu3 }
 0x2e5   : > { %v5174_v56 = vpack.c.bf16 %v8004_v30, %v8004_v30  ;;  %5229 = vmatpush.msrb.mxu1 %v7871_v57  ;;  %5300 = vmatpush.msrb.mxu3 %v5269_v20  ;;  %v4717_v28 = vadd.f32 %v4664_v23, %v4035_v29  ;;  %v5266_v57 = vmul.f32 %v7829_v48, %v7829_v48  ;;  %v3682_v1 = vpop.f32.mrf.mxu1 }
 0x2e6   : > { %v3726_v52 = vadd.f32 %v3682_v1, %v7566_v19 }
 0x2e7   : > { %5206 = vst.msk [vmem:[%s7723_s22 + $0x44] sm:$0xf] %vm405_vm5, %v5174_v56  ;;  %5230 = vmatpush.msrb.mxu1 %v7848_v17  ;;  %5301 = vmatpush.msrb.mxu3 %v5268_v14  ;;  %v5265_v17 = vmul.f32 %v7807_v55, %v7807_v55 }
 0x2e9   : > { %5231 = vmatpush.msrb.mxu1 %v7829_v48  ;;  %5302 = vmatpush.msrb.mxu3 %v5267_v6  ;;  %v5264_v48 = vmul.f32 %v7789_v49, %v7789_v49 }
 0x2ea   : > { %v3987_v24 = vpop.f32.mrf.mxu2  ;;  %v5090_v12 = vpop.f32.mrf.mxu0 }
 0x2eb   : > { %v8024_v45 = vadd.f32 %v5090_v12, %v4717_v28  ;;  %5232 = vmatpush.msrb.mxu1 %v7807_v55  ;;  %5303 = vmatpush.msrb.mxu3 %v5266_v57  ;;  %v4037_v13 = vadd.f32 %v3987_v24, %v3722_v62  ;;  %v8208_v24 = vld [vmem:[#allocation3_spill] sm:$0xff] }
 0x2ec   : > { %v4666_v43 = vpop.f32.mrf.mxu3 }
 0x2ed   : > { %v5175_v35 = vpack.c.bf16 %v8024_v45, %v8024_v45  ;;  %5233 = vmatpush.msrb.mxu1 %v7789_v49  ;;  %5304 = vmatpush.msrb.mxu3 %v5265_v17  ;;  %v4718_v51 = vadd.f32 %v4666_v43, %v4036_v63  ;;  %v5262_v49 = vmul.f32 %v7748_v4, %v7748_v4  ;;  %v3684_v25 = vpop.f32.mrf.mxu1 }
 0x2ee   : > { %v3727_v18 = vadd.f32 %v3684_v25, %v8208_v24 }
 0x2ef   : > { %5207 = vst.msk [vmem:[%s7723_s22 + $0x48] sm:$0xf] %vm405_vm5, %v5175_v35  ;;  %5234 = vmatpush.msrb.mxu1 %v7768_v37  ;;  %5305 = vmatpush.msrb.mxu3 %v5264_v48  ;;  %v5261_v37 = vmul.f32 %v7716_v36, %v7716_v36 }
 0x2f1   : > { %5235 = vmatpush.msrb.mxu1 %v7748_v4  ;;  %5306 = vmatpush.msrb.mxu3 %v5263_v26 }
 0x2f2   : > { %v3989_v55 = vpop.f32.mrf.mxu2  ;;  %v5092_v10 = vpop.f32.mrf.mxu0 }
 0x2f3   : > { %v8044_v38 = vadd.f32 %v5092_v10, %v4718_v51  ;;  %5236 = vmatpush.msrb.mxu1 %v7716_v36  ;;  %5307 = vmatpush.msrb.mxu3 %v5262_v49  ;;  %v4038_v16 = vadd.f32 %v3989_v55, %v3723_v61 }
 0x2f4   : > { %v4669_v39 = vpop.f32.mrf.mxu3 }
 0x2f5   : > { %v5176_v58 = vpack.c.bf16 %v8044_v38, %v8044_v38  ;;  %5308 = vmatpush.msrb.mxu3 %v5261_v37  ;;  %v4719_v4 = vadd.f32 %v4669_v39, %v4037_v13  ;;  %v3687_v60 = vpop.f32.mrf.mxu1  ;;  %v8209_v37 = vld [vmem:[#allocation4_spill] sm:$0xff] }
 0x2f6   : > { %v3728_v48 = vadd.f32 %v3687_v60, %v7601_v40 }
 0x2f7   : > { %5208 = vst.msk [vmem:[%s7723_s22 + $0x4c] sm:$0xf] %vm405_vm5, %v5176_v58 }
 0x2fa   : > { %v3992_v41 = vpop.f32.mrf.mxu2  ;;  %v5095_v5 = vpop.f32.mrf.mxu0 }
 0x2fb   : > { %v8054_v3 = vadd.f32 %v5095_v5, %v4719_v4  ;;  %v4039_v42 = vadd.f32 %v3992_v41, %v3724_v27 }
 0x2fc   : > { %v4671_v32 = vpop.f32.mrf.mxu3 }
 0x2fd   : > { %v5177_v36 = vpack.c.bf16 %v8054_v3, %v8054_v3  ;;  %v4720_v53 = vadd.f32 %v4671_v32, %v4038_v16  ;;  %v3689_v31 = vpop.f32.mrf.mxu1  ;;  %v8210_v32 = vld [vmem:[#allocation5_spill] sm:$0xff] }
 0x2fe   : > { %v3729_v13 = vadd.f32 %v3689_v31, %v8209_v37 }
 0x2ff   : > { %5209 = vst.msk [vmem:[%s7723_s22 + $0x50] sm:$0xf] %vm405_vm5, %v5177_v36 }
 0x302   : > { %v3994_v22 = vpop.f32.mrf.mxu2  ;;  %v5097_v11 = vpop.f32.mrf.mxu0 }
 0x303   : > { %v8061_v9 = vadd.f32 %v5097_v11, %v4720_v53  ;;  %v4040_v54 = vadd.f32 %v3994_v22, %v3725_v46 }
 0x304   : > { %v4674_v59 = vpop.f32.mrf.mxu3 }
 0x305   : > { %v5178_v21 = vpack.c.bf16 %v8061_v9, %v8061_v9  ;;  %v4721_v44 = vadd.f32 %v4674_v59, %v4039_v42  ;;  %v3692_v10 = vpop.f32.mrf.mxu1 }
 0x306   : > { %v3730_v16 = vadd.f32 %v3692_v10, %v8210_v32 }
 0x307   : > { %5210 = vst.msk [vmem:[%s7723_s22 + $0x54] sm:$0xf] %vm405_vm5, %v5178_v21  ;;  %v8211_v21 = vld [vmem:[#allocation6_spill] sm:$0xff] }
 0x30a   : > { %v3997_v7 = vpop.f32.mrf.mxu2  ;;  %v5100_v8 = vpop.f32.mrf.mxu0 }
 0x30b   : > { %v8068_v2 = vadd.f32 %v5100_v8, %v4721_v44  ;;  %v4041_v56 = vadd.f32 %v3997_v7, %v3726_v52 }
 0x30c   : > { %v4676_v15 = vpop.f32.mrf.mxu3 }
 0x30d   : > { %v5179_v47 = vpack.c.bf16 %v8068_v2, %v8068_v2  ;;  %v4722_v0 = vadd.f32 %v4676_v15, %v4040_v54  ;;  %v3694_v36 = vpop.f32.mrf.mxu1 }
 0x30e   : > { %v3731_v44 = vadd.f32 %v3694_v36, %v8211_v21 }
 0x30f   : > { %5211 = vst.msk [vmem:[%s7723_s22 + $0x58] sm:$0xf] %vm405_vm5, %v5179_v47 }
 0x312   : > { %v3999_v34 = vpop.f32.mrf.mxu2  ;;  %v5102_v23 = vpop.f32.mrf.mxu0 }
 0x313   : > { %v8075_v29 = vadd.f32 %v5102_v23, %v4722_v0  ;;  %v4042_v43 = vadd.f32 %v3999_v34, %v3727_v18  ;;  %v8212_v34 = vld [vmem:[#allocation7_spill] sm:$0xff]  ;;  %v8213_v18 = vld [vmem:[#allocation8_spill] sm:$0xff] }
 0x314   : > { %v4679_v20 = vpop.f32.mrf.mxu3 }
 0x315   : > { %v5180_v14 = vpack.c.bf16 %v8075_v29, %v8075_v29  ;;  %v4723_v28 = vadd.f32 %v4679_v20, %v4041_v56  ;;  %v3697_v15 = vpop.f32.mrf.mxu1 }
 0x316   : > { %v3732_v52 = vadd.f32 %v3697_v15, %v8212_v34 }
 0x317   : > { %5212 = vst.msk [vmem:[%s7723_s22 + $0x5c] sm:$0xf] %vm405_vm5, %v5180_v14 }
 0x31a   : > { %v4002_v6 = vpop.f32.mrf.mxu2  ;;  %v5105_v57 = vpop.f32.mrf.mxu0 }
 0x31b   : > { %v8082_v19 = vadd.f32 %v5105_v57, %v4723_v28  ;;  %v4043_v62 = vadd.f32 %v4002_v6, %v3728_v48 }
 0x31c   : > { %v4681_v12 = vpop.f32.mrf.mxu3 }
 0x31d   : > { %v5181_v17 = vpack.c.bf16 %v8082_v19, %v8082_v19  ;;  %v4724_v63 = vadd.f32 %v4681_v12, %v4042_v43  ;;  %v3699_v28 = vpop.f32.mrf.mxu1 }
 0x31e   : > { %v3733_v57 = vadd.f32 %v3699_v28, %v8213_v18 }
 0x31f   : > { %5213 = vst.msk [vmem:[%s7723_s22 + $0x60] sm:$0xf] %vm405_vm5, %v5181_v17 }
 0x322   : > { %v4004_v35 = vpop.f32.mrf.mxu2  ;;  %v5107_v51 = vpop.f32.mrf.mxu0 }
 0x323   : > { %v8089_v55 = vadd.f32 %v5107_v51, %v4724_v63  ;;  %v4044_v41 = vadd.f32 %v4004_v35, %v3729_v13 }
 0x324   : > { %v4684_v26 = vpop.f32.mrf.mxu3 }
 0x325   : > { %v5182_v49 = vpack.c.bf16 %v8089_v55, %v8089_v55  ;;  %v4725_v39 = vadd.f32 %v4684_v26, %v4043_v62 }
 0x327   : > { %5214 = vst.msk [vmem:[%s7723_s22 + $0x64] sm:$0xf] %vm405_vm5, %v5182_v49  ;;  %v6288_v49 = vmov 1.0  }
 0x328   : > { %5237 = vmatmul.f32.vlgmr.msrb.gmra.mxu1 %v6288_v49  ;;  %5309 = vmatmul.f32.vlgmr.msrb.gmra.mxu3 %v6288_v49 }
 0x32a   : > { %v4007_v33 = vpop.f32.mrf.mxu2  ;;  %v5110_v58 = vpop.f32.mrf.mxu0 }
 0x32b   : > { %v8096_v40 = vadd.f32 %v5110_v58, %v4725_v39  ;;  %v4045_v27 = vadd.f32 %v4007_v33, %v3730_v16  ;;  %v5286_v58 = vmul.f32 %v8089_v55, %v8089_v55 }
 0x32c   : > { %v4686_v4 = vpop.f32.mrf.mxu3 }
 0x32d   : > { %v5183_v61 = vpack.c.bf16 %v8096_v40, %v8096_v40  ;;  %v4726_v5 = vadd.f32 %v4686_v4, %v4044_v41  ;;  %v5287_v33 = vmul.f32 %v8096_v40, %v8096_v40  ;;  %v5285_v4 = vmul.f32 %v8082_v19, %v8082_v19 }
 0x32e   : > { %v5284_v41 = vmul.f32 %v8075_v29, %v8075_v29 }
 0x32f   : > { %5215 = vst.msk [vmem:[%s7723_s22 + $0x68] sm:$0xf] %vm405_vm5, %v5183_v61 }
 0x332   : > { %v5112_v1 = vpop.f32.mrf.mxu0  ;;  %v4009_v11 = vpop.f32.mrf.mxu2 }
 0x333   : > { %v5152_v22 = vadd.f32 %v5112_v1, %v4726_v5  ;;  %v4046_v8 = vadd.f32 %v4009_v11, %v3731_v44 }
 0x334   : > { %v4689_v53 = vpop.f32.mrf.mxu3 }
 0x335   : > { %v5184_v59 = vpack.c.bf16 %v5152_v22, %v5152_v22  ;;  %v4727_v42 = vadd.f32 %v4689_v53, %v4045_v27  ;;  %v5288_v13 = vmul.f32 %v5152_v22, %v5152_v22 }
 0x337   : > { %5216 = vst.msk [vmem:[%s7723_s22 + $0x6c] sm:$0xf] %vm405_vm5, %v5184_v59 }
 0x33a   : > { %v5115_v7 = vpop.f32.mrf.mxu0  ;;  %v4012_v47 = vpop.f32.mrf.mxu2 }
 0x33b   : > { %v5153_v25 = vadd.f32 %v5115_v7, %v4727_v42  ;;  %v4047_v60 = vadd.f32 %v4012_v47, %v3732_v52 }
 0x33c   : > { %v4691_v46 = vpop.f32.mrf.mxu3 }
 0x33d   : > { %v5185_v54 = vpack.c.bf16 %v5153_v25, %v5153_v25  ;;  %v4728_v0 = vadd.f32 %v4691_v46, %v4046_v8  ;;  %v5289_v37 = vmul.f32 %v5153_v25, %v5153_v25 }
 0x33f   : > { %5217 = vst.msk [vmem:[%s7723_s22 + $0x70] sm:$0xf] %vm405_vm5, %v5185_v54 }
 0x342   : > { %v5117_v23 = vpop.f32.mrf.mxu0  ;;  %v4014_v24 = vpop.f32.mrf.mxu2 }
 0x343   : > { %v5154_v20 = vadd.f32 %v5117_v23, %v4728_v0  ;;  %v4048_v31 = vadd.f32 %v4014_v24, %v3733_v57 }
 0x344   : > { %v4694_v56 = vpop.f32.mrf.mxu3 }
 0x345   : > { %v5186_v14 = vpack.c.bf16 %v5154_v20, %v5154_v20  ;;  %v4729_v6 = vadd.f32 %v4694_v56, %v4047_v60  ;;  %v5290_v39 = vmul.f32 %v5154_v20, %v5154_v20 }
 0x347   : > { %5218 = vst.msk [vmem:[%s7723_s22 + $0x74] sm:$0xf] %vm405_vm5, %v5186_v14 }
 0x34a   : > { %v5120_v12 = vpop.f32.mrf.mxu0 }
 0x34b   : > { %v5155_v43 = vadd.f32 %v5120_v12, %v4729_v6 }
 0x34c   : > { %v4696_v63 = vpop.f32.mrf.mxu3 }
 0x34d   : > { %v5187_v17 = vpack.c.bf16 %v5155_v43, %v5155_v43  ;;  %v4730_v35 = vadd.f32 %v4696_v63, %v4048_v31  ;;  %v5291_v10 = vmul.f32 %v5155_v43, %v5155_v43 }
 0x34f   : > { %5219 = vst.msk [vmem:[%s7723_s22 + $0x78] sm:$0xf] %vm405_vm5, %v5187_v17 }
 0x352   : > { %v5122_v48 = vpop.f32.mrf.mxu0 }
 0x353   : > { %v5156_v51 = vadd.f32 %v5122_v48, %v4730_v35 }
 0x355   : > { %v5188_v26 = vpack.c.bf16 %v5156_v51, %v5156_v51  ;;  %v5292_v62 = vmul.f32 %v5156_v51, %v5156_v51  ;;  %5241 = vmatpush.msrb.mxu2 %v5156_v51 }
 0x357   : > { %5220 = vst.msk [vmem:[%s7723_s22 + $0x7c] sm:$0xf] %vm405_vm5, %v5188_v26  ;;  %5242 = vmatpush.msrb.mxu2 %v5155_v43  ;;  %5313 = vmatpush.msra.mxu1 %v5292_v62 }
 0x359   : > { %5243 = vmatpush.msrb.mxu2 %v5154_v20  ;;  %5314 = vmatpush.msra.mxu1 %v5291_v10 }
 0x35b   : > { %5244 = vmatpush.msrb.mxu2 %v5153_v25  ;;  %5315 = vmatpush.msra.mxu1 %v5290_v39 }
 0x35d   : > { %5245 = vmatpush.msrb.mxu2 %v5152_v22  ;;  %5316 = vmatpush.msra.mxu1 %v5289_v37 }
 0x35f   : > { %5246 = vmatpush.msrb.mxu2 %v8096_v40  ;;  %5317 = vmatpush.msra.mxu1 %v5288_v13  ;;  %v5283_v40 = vmul.f32 %v8068_v2, %v8068_v2 }
 0x361   : > { %5247 = vmatpush.msrb.mxu2 %v8089_v55  ;;  %5318 = vmatpush.msra.mxu1 %v5287_v33  ;;  %v5282_v55 = vmul.f32 %v8061_v9, %v8061_v9 }
 0x363   : > { %5248 = vmatpush.msrb.mxu2 %v8082_v19  ;;  %5319 = vmatpush.msra.mxu1 %v5286_v58  ;;  %v5281_v19 = vmul.f32 %v8054_v3, %v8054_v3 }
 0x365   : > { %5249 = vmatpush.msrb.mxu2 %v8075_v29  ;;  %5320 = vmatpush.msra.mxu1 %v5285_v4  ;;  %v5280_v29 = vmul.f32 %v8044_v38, %v8044_v38 }
 0x367   : > { %5250 = vmatpush.msrb.mxu2 %v8068_v2  ;;  %5321 = vmatpush.msra.mxu1 %v5284_v41  ;;  %v5279_v2 = vmul.f32 %v8024_v45, %v8024_v45 }
 0x369   : > { %5251 = vmatpush.msrb.mxu2 %v8061_v9  ;;  %5322 = vmatpush.msra.mxu1 %v5283_v40  ;;  %v5278_v9 = vmul.f32 %v8004_v30, %v8004_v30 }
 0x36b   : > { %5252 = vmatpush.msrb.mxu2 %v8054_v3  ;;  %5323 = vmatpush.msra.mxu1 %v5282_v55  ;;  %v5277_v3 = vmul.f32 %v7988_v50, %v7988_v50 }
 0x36d   : > { %5253 = vmatpush.msrb.mxu2 %v8044_v38  ;;  %5324 = vmatpush.msra.mxu1 %v5281_v19 }
 0x36f   : > { %5254 = vmatpush.msrb.mxu2 %v8024_v45  ;;  %5325 = vmatpush.msra.mxu1 %v5280_v29 }
 0x371   : > { %5255 = vmatpush.msrb.mxu2 %v8004_v30  ;;  %5326 = vmatpush.msra.mxu1 %v5279_v2 }
 0x373   : > { %5256 = vmatpush.msrb.mxu2 %v7988_v50  ;;  %5327 = vmatpush.msra.mxu1 %v5278_v9 }
 0x374   : > { %5257 = vmatmul.f32.vlgmr.msrb.gmra.mxu2 %v6288_v49 }
 0x375   : > { %5328 = vmatpush.msra.mxu1 %v5277_v3 }
 0x376   : > { %5329 = vmatmul.f32.vlgmr.msra.gmra.mxu1 %v6288_v49 }
 0x3a5   : > { %v5238_v38 = vpop.f32.mrf.mxu1 }
 0x3ab   : > { %v5310_v61 = vpop.f32.mrf.mxu3 }
 0x3f3   : > { %v5330_v5 = vpop.f32.mrf.mxu1 }
 0x3f4   : > { %v5331_v32 = vadd.f32 %v5330_v5, %v5310_v61 }
 0x3f6   : > { %v5334_v45 = vrot.slane %v5331_v32, 7 }
 0x3f7   : > { %v5258_v16 = vpop.f32.mrf.mxu2 }
 0x3f8   : > { %v5259_v30 = vadd.f32 %v5258_v16, %v5238_v38 }
 0x3fa   : > { %v5337_v36 = vsel %vm5336_vm0, %v5259_v30, %v5334_v45 }
 0x3fb   : > { %5339 = vst.msk [vmem:[%s235_s26] sm:$0x3] %vm5338_vm1, %v5337_v36 }
 0x3fc PF: > { %s16_s18 = sadd.s32 1, %s6285_s18  }
 0x3fd   : > { %p13_p4 = scmp.ge.s32.totalorder %s16_s18, 4  }
 0x3ff   :  { %15 = sbr.rel (!%p13_p4) target bundleno = 1 (0x1), region = 89 }

// kernel: basic_block.3
= control target key start
LH: loop header
LB: loop body
LE: loop exit
PB: predicated region body
PF: predicated region fallthrough
CT: control target
= control target key end

     0   :  { %9 = vsyncpa [#allocation4], 0  ;;  %s8002_s0 = inlined_call_operand.hbm [shape: f32[2,16,16,64], index: 0, kind: input, shape index: {}]   ;;  %s8003_s1 = inlined_call_operand.vmem [shape: bf16[9,64,64], index: 1, kind: input, shape index: {}]   ;;  %s8004_s2 = inlined_call_operand.vmem [shape: bf16[2,16,16,64], index: 2, kind: output, shape index: {0}]   ;;  %s8005_s3 = inlined_call_operand.vmem [shape: f32[2,2,64], index: 3, kind: output, shape index: {1}]  }
   0x1   :  { %11 = vsyncpa [#allocation4 + $0x1], 0  ;;  %s6162_s12 = smov 0   ;;  %s6164_s13 = smov 0  }
   0x2   :  { %s6166_s14 = smov 0   ;;  %s6168_s15 = smov 0  }
   0x3 LB: > { %s6181_s16 = sadd.s32 4294967295, %s6136_s15   ;;  %s6184_s17 = sadd.s32 1, %s6136_s15   ;;  %s6136_s15 = sphi %s6168_s15, %s8064_s15   ;;  %s6132_s14 = sphi %s6166_s14, %s8063_s14   ;;  %s6128_s13 = sphi %s6164_s13, %s8062_s13   ;;  %s6124_s12 = sphi %s6162_s12, %s8061_s12  }
   0x4   : > { %s21_s18 = ssub.s32 %s6136_s15, %s6184_s17  ;;  %s24_s19 = sadd.s32 1, %s6132_s14 }
   0x5   : > { %p22_p0 = scmp.eq.s32.totalorder %s21_s18, 0  ;;  %p31_p1 = scmp.ne.s32.totalorder %s6132_s14, %s6128_s13 }
   0x6   : > { %p32_p2 = scmp.eq.s32.totalorder %s6136_s15, 0  ;;  %p37_p3 = scmp.ne.s32.totalorder %s6128_s13, %s6124_s12 }
   0x7   : > { %s6194_s20 = scalar_select %p22_p0, %s6132_s14, %s24_s19  }
   0x8   : > { %p6196_p4 = por %p32_p2, %p31_p1  ;;  %p38_p5 = scmp.eq.s32.totalorder %s6181_s16, 0 }
   0x9   : > { %p5979_p6 = scmp.lt.s32.totalorder %s6136_s15, 2  ;;  %s137_s23 = sand.u32 1, %s6132_s14  }
   0xa   : > { %p6202_p7 = por %p38_p5, %p37_p3  ;;  %s5273_s24 = sshll.u32 %s137_s23, 8 }
   0xb   : > { %s5875_s25 = sshll.u32 %s6136_s15, 8  ;;  %s141_s29 = scalar_lea.vmem [#allocation3], %s5273_s24 }
   0xc   : > { %s146_s28 = scalar_lea.hbm %s8002_s0, %s5875_s25  ;;  %s149_s30 = sshll.u32 %s141_s29, 4  ;;  %s150_s30 = int_to_ptr.vmem [resolvable:$true] %s149_s30 }
   0xd   : > { %s147_s4 = sshll.u32 %s146_s28, 4  ;;  %p6213_p8 = pnand %p5979_p6, %p6196_p4  ;;  %s148_s4 = int_to_ptr.hbm [resolvable:$true] %s147_s4 }
   0xe   : > { %p5276_p9 = scmp.ge.s32.totalorder %s6136_s15, 1  ;;  %s138_s6 = scalar_lea.sflag [#allocation4], %s137_s23 }
   0xf   : > { %s6072_s7 = sshra.s32 %s148_s4, 4  ;;  %p6076_p11 = pneg %p6213_p8  ;;  %s6073_s7 = int_to_ptr.hbm [resolvable:$true] %s6072_s7 }
  0x10   : > { %s6074_s8 = scalar_lea.hbm %s6073_s7, 256  ;;  %s6079_s11 = scalar_lea.hbm %s8002_s0, 512 }
  0x11   : > { %p6075_p10 = scmp.ne.s32.totalorder %s6073_s7, %s6074_s8  ;;  %p6080_p0 = scmp.lt.s32.totalorder %s6073_s7, %s8002_s0 }
  0x12   : > { %p6081_p1 = scmp.lt.s32.totalorder %s6079_s11, %s6074_s8 }
  0x13   : > { %p6077_p12 = pnand %p6076_p11, %p6075_p10 }
  0x14   : > { %p6082_p2 = por %p6081_p1, %p6080_p0 }
  0x15   : > { %p6078_p13 = pneg %p6077_p12 }
  0x17   : > { %p6083_p3 = pnand %p6082_p2, %p6078_p13 }
  0x19   : > { %6086 = shalt.err (!%p6083_p3)
}
  0x1a   : > { %s6138_s19 = smov 128   ;;  %s6139_s21 = smov 8  }
  0x1b   : > { %5978 = dma.hbm_to_vmem [thread:$0]  (!%p6213_p8), %s148_s4, 4096, %s150_s30, %s138_s6, %s6138_s19, %s6138_s19, %s6139_s21  }
  0x1c   : > { %p157_p4 = scmp.lt.s32.totalorder %s6136_s15, 3 }
  0x1e   : > { %p158_p5 = pnand %p5276_p9, %p157_p4 }
  0x20   : > { %161 = sbr.rel (%p158_p5) target bundleno = 1020 (0x3fc), region = 28 }
  0x25   : > { %s163_s23 = sand.u32 1, %s6128_s13  }
  0x26   : > { %s5277_s24 = sshll.u32 %s163_s23, 8  ;;  %s164_s25 = scalar_lea.sflag [#allocation4], %s163_s23 }
  0x27   : > { %s6232_s26 = scalar_lea.vmem [#allocation3], %s5277_s24 }
  0x28   : > { %6119 = dma.done.wait (%p6202_p7), %s164_s25, 4096  }
  0x29   : > { %6121 = vsyncadd (%p6202_p7), %s164_s25, 4294963200  ;;  %vm237_vm0 = vcmask 519168   ;;  %v6140_v0 = vmov 0   ;;  %vm240_vm1 = vcmask 516096   ;;  %vm247_vm2 = vsmask.f32 256 }
  0x2a   : > { %238 = vst.msk [vmem:[#allocation2] sm:$0xf] %vm237_vm0, %v6140_v0  ;;  %vm303_vm3 = vsmask.f32 7938  ;;  %vm6242_vm4 = vmand %vm240_vm1, %vm247_vm2  ;;  %v5900_v2 = vld [vmem:[%s8003_s1 + $0x38] sm:$0xff]  ;;  %v5899_v4 = vld [vmem:[%s8003_s1 + $0x30] sm:$0xff] }
  0x2b   : > { %239 = vst.msk [vmem:[#allocation2 + $0x4] sm:$0xf] %vm237_vm0, %v6140_v0  ;;  %vm6251_vm5 = vmand %vm240_vm1, %vm303_vm3  ;;  %v213_v5 = vld [vmem:[%s6232_s26 + $0x40] sm:$0xff]  ;;  %v214_v6 = vld [vmem:[%s6232_s26 + $0x48] sm:$0xff]  ;;  %vm391_vm6 = vsmask.f32 4368  ;;  %5961 = vmatpush.bf16.msra.mxu1 %v5900_v2  ;;  %5962 = vmatpush.bf16.msra.mxu2 %v5900_v2 }
  0x2c   : > { %241 = vst.msk [vmem:[#allocation2 + $0x8] sm:$0x1] %vm240_vm1, %v6140_v0  ;;  %v264_v7 = vld [vmem:[#allocation2 + $0x3c] sm:$0x1]  ;;  %v320_v8 = vld [vmem:[#allocation2 + $0x44] sm:$0x1]  ;;  %v367_v9 = vpack.c.bf16 %v213_v5, %v213_v5  ;;  %v368_v10 = vpack.c.bf16 %v214_v6, %v214_v6  ;;  %5963 = vmatpush.bf16.msra.mxu3 %v5900_v2  ;;  %1405 = vmatpush.bf16.msra.mxu0 %v5900_v2  ;;  %vm6276_vm7 = vmor %vm247_vm2, %vm391_vm6 }
  0x2d   : > { %243 = vst.msk [vmem:[#allocation2 + $0xcc] sm:$0xf] %vm237_vm0, %v6140_v0  ;;  %v215_v11 = vld [vmem:[%s6232_s26 + $0x50] sm:$0xff]  ;;  %v265_v12 = vsel %vm6242_vm4, 0, %v264_v7  ;;  %v321_v13 = vsel %vm6251_vm5, 0, %v320_v8  ;;  %v216_v14 = vld [vmem:[%s6232_s26 + $0x58] sm:$0xff]  ;;  %vm6286_vm8 = vmand %vm237_vm0, %vm303_vm3 }
  0x2e   : > { %244 = vst.msk [vmem:[#allocation2 + $0xd0] sm:$0xf] %vm237_vm0, %v6140_v0  ;;  %v267_v15 = vld [vmem:[#allocation2 + $0x48] sm:$0x1]  ;;  %v369_v16 = vpack.c.bf16 %v215_v11, %v215_v11  ;;  %v225_v17 = vld [vmem:[%s6232_s26 + $0xa0] sm:$0xff]  ;;  %v462_v19 = vshrl.u32 %v367_v9, 16  ;;  %v370_v25 = vpack.c.bf16 %v216_v14, %v216_v14 }
  0x2f   : > { %245 = vst.msk [vmem:[#allocation2 + $0xd4] sm:$0x1] %vm240_vm1, %v6140_v0  ;;  %v5898_v18 = vld [vmem:[%s8003_s1 + $0x28] sm:$0xff]  ;;  %v465_v20 = vshll.u32 %v367_v9, 16  ;;  %v470_v21 = vshrl.u32 %v368_v10, 16  ;;  %v473_v22 = vshll.u32 %v368_v10, 16  ;;  %v379_v27 = vpack.c.bf16 %v225_v17, %v225_v17  ;;  %5964 = vmatpush.bf16.msra.mxu1 %v5899_v4  ;;  %5965 = vmatpush.bf16.msra.mxu2 %v5899_v4 }
  0x30   : > { %266 = vst [vmem:[#allocation2 + $0x3c] sm:$0x1] %v265_v12  ;;  %v268_v23 = vsel %vm6242_vm4, 0, %v267_v15  ;;  %v323_v24 = vld [vmem:[#allocation2 + $0x50] sm:$0x1]  ;;  %v479_v26 = vshrl.u32 %v369_v16, 16  ;;  %5966 = vmatpush.bf16.msra.mxu3 %v5899_v4  ;;  %1406 = vmatpush.bf16.msra.mxu0 %v5899_v4 }
  0x31   : > { %322 = vst [vmem:[#allocation2 + $0x44] sm:$0x1] %v321_v13  ;;  %v464_v28 = vrot.slane %v462_v19, 7  ;;  %v472_v29 = vrot.slane %v470_v21, 7  ;;  %v324_v30 = vsel %vm6251_vm5, 0, %v323_v24  ;;  %v482_v31 = vshll.u32 %v369_v16, 16 }
  0x32   : > { %269 = vst [vmem:[#allocation2 + $0x48] sm:$0x1] %v268_v23  ;;  %v481_v33 = vrot.slane %v479_v26, 7  ;;  %v487_v34 = vshrl.u32 %v370_v25, 16  ;;  %v490_v35 = vshll.u32 %v370_v25, 16  ;;  %v226_v36 = vld [vmem:[%s6232_s26 + $0xa8] sm:$0xff] }
  0x33   : > { %325 = vst [vmem:[#allocation2 + $0x50] sm:$0x1] %v324_v30  ;;  %v467_v37 = vor.u32 %v465_v20, %v464_v28  ;;  %v468_v38 = vrot.slane %v464_v28, 4  ;;  %v475_v39 = vor.u32 %v473_v22, %v472_v29  ;;  %v477_v40 = vrot.slane %v472_v29, 4  ;;  %v282_v41 = vld [vmem:[#allocation2 + $0x84] sm:$0x1]  ;;  %5967 = vmatpush.bf16.msra.mxu1 %v5898_v18  ;;  %5968 = vmatpush.bf16.msra.mxu2 %v5898_v18 }
  0x34   : > { %v338_v42 = vld [vmem:[#allocation2 + $0x8c] sm:$0x1]  ;;  %v5897_v43 = vld [vmem:[%s8003_s1 + $0x20] sm:$0xff]  ;;  %v484_v45 = vor.u32 %v482_v31, %v481_v33  ;;  %v485_v46 = vrot.slane %v481_v33, 4  ;;  %v489_v47 = vrot.slane %v487_v34, 7  ;;  %v283_v48 = vsel %vm6242_vm4, 0, %v282_v41  ;;  %5969 = vmatpush.bf16.msra.mxu3 %v5898_v18  ;;  %1407 = vmatpush.bf16.msra.mxu0 %v5898_v18 }
  0x35   : > { %v476_v49 = vsel %vm6276_vm7, %v468_v38, %v475_v39  ;;  %284 = vst [vmem:[#allocation2 + $0x84] sm:$0x1] %v283_v48  ;;  %v339_v50 = vsel %vm6251_vm5, 0, %v338_v42  ;;  %v380_v51 = vpack.c.bf16 %v226_v36, %v226_v36  ;;  %v564_v52 = vshrl.u32 %v379_v27, 16  ;;  %v5896_v53 = vld [vmem:[%s8003_s1 + $0x18] sm:$0xff]  ;;  %v5895_v18 = vld [vmem:[%s8003_s1 + $0x10] sm:$0xff] }
  0x36   : > { %v249_v54 = vld [vmem:[#allocation2] sm:$0x1]  ;;  %747 = vst.msk [vmem:[#allocation2 + $0x40] sm:$0xf] %vm237_vm0, %v476_v49  ;;  %v492_v56 = vor.u32 %v490_v35, %v489_v47  ;;  %v494_v57 = vrot.slane %v489_v47, 4  ;;  %v567_v58 = vshll.u32 %v379_v27, 16 }
  0x37   : > { %v744_v55 = vld [vmem:[#allocation2 + $0x3c] sm:$0xf]  ;;  %340 = vst [vmem:[#allocation2 + $0x8c] sm:$0x1] %v339_v50  ;;  %v566_v61 = vrot.slane %v564_v52, 7  ;;  %v572_v62 = vshrl.u32 %v380_v51, 16  ;;  %5970 = vmatpush.bf16.msra.mxu1 %v5897_v43  ;;  %5971 = vmatpush.bf16.msra.mxu2 %v5897_v43 }
  0x38   : > { %v745_v59 = vsel %vm6286_vm8, %v467_v37, %v744_v55  ;;  %v748_v60 = vld [vmem:[#allocation2 + $0x44] sm:$0x1]  ;;  %vm884_vm9 = vsmask.f32 3328  ;;  %vm885_vm10 = vsmask.f32 7440  ;;  %v493_v0 = vsel %vm6276_vm7, %v485_v46, %v492_v56  ;;  %5972 = vmatpush.bf16.msra.mxu3 %v5897_v43  ;;  %1408 = vmatpush.bf16.msra.mxu0 %v5897_v43 }
  0x39   : > { %746 = vst [vmem:[#allocation2 + $0x3c] sm:$0xf] %v745_v59  ;;  %v749_v63 = vsel %vm6242_vm4, %v477_v40, %v748_v60  ;;  %v751_v2 = vld [vmem:[#allocation2 + $0x48] sm:$0xf]  ;;  %v575_v4 = vshll.u32 %v380_v51, 16  ;;  %v569_v7 = vor.u32 %v567_v58, %v566_v61  ;;  %v570_v8 = vrot.slane %v566_v61, 4  ;;  %vm6342_vm12 = vmor %vm884_vm9, %vm885_vm10 }
  0x3a   : > { %750 = vst [vmem:[#allocation2 + $0x44] sm:$0x1] %v749_v63  ;;  %v752_v5 = vsel %vm6286_vm8, %v484_v45, %v751_v2  ;;  %v755_v6 = vld [vmem:[#allocation2 + $0x50] sm:$0x1]  ;;  %v574_v9 = vrot.slane %v572_v62, 7  ;;  %v250_v11 = vsel %vm6242_vm4, 0, %v249_v54 }
  0x3b   : > { %753 = vst [vmem:[#allocation2 + $0x48] sm:$0xf] %v752_v5  ;;  %v756_v10 = vsel %vm6242_vm4, %v494_v57, %v755_v6  ;;  %v305_v12 = vld [vmem:[#allocation2 + $0x8] sm:$0x1]  ;;  %v829_v13 = vld [vmem:[#allocation2 + $0x4] sm:$0xf]  ;;  %1646 = vmatpush.bf16.msrb.mxu1 %v5896_v53 }
  0x3c   : > { %754 = vst.msk [vmem:[#allocation2 + $0x4c] sm:$0xf] %vm237_vm0, %v493_v0  ;;  %v577_v14 = vor.u32 %v575_v4, %v574_v9  ;;  %v579_v15 = vrot.slane %v574_v9, 4  ;;  %v897_v16 = vshll.u32 %v829_v13, 16  ;;  %v901_v17 = vshrl.u32 %v829_v13, 16  ;;  %v217_v20 = vld [vmem:[%s6232_s26 + $0x60] sm:$0xff] }
  0x3d   : > { %757 = vst [vmem:[#allocation2 + $0x50] sm:$0x1] %v756_v10  ;;  %v786_v19 = vld [vmem:[#allocation2 + $0x84] sm:$0xf]  ;;  %v839_v21 = vld [vmem:[#allocation2 + $0x40] sm:$0xf]  ;;  %v6337_v45 = vpack.c.bf16 %v217_v20, %v217_v20 }
  0x3e   : > { %v578_v22 = vsel %vm6276_vm7, %v570_v8, %v577_v14  ;;  %v787_v23 = vsel %vm6286_vm8, %v569_v7, %v786_v19  ;;  %251 = vst [vmem:[#allocation2] sm:$0x1] %v250_v11  ;;  %v6321_v24 = vrot.slane %v897_v16, 5  ;;  %v903_v25 = vrot.slane %v901_v17, 4  ;;  %v790_v28 = vld [vmem:[#allocation2 + $0x8c] sm:$0x1] }
  0x3f   : > { %v1017_v26 = vshll.u32 %v839_v21, 16  ;;  %v1021_v27 = vshrl.u32 %v839_v21, 16  ;;  %788 = vst [vmem:[#allocation2 + $0x84] sm:$0xf] %v787_v23  ;;  %v791_v30 = vsel %vm6242_vm4, %v579_v15, %v790_v28  ;;  %v306_v31 = vsel %vm6251_vm5, 0, %v305_v12  ;;  %1647 = vmatpush.bf16.msrb.mxu1 %v5895_v18  ;;  %v5894_v34 = vld [vmem:[%s8003_s1 + $0x8] sm:$0xff] }
  0x40   : > { %v838_v29 = vld [vmem:[#allocation2 + $0x3c] sm:$0xf]  ;;  %789 = vst.msk [vmem:[#allocation2 + $0x88] sm:$0xf] %vm237_vm0, %v578_v22  ;;  %v904_v33 = vor.u32 %v903_v25, %v6321_v24  ;;  %v5893_v43 = vld [vmem:[%s8003_s1] sm:$0xff]  ;;  %vm1352_vm11 = vcmask 523264  }
  0x41   : > { %v873_v35 = vld [vmem:[#allocation2 + $0x44] sm:$0x1]  ;;  %v1008_v36 = vshrl.u32 %v838_v29, 16  ;;  %v1011_v37 = vshll.u32 %v838_v29, 16  ;;  %v1019_v38 = vrot.slane %v1017_v26, 5  ;;  %v1023_v39 = vrot.slane %v1021_v27, 4 }
  0x42   : > { %v1027_v40 = vshll.u32 %v873_v35, 16  ;;  %v840_v41 = vld [vmem:[#allocation2 + $0x48] sm:$0xf]  ;;  %792 = vst [vmem:[#allocation2 + $0x8c] sm:$0x1] %v791_v30  ;;  %v6332_v42 = vrot.slane %v904_v33, 4 }
  0x43   : > { %v1010_v46 = vrot.slane %v1008_v36, 4  ;;  %v1013_v47 = vrot.slane %v1011_v37, 5  ;;  %v1024_v48 = vor.u32 %v1023_v39, %v1019_v38  ;;  %v841_v49 = vld [vmem:[#allocation2 + $0x4c] sm:$0xf]  ;;  %v1032_v50 = vshrl.u32 %v840_v41, 16  ;;  %v218_v51 = vld [vmem:[%s6232_s26 + $0x68] sm:$0xff]  ;;  %1648 = vmatpush.bf16.msrb.mxu1 %v5894_v34 }
  0x44   : > { %v1029_v53 = vrot.slane %v1027_v40, 5  ;;  %v874_v54 = vld [vmem:[#allocation2 + $0x50] sm:$0x1]  ;;  %v1035_v55 = vshll.u32 %v840_v41, 16  ;;  %v1041_v56 = vshll.u32 %v841_v49, 16  ;;  %v1045_v57 = vshrl.u32 %v841_v49, 16 }
  0x45   : > { %v1014_v58 = vor.u32 %v1013_v47, %v1010_v46  ;;  %v1025_v59 = vrot.slane %v1024_v48, 4  ;;  %v1034_v60 = vrot.slane %v1032_v50, 4  ;;  %v1051_v61 = vshll.u32 %v874_v54, 16  ;;  %307 = vst [vmem:[#allocation2 + $0x8] sm:$0x1] %v306_v31  ;;  %v227_v36 = vld [vmem:[%s6232_s26 + $0xb0] sm:$0xff] }
  0x46   : > { %v1037_v62 = vrot.slane %v1035_v55, 5  ;;  %v1043_v63 = vrot.slane %v1041_v56, 5  ;;  %v1047_v0 = vrot.slane %v1045_v57, 4  ;;  %v850_v2 = vld [vmem:[#allocation2 + $0x84] sm:$0xf]  ;;  %v6346_v4 = vpack.c.bf16 %v218_v51, %v218_v51  ;;  %p195_p6 = scmp.lt.s32.totalorder %s6181_s16, 1 }
  0x47   : > { %v1015_v5 = vrot.slane %v1014_v58, 4  ;;  %v1030_v6 = vsel %vm6342_vm12, %v1025_v59, %v1029_v53  ;;  %v1053_v7 = vrot.slane %v1051_v61, 5  ;;  %v851_v8 = vld [vmem:[#allocation2 + $0x88] sm:$0xf]  ;;  %v1152_v9 = vshrl.u32 %v850_v2, 16  ;;  %1649 = vmatpush.bf16.msrb.mxu1 %v5893_v43 }
  0x48   : > { %v1291_v10 = vunpack.c.l.b16 %v1030_v6  ;;  %v1038_v11 = vor.u32 %v1037_v62, %v1034_v60  ;;  %v1048_v12 = vor.u32 %v1047_v0, %v1043_v63  ;;  %v1155_v13 = vshll.u32 %v850_v2, 16  ;;  %v828_v27 = vld [vmem:[#allocation2] sm:$0xf]  ;;  %v270_v35 = vld [vmem:[#allocation2 + $0x54] sm:$0x1]  ;;  %s8066_s16 = smov (!%p195_p6, %s6181_s16), 1 }
  0x49   : > { %v1020_v14 = vsel %vm6342_vm12, %v1015_v5, %v1019_v38  ;;  %v879_v15 = vld [vmem:[#allocation2 + $0x8c] sm:$0x1]  ;;  %v1154_v16 = vrot.slane %v1152_v9, 4  ;;  %v1161_v17 = vshll.u32 %v851_v8, 16  ;;  %v1165_v18 = vshrl.u32 %v851_v8, 16  ;;  %s5876_s5 = sshll.u32 %s8066_s16, 7 }
  0x4a   : > { %v1290_v19 = vunpack.c.l.b16 %v1020_v14  ;;  %v1039_v20 = vrot.slane %v1038_v11, 4  ;;  %v1049_v21 = vrot.slane %v1048_v12, 4  ;;  %v1157_v22 = vrot.slane %v1155_v13, 5  ;;  %v326_v48 = vld [vmem:[#allocation2 + $0x5c] sm:$0x1]  ;;  %s7549_s8 = scalar_lea.vmem %s8004_s2, %s5876_s5  ;;  %s5280_s9 = sshll.u32 %s8066_s16, 1 }
  0x4b   : > { %v1163_v23 = vrot.slane %v1161_v17, 5  ;;  %v1167_v25 = vrot.slane %v1165_v18, 4  ;;  %v1171_v26 = vshll.u32 %v879_v15, 16  ;;  %v496_v28 = vshrl.u32 %v6337_v45, 16  ;;  %v285_v62 = vld [vmem:[#allocation2 + $0x90] sm:$0x1]  ;;  %s203_s12 = scalar_lea.vmem %s8005_s3, %s5280_s9 }
  0x4c   : > { %v1317_v29 = vpack.c.b16 %v1291_v10, %v1290_v19  ;;  %v1044_v30 = vsel %vm6342_vm12, %v1039_v20, %v1043_v63  ;;  %v1054_v31 = vsel %vm6342_vm12, %v1049_v21, %v1053_v7  ;;  %v1158_v33 = vor.u32 %v1157_v22, %v1154_v16  ;;  %v868_v34 = vld [vmem:[#allocation2 + $0x8] sm:$0x1]  ;;  %v341_v63 = vld [vmem:[#allocation2 + $0x98] sm:$0x1]  ;;  %v228_v7 = vld [vmem:[%s6232_s26 + $0xb8] sm:$0xff] }
  0x4d   : > { %v1292_v37 = vunpack.c.l.b16 %v1044_v30  ;;  %v1293_v38 = vunpack.c.l.b16 %v1054_v31  ;;  %v1168_v39 = vor.u32 %v1167_v25, %v1163_v23  ;;  %v1173_v40 = vrot.slane %v1171_v26, 5  ;;  %v252_v8 = vld [vmem:[#allocation2 + $0xc] sm:$0x1]  ;;  %v308_v13 = vld [vmem:[#allocation2 + $0x14] sm:$0x1]  ;;  %v205_v17 = vld [vmem:[%s6232_s26] sm:$0xff] }
  0x4e   : > { %5310 = vmatmul.msk.bf16.vlgmr.msra.gmra.mxu1 %vm1352_vm11, %v1317_v29  ;;  %v1159_v41 = vrot.slane %v1158_v33, 4  ;;  %v888_v43 = vshrl.u32 %v828_v27, 16  ;;  %v891_v46 = vshll.u32 %v828_v27, 16  ;;  %v907_v47 = vshll.u32 %v868_v34, 16  ;;  %v206_v21 = vld [vmem:[%s6232_s26 + $0x8] sm:$0xff]  ;;  %v219_v26 = vld [vmem:[%s6232_s26 + $0x70] sm:$0xff] }
  0x4f   : > { %v1318_v49 = vpack.c.b16 %v1293_v38, %v1292_v37  ;;  %v1169_v50 = vrot.slane %v1168_v39, 4  ;;  %v271_v51 = vsel %vm6242_vm4, 0, %v270_v35  ;;  %v381_v53 = vpack.c.bf16 %v227_v36, %v227_v36  ;;  %v273_v36 = vld [vmem:[#allocation2 + $0x60] sm:$0x1]  ;;  %v356_v1 = vld [vmem:[#allocation2 + $0xd4] sm:$0x1] }
  0x50   : > { %v1164_v54 = vsel %vm6342_vm12, %v1159_v41, %v1163_v23  ;;  %v890_v55 = vrot.slane %v888_v43, 4  ;;  %v893_v56 = vrot.slane %v891_v46, 5  ;;  %v909_v57 = vrot.slane %v907_v47, 5  ;;  %272 = vst [vmem:[#allocation2 + $0x54] sm:$0x1] %v271_v51  ;;  %v5877_v47 = vld [vmem:[#allocation2] sm:$0xff] }
  0x51   : > { %5311 = vmatmul.msk.bf16.vlgmr.msra.gmra.mxu2 %vm1352_vm11, %v1318_v49  ;;  %v1174_v58 = vsel %vm6342_vm12, %v1169_v50, %v1173_v40  ;;  %v1302_v59 = vunpack.c.l.b16 %v1164_v54  ;;  %v327_v60 = vsel %vm6251_vm5, 0, %v326_v48  ;;  %v498_v61 = vrot.slane %v496_v28, 7  ;;  %v220_v50 = vld [vmem:[%s6232_s26 + $0x78] sm:$0xff]  ;;  %v329_v54 = vld [vmem:[#allocation2 + $0x68] sm:$0x1] }
  0x52   : > { %v1303_v0 = vunpack.c.l.b16 %v1174_v58  ;;  %v894_v2 = vor.u32 %v893_v56, %v890_v55  ;;  %v910_v5 = vsel %vm6342_vm12, %v6332_v42, %v909_v57  ;;  %328 = vst [vmem:[#allocation2 + $0x5c] sm:$0x1] %v327_v60  ;;  %v499_v6 = vshll.u32 %v6337_v45, 16 }
  0x53   : > { %v1281_v9 = vunpack.c.l.b16 %v910_v5  ;;  %v502_v10 = vrot.slane %v498_v61, 4  ;;  %v504_v11 = vshrl.u32 %v6346_v4, 16  ;;  %v507_v12 = vshll.u32 %v6346_v4, 16 }
  0x54   : > { %v1323_v14 = vpack.c.b16 %v1303_v0, %v1302_v59  ;;  %v895_v15 = vrot.slane %v894_v2, 4  ;;  %v501_v16 = vor.u32 %v499_v6, %v498_v61  ;;  %v286_v42 = vsel %vm6242_vm4, 0, %v285_v62  ;;  %v229_v61 = vld [vmem:[%s6232_s26 + $0xc0] sm:$0xff] }
  0x55   : > { %v506_v18 = vrot.slane %v504_v11, 7  ;;  %287 = vst [vmem:[#allocation2 + $0x90] sm:$0x1] %v286_v42  ;;  %v342_v45 = vsel %vm6251_vm5, 0, %v341_v63  ;;  %v382_v19 = vpack.c.bf16 %v228_v7, %v228_v7  ;;  %v581_v20 = vshrl.u32 %v381_v53, 16 }
  0x56   : > { %5316 = vmatmul.msk.bf16.vlgmr.msra.gmra.mxu3 %vm1352_vm11, %v1323_v14  ;;  %v900_v4 = vsel %vm6342_vm12, %v895_v15, %v6321_v24  ;;  %343 = vst [vmem:[#allocation2 + $0x98] sm:$0x1] %v342_v45  ;;  %v584_v22 = vshll.u32 %v381_v53, 16  ;;  %v253_v23 = vsel %vm6242_vm4, 0, %v252_v8  ;;  %v309_v25 = vsel %vm6251_vm5, 0, %v308_v13  ;;  %v207_v45 = vld [vmem:[%s6232_s26 + $0x10] sm:$0xff] }
  0x57   : > { %v1280_v27 = vunpack.c.l.b16 %v900_v4  ;;  %v509_v28 = vor.u32 %v507_v12, %v506_v18  ;;  %v511_v29 = vrot.slane %v506_v18, 4  ;;  %v758_v30 = vld [vmem:[#allocation2 + $0x54] sm:$0xf]  ;;  %v583_v31 = vrot.slane %v581_v20, 7  ;;  %254 = vst [vmem:[#allocation2 + $0xc] sm:$0x1] %v253_v23 }
  0x58   : > { %v759_v33 = vsel %vm6286_vm8, %v501_v16, %v758_v30  ;;  %v589_v34 = vshrl.u32 %v382_v19, 16  ;;  %v592_v24 = vshll.u32 %v382_v19, 16  ;;  %310 = vst [vmem:[#allocation2 + $0x14] sm:$0x1] %v309_v25  ;;  %v359_v35 = vpack.c.bf16 %v205_v17, %v205_v17  ;;  %v208_v23 = vld [vmem:[%s6232_s26 + $0x18] sm:$0xff] }
  0x59   : > { %v1312_v37 = vpack.c.b16 %v1281_v9, %v1280_v27  ;;  %v510_v38 = vsel %vm6276_vm7, %v502_v10, %v509_v28  ;;  %760 = vst [vmem:[#allocation2 + $0x54] sm:$0xf] %v759_v33  ;;  %v762_v39 = vld [vmem:[#allocation2 + $0x5c] sm:$0x1]  ;;  %v586_v40 = vor.u32 %v584_v22, %v583_v31  ;;  %v587_v41 = vrot.slane %v583_v31, 4  ;;  %v230_v10 = vld [vmem:[%s6232_s26 + $0xc8] sm:$0xff] }
  0x5a   : > { %761 = vst.msk [vmem:[#allocation2 + $0x58] sm:$0xf] %vm237_vm0, %v510_v38  ;;  %v763_v43 = vsel %vm6242_vm4, %v511_v29, %v762_v39  ;;  %v591_v46 = vrot.slane %v589_v34, 7  ;;  %v360_v48 = vpack.c.bf16 %v206_v21, %v206_v21  ;;  %v394_v49 = vshrl.u32 %v359_v35, 16 }
  0x5b   : > { %5305 = vmatmul.msk.bf16.vlgmr.msra.gmra.mxu0 %vm1352_vm11, %v1312_v37  ;;  %764 = vst [vmem:[#allocation2 + $0x5c] sm:$0x1] %v763_v43  ;;  %v397_v51 = vshll.u32 %v359_v35, 16  ;;  %v274_v53 = vsel %vm6242_vm4, 0, %v273_v36  ;;  %v373_v55 = vpack.c.bf16 %v219_v26, %v219_v26  ;;  %v330_v9 = vsel %vm6251_vm5, 0, %v329_v54 }
  0x5c   : > { %v594_v56 = vor.u32 %v592_v24, %v591_v46  ;;  %v596_v57 = vrot.slane %v591_v46, 4  ;;  %v793_v58 = vld [vmem:[#allocation2 + $0x90] sm:$0xf]  ;;  %v396_v59 = vrot.slane %v394_v49, 7  ;;  %v402_v60 = vshrl.u32 %v360_v48, 16 }
  0x5d   : > { %v794_v62 = vsel %vm6286_vm8, %v586_v40, %v793_v58  ;;  %v797_v63 = vld [vmem:[#allocation2 + $0x98] sm:$0x1]  ;;  %v405_v0 = vshll.u32 %v360_v48, 16  ;;  %275 = vst [vmem:[#allocation2 + $0x60] sm:$0x1] %v274_v53  ;;  %v513_v2 = vshrl.u32 %v373_v55, 16  ;;  %v6413_v13 = vpack.c.bf16 %v220_v50, %v220_v50 }
  0x5e   : > { %v595_v5 = vsel %vm6276_vm7, %v587_v41, %v594_v56  ;;  %795 = vst [vmem:[#allocation2 + $0x90] sm:$0xf] %v794_v62  ;;  %v798_v6 = vsel %vm6242_vm4, %v596_v57, %v797_v63  ;;  %5401 = vmatmul.msk.bf16.vlgmr.msrb.gmra.mxu1 %vm1352_vm11, %v5877_v47  ;;  %v399_v7 = vor.u32 %v397_v51, %v396_v59  ;;  %v716_v8 = vld [vmem:[#allocation2 + $0xc] sm:$0xf]  ;;  %v404_v11 = vrot.slane %v402_v60, 7 }
  0x5f   : > { %796 = vst.msk [vmem:[#allocation2 + $0x94] sm:$0xf] %vm237_vm0, %v595_v5  ;;  %v720_v12 = vld [vmem:[#allocation2 + $0x14] sm:$0x1]  ;;  %v6415_v14 = vrot.slane %v513_v2, 7  ;;  %v400_v16 = vrot.slane %v396_v59, 4  ;;  %v6419_v18 = vpack.c.bf16 %v229_v61, %v229_v61  ;;  %v6424_v29 = vpack.c.bf16 %v230_v10, %v230_v10 }
  0x60   : > { %v842_v15 = vld [vmem:[#allocation2 + $0x54] sm:$0xf]  ;;  %799 = vst [vmem:[#allocation2 + $0x98] sm:$0x1] %v798_v6  ;;  %v717_v42 = vsel %vm6286_vm8, %v399_v7, %v716_v8  ;;  %v516_v17 = vshll.u32 %v373_v55, 16  ;;  %v407_v4 = vor.u32 %v405_v0, %v404_v11  ;;  %v409_v22 = vrot.slane %v404_v11, 4 }
  0x61   : > { %v843_v19 = vld [vmem:[#allocation2 + $0x58] sm:$0xf]  ;;  %v1056_v20 = vshrl.u32 %v842_v15, 16  ;;  %v1059_v21 = vshll.u32 %v842_v15, 16  ;;  %718 = vst [vmem:[#allocation2 + $0xc] sm:$0xf] %v717_v42  ;;  %v6434_v46 = vpack.c.bf16 %v207_v45, %v207_v45  ;;  %v6436_v51 = vpack.c.bf16 %v208_v23, %v208_v23 }
  0x62   : > { %v875_v25 = vld [vmem:[#allocation2 + $0x5c] sm:$0x1]  ;;  %v1065_v26 = vshll.u32 %v843_v19, 16  ;;  %v1069_v27 = vshrl.u32 %v843_v19, 16  ;;  %v518_v28 = vor.u32 %v516_v17, %v6415_v14  ;;  %331 = vst [vmem:[#allocation2 + $0x68] sm:$0x1] %v330_v9  ;;  %v408_v36 = vsel %vm6276_vm7, %v400_v16, %v407_v4 }
  0x63   : > { %v1058_v30 = vrot.slane %v1056_v20, 4  ;;  %v1061_v31 = vrot.slane %v1059_v21, 5  ;;  %v1075_v33 = vshll.u32 %v875_v25, 16  ;;  %v521_v34 = vshrl.u32 %v6413_v13, 16  ;;  %719 = vst.msk [vmem:[#allocation2 + $0x10] sm:$0xf] %vm237_vm0, %v408_v36 }
  0x64   : > { %v1067_v24 = vrot.slane %v1065_v26, 5  ;;  %v1071_v35 = vrot.slane %v1069_v27, 4  ;;  %v721_v37 = vsel %vm6242_vm4, %v409_v22, %v720_v12  ;;  %v765_v38 = vld [vmem:[#allocation2 + $0x60] sm:$0xf]  ;;  %v519_v57 = vrot.slane %v6415_v14, 4 }
  0x65   : > { %v1062_v39 = vor.u32 %v1061_v31, %v1058_v30  ;;  %v1077_v40 = vrot.slane %v1075_v33, 5  ;;  %v852_v41 = vld [vmem:[#allocation2 + $0x90] sm:$0xf]  ;;  %v766_v43 = vsel %vm6286_vm8, %v518_v28, %v765_v38  ;;  %722 = vst [vmem:[#allocation2 + $0x14] sm:$0x1] %v721_v37  ;;  %v523_v6 = vrot.slane %v521_v34, 7 }
  0x66   : > { %v1072_v47 = vor.u32 %v1071_v35, %v1067_v24  ;;  %v853_v48 = vld [vmem:[#allocation2 + $0x94] sm:$0xf]  ;;  %v1176_v49 = vshrl.u32 %v852_v41, 16  ;;  %v1179_v50 = vshll.u32 %v852_v41, 16  ;;  %v288_v58 = vld [vmem:[#allocation2 + $0x9c] sm:$0x1] }
  0x67   : > { %v1063_v53 = vrot.slane %v1062_v39, 4  ;;  %v880_v54 = vld [vmem:[#allocation2 + $0x98] sm:$0x1]  ;;  %v1185_v55 = vshll.u32 %v853_v48, 16  ;;  %v1189_v56 = vshrl.u32 %v853_v48, 16  ;;  %v524_v17 = vshll.u32 %v6413_v13, 16 }
  0x68   : > { %v1073_v59 = vrot.slane %v1072_v47, 4  ;;  %v1178_v60 = vrot.slane %v1176_v49, 4  ;;  %v1181_v61 = vrot.slane %v1179_v50, 5  ;;  %v1195_v62 = vshll.u32 %v880_v54, 16  ;;  %767 = vst [vmem:[#allocation2 + $0x60] sm:$0xf] %v766_v43 }
  0x69   : > { %v1068_v63 = vsel %vm6342_vm12, %v1063_v53, %v1067_v24  ;;  %v1187_v0 = vrot.slane %v1185_v55, 5  ;;  %v1191_v2 = vrot.slane %v1189_v56, 4  ;;  %v830_v5 = vld [vmem:[#allocation2 + $0xc] sm:$0xf]  ;;  %v528_v45 = vrot.slane %v523_v6, 4 }
  0x6a   : > { %v1078_v7 = vsel %vm6342_vm12, %v1073_v59, %v1077_v40  ;;  %v1294_v8 = vunpack.c.l.b16 %v1068_v63  ;;  %v1182_v9 = vor.u32 %v1181_v61, %v1178_v60  ;;  %v1197_v10 = vrot.slane %v1195_v62, 5  ;;  %v831_v42 = vld [vmem:[#allocation2 + $0x10] sm:$0xf]  ;;  %v769_v19 = vld [vmem:[#allocation2 + $0x68] sm:$0x1] }
  0x6b   : > { %v1295_v11 = vunpack.c.l.b16 %v1078_v7  ;;  %v1192_v12 = vor.u32 %v1191_v2, %v1187_v0  ;;  %v912_v14 = vshrl.u32 %v830_v5, 16  ;;  %v915_v15 = vshll.u32 %v830_v5, 16  ;;  %v5878_v31 = vld [vmem:[#allocation2 + $0xc] sm:$0xff]  ;;  %v344_v36 = vld [vmem:[#allocation2 + $0xa4] sm:$0x1] }
  0x6c   : > { %v1183_v16 = vrot.slane %v1182_v9, 4  ;;  %v289_v20 = vsel %vm6242_vm4, 0, %v288_v58  ;;  %v869_v22 = vld [vmem:[#allocation2 + $0x14] sm:$0x1]  ;;  %v921_v27 = vshll.u32 %v831_v42, 16  ;;  %v925_v28 = vshrl.u32 %v831_v42, 16 }
  0x6d   : > { %v1319_v21 = vpack.c.b16 %v1295_v11, %v1294_v8  ;;  %v1193_v4 = vrot.slane %v1192_v12, 4  ;;  %v914_v23 = vrot.slane %v912_v14, 4  ;;  %v917_v25 = vrot.slane %v915_v15, 5  ;;  %290 = vst [vmem:[#allocation2 + $0x9c] sm:$0x1] %v289_v20 }
  0x6e   : > { %v1188_v26 = vsel %vm6342_vm12, %v1183_v16, %v1187_v0  ;;  %v931_v30 = vshll.u32 %v869_v22, 16  ;;  %v526_v24 = vor.u32 %v524_v17, %v523_v6  ;;  %v923_v38 = vrot.slane %v921_v27, 5  ;;  %5402 = vmatmul.msk.bf16.gmra.mxu1 %vm1352_vm11, %v5878_v31  ;;  %v255_v49 = vld [vmem:[#allocation2 + $0x18] sm:$0x1]  ;;  %v311_v56 = vld [vmem:[#allocation2 + $0x20] sm:$0x1] }
  0x6f   : > { %5312 = vmatmul.msk.bf16.gmra.mxu2 %vm1352_vm11, %v1319_v21  ;;  %v1198_v13 = vsel %vm6342_vm12, %v1193_v4, %v1197_v10  ;;  %v1304_v33 = vunpack.c.l.b16 %v1188_v26  ;;  %v918_v34 = vor.u32 %v917_v25, %v914_v23  ;;  %v844_v35 = vld [vmem:[#allocation2 + $0x60] sm:$0xf]  ;;  %v927_v39 = vrot.slane %v925_v28, 4  ;;  %v276_v25 = vld [vmem:[#allocation2 + $0x6c] sm:$0x1] }
  0x70   : > { %v1305_v37 = vunpack.c.l.b16 %v1198_v13  ;;  %v933_v40 = vrot.slane %v931_v30, 5  ;;  %v527_v43 = vsel %vm6276_vm7, %v519_v57, %v526_v24  ;;  %v770_v47 = vsel %vm6242_vm4, %v528_v45, %v769_v19  ;;  %v221_v45 = vld [vmem:[%s6232_s26 + $0x80] sm:$0xff]  ;;  %v222_v19 = vld [vmem:[%s6232_s26 + $0x88] sm:$0xff]  ;;  %v231_v26 = vld [vmem:[%s6232_s26 + $0xd0] sm:$0xff] }
  0x71   : > { %v919_v41 = vrot.slane %v918_v34, 4  ;;  %v1080_v48 = vshrl.u32 %v844_v35, 16  ;;  %v928_v53 = vor.u32 %v927_v39, %v923_v38  ;;  %768 = vst.msk [vmem:[#allocation2 + $0x64] sm:$0xf] %vm237_vm0, %v527_v43  ;;  %v1083_v54 = vshll.u32 %v844_v35, 16 }
  0x72   : > { %v1324_v50 = vpack.c.b16 %v1305_v37, %v1304_v33  ;;  %v345_v55 = vsel %vm6251_vm5, 0, %v344_v36  ;;  %771 = vst [vmem:[#allocation2 + $0x68] sm:$0x1] %v770_v47  ;;  %v598_v57 = vshrl.u32 %v6419_v18, 16  ;;  %v601_v60 = vshll.u32 %v6419_v18, 16 }
  0x73   : > { %v924_v58 = vsel %vm6342_vm12, %v919_v41, %v923_v38  ;;  %v1082_v59 = vrot.slane %v1080_v48, 4  ;;  %v929_v61 = vrot.slane %v928_v53, 4  ;;  %v1085_v63 = vrot.slane %v1083_v54, 5  ;;  %346 = vst [vmem:[#allocation2 + $0xa4] sm:$0x1] %v345_v55  ;;  %v232_v55 = vld [vmem:[%s6232_s26 + $0xd8] sm:$0xff] }
  0x74   : > { %5317 = vmatmul.msk.bf16.gmra.mxu3 %vm1352_vm11, %v1324_v50  ;;  %v1282_v62 = vunpack.c.l.b16 %v924_v58  ;;  %v606_v0 = vshrl.u32 %v6424_v29, 16  ;;  %v600_v2 = vrot.slane %v598_v57, 7  ;;  %v609_v5 = vshll.u32 %v6424_v29, 16  ;;  %v800_v10 = vld [vmem:[#allocation2 + $0x9c] sm:$0xf] }
  0x75   : > { %v256_v6 = vsel %vm6242_vm4, 0, %v255_v49  ;;  %v312_v7 = vsel %vm6251_vm5, 0, %v311_v56  ;;  %v934_v18 = vsel %vm6342_vm12, %v929_v61, %v933_v40  ;;  %v1086_v8 = vor.u32 %v1085_v63, %v1082_v59  ;;  %v332_v40 = vld [vmem:[#allocation2 + $0x74] sm:$0x1]  ;;  %v291_v56 = vld [vmem:[#allocation2 + $0xa8] sm:$0x1] }
  0x76   : > { %v608_v9 = vrot.slane %v606_v0, 7  ;;  %257 = vst [vmem:[#allocation2 + $0x18] sm:$0x1] %v256_v6  ;;  %v411_v11 = vshrl.u32 %v6434_v46, 16  ;;  %v1283_v12 = vunpack.c.l.b16 %v934_v18  ;;  %v603_v29 = vor.u32 %v601_v60, %v600_v2  ;;  %v347_v61 = vld [vmem:[#allocation2 + $0xb0] sm:$0x1] }
  0x77   : > { %v604_v14 = vrot.slane %v600_v2, 4  ;;  %313 = vst [vmem:[#allocation2 + $0x20] sm:$0x1] %v312_v7  ;;  %v414_v15 = vshll.u32 %v6434_v46, 16  ;;  %v1087_v4 = vrot.slane %v1086_v8, 4  ;;  %v419_v23 = vshrl.u32 %v6436_v51, 16 }
  0x78   : > { %v611_v16 = vor.u32 %v609_v5, %v608_v9  ;;  %v613_v42 = vrot.slane %v608_v9, 4  ;;  %v413_v17 = vrot.slane %v411_v11, 7  ;;  %v1313_v20 = vpack.c.b16 %v1283_v12, %v1282_v62  ;;  %v845_v21 = vld [vmem:[#allocation2 + $0x64] sm:$0xf] }
  0x79   : > { %v801_v22 = vsel %vm6286_vm8, %v603_v29, %v800_v10  ;;  %v876_v27 = vld [vmem:[#allocation2 + $0x68] sm:$0x1]  ;;  %v1089_v28 = vshll.u32 %v845_v21, 16  ;;  %v1093_v30 = vshrl.u32 %v845_v21, 16  ;;  %v422_v34 = vshll.u32 %v6436_v51, 16 }
  0x7a   : > { %v612_v46 = vsel %vm6276_vm7, %v604_v14, %v611_v16  ;;  %802 = vst [vmem:[#allocation2 + $0x9c] sm:$0xf] %v801_v22  ;;  %v416_v31 = vor.u32 %v414_v15, %v413_v17  ;;  %5306 = vmatmul.msk.bf16.gmra.mxu0 %vm1352_vm11, %v1313_v20  ;;  %v1099_v13 = vshll.u32 %v876_v27, 16  ;;  %v804_v33 = vld [vmem:[#allocation2 + $0xa4] sm:$0x1]  ;;  %v375_v24 = vpack.c.bf16 %v221_v45, %v221_v45 }
  0x7b   : > { %803 = vst.msk [vmem:[#allocation2 + $0xa0] sm:$0xf] %vm237_vm0, %v612_v46  ;;  %v6485_v35 = vpack.c.bf16 %v222_v19, %v222_v19  ;;  %v1091_v36 = vrot.slane %v1089_v28, 5  ;;  %v1095_v37 = vrot.slane %v1093_v30, 4  ;;  %v805_v38 = vsel %vm6242_vm4, %v613_v42, %v804_v33 }
  0x7c   : > { %v417_v39 = vrot.slane %v413_v17, 4  ;;  %v1101_v41 = vrot.slane %v1099_v13, 5  ;;  %806 = vst [vmem:[#allocation2 + $0xa4] sm:$0x1] %v805_v38  ;;  %v421_v43 = vrot.slane %v419_v23, 7  ;;  %v6489_v48 = vpack.c.bf16 %v231_v26, %v231_v26  ;;  %v209_v17 = vld [vmem:[%s6232_s26 + $0x20] sm:$0xff] }
  0x7d   : > { %v723_v47 = vld [vmem:[#allocation2 + $0x18] sm:$0xf]  ;;  %v1092_v51 = vsel %vm6342_vm12, %v1087_v4, %v1091_v36  ;;  %v1096_v49 = vor.u32 %v1095_v37, %v1091_v36  ;;  %v277_v54 = vsel %vm6242_vm4, 0, %v276_v25  ;;  %v333_v60 = vsel %vm6251_vm5, 0, %v332_v40 }
  0x7e   : > { %v724_v50 = vsel %vm6286_vm8, %v416_v31, %v723_v47  ;;  %v727_v53 = vld [vmem:[#allocation2 + $0x20] sm:$0x1]  ;;  %v1296_v58 = vunpack.c.l.b16 %v1092_v51  ;;  %v424_v59 = vor.u32 %v422_v34, %v421_v43  ;;  %v426_v57 = vrot.slane %v421_v43, 4  ;;  %278 = vst [vmem:[#allocation2 + $0x6c] sm:$0x1] %v277_v54 }
  0x7f   : > { %725 = vst [vmem:[#allocation2 + $0x18] sm:$0xf] %v724_v50  ;;  %v1097_v62 = vrot.slane %v1096_v49, 4  ;;  %v530_v63 = vshrl.u32 %v375_v24, 16  ;;  %v533_v0 = vshll.u32 %v375_v24, 16  ;;  %v538_v2 = vshrl.u32 %v6485_v35, 16 }
  0x80   : > { %v425_v6 = vsel %vm6276_vm7, %v417_v39, %v424_v59  ;;  %v728_v7 = vsel %vm6242_vm4, %v426_v57, %v727_v53  ;;  %334 = vst [vmem:[#allocation2 + $0x74] sm:$0x1] %v333_v60  ;;  %v541_v18 = vshll.u32 %v6485_v35, 16  ;;  %v292_v8 = vsel %vm6242_vm4, 0, %v291_v56 }
  0x81   : > { %v854_v5 = vld [vmem:[#allocation2 + $0x9c] sm:$0xf]  ;;  %v1102_v9 = vsel %vm6342_vm12, %v1097_v62, %v1101_v41  ;;  %726 = vst.msk [vmem:[#allocation2 + $0x1c] sm:$0xf] %vm237_vm0, %v425_v6  ;;  %v6511_v29 = vpack.c.bf16 %v232_v55, %v232_v55  ;;  %v532_v42 = vrot.slane %v530_v63, 7  ;;  %v540_v21 = vrot.slane %v538_v2, 7 }
  0x82   : > { %v855_v10 = vld [vmem:[#allocation2 + $0xa0] sm:$0xf]  ;;  %v1200_v11 = vshrl.u32 %v854_v5, 16  ;;  %v1203_v12 = vshll.u32 %v854_v5, 16  ;;  %v1297_v14 = vunpack.c.l.b16 %v1102_v9  ;;  %729 = vst [vmem:[#allocation2 + $0x20] sm:$0x1] %v728_v7  ;;  %v6516_v31 = vpack.c.bf16 %v209_v17, %v209_v17 }
  0x83   : > { %v1209_v15 = vshll.u32 %v855_v10, 16  ;;  %v1213_v16 = vshrl.u32 %v855_v10, 16  ;;  %v881_v45 = vld [vmem:[#allocation2 + $0xa4] sm:$0x1]  ;;  %v348_v4 = vsel %vm6251_vm5, 0, %v347_v61  ;;  %v535_v30 = vor.u32 %v533_v0, %v532_v42 }
  0x84   : > { %v1202_v19 = vrot.slane %v1200_v11, 4  ;;  %v1205_v20 = vrot.slane %v1203_v12, 5  ;;  %v1320_v22 = vpack.c.b16 %v1297_v14, %v1296_v58  ;;  %v1219_v26 = vshll.u32 %v881_v45, 16  ;;  %293 = vst [vmem:[#allocation2 + $0xa8] sm:$0x1] %v292_v8 }
  0x85   : > { %v1211_v23 = vrot.slane %v1209_v15, 5  ;;  %v1215_v25 = vrot.slane %v1213_v16, 4  ;;  %v536_v46 = vrot.slane %v532_v42, 4  ;;  %349 = vst [vmem:[#allocation2 + $0xb0] sm:$0x1] %v348_v4  ;;  %v543_v37 = vor.u32 %v541_v18, %v540_v21  ;;  %v210_v16 = vld [vmem:[%s6232_s26 + $0x28] sm:$0xff] }
  0x86   : > { %v1206_v27 = vor.u32 %v1205_v20, %v1202_v19  ;;  %v832_v28 = vld [vmem:[#allocation2 + $0x18] sm:$0xf]  ;;  %5313 = vmatmul.msk.bf16.gmra.mxu2 %vm1352_vm11, %v1320_v22  ;;  %v1221_v33 = vrot.slane %v1219_v26, 5  ;;  %v772_v35 = vld [vmem:[#allocation2 + $0x6c] sm:$0xf]  ;;  %v545_v38 = vrot.slane %v540_v21, 4 }
  0x87   : > { %v1216_v13 = vor.u32 %v1215_v25, %v1211_v23  ;;  %v936_v34 = vshrl.u32 %v832_v28, 16  ;;  %v939_v24 = vshll.u32 %v832_v28, 16  ;;  %v773_v39 = vsel %vm6286_vm8, %v535_v30, %v772_v35  ;;  %v776_v40 = vld [vmem:[#allocation2 + $0x74] sm:$0x1]  ;;  %v258_v5 = vld [vmem:[#allocation2 + $0x24] sm:$0x1] }
  0x88   : > { %v1207_v36 = vrot.slane %v1206_v27, 4  ;;  %v6521_v43 = vld [vmem:[#allocation2 + $0x1c] sm:$0xf]  ;;  %v615_v49 = vshrl.u32 %v6489_v48, 16  ;;  %v544_v56 = vsel %vm6276_vm7, %v536_v46, %v543_v37  ;;  %774 = vst [vmem:[#allocation2 + $0x6c] sm:$0xf] %v773_v39  ;;  %v777_v2 = vsel %vm6242_vm4, %v545_v38, %v776_v40 }
  0x89   : > { %v1217_v41 = vrot.slane %v1216_v13, 4  ;;  %v938_v47 = vrot.slane %v936_v34, 4  ;;  %v941_v51 = vrot.slane %v939_v24, 5  ;;  %v6526_v53 = vld [vmem:[#allocation2 + $0x20] sm:$0x1]  ;;  %v945_v54 = vshll.u32 %v6521_v43, 16 }
  0x8a   : > { %v1212_v50 = vsel %vm6342_vm12, %v1207_v36, %v1211_v23  ;;  %v949_v55 = vshrl.u32 %v6521_v43, 16  ;;  %v955_v60 = vshll.u32 %v6526_v53, 16  ;;  %775 = vst.msk [vmem:[#allocation2 + $0x70] sm:$0xf] %vm237_vm0, %v544_v56  ;;  %v5879_v61 = vld [vmem:[#allocation2 + $0x18] sm:$0xff]  ;;  %v617_v8 = vrot.slane %v615_v49, 7 }
  0x8b   : > { %v1222_v58 = vsel %vm6342_vm12, %v1217_v41, %v1221_v33  ;;  %v1306_v59 = vunpack.c.l.b16 %v1212_v50  ;;  %v942_v57 = vor.u32 %v941_v51, %v938_v47  ;;  %v947_v63 = vrot.slane %v945_v54, 5  ;;  %v314_v6 = vld [vmem:[#allocation2 + $0x2c] sm:$0x1]  ;;  %778 = vst [vmem:[#allocation2 + $0x74] sm:$0x1] %v777_v2  ;;  %5403 = vmatmul.msk.bf16.gmra.mxu1 %vm1352_vm11, %v5879_v61 }
  0x8c   : > { %v1307_v62 = vunpack.c.l.b16 %v1222_v58  ;;  %v951_v0 = vrot.slane %v949_v55, 4  ;;  %v957_v18 = vrot.slane %v955_v60, 5  ;;  %v618_v9 = vshll.u32 %v6489_v48, 16  ;;  %v807_v15 = vld [vmem:[#allocation2 + $0xa8] sm:$0xf] }
  0x8d   : > { %v943_v7 = vrot.slane %v942_v57, 4  ;;  %v623_v12 = vshrl.u32 %v6511_v29, 16  ;;  %v626_v14 = vshll.u32 %v6511_v29, 16  ;;  %v621_v45 = vrot.slane %v617_v8, 4  ;;  %v811_v36 = vld [vmem:[#allocation2 + $0xb0] sm:$0x1] }
  0x8e   : > { %v1325_v10 = vpack.c.b16 %v1307_v62, %v1306_v59  ;;  %v952_v11 = vor.u32 %v951_v0, %v947_v63  ;;  %v620_v17 = vor.u32 %v618_v9, %v617_v8  ;;  %v259_v19 = vsel %vm6242_vm4, 0, %v258_v5  ;;  %v223_v50 = vld [vmem:[%s6232_s26 + $0x90] sm:$0xff]  ;;  %v279_v58 = vld [vmem:[#allocation2 + $0x78] sm:$0x1]  ;;  %v335_v59 = vld [vmem:[#allocation2 + $0x80] sm:$0x1] }
  0x8f   : > { %v948_v42 = vsel %vm6342_vm12, %v943_v7, %v947_v63  ;;  %v625_v21 = vrot.slane %v623_v12, 7  ;;  %260 = vst [vmem:[#allocation2 + $0x24] sm:$0x1] %v259_v19  ;;  %v315_v4 = vsel %vm6251_vm5, 0, %v314_v6  ;;  %v846_v29 = vld [vmem:[#allocation2 + $0x6c] sm:$0xf]  ;;  %v364_v23 = vpack.c.bf16 %v210_v16, %v210_v16 }
  0x90   : > { %5318 = vmatmul.msk.bf16.gmra.mxu3 %vm1352_vm11, %v1325_v10  ;;  %v953_v48 = vrot.slane %v952_v11, 4  ;;  %v1284_v20 = vunpack.c.l.b16 %v948_v42  ;;  %v808_v22 = vsel %vm6286_vm8, %v620_v17, %v807_v15  ;;  %316 = vst [vmem:[#allocation2 + $0x2c] sm:$0x1] %v315_v4  ;;  %v428_v25 = vshrl.u32 %v6516_v31, 16  ;;  %v224_v10 = vld [vmem:[%s6232_s26 + $0x98] sm:$0xff] }
  0x91   : > { %v431_v26 = vshll.u32 %v6516_v31, 16  ;;  %v847_v28 = vld [vmem:[#allocation2 + $0x70] sm:$0xf]  ;;  %v1104_v30 = vshrl.u32 %v846_v29, 16  ;;  %v1107_v46 = vshll.u32 %v846_v29, 16  ;;  %v628_v13 = vor.u32 %v626_v14, %v625_v21 }
  0x92   : > { %v958_v27 = vsel %vm6342_vm12, %v953_v48, %v957_v18  ;;  %809 = vst [vmem:[#allocation2 + $0xa8] sm:$0xf] %v808_v22  ;;  %v1113_v34 = vshll.u32 %v847_v28, 16  ;;  %v1117_v24 = vshrl.u32 %v847_v28, 16  ;;  %v630_v35 = vrot.slane %v625_v21, 4  ;;  %v233_v48 = vld [vmem:[%s6232_s26 + $0xe0] sm:$0xff] }
  0x93   : > { %v1285_v33 = vunpack.c.l.b16 %v958_v27  ;;  %v877_v37 = vld [vmem:[#allocation2 + $0x74] sm:$0x1]  ;;  %v1106_v38 = vrot.slane %v1104_v30, 4  ;;  %v1109_v39 = vrot.slane %v1107_v46, 5  ;;  %v629_v31 = vsel %vm6276_vm7, %v621_v45, %v628_v13  ;;  %v350_v30 = vld [vmem:[#allocation2 + $0xbc] sm:$0x1] }
  0x94   : > { %v430_v40 = vrot.slane %v428_v25, 7  ;;  %v1115_v47 = vrot.slane %v1113_v34, 5  ;;  %v1119_v51 = vrot.slane %v1117_v24, 4  ;;  %v1123_v49 = vshll.u32 %v877_v37, 16  ;;  %810 = vst.msk [vmem:[#allocation2 + $0xac] sm:$0xf] %vm237_vm0, %v629_v31 }
  0x95   : > { %v1314_v41 = vpack.c.b16 %v1285_v33, %v1284_v20  ;;  %v1110_v54 = vor.u32 %v1109_v39, %v1106_v38  ;;  %v812_v55 = vsel %vm6242_vm4, %v630_v35, %v811_v36  ;;  %v436_v62 = vshrl.u32 %v364_v23, 16  ;;  %v294_v28 = vld [vmem:[#allocation2 + $0xb4] sm:$0x1] }
  0x96   : > { %v433_v56 = vor.u32 %v431_v26, %v430_v40  ;;  %v1120_v57 = vor.u32 %v1119_v51, %v1115_v47  ;;  %v1125_v60 = vrot.slane %v1123_v49, 5  ;;  %813 = vst [vmem:[#allocation2 + $0xb0] sm:$0x1] %v812_v55  ;;  %v434_v61 = vrot.slane %v430_v40, 4  ;;  %v730_v2 = vld [vmem:[#allocation2 + $0x24] sm:$0xf] }
  0x97   : > { %5307 = vmatmul.msk.bf16.gmra.mxu0 %vm1352_vm11, %v1314_v41  ;;  %v1111_v63 = vrot.slane %v1110_v54, 4  ;;  %v439_v0 = vshll.u32 %v364_v23, 16  ;;  %v734_v5 = vld [vmem:[#allocation2 + $0x2c] sm:$0x1]  ;;  %v377_v6 = vpack.c.bf16 %v223_v50, %v223_v50  ;;  %v438_v8 = vrot.slane %v436_v62, 7  ;;  %v234_v50 = vld [vmem:[%s6232_s26 + $0xe8] sm:$0xff] }
  0x98   : > { %v1121_v7 = vrot.slane %v1120_v57, 4  ;;  %v731_v9 = vsel %vm6286_vm8, %v433_v56, %v730_v2  ;;  %v280_v11 = vsel %vm6242_vm4, 0, %v279_v58  ;;  %v336_v16 = vsel %vm6251_vm5, 0, %v335_v59 }
  0x99   : > { %v856_v18 = vld [vmem:[#allocation2 + $0xa8] sm:$0xf]  ;;  %v1116_v12 = vsel %vm6342_vm12, %v1111_v63, %v1115_v47  ;;  %732 = vst [vmem:[#allocation2 + $0x24] sm:$0xf] %v731_v9  ;;  %v441_v45 = vor.u32 %v439_v0, %v438_v8  ;;  %v443_v19 = vrot.slane %v438_v8, 4  ;;  %v378_v22 = vpack.c.bf16 %v224_v10, %v224_v10  ;;  %v5904_v8 = vld [vmem:[%s8003_s1 + $0x58] sm:$0xff] }
  0x9a   : > { %v1224_v14 = vshrl.u32 %v856_v18, 16  ;;  %v1227_v15 = vshll.u32 %v856_v18, 16  ;;  %v1126_v42 = vsel %vm6342_vm12, %v1121_v7, %v1125_v60  ;;  %v1298_v17 = vunpack.c.l.b16 %v1116_v12  ;;  %281 = vst [vmem:[#allocation2 + $0x78] sm:$0x1] %v280_v11  ;;  %v5924_v9 = vld [vmem:[%s8003_s1 + $0x78] sm:$0xff]  ;;  %2027 = vmatpush.bf16.msrb.mxu2 %v5904_v8 }
  0x9b   : > { %v1299_v20 = vunpack.c.l.b16 %v1126_v42  ;;  %v857_v21 = vld [vmem:[#allocation2 + $0xac] sm:$0xf]  ;;  %337 = vst [vmem:[#allocation2 + $0x80] sm:$0x1] %v336_v16  ;;  %v442_v26 = vsel %vm6276_vm7, %v434_v61, %v441_v45  ;;  %v735_v27 = vsel %vm6242_vm4, %v443_v19, %v734_v5  ;;  %v547_v34 = vshrl.u32 %v377_v6, 16  ;;  %2341 = vmatpush.bf16.msrb.mxu3 %v5924_v9 }
  0x9c   : > { %v1226_v4 = vrot.slane %v1224_v14, 4  ;;  %v1229_v29 = vrot.slane %v1227_v15, 5  ;;  %v1233_v23 = vshll.u32 %v857_v21, 16  ;;  %v1237_v25 = vshrl.u32 %v857_v21, 16  ;;  %733 = vst.msk [vmem:[#allocation2 + $0x28] sm:$0xf] %vm237_vm0, %v442_v26 }
  0x9d   : > { %v1321_v46 = vpack.c.b16 %v1299_v20, %v1298_v17  ;;  %v882_v13 = vld [vmem:[#allocation2 + $0xb0] sm:$0x1]  ;;  %v550_v24 = vshll.u32 %v377_v6, 16  ;;  %736 = vst [vmem:[#allocation2 + $0x2c] sm:$0x1] %v735_v27  ;;  %v6580_v38 = vpack.c.bf16 %v233_v48, %v233_v48  ;;  %v549_v31 = vrot.slane %v547_v34, 7 }
  0x9e   : > { %v1230_v33 = vor.u32 %v1229_v29, %v1226_v4  ;;  %v1235_v35 = vrot.slane %v1233_v23, 5  ;;  %v1239_v36 = vrot.slane %v1237_v25, 4  ;;  %v1243_v37 = vshll.u32 %v882_v13, 16  ;;  %v261_v23 = vld [vmem:[#allocation2 + $0x30] sm:$0x1] }
  0x9f   : > { %5314 = vmatmul.msk.bf16.gmra.mxu2 %vm1352_vm11, %v1321_v46  ;;  %v555_v40 = vshrl.u32 %v378_v22, 16  ;;  %v558_v41 = vshll.u32 %v378_v22, 16  ;;  %v295_v54 = vsel %vm6242_vm4, 0, %v294_v28  ;;  %v351_v55 = vsel %vm6251_vm5, 0, %v350_v30  ;;  %v211_v22 = vld [vmem:[%s6232_s26 + $0x30] sm:$0xff]  ;;  %v212_v46 = vld [vmem:[%s6232_s26 + $0x38] sm:$0xff] }
  0xa0   : > { %v1231_v39 = vrot.slane %v1230_v33, 4  ;;  %v1240_v47 = vor.u32 %v1239_v36, %v1235_v35  ;;  %v1245_v51 = vrot.slane %v1243_v37, 5  ;;  %v834_v49 = vld [vmem:[#allocation2 + $0x24] sm:$0xf]  ;;  %v552_v57 = vor.u32 %v550_v24, %v549_v31  ;;  %296 = vst [vmem:[#allocation2 + $0xb4] sm:$0x1] %v295_v54 }
  0xa1   : > { %v960_v58 = vshrl.u32 %v834_v49, 16  ;;  %v963_v59 = vshll.u32 %v834_v49, 16  ;;  %v779_v60 = vld [vmem:[#allocation2 + $0x78] sm:$0xf]  ;;  %v553_v63 = vrot.slane %v549_v31, 4  ;;  %v557_v0 = vrot.slane %v555_v40, 7 }
  0xa2   : > { %v1236_v56 = vsel %vm6342_vm12, %v1231_v39, %v1235_v35  ;;  %v1241_v61 = vrot.slane %v1240_v47, 4  ;;  %v783_v2 = vld [vmem:[#allocation2 + $0x80] sm:$0x1]  ;;  %v780_v7 = vsel %vm6286_vm8, %v552_v57, %v779_v60  ;;  %352 = vst [vmem:[#allocation2 + $0xbc] sm:$0x1] %v351_v55  ;;  %v388_v18 = vpack.c.bf16 %v234_v50, %v234_v50  ;;  %v5928_v60 = vld [vmem:[%s8003_s1 + $0x98] sm:$0xff] }
  0xa3   : > { %v1308_v62 = vunpack.c.l.b16 %v1236_v56  ;;  %v962_v5 = vrot.slane %v960_v58, 4  ;;  %v965_v6 = vrot.slane %v963_v59, 5  ;;  %v6600_v11 = vld [vmem:[#allocation2 + $0x28] sm:$0xf]  ;;  %v560_v12 = vor.u32 %v558_v41, %v557_v0  ;;  %781 = vst [vmem:[#allocation2 + $0x78] sm:$0xf] %v780_v7  ;;  %3023 = vmatpush.bf16.msrb.mxu0 %v5928_v60 }
  0xa4   : > { %v1246_v10 = vsel %vm6342_vm12, %v1241_v61, %v1245_v51  ;;  %v562_v14 = vrot.slane %v557_v0, 4  ;;  %v632_v15 = vshrl.u32 %v6580_v38, 16  ;;  %v6603_v42 = vld [vmem:[#allocation2 + $0x2c] sm:$0x1]  ;;  %v969_v45 = vshll.u32 %v6600_v11, 16  ;;  %v5880_v48 = vld [vmem:[#allocation2 + $0x24] sm:$0xff] }
  0xa5   : > { %v1309_v16 = vunpack.c.l.b16 %v1246_v10  ;;  %v966_v17 = vor.u32 %v965_v6, %v962_v5  ;;  %v973_v19 = vshrl.u32 %v6600_v11, 16  ;;  %v979_v20 = vshll.u32 %v6603_v42, 16  ;;  %v317_v25 = vld [vmem:[#allocation2 + $0x38] sm:$0x1]  ;;  %5404 = vmatmul.msk.bf16.gmra.mxu1 %vm1352_vm11, %v5880_v48  ;;  %v5923_v5 = vld [vmem:[%s8003_s1 + $0x70] sm:$0xff]  ;;  %v5902_v48 = vld [vmem:[%s8003_s1 + $0x48] sm:$0xff] }
  0xa6   : > { %v561_v21 = vsel %vm6276_vm7, %v553_v63, %v560_v12  ;;  %v784_v4 = vsel %vm6242_vm4, %v562_v14, %v783_v2  ;;  %v634_v29 = vrot.slane %v632_v15, 7  ;;  %v971_v28 = vrot.slane %v969_v45, 5  ;;  %v5903_v2 = vld [vmem:[%s8003_s1 + $0x50] sm:$0xff]  ;;  %2342 = vmatpush.bf16.msrb.mxu3 %v5923_v5 }
  0xa7   : > { %v1326_v26 = vpack.c.b16 %v1309_v16, %v1308_v62  ;;  %v967_v27 = vrot.slane %v966_v17, 4  ;;  %v975_v30 = vrot.slane %v973_v19, 4  ;;  %782 = vst.msk [vmem:[#allocation2 + $0x7c] sm:$0xf] %vm237_vm0, %v561_v21  ;;  %v981_v13 = vrot.slane %v979_v20, 5  ;;  %v5927_v6 = vld [vmem:[%s8003_s1 + $0x90] sm:$0xff]  ;;  %2028 = vmatpush.bf16.msrb.mxu2 %v5903_v2 }
  0xa8   : > { %785 = vst [vmem:[#allocation2 + $0x80] sm:$0x1] %v784_v4  ;;  %v635_v33 = vshll.u32 %v6580_v38, 16  ;;  %v638_v34 = vrot.slane %v634_v29, 4  ;;  %v640_v24 = vshrl.u32 %v388_v18, 16  ;;  %v643_v37 = vshll.u32 %v388_v18, 16  ;;  %3024 = vmatpush.bf16.msrb.mxu0 %v5927_v6 }
  0xa9   : > { %5319 = vmatmul.msk.bf16.gmra.mxu3 %vm1352_vm11, %v1326_v26  ;;  %v972_v35 = vsel %vm6342_vm12, %v967_v27, %v971_v28  ;;  %v976_v36 = vor.u32 %v975_v30, %v971_v28  ;;  %v262_v39 = vsel %vm6242_vm4, 0, %v261_v23  ;;  %v814_v41 = vld [vmem:[#allocation2 + $0xb4] sm:$0xf]  ;;  %v318_v47 = vsel %vm6251_vm5, 0, %v317_v25  ;;  %v818_v57 = vld [vmem:[#allocation2 + $0xbc] sm:$0x1] }
  0xaa   : > { %v637_v31 = vor.u32 %v635_v33, %v634_v29  ;;  %v642_v40 = vrot.slane %v640_v24, 7  ;;  %263 = vst [vmem:[#allocation2 + $0x30] sm:$0x1] %v262_v39  ;;  %v1286_v51 = vunpack.c.l.b16 %v972_v35  ;;  %v848_v49 = vld [vmem:[#allocation2 + $0x78] sm:$0xf]  ;;  %v365_v50 = vpack.c.bf16 %v211_v22, %v211_v22  ;;  %v5922_v20 = vld [vmem:[%s8003_s1 + $0x68] sm:$0xff] }
  0xab   : > { %v977_v38 = vrot.slane %v976_v36, 4  ;;  %319 = vst [vmem:[#allocation2 + $0x38] sm:$0x1] %v318_v47  ;;  %v366_v54 = vpack.c.bf16 %v212_v46, %v212_v46  ;;  %v1128_v55 = vshrl.u32 %v848_v49, 16  ;;  %v1131_v56 = vshll.u32 %v848_v49, 16  ;;  %2029 = vmatpush.bf16.msrb.mxu2 %v5902_v48  ;;  %v5926_v33 = vld [vmem:[%s8003_s1 + $0x88] sm:$0xff]  ;;  %2343 = vmatpush.bf16.msrb.mxu3 %v5922_v20 }
  0xac   : > { %v645_v58 = vor.u32 %v643_v37, %v642_v40  ;;  %v647_v59 = vrot.slane %v642_v40, 4  ;;  %v815_v62 = vsel %vm6286_vm8, %v637_v31, %v814_v41  ;;  %v445_v63 = vshrl.u32 %v365_v50, 16  ;;  %v5921_v36 = vld [vmem:[%s8003_s1 + $0x60] sm:$0xff]  ;;  %3025 = vmatpush.bf16.msrb.mxu0 %v5926_v33  ;;  %v6682_v20 = vld [vmem:[#allocation2 + $0x10] sm:$0xf] }
  0xad   : > { %v982_v61 = vsel %vm6342_vm12, %v977_v38, %v981_v13  ;;  %v448_v0 = vshll.u32 %v365_v50, 16  ;;  %v1130_v8 = vrot.slane %v1128_v55, 4  ;;  %v1133_v9 = vrot.slane %v1131_v56, 5  ;;  %816 = vst [vmem:[#allocation2 + $0xb4] sm:$0xf] %v815_v62  ;;  %v5925_v41 = vld [vmem:[%s8003_s1 + $0x80] sm:$0xff] }
  0xae   : > { %v1287_v7 = vunpack.c.l.b16 %v982_v61  ;;  %v849_v18 = vld [vmem:[#allocation2 + $0x7c] sm:$0xf]  ;;  %v646_v10 = vsel %vm6276_vm7, %v638_v34, %v645_v58  ;;  %v819_v16 = vsel %vm6242_vm4, %v647_v59, %v818_v57  ;;  %v447_v29 = vrot.slane %v445_v63, 7  ;;  %v5901_v34 = vld [vmem:[%s8003_s1 + $0x40] sm:$0xff] }
  0xaf   : > { %v878_v12 = vld [vmem:[#allocation2 + $0x80] sm:$0x1]  ;;  %v1137_v14 = vshll.u32 %v849_v18, 16  ;;  %v1141_v15 = vshrl.u32 %v849_v18, 16  ;;  %817 = vst.msk [vmem:[#allocation2 + $0xb8] sm:$0xf] %vm237_vm0, %v646_v10  ;;  %v1134_v45 = vor.u32 %v1133_v9, %v1130_v8  ;;  %2030 = vmatpush.bf16.msrb.mxu2 %v5901_v34  ;;  %2344 = vmatpush.bf16.msrb.mxu3 %v5921_v36 }
  0xb0   : > { %v1315_v17 = vpack.c.b16 %v1287_v7, %v1286_v51  ;;  %v1147_v19 = vshll.u32 %v878_v12, 16  ;;  %820 = vst [vmem:[#allocation2 + $0xbc] sm:$0x1] %v819_v16  ;;  %v453_v22 = vshrl.u32 %v366_v54, 16  ;;  %v456_v26 = vshll.u32 %v366_v54, 16  ;;  %3026 = vmatpush.bf16.msrb.mxu0 %v5925_v41 }
  0xb1   : > { %v1139_v21 = vrot.slane %v1137_v14, 5  ;;  %v1143_v4 = vrot.slane %v1141_v15, 4  ;;  %v1135_v23 = vrot.slane %v1134_v45, 4  ;;  %v450_v28 = vor.u32 %v448_v0, %v447_v29  ;;  %v737_v13 = vld [vmem:[#allocation2 + $0x30] sm:$0xf] }
  0xb2   : > { %5308 = vmatmul.msk.bf16.gmra.mxu0 %vm1352_vm11, %v1315_v17  ;;  %v1149_v25 = vrot.slane %v1147_v19, 5  ;;  %v451_v30 = vrot.slane %v447_v29, 4  ;;  %v455_v46 = vrot.slane %v453_v22, 7  ;;  %v741_v35 = vld [vmem:[#allocation2 + $0x38] sm:$0x1]  ;;  %vm1779_vm13 = vcmask 1042432  }
  0xb3   : > { %v1144_v27 = vor.u32 %v1143_v4, %v1139_v21  ;;  %v1140_v24 = vsel %vm6342_vm12, %v1135_v23, %v1139_v21  ;;  %vm1780_vm14 = vcmask 1046532   ;;  %v738_v50 = vsel %vm6286_vm8, %v450_v28, %v737_v13  ;;  %v1731_v54 = vld [vmem:[#allocation2] sm:$0xe]  ;;  %v6016_v6 = vld [vmem:[#allocation2 + $0x4] sm:$0xf] }
  0xb4   : > { %v858_v39 = vld [vmem:[#allocation2 + $0xb4] sm:$0xf]  ;;  %v458_v31 = vor.u32 %v456_v26, %v455_v46  ;;  %v460_v40 = vrot.slane %v455_v46, 4  ;;  %v1300_v47 = vunpack.c.l.b16 %v1140_v24  ;;  %739 = vst [vmem:[#allocation2 + $0x30] sm:$0xf] %v738_v50  ;;  %v1784_v7 = vrot.slane %v6016_v6, 5  ;;  %vm6677_vm15 = vmor %vm1779_vm13, %vm1780_vm14 }
  0xb5   : > { %v1145_v37 = vrot.slane %v1144_v27, 4  ;;  %v1248_v51 = vshrl.u32 %v858_v39, 16  ;;  %v1251_v49 = vshll.u32 %v858_v39, 16  ;;  %v5417_v9 = vrot.slane %v1731_v54, 9  ;;  %v2458_v15 = vld [vmem:[#allocation2 + $0xc] sm:$0xf] }
  0xb6   : > { %v859_v38 = vld [vmem:[#allocation2 + $0xb8] sm:$0xf]  ;;  %v459_v57 = vsel %vm6276_vm7, %v451_v30, %v458_v31  ;;  %v742_v5 = vsel %vm6242_vm4, %v460_v40, %v741_v35  ;;  %v6017_v17 = vld [vmem:[#allocation2 + $0x8] sm:$0x1]  ;;  %v1786_v48 = vrot.slane %v1784_v7, 4  ;;  %v2507_v22 = vshrl.u32 %v2458_v15, 16 }
  0xb7   : > { %v1150_v55 = vsel %vm6342_vm12, %v1145_v37, %v1149_v25  ;;  %v883_v56 = vld [vmem:[#allocation2 + $0xbc] sm:$0x1]  ;;  %v1257_v58 = vshll.u32 %v859_v38, 16  ;;  %v1261_v59 = vshrl.u32 %v859_v38, 16  ;;  %v1250_v61 = vrot.slane %v1248_v51, 4 }
  0xb8   : > { %v1301_v60 = vunpack.c.l.b16 %v1150_v55  ;;  %v1253_v62 = vrot.slane %v1251_v49, 5  ;;  %v1267_v63 = vshll.u32 %v883_v56, 16  ;;  %740 = vst.msk [vmem:[#allocation2 + $0x34] sm:$0xf] %vm237_vm0, %v459_v57  ;;  %v1787_v45 = vrot.slane %v6017_v17, 5 }
  0xb9   : > { %v1259_v0 = vrot.slane %v1257_v58, 5  ;;  %v1263_v2 = vrot.slane %v1261_v59, 4  ;;  %743 = vst [vmem:[#allocation2 + $0x38] sm:$0x1] %v742_v5  ;;  %v1785_v29 = vsel %vm6677_vm15, %v5417_v9, %v1784_v7  ;;  %v2510_v23 = vshll.u32 %v2458_v15, 16 }
  0xba   : > { %v1322_v18 = vpack.c.b16 %v1301_v60, %v1300_v47  ;;  %v1254_v8 = vor.u32 %v1253_v62, %v1250_v61  ;;  %v1269_v12 = vrot.slane %v1267_v63, 5  ;;  %v2516_v24 = vshll.u32 %v6682_v20, 16  ;;  %v6703_v58 = vld [vmem:[#allocation2 + $0x14] sm:$0x1]  ;;  %v6018_v9 = vld [vmem:[#allocation2 + $0x10] sm:$0xf] }
  0xbb   : > { %v1264_v10 = vor.u32 %v1263_v2, %v1259_v0  ;;  %v836_v4 = vld [vmem:[#allocation2 + $0x30] sm:$0xf]  ;;  %v1788_v39 = vsel %vm6677_vm15, %v1786_v48, %v1787_v45  ;;  %v2520_v31 = vshrl.u32 %v6682_v20, 16  ;;  %v1903_v49 = vunpack.c.l.b16 %v1785_v29 }
  0xbc   : > { %5315 = vmatmul.msk.bf16.gmra.mxu2 %vm1352_vm11, %v1322_v18  ;;  %v1255_v16 = vrot.slane %v1254_v8, 4  ;;  %v984_v28 = vshrl.u32 %v836_v4, 16  ;;  %v987_v30 = vshll.u32 %v836_v4, 16  ;;  %v2509_v50 = vrot.slane %v2507_v22, 4  ;;  %v6019_v4 = vld [vmem:[#allocation2 + $0x14] sm:$0x1] }
  0xbd   : > { %v1265_v19 = vrot.slane %v1264_v10, 4  ;;  %v1904_v56 = vunpack.c.l.b16 %v1788_v39  ;;  %v2512_v59 = vrot.slane %v2510_v23, 5  ;;  %v2518_v60 = vrot.slane %v2516_v24, 5  ;;  %v2461_v22 = vld [vmem:[#allocation2 + $0x18] sm:$0xf] }
  0xbe   : > { %v1260_v21 = vsel %vm6342_vm12, %v1255_v16, %v1259_v0  ;;  %v986_v36 = vrot.slane %v984_v28, 4  ;;  %v989_v37 = vrot.slane %v987_v30, 5  ;;  %v2522_v61 = vrot.slane %v2520_v31, 4  ;;  %v2462_v23 = vld [vmem:[#allocation2 + $0x1c] sm:$0xf] }
  0xbf   : > { %v1270_v25 = vsel %vm6342_vm12, %v1265_v19, %v1269_v12  ;;  %v1310_v26 = vunpack.c.l.b16 %v1260_v21  ;;  %v6690_v27 = vld [vmem:[#allocation2 + $0x34] sm:$0xf]  ;;  %v2526_v0 = vshll.u32 %v6703_v58, 16  ;;  %v1935_v6 = vpack.c.b16 %v1904_v56, %v1903_v49  ;;  %v1732_v12 = vld [vmem:[#allocation2 + $0xc] sm:$0xe]  ;;  %v5882_v19 = vld [vmem:[#allocation2 + $0x3c] sm:$0xff] }
  0xc0   : > { %v5881_v46 = vld [vmem:[#allocation2 + $0x30] sm:$0xff]  ;;  %v1311_v13 = vunpack.c.l.b16 %v1270_v25  ;;  %v993_v33 = vshll.u32 %v6690_v27, 16  ;;  %v997_v34 = vshrl.u32 %v6690_v27, 16  ;;  %v6695_v35 = vld [vmem:[#allocation2 + $0x38] sm:$0x1]  ;;  %v990_v51 = vor.u32 %v989_v37, %v986_v36 }
  0xc1   : > { %5405 = vmatmul.msk.bf16.gmra.mxu1 %vm1352_vm11, %v5881_v46  ;;  %v1003_v38 = vshll.u32 %v6695_v35, 16  ;;  %v2513_v7 = vor.u32 %v2512_v59, %v2509_v50  ;;  %v2523_v8 = vor.u32 %v2522_v61, %v2518_v60  ;;  %v1791_v10 = vrot.slane %v6018_v9, 5  ;;  %v5905_v25 = vld [vmem:[#allocation2 + $0xc] sm:$0xff] }
  0xc2   : > { %v1327_v40 = vpack.c.b16 %v1311_v13, %v1310_v26  ;;  %v995_v41 = vrot.slane %v993_v33, 5  ;;  %v999_v47 = vrot.slane %v997_v34, 4  ;;  %v991_v57 = vrot.slane %v990_v51, 4  ;;  %v2463_v51 = vld [vmem:[#allocation2 + $0x20] sm:$0x1] }
  0xc3   : > { %v1005_v55 = vrot.slane %v1003_v38, 5  ;;  %v2514_v16 = vrot.slane %v2513_v7, 4  ;;  %v2528_v17 = vrot.slane %v2526_v0, 5  ;;  %v2524_v45 = vrot.slane %v2523_v8, 4  ;;  %v2464_v0 = vld [vmem:[#allocation2 + $0x24] sm:$0xf] }
  0xc4   : > { %5320 = vmatmul.msk.bf16.gmra.mxu3 %vm1352_vm11, %v1327_v40  ;;  %v1000_v54 = vor.u32 %v999_v47, %v995_v41  ;;  %v996_v63 = vsel %vm6342_vm12, %v991_v57, %v995_v41  ;;  %v5418_v48 = vrot.slane %v1732_v12, 9  ;;  %v1793_v21 = vrot.slane %v1791_v10, 4 }
  0xc5   : > { %v1288_v5 = vunpack.c.l.b16 %v996_v63  ;;  %v1794_v29 = vrot.slane %v6019_v4, 5  ;;  %v2519_v26 = vsel %vm6342_vm12, %v2514_v16, %v2518_v60  ;;  %v2529_v28 = vsel %vm6342_vm12, %v2524_v45, %v2528_v17  ;;  %v5883_v60 = vld [vmem:[#allocation2 + $0x48] sm:$0xff]  ;;  %v5906_v16 = vld [vmem:[#allocation2 + $0x18] sm:$0xff] }
  0xc6   : > { %v1001_v62 = vrot.slane %v1000_v54, 4  ;;  %v1792_v30 = vsel %vm6677_vm15, %v5418_v48, %v1791_v10  ;;  %v2531_v13 = vshrl.u32 %v2461_v22, 16  ;;  %v2534_v33 = vshll.u32 %v2461_v22, 16 }
  0xc7   : > { %v1795_v46 = vsel %vm6677_vm15, %v1793_v21, %v1794_v29  ;;  %v2540_v34 = vshll.u32 %v2462_v23, 16  ;;  %v2544_v24 = vshrl.u32 %v2462_v23, 16  ;;  %v1905_v36 = vunpack.c.l.b16 %v1792_v30 }
  0xc8   : > { %v1006_v2 = vsel %vm6342_vm12, %v1001_v62, %v1005_v55  ;;  %v1906_v37 = vunpack.c.l.b16 %v1795_v46  ;;  %v2899_v39 = vunpack.c.l.b16 %v2519_v26  ;;  %v2900_v31 = vunpack.c.l.b16 %v2529_v28  ;;  %v1733_v55 = vld [vmem:[#allocation2 + $0x18] sm:$0xe] }
  0xc9   : > { %v1289_v18 = vunpack.c.l.b16 %v1006_v2  ;;  %v2533_v40 = vrot.slane %v2531_v13, 4  ;;  %v2536_v41 = vrot.slane %v2534_v33, 5  ;;  %v2542_v47 = vrot.slane %v2540_v34, 5  ;;  %v2465_v2 = vld [vmem:[#allocation2 + $0x28] sm:$0xf] }
  0xca   : > { %v2546_v38 = vrot.slane %v2544_v24, 4  ;;  %v1936_v49 = vpack.c.b16 %v1906_v37, %v1905_v36  ;;  %v1798_v50 = vrot.slane %v6521_v43, 5  ;;  %v2931_v54 = vpack.c.b16 %v2900_v31, %v2899_v39  ;;  %v2466_v24 = vld [vmem:[#allocation2 + $0x2c] sm:$0x1] }
  0xcb   : > { %v1316_v15 = vpack.c.b16 %v1289_v18, %v1288_v5  ;;  %v2537_v56 = vor.u32 %v2536_v41, %v2533_v40  ;;  %v2550_v57 = vshll.u32 %v2463_v51, 16  ;;  %v5419_v61 = vrot.slane %v1733_v55, 9  ;;  %v1734_v5 = vld [vmem:[#allocation2 + $0x24] sm:$0xe]  ;;  %v6742_v46 = vpop.f32.mrf.mxu1  ;;  %v5884_v51 = vld [vmem:[#allocation2 + $0x54] sm:$0xff] }
  0xcc   : > { %5457 = vmatmul.msk.bf16.vlgmr.msrb.gmra.mxu2 %vm1352_vm11, %v1935_v6  ;;  %v2547_v59 = vor.u32 %v2546_v38, %v2542_v47  ;;  %v1800_v62 = vrot.slane %v1798_v50, 4  ;;  %v1801_v63 = vrot.slane %v6526_v53, 5  ;;  %v1805_v6 = vrot.slane %v6600_v11, 5 }
  0xcd   : > { %5309 = vmatmul.msk.bf16.gmra.mxu0 %vm1352_vm11, %v1316_v15  ;;  %v1808_v43 = vrot.slane %v6603_v42, 5  ;;  %v2538_v7 = vrot.slane %v2537_v56, 4  ;;  %v2552_v8 = vrot.slane %v2550_v57, 5  ;;  %v5420_v9 = vrot.slane %v1734_v5, 9 }
  0xce   : > { %v2548_v18 = vrot.slane %v2547_v59, 4  ;;  %v2555_v10 = vshrl.u32 %v2464_v0, 16  ;;  %v2558_v12 = vshll.u32 %v2464_v0, 16  ;;  %v1807_v15 = vrot.slane %v1805_v6, 4  ;;  %v2468_v59 = vld [vmem:[#allocation2 + $0x34] sm:$0xf] }
  0xcf   : > { %v1799_v53 = vsel %vm6677_vm15, %v5419_v61, %v1798_v50  ;;  %v2564_v17 = vshll.u32 %v2465_v2, 16  ;;  %v2568_v45 = vshrl.u32 %v2465_v2, 16  ;;  %v1802_v11 = vsel %vm6677_vm15, %v1800_v62, %v1801_v63  ;;  %v1735_v50 = vld [vmem:[#allocation2 + $0x30] sm:$0xe]  ;;  %v5907_v0 = vld [vmem:[#allocation2 + $0x24] sm:$0xff] }
  0xd0   : > { %v1809_v42 = vsel %vm6677_vm15, %v1807_v15, %v1808_v43  ;;  %v2543_v21 = vsel %vm6342_vm12, %v2538_v7, %v2542_v47  ;;  %v2553_v4 = vsel %vm6342_vm12, %v2548_v18, %v2552_v8  ;;  %v1907_v22 = vunpack.c.l.b16 %v1799_v53 }
  0xd1   : > { %5406 = vmatmul.msk.bf16.gmra.mxu1 %vm1352_vm11, %v5882_v19  ;;  %v1806_v19 = vsel %vm6677_vm15, %v5420_v9, %v1805_v6  ;;  %v1910_v29 = vunpack.c.l.b16 %v1809_v42  ;;  %v2557_v23 = vrot.slane %v2555_v10, 4  ;;  %v1908_v26 = vunpack.c.l.b16 %v1802_v11 }
  0xd2   : > { %v1909_v48 = vunpack.c.l.b16 %v1806_v19  ;;  %v2566_v28 = vrot.slane %v2564_v17, 5  ;;  %v2570_v30 = vrot.slane %v2568_v45, 4  ;;  %v2901_v33 = vunpack.c.l.b16 %v2543_v21  ;;  %v2469_v45 = vld [vmem:[#allocation2 + $0x38] sm:$0x1] }
  0xd3   : > { %v2902_v34 = vunpack.c.l.b16 %v2553_v4  ;;  %v1937_v37 = vpack.c.b16 %v1908_v26, %v1907_v22  ;;  %v2574_v31 = vshll.u32 %v2466_v24, 16  ;;  %v1815_v55 = vrot.slane %v6695_v35, 5  ;;  %v6748_v57 = vpop.f32.mrf.mxu1  ;;  %v2471_v24 = vld [vmem:[#allocation2 + $0x40] sm:$0xf] }
  0xd4   : > { %5561 = vmatmul.msk.bf16.vlgmr.msrb.gmra.mxu3 %vm1352_vm11, %v5905_v25  ;;  %v2560_v25 = vrot.slane %v2558_v12, 5  ;;  %v1938_v13 = vpack.c.b16 %v1910_v29, %v1909_v48  ;;  %v2571_v39 = vor.u32 %v2570_v30, %v2566_v28  ;;  %v6752_v62 = vpop.f32.mrf.mxu2  ;;  %v2588_v35 = vshll.u32 %v2468_v59, 16  ;;  %v5885_v30 = vld [vmem:[#allocation2 + $0x60] sm:$0xff] }
  0xd5   : > { %v2932_v40 = vpack.c.b16 %v2902_v34, %v2901_v33  ;;  %v2576_v38 = vrot.slane %v2574_v31, 5  ;;  %v2592_v43 = vshrl.u32 %v2468_v59, 16  ;;  %v2598_v22 = vshll.u32 %v2469_v45, 16  ;;  %v2470_v34 = vld [vmem:[#allocation2 + $0x3c] sm:$0xf] }
  0xd6   : > { %v2561_v36 = vor.u32 %v2560_v25, %v2557_v23  ;;  %v2572_v47 = vrot.slane %v2571_v39, 4  ;;  %v2590_v53 = vrot.slane %v2588_v35, 5  ;;  %vm5170_vm1 = vcmask 517120  }
  0xd7   : > { %v2594_v17 = vrot.slane %v2592_v43, 4  ;;  %v1736_v43 = vld [vmem:[#allocation2 + $0x3c] sm:$0xe] }
  0xd8   : > { %v2562_v41 = vrot.slane %v2561_v36, 4  ;;  %v1410_v56 = vpop.f32.mrf.mxu0  ;;  %v2577_v2 = vsel %vm6342_vm12, %v2572_v47, %v2576_v38  ;;  %v5908_v36 = vld [vmem:[#allocation2 + $0x30] sm:$0xff]  ;;  %v2612_v47 = vshll.u32 %v2471_v24, 16  ;;  %v2616_v38 = vshrl.u32 %v2471_v24, 16 }
  0xd9   : > { %v2904_v10 = vunpack.c.l.b16 %v2577_v2  ;;  %v6762_v11 = vpop.f32.mrf.mxu3  ;;  %v2595_v29 = vor.u32 %v2594_v17, %v2590_v53  ;;  %v6020_v2 = vld [vmem:[#allocation2 + $0x40] sm:$0xf]  ;;  %v2473_v17 = vld [vmem:[#allocation2 + $0x48] sm:$0xf] }
  0xda   : > { %v2567_v61 = vsel %vm6342_vm12, %v2562_v41, %v2566_v28  ;;  %v2600_v28 = vrot.slane %v2598_v22, 5  ;;  %v2606_v41 = vshll.u32 %v2470_v34, 16  ;;  %v2618_v59 = vrot.slane %v2616_v38, 4  ;;  %v5909_v22 = vld [vmem:[#allocation2 + $0x3c] sm:$0xff] }
  0xdb   : > { %v2903_v9 = vunpack.c.l.b16 %v2567_v61  ;;  %v1651_v19 = vpop.f32.mrf.mxu1  ;;  %v2596_v26 = vrot.slane %v2595_v29, 4  ;;  %v2472_v61 = vld [vmem:[#allocation2 + $0x44] sm:$0x1] }
  0xdc   : > { %5458 = vmatmul.msk.bf16.gmra.mxu2 %vm1352_vm11, %v1936_v49  ;;  %v2467_v49 = vld [vmem:[#allocation2 + $0x30] sm:$0xf]  ;;  %v6764_v42 = vadd.f32 %v1651_v19, %v1410_v56  ;;  %v6768_v23 = vpop.f32.mrf.mxu2  ;;  %v2614_v56 = vrot.slane %v2612_v47, 5  ;;  %v2622_v35 = vshll.u32 %v2472_v61, 16 }
  0xdd   : > { %5601 = vmatmul.msk.bf16.vlgmr.msrb.gmra.mxu0 %vm1352_vm11, %v2931_v54  ;;  %v1812_v54 = vrot.slane %v6690_v27, 5  ;;  %v2579_v5 = vshrl.u32 %v2467_v49, 16  ;;  %v2582_v6 = vshll.u32 %v2467_v49, 16  ;;  %v2933_v21 = vpack.c.b16 %v2904_v10, %v2903_v9  ;;  %v5886_v9 = vld [vmem:[#allocation2 + $0x6c] sm:$0xff] }
  0xde   : > { %v2601_v39 = vsel %vm6342_vm12, %v2596_v26, %v2600_v28  ;;  %v5422_v10 = vrot.slane %v1736_v43, 9  ;;  %v1737_v43 = vld [vmem:[#allocation2 + $0x48] sm:$0xe] }
  0xdf   : > { %v1814_v63 = vrot.slane %v1812_v54, 4  ;;  %v2581_v15 = vrot.slane %v2579_v5, 4  ;;  %v1819_v5 = vrot.slane %v6020_v2, 5 }
  0xe0   : > { %v6766_v48 = vpop.f32.mrf.mxu0 }
  0xe1   : > { %5407 = vmatmul.msk.bf16.gmra.mxu1 %vm1352_vm11, %v5883_v60  ;;  %v5421_v60 = vrot.slane %v1735_v50, 9  ;;  %v1816_v7 = vsel %vm6677_vm15, %v1814_v63, %v1815_v55  ;;  %v6778_v31 = vpop.f32.mrf.mxu3  ;;  %v2906_v50 = vunpack.c.l.b16 %v2601_v39  ;;  %v2608_v55 = vrot.slane %v2606_v41, 5 }
  0xe2   : > { %v1912_v8 = vunpack.c.l.b16 %v1816_v7  ;;  %v1820_v26 = vsel %vm6677_vm15, %v5422_v10, %v1819_v5 }
  0xe3   : > { %v1813_v27 = vsel %vm6677_vm15, %v5421_v60, %v1812_v54  ;;  %v6772_v33 = vpop.f32.mrf.mxu1 }
  0xe4   : > { %5562 = vmatmul.msk.bf16.gmra.mxu3 %vm1352_vm11, %v5906_v16  ;;  %v1911_v18 = vunpack.c.l.b16 %v1813_v27  ;;  %v2584_v16 = vrot.slane %v2582_v6, 5  ;;  %v2619_v27 = vor.u32 %v2618_v59, %v2614_v56 }
  0xe6   : > { %v1939_v12 = vpack.c.b16 %v1912_v8, %v1911_v18  ;;  %v2585_v4 = vor.u32 %v2584_v16, %v2581_v15  ;;  %v1821_v15 = vrot.slane %v1819_v5, 4  ;;  %v6021_v16 = vld [vmem:[#allocation2 + $0x44] sm:$0x1]  ;;  %v2620_v19 = vrot.slane %v2619_v27, 4  ;;  %v6022_v27 = vld [vmem:[#allocation2 + $0x4c] sm:$0xf] }
  0xe8   : > { %v2586_v25 = vrot.slane %v2585_v4, 4  ;;  %v2474_v4 = vld [vmem:[#allocation2 + $0x4c] sm:$0xf] }
  0xeb   : > { %v1656_v60 = vpop.f32.mrf.mxu1 }
  0xec   : > { %5459 = vmatmul.msk.bf16.gmra.mxu2 %vm1352_vm11, %v1937_v37  ;;  %v2591_v37 = vsel %vm6342_vm12, %v2586_v25, %v2590_v53  ;;  %v1822_v53 = vrot.slane %v6021_v16, 5  ;;  %v2630_v25 = vshll.u32 %v2473_v17, 16  ;;  %v5887_v16 = vld [vmem:[#allocation2 + $0x78] sm:$0xff] }
  0xed   : > { %5602 = vmatmul.msk.bf16.gmra.mxu0 %vm1352_vm11, %v2932_v40  ;;  %v2603_v40 = vshrl.u32 %v2470_v34, 16  ;;  %v2905_v49 = vunpack.c.l.b16 %v2591_v37  ;;  %v2640_v34 = vshrl.u32 %v2474_v4, 16  ;;  %v1913_v37 = vunpack.c.l.b16 %v1820_v26 }
  0xee   : > { %v1823_v28 = vsel %vm6677_vm15, %v1821_v15, %v1822_v53  ;;  %v5423_v53 = vrot.slane %v1737_v43, 9 }
  0xef   : > { %v2605_v54 = vrot.slane %v2603_v40, 4  ;;  %v1914_v39 = vunpack.c.l.b16 %v1823_v28  ;;  %v2632_v40 = vrot.slane %v2630_v25, 5 }
  0xf1   : > { %5408 = vmatmul.msk.bf16.gmra.mxu1 %vm1352_vm11, %v5884_v51  ;;  %v2609_v6 = vor.u32 %v2608_v55, %v2605_v54  ;;  %v2642_v54 = vrot.slane %v2640_v34, 4  ;;  %v1940_v61 = vpack.c.b16 %v1914_v39, %v1913_v37 }
  0xf2   : > { %v6781_v51 = vpop.f32.mrf.mxu2 }
  0xf3   : > { %v2610_v45 = vrot.slane %v2609_v6, 4  ;;  %v6794_v29 = vpop.f32.mrf.mxu1 }
  0xf4   : > { %5563 = vmatmul.msk.bf16.gmra.mxu3 %vm1352_vm11, %v5907_v0  ;;  %v2934_v0 = vpack.c.b16 %v2906_v50, %v2905_v49  ;;  %v2475_v49 = vld [vmem:[#allocation2 + $0x50] sm:$0x1] }
  0xf5   : > { %v2615_v24 = vsel %vm6342_vm12, %v2610_v45, %v2614_v56  ;;  %v2646_v2 = vshll.u32 %v2475_v49, 16  ;;  %v6023_v45 = vld [vmem:[#allocation2 + $0x50] sm:$0x1] }
  0xf6   : > { %v2907_v41 = vunpack.c.l.b16 %v2615_v24 }
  0xf7   : > { %v6786_v7 = vpop.f32.mrf.mxu3  ;;  %v2648_v10 = vrot.slane %v2646_v2, 5 }
  0xf8   : > { %8021 = vst [vmem:[#allocation6_spill] sm:$0xff] %v6786_v7 }
  0xfa   : > { %v6792_v8 = vpop.f32.mrf.mxu2 }
  0xfc   : > { %5460 = vmatmul.msk.bf16.gmra.mxu2 %vm1352_vm11, %v1938_v13  ;;  %v1415_v13 = vpop.f32.mrf.mxu0 }
  0xfd   : > { %5603 = vmatmul.msk.bf16.gmra.mxu0 %vm1352_vm11, %v2933_v21  ;;  %v6784_v63 = vadd.f32 %v1656_v60, %v1415_v13  ;;  %v2624_v21 = vrot.slane %v2622_v35, 5  ;;  %v1826_v35 = vrot.slane %v6022_v27, 5  ;;  %v6024_v27 = vld [vmem:[#allocation2 + $0x58] sm:$0xf] }
  0xff   : > { %v6806_v38 = vpop.f32.mrf.mxu3  ;;  %v1827_v34 = vsel %vm6677_vm15, %v5423_v53, %v1826_v35 }
 0x100   : > { %8022 = vst [vmem:[#allocation7_spill] sm:$0xff] %v6806_v38 }
 0x101   : > { %5409 = vmatmul.msk.bf16.gmra.mxu1 %vm1352_vm11, %v5885_v30  ;;  %v2636_v30 = vshll.u32 %v2474_v4, 16  ;;  %v2476_v4 = vld [vmem:[#allocation2 + $0x54] sm:$0xf] }
 0x102   : > { %v2654_v37 = vshll.u32 %v2476_v4, 16 }
 0x103   : > { %v2638_v50 = vrot.slane %v2636_v30, 5 }
 0x104   : > { %5564 = vmatmul.msk.bf16.gmra.mxu3 %vm1352_vm11, %v5908_v36  ;;  %v6789_v18 = vpop.f32.mrf.mxu0  ;;  %v2625_v36 = vsel %vm6342_vm12, %v2620_v19, %v2624_v21  ;;  %v1829_v19 = vrot.slane %v6023_v45, 5 }
 0x105   : > { %v2908_v47 = vunpack.c.l.b16 %v2625_v36  ;;  %v2643_v6 = vor.u32 %v2642_v54, %v2638_v50  ;;  %v2651_v36 = vshrl.u32 %v2476_v4, 16 }
 0x107   : > { %v2935_v5 = vpack.c.b16 %v2908_v47, %v2907_v41  ;;  %v2644_v15 = vrot.slane %v2643_v6, 4  ;;  %v2653_v54 = vrot.slane %v2651_v36, 4 }
 0x108   : > { %v1661_v59 = vpop.f32.mrf.mxu1 }
 0x109   : > { %v6808_v60 = vpop.f32.mrf.mxu2  ;;  %v2649_v28 = vsel %vm6342_vm12, %v2644_v15, %v2648_v10 }
 0x10a   : > { %v2910_v49 = vunpack.c.l.b16 %v2649_v28 }
 0x10c   : > { %5461 = vmatmul.msk.bf16.gmra.mxu2 %vm1352_vm11, %v1939_v12  ;;  %v2627_v12 = vshrl.u32 %v2473_v17, 16  ;;  %v1828_v17 = vrot.slane %v1826_v35, 4  ;;  %v1833_v35 = vrot.slane %v6024_v27, 5 }
 0x10d   : > { %5604 = vmatmul.msk.bf16.gmra.mxu0 %vm1352_vm11, %v2934_v0 }
 0x10e   : > { %v2629_v13 = vrot.slane %v2627_v12, 4  ;;  %v5910_v12 = vld [vmem:[#allocation2 + $0x48] sm:$0xff]  ;;  %v1830_v24 = vsel %vm6677_vm15, %v1828_v17, %v1829_v19  ;;  %v6025_v17 = vld [vmem:[#allocation2 + $0x5c] sm:$0x1] }
 0x10f   : > { %v1916_v41 = vunpack.c.l.b16 %v1830_v24  ;;  %v1836_v45 = vrot.slane %v6025_v17, 5  ;;  %v5888_v19 = vld [vmem:[#allocation2 + $0x84] sm:$0xff] }
 0x110   : > { %v2633_v0 = vor.u32 %v2632_v40, %v2629_v13  ;;  %v6816_v25 = vpop.f32.mrf.mxu1  ;;  %v1915_v40 = vunpack.c.l.b16 %v1827_v34  ;;  %v2480_v24 = vld [vmem:[#allocation2 + $0x64] sm:$0xf] }
 0x111   : > { %5410 = vmatmul.msk.bf16.gmra.mxu1 %vm1352_vm11, %v5886_v9  ;;  %v6822_v30 = vpop.f32.mrf.mxu2 }
 0x112   : > { %v2634_v9 = vrot.slane %v2633_v0, 4  ;;  %v2478_v0 = vld [vmem:[#allocation2 + $0x5c] sm:$0x1]  ;;  %v1941_v2 = vpack.c.b16 %v1916_v41, %v1915_v40 }
 0x113   : > { %v6814_v21 = vpop.f32.mrf.mxu3  ;;  %v2670_v10 = vshll.u32 %v2478_v0, 16 }
 0x114   : > { %5565 = vmatmul.msk.bf16.gmra.mxu3 %vm1352_vm11, %v5909_v22  ;;  %v1420_v55 = vpop.f32.mrf.mxu0  ;;  %8023 = vst [vmem:[#allocation8_spill] sm:$0xff] %v6814_v21  ;;  %v2477_v22 = vld [vmem:[#allocation2 + $0x58] sm:$0xf]  ;;  %v2639_v26 = vsel %vm6342_vm12, %v2634_v9, %v2638_v50 }
 0x115   : > { %v6810_v56 = vadd.f32 %v1661_v59, %v1420_v55  ;;  %v2660_v39 = vshll.u32 %v2477_v22, 16  ;;  %v2664_v13 = vshrl.u32 %v2477_v22, 16  ;;  %v2909_v47 = vunpack.c.l.b16 %v2639_v26 }
 0x116   : > { %v2656_v55 = vrot.slane %v2654_v37, 5  ;;  %v1835_v22 = vrot.slane %v1833_v35, 4  ;;  %v2672_v34 = vrot.slane %v2670_v10, 5  ;;  %v5911_v37 = vld [vmem:[#allocation2 + $0x54] sm:$0xff] }
 0x117   : > { %v2662_v59 = vrot.slane %v2660_v39, 5 }
 0x118   : > { %v2657_v43 = vor.u32 %v2656_v55, %v2653_v54  ;;  %v2688_v54 = vshrl.u32 %v2480_v24, 16 }
 0x11a   : > { %v2658_v26 = vrot.slane %v2657_v43, 4  ;;  %v2690_v17 = vrot.slane %v2688_v54, 4 }
 0x11b   : > { %v6832_v6 = vpop.f32.mrf.mxu3 }
 0x11c   : > { %5462 = vmatmul.msk.bf16.gmra.mxu2 %vm1352_vm11, %v1940_v61  ;;  %v6830_v50 = vpop.f32.mrf.mxu0  ;;  %v2666_v61 = vrot.slane %v2664_v13, 4  ;;  %8024 = vst [vmem:[#allocation9_spill] sm:$0xff] %v6832_v6  ;;  %v2663_v55 = vsel %vm6342_vm12, %v2658_v26, %v2662_v59  ;;  %v6026_v26 = vld [vmem:[#allocation2 + $0x64] sm:$0xf] }
 0x11d   : > { %5605 = vmatmul.msk.bf16.gmra.mxu0 %vm1352_vm11, %v2935_v5  ;;  %v2936_v5 = vpack.c.b16 %v2910_v49, %v2909_v47  ;;  %v1837_v47 = vsel %vm6677_vm15, %v1835_v22, %v1836_v45  ;;  %v2684_v49 = vshll.u32 %v2480_v24, 16  ;;  %v6027_v24 = vld [vmem:[#allocation2 + $0x68] sm:$0x1] }
 0x11e   : > { %v2667_v9 = vor.u32 %v2666_v61, %v2662_v59  ;;  %v2481_v59 = vld [vmem:[#allocation2 + $0x68] sm:$0x1] }
 0x120   : > { %v2668_v28 = vrot.slane %v2667_v9, 4  ;;  %v2911_v9 = vunpack.c.l.b16 %v2663_v55 }
 0x121   : > { %5411 = vmatmul.msk.bf16.gmra.mxu1 %vm1352_vm11, %v5887_v16  ;;  %v1738_v16 = vld [vmem:[#allocation2 + $0x54] sm:$0xe] }
 0x122   : > { %v1666_v15 = vpop.f32.mrf.mxu1  ;;  %v6834_v53 = vpop.f32.mrf.mxu2  ;;  %v5424_v4 = vrot.slane %v1738_v16, 9  ;;  %v2673_v61 = vsel %vm6342_vm12, %v2668_v28, %v2672_v34  ;;  %v2686_v16 = vrot.slane %v2684_v49, 5  ;;  %v1840_v28 = vrot.slane %v6026_v26, 5  ;;  %v1739_v34 = vld [vmem:[#allocation2 + $0x60] sm:$0xe] }
 0x123   : > { %v2912_v10 = vunpack.c.l.b16 %v2673_v61  ;;  %v5425_v49 = vrot.slane %v1739_v34, 9 }
 0x124   : > { %5566 = vmatmul.msk.bf16.gmra.mxu3 %vm1352_vm11, %v5910_v12  ;;  %v2479_v12 = vld [vmem:[#allocation2 + $0x60] sm:$0xf]  ;;  %v1834_v41 = vsel %vm6677_vm15, %v5424_v4, %v1833_v35  ;;  %v2691_v22 = vor.u32 %v2690_v17, %v2686_v16  ;;  %v1842_v54 = vrot.slane %v1840_v28, 4 }
 0x125   : > { %v2675_v13 = vshrl.u32 %v2479_v12, 16  ;;  %v2678_v40 = vshll.u32 %v2479_v12, 16  ;;  %v2937_v4 = vpack.c.b16 %v2912_v10, %v2911_v9  ;;  %v2694_v12 = vshll.u32 %v2481_v59, 16 }
 0x126   : > { %v1841_v17 = vsel %vm6677_vm15, %v5425_v49, %v1840_v28 }
 0x127   : > { %v2677_v27 = vrot.slane %v2675_v13, 4  ;;  %v2680_v43 = vrot.slane %v2678_v40, 5  ;;  %v2692_v40 = vrot.slane %v2691_v22, 4 }
 0x12a   : > { %v6852_v35 = vpop.f32.mrf.mxu1 }
 0x12c   : > { %5463 = vmatmul.msk.bf16.gmra.mxu2 %vm1352_vm11, %v1941_v2  ;;  %v6849_v0 = vpop.f32.mrf.mxu3  ;;  %v1917_v2 = vunpack.c.l.b16 %v1834_v41  ;;  %v2696_v41 = vrot.slane %v2694_v12, 5  ;;  %v1919_v12 = vunpack.c.l.b16 %v1841_v17 }
 0x12d   : > { %5606 = vmatmul.msk.bf16.gmra.mxu0 %vm1352_vm11, %v2936_v5  ;;  %8025 = vst [vmem:[#allocation10_spill] sm:$0xff] %v6849_v0  ;;  %v1918_v5 = vunpack.c.l.b16 %v1837_v47  ;;  %v5889_v47 = vld [vmem:[#allocation2 + $0x90] sm:$0xff] }
 0x12e   : > { %v2697_v10 = vsel %vm6342_vm12, %v2692_v40, %v2696_v41 }
 0x12f   : > { %v1425_v36 = vpop.f32.mrf.mxu0  ;;  %v1942_v45 = vpack.c.b16 %v1918_v5, %v1917_v2  ;;  %v2482_v2 = vld [vmem:[#allocation2 + $0x6c] sm:$0xf]  ;;  %v2483_v5 = vld [vmem:[#allocation2 + $0x70] sm:$0xf]  ;;  %v2914_v34 = vunpack.c.l.b16 %v2697_v10 }
 0x130   : > { %v6838_v39 = vadd.f32 %v1666_v15, %v1425_v36  ;;  %v6854_v15 = vpop.f32.mrf.mxu2  ;;  %v1843_v36 = vrot.slane %v6027_v24, 5  ;;  %v2712_v22 = vshrl.u32 %v2483_v5, 16 }
 0x131   : > { %5412 = vmatmul.msk.bf16.gmra.mxu1 %vm1352_vm11, %v5888_v19  ;;  %v2681_v19 = vor.u32 %v2680_v43, %v2677_v27  ;;  %v5912_v43 = vld [vmem:[#allocation2 + $0x60] sm:$0xff] }
 0x132   : > { %v1844_v59 = vsel %vm6677_vm15, %v1842_v54, %v1843_v36  ;;  %v2714_v41 = vrot.slane %v2712_v22, 4  ;;  %v2484_v36 = vld [vmem:[#allocation2 + $0x74] sm:$0x1] }
 0x133   : > { %v1920_v26 = vunpack.c.l.b16 %v1844_v59  ;;  %v2718_v59 = vshll.u32 %v2484_v36, 16 }
 0x134   : > { %5567 = vmatmul.msk.bf16.gmra.mxu3 %vm1352_vm11, %v5911_v37  ;;  %v2682_v37 = vrot.slane %v2681_v19, 4  ;;  %v6858_v13 = vpop.f32.mrf.mxu3  ;;  %v2702_v19 = vshll.u32 %v2482_v2, 16 }
 0x135   : > { %8026 = vst [vmem:[#allocation11_spill] sm:$0xff] %v6858_v13  ;;  %v1943_v49 = vpack.c.b16 %v1920_v26, %v1919_v12  ;;  %v2485_v12 = vld [vmem:[#allocation2 + $0x78] sm:$0xf] }
 0x136   : > { %v2687_v9 = vsel %vm6342_vm12, %v2682_v37, %v2686_v16  ;;  %v2704_v37 = vrot.slane %v2702_v19, 5  ;;  %v2723_v36 = vshrl.u32 %v2485_v12, 16 }
 0x137   : > { %v6862_v27 = vpop.f32.mrf.mxu0  ;;  %v2913_v16 = vunpack.c.l.b16 %v2687_v9  ;;  %v1740_v9 = vld [vmem:[#allocation2 + $0x6c] sm:$0xe] }
 0x138   : > { %v5426_v22 = vrot.slane %v1740_v9, 9 }
 0x139   : > { %v2938_v54 = vpack.c.b16 %v2914_v34, %v2913_v16  ;;  %v2720_v34 = vrot.slane %v2718_v59, 5 }
 0x13c   : > { %5464 = vmatmul.msk.bf16.gmra.mxu2 %vm1352_vm11, %v1942_v45  ;;  %v2699_v45 = vshrl.u32 %v2482_v2, 16  ;;  %v6028_v2 = vld [vmem:[#allocation2 + $0x70] sm:$0xf] }
 0x13d   : > { %5607 = vmatmul.msk.bf16.gmra.mxu0 %vm1352_vm11, %v2937_v4  ;;  %v2708_v4 = vshll.u32 %v2483_v5, 16  ;;  %v1847_v5 = vrot.slane %v6028_v2, 5 }
 0x13e   : > { %v1671_v55 = vpop.f32.mrf.mxu1  ;;  %v2701_v24 = vrot.slane %v2699_v45, 4  ;;  %v6029_v45 = vld [vmem:[#allocation2 + $0x74] sm:$0x1] }
 0x13f   : > { %v6860_v61 = vpop.f32.mrf.mxu2  ;;  %v2710_v40 = vrot.slane %v2708_v4, 5  ;;  %v1850_v19 = vrot.slane %v6029_v45, 5  ;;  %v5890_v4 = vld [vmem:[#allocation2 + $0x9c] sm:$0xff] }
 0x141   : > { %5413 = vmatmul.msk.bf16.gmra.mxu1 %vm1352_vm11, %v5889_v47  ;;  %v2715_v17 = vor.u32 %v2714_v41, %v2710_v40 }
 0x143   : > { %v2716_v16 = vrot.slane %v2715_v17, 4 }
 0x144   : > { %5568 = vmatmul.msk.bf16.gmra.mxu3 %vm1352_vm11, %v5912_v43  ;;  %v2705_v43 = vor.u32 %v2704_v37, %v2701_v24  ;;  %v2486_v24 = vld [vmem:[#allocation2 + $0x7c] sm:$0xf] }
 0x145   : > { %v2732_v17 = vshll.u32 %v2486_v24, 16  ;;  %v2736_v59 = vshrl.u32 %v2486_v24, 16  ;;  %v2487_v24 = vld [vmem:[#allocation2 + $0x80] sm:$0x1] }
 0x146   : > { %v1673_v47 = vpop.f32.mrf.mxu1  ;;  %v2706_v26 = vrot.slane %v2705_v43, 4 }
 0x147   : > { %v6874_v13 = vpop.f32.mrf.mxu3  ;;  %v6876_v28 = vpop.f32.mrf.mxu2 }
 0x148   : > { %8027 = vst [vmem:[#allocation12_spill] sm:$0xff] %v6874_v13  ;;  %v1849_v13 = vrot.slane %v1847_v5, 4  ;;  %v2711_v45 = vsel %vm6342_vm12, %v2706_v26, %v2710_v40 }
 0x14a   : > { %v1430_v0 = vpop.f32.mrf.mxu0  ;;  %v1851_v43 = vsel %vm6677_vm15, %v1849_v13, %v1850_v19  ;;  %v2734_v13 = vrot.slane %v2732_v17, 5  ;;  %v2738_v19 = vrot.slane %v2736_v59, 4  ;;  %v6031_v17 = vld [vmem:[#allocation2 + $0x80] sm:$0x1] }
 0x14b   : > { %v6878_v10 = vadd.f32 %v1671_v55, %v1430_v0  ;;  %v5913_v55 = vld [vmem:[#allocation2 + $0x6c] sm:$0xff]  ;;  %v1857_v59 = vrot.slane %v6031_v17, 5 }
 0x14c   : > { %5465 = vmatmul.msk.bf16.gmra.mxu2 %vm1352_vm11, %v1943_v49  ;;  %v2726_v49 = vshll.u32 %v2485_v12, 16  ;;  %v1922_v12 = vunpack.c.l.b16 %v1851_v43 }
 0x14d   : > { %5608 = vmatmul.msk.bf16.gmra.mxu0 %vm1352_vm11, %v2938_v54  ;;  %v1848_v54 = vsel %vm6677_vm15, %v5426_v22, %v1847_v5  ;;  %v2915_v22 = vunpack.c.l.b16 %v2711_v45 }
 0x14e   : > { %v6882_v2 = vpop.f32.mrf.mxu1  ;;  %v2728_v5 = vrot.slane %v2726_v49, 5 }
 0x14f   : > { %v6884_v37 = vpop.f32.mrf.mxu3  ;;  %v2032_v0 = vpop.f32.mrf.mxu2 }
 0x150   : > { %8028 = vst [vmem:[#allocation13_spill] sm:$0xff] %v6884_v37  ;;  %v2112_v41 = vadd.f32 %v2032_v0, %v6764_v42  ;;  %v2721_v37 = vsel %vm6342_vm12, %v2716_v16, %v2720_v34  ;;  %v2725_v0 = vrot.slane %v2723_v36, 4  ;;  %v2739_v34 = vor.u32 %v2738_v19, %v2734_v13  ;;  %v2489_v19 = vld [vmem:[#allocation2 + $0x88] sm:$0xf] }
 0x151   : > { %5414 = vmatmul.msk.bf16.gmra.mxu1 %vm1352_vm11, %v5890_v4  ;;  %v1921_v4 = vunpack.c.l.b16 %v1848_v54  ;;  %v2916_v6 = vunpack.c.l.b16 %v2721_v37  ;;  %v1654_v36 = vadd.f32 %v6772_v33, %v6766_v48  ;;  %v1741_v37 = vld [vmem:[#allocation2 + $0x78] sm:$0xe] }
 0x152   : > { %v1432_v9 = vpop.f32.mrf.mxu0  ;;  %v2729_v16 = vor.u32 %v2728_v5, %v2725_v0 }
 0x153   : > { %v6896_v42 = vadd.f32 %v1673_v47, %v1432_v9  ;;  %v1944_v7 = vpack.c.b16 %v1922_v12, %v1921_v4  ;;  %v2939_v47 = vpack.c.b16 %v2916_v6, %v2915_v22  ;;  %v2742_v9 = vshll.u32 %v2487_v24, 16  ;;  %v5891_v4 = vld [vmem:[#allocation2 + $0xa8] sm:$0xff]  ;;  %v2488_v22 = vld [vmem:[#allocation2 + $0x84] sm:$0xf] }
 0x154   : > { %5569 = vmatmul.msk.bf16.gmra.mxu3 %vm1352_vm11, %v5913_v55  ;;  %v6030_v55 = vld [vmem:[#allocation2 + $0x7c] sm:$0xf]  ;;  %v2740_v6 = vrot.slane %v2739_v34, 4  ;;  %v5427_v12 = vrot.slane %v1741_v37, 9  ;;  %v2760_v37 = vshrl.u32 %v2489_v19, 16 }
 0x155   : > { %v1854_v54 = vrot.slane %v6030_v55, 5  ;;  %v2747_v55 = vshrl.u32 %v2488_v22, 16 }
 0x156   : > { %v6899_v21 = vpop.f32.mrf.mxu1 }
 0x157   : > { %v2346_v38 = vpop.f32.mrf.mxu3  ;;  %v2034_v40 = vpop.f32.mrf.mxu2  ;;  %v1856_v0 = vrot.slane %v1854_v54, 4 }
 0x158   : > { %v2426_v26 = vadd.f32 %v2346_v38, %v2112_v41  ;;  %v2113_v45 = vadd.f32 %v2034_v40, %v1654_v36  ;;  %v2730_v38 = vrot.slane %v2729_v16, 4  ;;  %v2744_v41 = vrot.slane %v2742_v9, 5 }
 0x159   : > { %v1858_v34 = vsel %vm6677_vm15, %v1856_v0, %v1857_v59  ;;  %v2750_v36 = vshll.u32 %v2488_v22, 16 }
 0x15a   : > { %v3028_v49 = vpop.f32.mrf.mxu0  ;;  %v2745_v16 = vsel %vm6342_vm12, %v2740_v6, %v2744_v41  ;;  %v1924_v17 = vunpack.c.l.b16 %v1858_v34  ;;  %v2749_v6 = vrot.slane %v2747_v55, 4  ;;  %v1742_v55 = vld [vmem:[#allocation2 + $0x84] sm:$0xe] }
 0x15b   : > { %v6903_v43 = vadd.f32 %v3028_v49, %v2426_v26  ;;  %v5914_v26 = vld [vmem:[#allocation2 + $0x78] sm:$0xff]  ;;  %v2756_v49 = vshll.u32 %v2489_v19, 16  ;;  %v2752_v41 = vrot.slane %v2750_v36, 5 }
 0x15c   : > { %5466 = vmatmul.msk.bf16.gmra.mxu2 %vm1352_vm11, %v1944_v7  ;;  %v2735_v7 = vsel %vm6342_vm12, %v2730_v38, %v2734_v13  ;;  %v2918_v38 = vunpack.c.l.b16 %v2745_v16  ;;  %v5932_v36 = vld [vmem:[%s8003_s1 + $0xb8] sm:$0xff] }
 0x15d   : > { %8029 = vst [vmem:[#allocation14_spill] sm:$0xff] %v6903_v43  ;;  %5609 = vmatmul.msk.bf16.gmra.mxu0 %vm1352_vm11, %v2939_v47  ;;  %v1855_v47 = vsel %vm6677_vm15, %v5427_v12, %v1854_v54  ;;  %v2762_v54 = vrot.slane %v2760_v37, 4  ;;  %v2753_v16 = vor.u32 %v2752_v41, %v2749_v6  ;;  %3449 = vmatpush.bf16.msra.mxu1 %v5932_v36 }
 0x15e   : > { %v6907_v5 = vpop.f32.mrf.mxu1  ;;  %v1923_v13 = vunpack.c.l.b16 %v1855_v47 }
 0x15f   : > { %v2348_v48 = vpop.f32.mrf.mxu3  ;;  %v2037_v33 = vpop.f32.mrf.mxu2  ;;  %v2754_v6 = vrot.slane %v2753_v16, 4 }
 0x160   : > { %v2427_v24 = vadd.f32 %v2348_v48, %v2113_v45  ;;  %v2114_v40 = vadd.f32 %v2037_v33, %v6784_v63  ;;  %v2917_v45 = vunpack.c.l.b16 %v2735_v7  ;;  %v2490_v48 = vld [vmem:[#allocation2 + $0x8c] sm:$0x1]  ;;  %v1945_v22 = vpack.c.b16 %v1924_v17, %v1923_v13 }
 0x161   : > { %5415 = vmatmul.msk.bf16.gmra.mxu1 %vm1352_vm11, %v5891_v4  ;;  %v6922_v4 = vrot.slane %v2756_v49, 5  ;;  %v2766_v34 = vshll.u32 %v2490_v48, 16  ;;  %v6033_v13 = vld [vmem:[#allocation2 + $0x8c] sm:$0x1]  ;;  %v5428_v17 = vrot.slane %v1742_v55, 9 }
 0x162   : > { %v3030_v9 = vpop.f32.mrf.mxu0  ;;  %v2940_v19 = vpack.c.b16 %v2918_v38, %v2917_v45  ;;  %v5931_v38 = vld [vmem:[%s8003_s1 + $0xb0] sm:$0xff] }
 0x163   : > { %v6919_v63 = vadd.f32 %v3030_v9, %v2427_v24  ;;  %v6032_v24 = vld [vmem:[#allocation2 + $0x88] sm:$0xf]  ;;  %v2763_v47 = vor.u32 %v2762_v54, %v6922_v4  ;;  %v2768_v54 = vrot.slane %v2766_v34, 5  ;;  %3450 = vmatpush.bf16.msra.mxu1 %v5931_v38 }
 0x164   : > { %5570 = vmatmul.msk.bf16.gmra.mxu3 %vm1352_vm11, %v5914_v26  ;;  %v1861_v9 = vrot.slane %v6032_v24, 5  ;;  %v1659_v26 = vadd.f32 %v6794_v29, %v6789_v18  ;;  %v1864_v18 = vrot.slane %v6033_v13, 5  ;;  %v5892_v29 = vld [vmem:[#allocation2 + $0xb4] sm:$0xff]  ;;  %v3209_v24 = vrot.slane %v6703_v58, 5 }
 0x165   : > { %8030 = vst [vmem:[#allocation15_spill] sm:$0xff] %v6919_v63  ;;  %v2764_v41 = vrot.slane %v2763_v47, 4  ;;  %v2759_v58 = vsel %vm6342_vm12, %v2754_v6, %v6922_v4  ;;  %v5929_v4 = vld [vmem:[%s8003_s1 + $0xa0] sm:$0xff]  ;;  %v2494_v63 = vld [vmem:[#allocation2 + $0x9c] sm:$0xf] }
 0x166   : > { %v6924_v12 = vpop.f32.mrf.mxu1  ;;  %v1863_v45 = vrot.slane %v1861_v9, 4  ;;  %v1862_v16 = vsel %vm6677_vm15, %v5428_v17, %v1861_v9  ;;  %v3140_v9 = vld [vmem:[#allocation2 + $0xc] sm:$0xe]  ;;  %v2919_v6 = vunpack.c.l.b16 %v2759_v58 }
 0x167   : > { %v2351_v59 = vpop.f32.mrf.mxu3  ;;  %v2039_v0 = vpop.f32.mrf.mxu2  ;;  %v5617_v38 = vrot.slane %v3140_v9, 9 }
 0x168   : > { %v2428_v33 = vadd.f32 %v2351_v59, %v2114_v40  ;;  %v3206_v40 = vrot.slane %v6682_v20, 5  ;;  %v2115_v37 = vadd.f32 %v2039_v0, %v1659_v26  ;;  %v2491_v20 = vld [vmem:[#allocation2 + $0x90] sm:$0xf]  ;;  %v5915_v26 = vld [vmem:[#allocation2 + $0x84] sm:$0xff]  ;;  %v1865_v47 = vsel %vm6677_vm15, %v1863_v45, %v1864_v18 }
 0x169   : > { %v2771_v34 = vshrl.u32 %v2491_v20, 16  ;;  %v2774_v55 = vshll.u32 %v2491_v20, 16  ;;  %v1925_v18 = vunpack.c.l.b16 %v1862_v16  ;;  %v1926_v45 = vunpack.c.l.b16 %v1865_v47 }
 0x16a   : > { %v3033_v7 = vpop.f32.mrf.mxu0 }
 0x16b   : > { %v6932_v49 = vadd.f32 %v3033_v7, %v2428_v33  ;;  %v2492_v33 = vld [vmem:[#allocation2 + $0x94] sm:$0xf]  ;;  %v2776_v20 = vrot.slane %v2774_v55, 5  ;;  %v1946_v58 = vpack.c.b16 %v1926_v45, %v1925_v18  ;;  %v1664_v55 = vadd.f32 %v6816_v25, %v6830_v50  ;;  %v2495_v18 = vld [vmem:[#allocation2 + $0xa0] sm:$0xf] }
 0x16c   : > { %5467 = vmatmul.msk.bf16.gmra.mxu2 %vm1352_vm11, %v1945_v22  ;;  %v3208_v22 = vrot.slane %v3206_v40, 4  ;;  %v2784_v13 = vshrl.u32 %v2492_v33, 16  ;;  %v6035_v45 = vld [vmem:[#allocation2 + $0x98] sm:$0x1] }
 0x16d   : > { %8031 = vst [vmem:[#allocation16_spill] sm:$0xff] %v6932_v49  ;;  %5610 = vmatmul.msk.bf16.gmra.mxu0 %vm1352_vm11, %v2940_v19 }
 0x16e   : > { %v6940_v59 = vpop.f32.mrf.mxu1 }
 0x16f   : > { %v2353_v0 = vpop.f32.mrf.mxu3  ;;  %v2042_v48 = vpop.f32.mrf.mxu2 }
 0x170   : > { %v2429_v19 = vadd.f32 %v2353_v0, %v2115_v37  ;;  %v2116_v7 = vadd.f32 %v2042_v48, %v6810_v56  ;;  %v2769_v37 = vsel %vm6342_vm12, %v2764_v41, %v2768_v54  ;;  %v2780_v56 = vshll.u32 %v2492_v33, 16 }
 0x171   : > { %5416 = vmatmul.msk.bf16.gmra.mxu1 %vm1352_vm11, %v5892_v29  ;;  %v5930_v29 = vld [vmem:[%s8003_s1 + $0xa8] sm:$0xff]  ;;  %v2920_v41 = vunpack.c.l.b16 %v2769_v37  ;;  %v2773_v54 = vrot.slane %v2771_v34, 4  ;;  %v2786_v48 = vrot.slane %v2784_v13, 4 }
 0x172   : > { %v3035_v36 = vpop.f32.mrf.mxu0  ;;  %3451 = vmatpush.bf16.msra.mxu1 %v5930_v29  ;;  %v6963_v0 = vrot.slane %v2780_v56, 5  ;;  %v6034_v56 = vld [vmem:[#allocation2 + $0x94] sm:$0xf] }
 0x173   : > { %v6957_v17 = vadd.f32 %v3035_v36, %v2429_v19  ;;  %v3207_v19 = vsel %vm6677_vm15, %v5617_v38, %v3206_v40  ;;  %v2493_v36 = vld [vmem:[#allocation2 + $0x98] sm:$0x1]  ;;  %v2941_v37 = vpack.c.b16 %v2920_v41, %v2919_v6  ;;  %v1868_v13 = vrot.slane %v6034_v56, 5 }
 0x174   : > { %5571 = vmatmul.msk.bf16.gmra.mxu3 %vm1352_vm11, %v5915_v26  ;;  %v3210_v26 = vsel %vm6677_vm15, %v3208_v22, %v3209_v24  ;;  %v3325_v29 = vunpack.c.l.b16 %v3207_v19  ;;  %v2777_v49 = vor.u32 %v2776_v20, %v2773_v54  ;;  %v2787_v40 = vor.u32 %v2786_v48, %v6963_v0  ;;  %v1743_v22 = vld [vmem:[#allocation2 + $0x90] sm:$0xe] }
 0x175   : > { %8032 = vst [vmem:[#allocation17_spill] sm:$0xff] %v6957_v17  ;;  %v3326_v34 = vunpack.c.l.b16 %v3210_v26  ;;  %v2790_v38 = vshll.u32 %v2493_v36, 16  ;;  %v5429_v25 = vrot.slane %v1743_v22, 9  ;;  %v1870_v50 = vrot.slane %v1868_v13, 4 }
 0x176   : > { %v6965_v33 = vpop.f32.mrf.mxu1  ;;  %3452 = vmatpush.bf16.msra.mxu1 %v5929_v4  ;;  %v1871_v4 = vrot.slane %v6035_v45, 5  ;;  %v2778_v6 = vrot.slane %v2777_v49, 4  ;;  %v2788_v41 = vrot.slane %v2787_v40, 4  ;;  %v2795_v48 = vshrl.u32 %v2494_v63, 16 }
 0x177   : > { %v2356_v16 = vpop.f32.mrf.mxu3  ;;  %v2044_v47 = vpop.f32.mrf.mxu2  ;;  %v3357_v24 = vpack.c.b16 %v3326_v34, %v3325_v29  ;;  %v2792_v54 = vrot.slane %v2790_v38, 5  ;;  %v5916_v29 = vld [vmem:[#allocation2 + $0x90] sm:$0xff] }
 0x178   : > { %v2430_v9 = vadd.f32 %v2356_v16, %v2116_v7  ;;  %v2117_v7 = vadd.f32 %v2044_v47, %v1664_v55  ;;  %v2804_v16 = vshll.u32 %v2495_v18, 16  ;;  %v2808_v47 = vshrl.u32 %v2495_v18, 16  ;;  %v3141_v18 = vld [vmem:[#allocation2 + $0x18] sm:$0xe] }
 0x179   : > { %v1869_v55 = vsel %vm6677_vm15, %v5429_v25, %v1868_v13  ;;  %v1872_v49 = vsel %vm6677_vm15, %v1870_v50, %v1871_v4  ;;  %v2793_v56 = vsel %vm6342_vm12, %v2788_v41, %v2792_v54  ;;  %v2797_v40 = vrot.slane %v2795_v48, 4  ;;  %v2496_v25 = vld [vmem:[#allocation2 + $0xa4] sm:$0x1] }
 0x17a   : > { %v3038_v17 = vpop.f32.mrf.mxu0  ;;  %v2810_v13 = vrot.slane %v2808_v47, 4  ;;  %v1928_v4 = vunpack.c.l.b16 %v1872_v49  ;;  %v5618_v50 = vrot.slane %v3141_v18, 9  ;;  %v1669_v41 = vadd.f32 %v6852_v35, %v6862_v27  ;;  %v1744_v18 = vld [vmem:[#allocation2 + $0x9c] sm:$0xe] }
 0x17b   : > { %v6974_v43 = vadd.f32 %v3038_v17, %v2430_v9  ;;  %v2798_v17 = vshll.u32 %v2494_v63, 16  ;;  %v2783_v63 = vsel %vm6342_vm12, %v2778_v6, %v6963_v0 }
 0x17c   : > { %5468 = vmatmul.msk.bf16.gmra.mxu2 %vm1352_vm11, %v1946_v58  ;;  %v6036_v58 = vld [vmem:[#allocation2 + $0x20] sm:$0x1]  ;;  %v2921_v6 = vunpack.c.l.b16 %v2783_v63 }
 0x17d   : > { %8033 = vst [vmem:[#allocation18_spill] sm:$0xff] %v6974_v43  ;;  %5611 = vmatmul.msk.bf16.gmra.mxu0 %vm1352_vm11, %v2941_v37  ;;  %v3216_v34 = vrot.slane %v6036_v58, 5  ;;  %v2800_v22 = vrot.slane %v2798_v17, 5  ;;  %v6038_v63 = vld [vmem:[#allocation2 + $0xa0] sm:$0xf] }
 0x17e   : > { %v6978_v20 = vpop.f32.mrf.mxu1  ;;  %v1875_v35 = vrot.slane %v6038_v63, 5  ;;  %v5917_v63 = vld [vmem:[#allocation2 + $0x9c] sm:$0xff]  ;;  %v353_v43 = vld [vmem:[#allocation2 + $0xc8] sm:$0x1] }
 0x17f   : > { %v2358_v19 = vpop.f32.mrf.mxu3  ;;  %v2047_v26 = vpop.f32.mrf.mxu2  ;;  %v2801_v47 = vor.u32 %v2800_v22, %v2797_v40  ;;  %v6039_v22 = vld [vmem:[#allocation2 + $0xa4] sm:$0x1] }
 0x180   : > { %v2431_v36 = vadd.f32 %v2358_v19, %v2117_v7  ;;  %v2118_v9 = vadd.f32 %v2047_v26, %v6838_v39  ;;  %v6037_v39 = vld [vmem:[#allocation2 + $0x1c] sm:$0xf]  ;;  %v6991_v7 = vrot.slane %v2804_v16, 5  ;;  %v2922_v19 = vunpack.c.l.b16 %v2793_v56 }
 0x181   : > { %5657 = vmatmul.msk.bf16.vlgmr.msra.gmra.mxu1 %vm1352_vm11, %v3357_v24  ;;  %v3213_v38 = vrot.slane %v6037_v39, 5  ;;  %v1927_v24 = vunpack.c.l.b16 %v1869_v55 }
 0x182   : > { %v3040_v37 = vpop.f32.mrf.mxu0  ;;  %v2811_v49 = vor.u32 %v2810_v13, %v6991_v7  ;;  %v5430_v13 = vrot.slane %v1744_v18, 9 }
 0x183   : > { %v6993_v45 = vadd.f32 %v3040_v37, %v2431_v36  ;;  %v3215_v0 = vrot.slane %v3213_v38, 4  ;;  %v3214_v48 = vsel %vm6677_vm15, %v5618_v50, %v3213_v38  ;;  %v2814_v36 = vshll.u32 %v2496_v25, 16 }
 0x184   : > { %5572 = vmatmul.msk.bf16.gmra.mxu3 %vm1352_vm11, %v5916_v29  ;;  %v1947_v55 = vpack.c.b16 %v1928_v4, %v1927_v24  ;;  %v2942_v37 = vpack.c.b16 %v2922_v19, %v2921_v6  ;;  %v3327_v27 = vunpack.c.l.b16 %v3214_v48  ;;  %v2802_v38 = vrot.slane %v2801_v47, 4  ;;  %v2498_v19 = vld [vmem:[#allocation2 + $0xac] sm:$0xf] }
 0x185   : > { %8034 = vst [vmem:[#allocation19_spill] sm:$0xff] %v6993_v45  ;;  %v3217_v26 = vsel %vm6677_vm15, %v3215_v0, %v3216_v34  ;;  %v2812_v34 = vrot.slane %v2811_v49, 4  ;;  %v2816_v40 = vrot.slane %v2814_v36, 5  ;;  %v1878_v24 = vrot.slane %v6039_v22, 5  ;;  %v297_v0 = vld [vmem:[#allocation2 + $0xc0] sm:$0x1] }
 0x186   : > { %v6998_v54 = vpop.f32.mrf.mxu1  ;;  %v3328_v56 = vunpack.c.l.b16 %v3217_v26  ;;  %v1877_v4 = vrot.slane %v1875_v35, 4  ;;  %v298_v48 = vsel %vm6242_vm4, 0, %v297_v0  ;;  %v2828_v18 = vshll.u32 %v2498_v19, 16 }
 0x187   : > { %v2361_v17 = vpop.f32.mrf.mxu3  ;;  %v2049_v16 = vpop.f32.mrf.mxu2  ;;  %299 = vst [vmem:[#allocation2 + $0xc0] sm:$0x1] %v298_v48  ;;  %v2832_v0 = vshrl.u32 %v2498_v19, 16 }
 0x188   : > { %v2432_v29 = vadd.f32 %v2361_v17, %v2118_v9  ;;  %v2119_v58 = vadd.f32 %v2049_v16, %v1669_v41  ;;  %v2497_v9 = vld [vmem:[#allocation2 + $0xa8] sm:$0xf]  ;;  %v3358_v25 = vpack.c.b16 %v3328_v56, %v3327_v27  ;;  %v2807_v17 = vsel %vm6342_vm12, %v2802_v38, %v6991_v7 }
 0x189   : > { %v235_v41 = vld [vmem:[%s6232_s26 + $0xf0] sm:$0xff]  ;;  %v2819_v47 = vshrl.u32 %v2497_v9, 16  ;;  %v2822_v36 = vshll.u32 %v2497_v9, 16  ;;  %v2817_v27 = vsel %vm6342_vm12, %v2812_v34, %v2816_v40  ;;  %v1879_v7 = vsel %vm6677_vm15, %v1877_v4, %v1878_v24 }
 0x18a   : > { %v3043_v39 = vpop.f32.mrf.mxu0  ;;  %v389_v38 = vpack.c.bf16 %v235_v41, %v235_v41  ;;  %v2923_v22 = vunpack.c.l.b16 %v2807_v17  ;;  %v1930_v24 = vunpack.c.l.b16 %v1879_v7  ;;  %v2834_v17 = vrot.slane %v2832_v0, 4 }
 0x18b   : > { %v7005_v50 = vadd.f32 %v3043_v39, %v2432_v29  ;;  %v236_v29 = vld [vmem:[%s6232_s26 + $0xf8] sm:$0xff]  ;;  %v1876_v39 = vsel %vm6677_vm15, %v5430_v13, %v1875_v35  ;;  %v2821_v34 = vrot.slane %v2819_v47, 4  ;;  %v2824_v40 = vrot.slane %v2822_v36, 5 }
 0x18c   : > { %5469 = vmatmul.msk.bf16.gmra.mxu2 %vm1352_vm11, %v1947_v55  ;;  %v6040_v55 = vld [vmem:[#allocation2 + $0x2c] sm:$0x1]  ;;  %v1929_v35 = vunpack.c.l.b16 %v1876_v39  ;;  %v649_v41 = vshrl.u32 %v389_v38, 16  ;;  %v2499_v39 = vld [vmem:[#allocation2 + $0xb0] sm:$0x1] }
 0x18d   : > { %8035 = vst [vmem:[#allocation20_spill] sm:$0xff] %v7005_v50  ;;  %5612 = vmatmul.msk.bf16.gmra.mxu0 %vm1352_vm11, %v2942_v37  ;;  %v3223_v49 = vrot.slane %v6040_v55, 5  ;;  %v2924_v55 = vunpack.c.l.b16 %v2817_v27 }
 0x18e   : > { %v7009_v6 = vpop.f32.mrf.mxu1  ;;  %v651_v45 = vrot.slane %v649_v41, 7 }
 0x18f   : > { %v2363_v26 = vpop.f32.mrf.mxu3  ;;  %v2052_v16 = vpop.f32.mrf.mxu2 }
 0x190   : > { %v2433_v37 = vadd.f32 %v2363_v26, %v2119_v58  ;;  %v2120_v56 = vadd.f32 %v2052_v16, %v6878_v10  ;;  %v6041_v58 = vld [vmem:[#allocation2 + $0x28] sm:$0xf]  ;;  %v390_v26 = vpack.c.bf16 %v236_v29, %v236_v29  ;;  %v3142_v10 = vld [vmem:[#allocation2 + $0x24] sm:$0xe] }
 0x191   : > { %5658 = vmatmul.msk.bf16.gmra.mxu1 %vm1352_vm11, %v3358_v25  ;;  %v3220_v48 = vrot.slane %v6041_v58, 5  ;;  %v5619_v13 = vrot.slane %v3142_v10, 9  ;;  %v7029_v25 = vrot.slane %v2828_v18, 5  ;;  %v1948_v18 = vpack.c.b16 %v1930_v24, %v1929_v35  ;;  %v6042_v10 = vld [vmem:[#allocation2 + $0xac] sm:$0xf] }
 0x192   : > { %v3045_v9 = vpop.f32.mrf.mxu0  ;;  %v657_v36 = vshrl.u32 %v390_v26, 16  ;;  %v2825_v58 = vor.u32 %v2824_v40, %v2821_v34  ;;  %v1882_v0 = vrot.slane %v6042_v10, 5  ;;  %v655_v34 = vrot.slane %v651_v45, 4  ;;  %v821_v35 = vld [vmem:[#allocation2 + $0xc0] sm:$0xf] }
 0x193   : > { %v7026_v16 = vadd.f32 %v3045_v9, %v2433_v37  ;;  %v3222_v4 = vrot.slane %v3220_v48, 4  ;;  %v3221_v29 = vsel %vm6677_vm15, %v5619_v13, %v3220_v48  ;;  %v2943_v37 = vpack.c.b16 %v2924_v55, %v2923_v22  ;;  %v5952_v22 = vld [vmem:[%s8003_s1 + $0xd8] sm:$0xff]  ;;  %v6043_v24 = vld [vmem:[#allocation2 + $0xb0] sm:$0x1] }
 0x194   : > { %5573 = vmatmul.msk.bf16.gmra.mxu3 %vm1352_vm11, %v5917_v63  ;;  %v2835_v13 = vor.u32 %v2834_v17, %v7029_v25  ;;  %v7042_v55 = vrot.slane %v657_v36, 7  ;;  %v660_v40 = vshll.u32 %v390_v26, 16  ;;  %v1885_v41 = vrot.slane %v6043_v24, 5  ;;  %v2500_v17 = vld [vmem:[#allocation2 + $0xb4] sm:$0xf]  ;;  %3764 = vmatpush.bf16.msra.mxu2 %v5952_v22  ;;  %v5956_v26 = vld [vmem:[%s8003_s1 + $0xf8] sm:$0xff] }
 0x195   : > { %8036 = vst [vmem:[#allocation21_spill] sm:$0xff] %v7026_v16  ;;  %v3224_v47 = vsel %vm6677_vm15, %v3222_v4, %v3223_v49  ;;  %v3329_v16 = vunpack.c.l.b16 %v3221_v29  ;;  %v2838_v49 = vshll.u32 %v2499_v39, 16  ;;  %v1745_v4 = vld [vmem:[#allocation2 + $0xa8] sm:$0xe]  ;;  %v2826_v29 = vrot.slane %v2825_v58, 4  ;;  %4446 = vmatpush.bf16.msra.mxu3 %v5956_v26  ;;  %v5960_v24 = vld [vmem:[%s8003_s1 + $0x118] sm:$0xff] }
 0x196   : > { %v7031_v19 = vpop.f32.mrf.mxu1  ;;  %v3330_v50 = vunpack.c.l.b16 %v3224_v47  ;;  %v1884_v36 = vrot.slane %v1882_v0, 4  ;;  %v662_v39 = vor.u32 %v660_v40, %v7042_v55  ;;  %v2846_v32 = vshll.u32 %v2500_v17, 16  ;;  %4872 = vmatpush.bf16.msra.mxu0 %v5960_v24 }
 0x197   : > { %v2366_v27 = vpop.f32.mrf.mxu3  ;;  %v2054_v63 = vpop.f32.mrf.mxu2 }
 0x198   : > { %v2434_v7 = vadd.f32 %v2366_v27, %v2120_v56  ;;  %v2121_v9 = vadd.f32 %v2054_v63, %v6896_v42  ;;  %v652_v56 = vshll.u32 %v389_v38, 16  ;;  %v354_v27 = vsel %vm6251_vm5, 0, %v353_v43 }
 0x199   : > { %v5431_v38 = vrot.slane %v1745_v4, 9  ;;  %v3359_v63 = vpack.c.b16 %v3330_v50, %v3329_v16  ;;  %355 = vst [vmem:[#allocation2 + $0xc8] sm:$0x1] %v354_v27  ;;  %v663_v4 = vsel %vm6276_vm7, %v655_v34, %v662_v39  ;;  %v3143_v27 = vld [vmem:[#allocation2 + $0x30] sm:$0xe] }
 0x19a   : > { %v3048_v48 = vpop.f32.mrf.mxu0  ;;  %v654_v47 = vor.u32 %v652_v56, %v651_v45  ;;  %v2836_v45 = vrot.slane %v2835_v13, 4  ;;  %v5918_v56 = vld [vmem:[#allocation2 + $0xa8] sm:$0xff]  ;;  %v2843_v13 = vshrl.u32 %v2500_v17, 16  ;;  %824 = vst.msk [vmem:[#allocation2 + $0xc4] sm:$0xf] %vm237_vm0, %v663_v4 }
 0x19b   : > { %v7044_v42 = vadd.f32 %v3048_v48, %v2434_v7  ;;  %v1677_v7 = vadd.f32 %v6882_v2, %v6742_v46  ;;  %v2501_v48 = vld [vmem:[#allocation2 + $0xb8] sm:$0xf]  ;;  %v2831_v46 = vsel %vm6342_vm12, %v2826_v29, %v7029_v25  ;;  %v1883_v44 = vsel %vm6677_vm15, %v5431_v38, %v1882_v0  ;;  %v6045_v29 = vld [vmem:[#allocation2 + $0x34] sm:$0xf]  ;;  %v2502_v4 = vld [vmem:[#allocation2 + $0xbc] sm:$0x1] }
 0x19c   : > { %5470 = vmatmul.msk.bf16.gmra.mxu2 %vm1352_vm11, %v1948_v18  ;;  %v2840_v18 = vrot.slane %v2838_v49, 5  ;;  %v822_v43 = vsel %vm6286_vm8, %v654_v47, %v821_v35  ;;  %v1886_v49 = vsel %vm6677_vm15, %v1884_v36, %v1885_v41  ;;  %v2852_v25 = vshll.u32 %v2501_v48, 16 }
 0x19d   : > { %5613 = vmatmul.msk.bf16.gmra.mxu0 %vm1352_vm11, %v2943_v37  ;;  %v6044_v37 = vld [vmem:[#allocation2 + $0x38] sm:$0x1]  ;;  %823 = vst [vmem:[#allocation2 + $0xc0] sm:$0xf] %v822_v43  ;;  %v2856_v35 = vshrl.u32 %v2501_v48, 16  ;;  %v3227_v0 = vrot.slane %v6045_v29, 5  ;;  %v1679_v41 = vadd.f32 %v6899_v21, %v6748_v57  ;;  %v2925_v47 = vunpack.c.l.b16 %v2831_v46 }
 0x19e   : > { %v7056_v58 = vpop.f32.mrf.mxu1  ;;  %v3230_v50 = vrot.slane %v6044_v37, 5  ;;  %v2841_v40 = vsel %vm6342_vm12, %v2836_v45, %v2840_v18  ;;  %v1932_v38 = vunpack.c.l.b16 %v1886_v49  ;;  %v5620_v36 = vrot.slane %v3143_v27, 9  ;;  %v6047_v27 = vld [vmem:[#allocation2 + $0xbc] sm:$0x1] }
 0x19f   : > { %v2368_v16 = vpop.f32.mrf.mxu3  ;;  %v2057_v10 = vpop.f32.mrf.mxu2  ;;  %v2926_v39 = vunpack.c.l.b16 %v2841_v40  ;;  %v2848_v45 = vrot.slane %v2846_v32, 5  ;;  %v7084_v43 = vrot.slane %v2852_v25, 5  ;;  %v2858_v57 = vrot.slane %v2856_v35, 4  ;;  %v1746_v32 = vld [vmem:[#allocation2 + $0xb4] sm:$0xe] }
 0x1a0   : > { %v2435_v22 = vadd.f32 %v2368_v16, %v2121_v9  ;;  %v2122_v2 = vadd.f32 %v2057_v10, %v1677_v7  ;;  %v664_v9 = vrot.slane %v7042_v55, 4  ;;  %v1931_v55 = vunpack.c.l.b16 %v1883_v44  ;;  %v825_v26 = vld [vmem:[#allocation2 + $0xc8] sm:$0x1] }
 0x1a1   : > { %5659 = vmatmul.msk.bf16.gmra.mxu1 %vm1352_vm11, %v3359_v63  ;;  %v3229_v63 = vrot.slane %v3227_v0, 4  ;;  %v2845_v7 = vrot.slane %v2843_v13, 4  ;;  %v3228_v37 = vsel %vm6677_vm15, %v5620_v36, %v3227_v0  ;;  %v6046_v13 = vld [vmem:[#allocation2 + $0xb8] sm:$0xf]  ;;  %v2944_v49 = vpack.c.b16 %v2926_v39, %v2925_v47  ;;  %v5951_v39 = vld [vmem:[%s8003_s1 + $0xd0] sm:$0xff] }
 0x1a2   : > { %v3050_v34 = vpop.f32.mrf.mxu0  ;;  %v826_v18 = vsel %vm6242_vm4, %v664_v9, %v825_v26  ;;  %v1949_v46 = vpack.c.b16 %v1932_v38, %v1931_v55  ;;  %v1889_v44 = vrot.slane %v6046_v13, 5  ;;  %v3331_v9 = vunpack.c.l.b16 %v3228_v37  ;;  %3765 = vmatpush.bf16.msra.mxu2 %v5951_v39 }
 0x1a3   : > { %v7079_v17 = vadd.f32 %v3050_v34, %v2435_v22  ;;  %v3231_v16 = vsel %vm6677_vm15, %v3229_v63, %v3230_v50  ;;  %827 = vst [vmem:[#allocation2 + $0xc8] sm:$0x1] %v826_v18  ;;  %v2849_v35 = vor.u32 %v2848_v45, %v2845_v7  ;;  %v2859_v24 = vor.u32 %v2858_v57, %v7084_v43  ;;  %v2504_v50 = vld [vmem:[#allocation2 + $0xc4] sm:$0xf]  ;;  %v5955_v7 = vld [vmem:[%s8003_s1 + $0xf0] sm:$0xff] }
 0x1a4   : > { %5574 = vmatmul.msk.bf16.gmra.mxu3 %vm1352_vm11, %v5918_v56  ;;  %v3332_v34 = vunpack.c.l.b16 %v3231_v16  ;;  %v2503_v40 = vld [vmem:[#allocation2 + $0xc0] sm:$0xf]  ;;  %v2862_v29 = vshll.u32 %v2502_v4, 16  ;;  %v1892_v36 = vrot.slane %v6047_v27, 5  ;;  %v2876_v63 = vshll.u32 %v2504_v50, 16 }
 0x1a5   : > { %v2867_v55 = vshrl.u32 %v2503_v40, 16  ;;  %v2870_v38 = vshll.u32 %v2503_v40, 16  ;;  %v2880_v26 = vshrl.u32 %v2504_v50, 16  ;;  %v1682_v45 = vadd.f32 %v6907_v5, %v6752_v62  ;;  %4447 = vmatpush.bf16.msra.mxu3 %v5955_v7  ;;  %v5959_v62 = vld [vmem:[%s8003_s1 + $0x110] sm:$0xff]  ;;  %v5958_v50 = vld [vmem:[%s8003_s1 + $0x108] sm:$0xff] }
 0x1a6   : > { %v7086_v21 = vpop.f32.mrf.mxu1  ;;  %v3360_v47 = vpack.c.b16 %v3332_v34, %v3331_v9  ;;  %v2850_v18 = vrot.slane %v2849_v35, 4  ;;  %v2860_v57 = vrot.slane %v2859_v24, 4  ;;  %v2864_v37 = vrot.slane %v2862_v29, 5  ;;  %4873 = vmatpush.bf16.msra.mxu0 %v5959_v62  ;;  %v5950_v24 = vld [vmem:[%s8003_s1 + $0xc8] sm:$0xff]  ;;  %v6049_v27 = vld [vmem:[#allocation2 + $0x40] sm:$0xf] }
 0x1a7   : > { %v2371_v10 = vpop.f32.mrf.mxu3  ;;  %v2059_v48 = vpop.f32.mrf.mxu2  ;;  %v2869_v5 = vrot.slane %v2867_v55, 4  ;;  %v7115_v9 = vrot.slane %v2876_v63, 5  ;;  %v2882_v34 = vrot.slane %v2880_v26, 4  ;;  %v5954_v29 = vld [vmem:[%s8003_s1 + $0xe8] sm:$0xff]  ;;  %v3881_v55 = vld [vmem:[#allocation2 + $0x18] sm:$0xf]  ;;  %3766 = vmatpush.bf16.msra.mxu2 %v5950_v24 }
 0x1a8   : > { %v2436_v22 = vadd.f32 %v2371_v10, %v2122_v2  ;;  %v2123_v56 = vadd.f32 %v2059_v48, %v1679_v41  ;;  %v5432_v2 = vrot.slane %v1746_v32, 9  ;;  %v1891_v41 = vrot.slane %v1889_v44, 4  ;;  %v5949_v26 = vld [vmem:[%s8003_s1 + $0xc0] sm:$0xff] }
 0x1a9   : > { %v2872_v32 = vrot.slane %v2870_v38, 5  ;;  %v2865_v35 = vsel %vm6342_vm12, %v2860_v57, %v2864_v37  ;;  %v2883_v57 = vor.u32 %v2882_v34, %v7115_v9  ;;  %4448 = vmatpush.bf16.msra.mxu3 %v5954_v29  ;;  %v5953_v37 = vld [vmem:[%s8003_s1 + $0xe0] sm:$0xff] }
 0x1aa   : > { %v3053_v25 = vpop.f32.mrf.mxu0  ;;  %v1890_v13 = vsel %vm6677_vm15, %v5432_v2, %v1889_v44  ;;  %v2855_v44 = vsel %vm6342_vm12, %v2850_v18, %v7084_v43  ;;  %v1684_v43 = vadd.f32 %v6924_v12, %v6768_v23  ;;  %v2505_v2 = vld [vmem:[#allocation2 + $0xc8] sm:$0x1]  ;;  %v2928_v23 = vunpack.c.l.b16 %v2865_v35  ;;  %4874 = vmatpush.bf16.msra.mxu0 %v5958_v50  ;;  %v5957_v35 = vld [vmem:[%s8003_s1 + $0x100] sm:$0xff] }
 0x1ab   : > { %v7093_v0 = vadd.f32 %v3053_v25, %v2436_v22  ;;  %v5919_v22 = vld [vmem:[#allocation2 + $0xb4] sm:$0xff]  ;;  %v1933_v38 = vunpack.c.l.b16 %v1890_v13  ;;  %v2927_v18 = vunpack.c.l.b16 %v2855_v44  ;;  %v2873_v12 = vor.u32 %v2872_v32, %v2869_v5  ;;  %3767 = vmatpush.bf16.msra.mxu2 %v5949_v26 }
 0x1ac   : > { %5471 = vmatmul.msk.bf16.gmra.mxu2 %vm1352_vm11, %v1949_v46  ;;  %v3930_v13 = vshrl.u32 %v3881_v55, 16  ;;  %v3933_v5 = vshll.u32 %v3881_v55, 16  ;;  %v1687_v26 = vadd.f32 %v6940_v59, %v6781_v51  ;;  %v6050_v51 = vld [vmem:[#allocation2 + $0x50] sm:$0x1] }
 0x1ad   : > { %5614 = vmatmul.msk.bf16.gmra.mxu0 %vm1352_vm11, %v2944_v49  ;;  %v1893_v49 = vsel %vm6677_vm15, %v1891_v41, %v1892_v36  ;;  %v3234_v36 = vrot.slane %v6049_v27, 5  ;;  %v3144_v41 = vld [vmem:[#allocation2 + $0x3c] sm:$0xe]  ;;  %v2945_v24 = vpack.c.b16 %v2928_v23, %v2927_v18  ;;  %4449 = vmatpush.bf16.msra.mxu3 %v5953_v37  ;;  %v2874_v27 = vrot.slane %v2873_v12, 4 }
 0x1ae   : > { %v7105_v16 = vpop.f32.mrf.mxu1  ;;  %v1934_v63 = vunpack.c.l.b16 %v1893_v49  ;;  %v5621_v39 = vrot.slane %v3144_v41, 9  ;;  %4875 = vmatpush.bf16.msra.mxu0 %v5957_v35  ;;  %v3932_v41 = vrot.slane %v3930_v13, 4  ;;  %v3935_v55 = vrot.slane %v3933_v5, 5 }
 0x1af   : > { %v2373_v10 = vpop.f32.mrf.mxu3  ;;  %v2062_v48 = vpop.f32.mrf.mxu2  ;;  %v3236_v7 = vrot.slane %v3234_v36, 4  ;;  %v3244_v59 = vrot.slane %v6050_v51, 5 }
 0x1b0   : > { %v2437_v4 = vadd.f32 %v2373_v10, %v2123_v56  ;;  %v2124_v46 = vadd.f32 %v2062_v48, %v1682_v45  ;;  %v6048_v56 = vld [vmem:[#allocation2 + $0x44] sm:$0x1]  ;;  %v7139_v45 = vld [vmem:[#allocation2 + $0x1c] sm:$0xf]  ;;  %v2886_v10 = vshll.u32 %v2505_v2, 16  ;;  %v1950_v44 = vpack.c.b16 %v1934_v63, %v1933_v38 }
 0x1b1   : > { %5660 = vmatmul.msk.bf16.gmra.mxu1 %vm1352_vm11, %v3360_v47  ;;  %v3237_v40 = vrot.slane %v6048_v56, 5  ;;  %v3939_v32 = vshll.u32 %v7139_v45, 16  ;;  %v3943_v34 = vshrl.u32 %v7139_v45, 16  ;;  %v7159_v38 = vld [vmem:[#allocation2 + $0x20] sm:$0x1] }
 0x1b2   : > { %v3055_v25 = vpop.f32.mrf.mxu0  ;;  %v2888_v2 = vrot.slane %v2886_v10, 5  ;;  %v3949_v10 = vshll.u32 %v7159_v38, 16 }
 0x1b3   : > { %v7133_v47 = vadd.f32 %v3055_v25, %v2437_v4  ;;  %v3235_v4 = vsel %vm6677_vm15, %v5621_v39, %v3234_v36  ;;  %v2884_v36 = vrot.slane %v2883_v57, 4  ;;  %v3941_v39 = vrot.slane %v3939_v32, 5  ;;  %v6051_v32 = vld [vmem:[#allocation2 + $0x4c] sm:$0xf] }
 0x1b4   : > { %5575 = vmatmul.msk.bf16.gmra.mxu3 %vm1352_vm11, %v5919_v22  ;;  %v3238_v22 = vsel %vm6677_vm15, %v3236_v7, %v3237_v40  ;;  %v3333_v29 = vunpack.c.l.b16 %v3235_v4  ;;  %v2879_v7 = vsel %vm6342_vm12, %v2874_v27, %v7115_v9  ;;  %v3936_v57 = vor.u32 %v3935_v55, %v3932_v41  ;;  %v7182_v41 = vld [vmem:[#allocation2 + $0x28] sm:$0xf] }
 0x1b5   : > { %v3334_v40 = vunpack.c.l.b16 %v3238_v22  ;;  %v2889_v23 = vsel %vm6342_vm12, %v2884_v36, %v2888_v2  ;;  %v5920_v22 = vld [vmem:[#allocation2 + $0xc0] sm:$0xff]  ;;  %v2929_v9 = vunpack.c.l.b16 %v2879_v7  ;;  %v3951_v35 = vrot.slane %v3949_v10, 5 }
 0x1b6   : > { %v7145_v48 = vpop.f32.mrf.mxu1  ;;  %v2930_v5 = vunpack.c.l.b16 %v2889_v23  ;;  %v1689_v27 = vadd.f32 %v6965_v33, %v6792_v8  ;;  %v5933_v23 = vld [vmem:[#allocation2 + $0x18] sm:$0xff]  ;;  %v3967_v51 = vshrl.u32 %v7182_v41, 16 }
 0x1b7   : > { %v2376_v49 = vpop.f32.mrf.mxu3  ;;  %v2064_v62 = vpop.f32.mrf.mxu2  ;;  %v3361_v63 = vpack.c.b16 %v3334_v40, %v3333_v29 }
 0x1b8   : > { %v2438_v56 = vadd.f32 %v2376_v49, %v2124_v46  ;;  %v2125_v25 = vadd.f32 %v2064_v62, %v1684_v43  ;;  %v3945_v46 = vrot.slane %v3943_v34, 4  ;;  %v3241_v34 = vrot.slane %v6051_v32, 5 }
 0x1b9   : > { %v2946_v55 = vpack.c.b16 %v2930_v5, %v2929_v9  ;;  %v4632_v32 = vrot.slane %v7159_v38, 5 }
 0x1ba   : > { %v3058_v50 = vpop.f32.mrf.mxu0  ;;  %v3946_v37 = vor.u32 %v3945_v46, %v3941_v39  ;;  %v3243_v40 = vrot.slane %v3241_v34, 4 }
 0x1bb   : > { %v7156_v43 = vadd.f32 %v3058_v50, %v2438_v56  ;;  %v3937_v56 = vrot.slane %v3936_v57, 4  ;;  %v3884_v50 = vld [vmem:[#allocation2 + $0x24] sm:$0xf] }
 0x1bc   : > { %5472 = vmatmul.msk.bf16.gmra.mxu2 %vm1352_vm11, %v1950_v44  ;;  %v3947_v44 = vrot.slane %v3946_v37, 4  ;;  %v3245_v2 = vsel %vm6677_vm15, %v3243_v40, %v3244_v59  ;;  %v3954_v57 = vshrl.u32 %v3884_v50, 16  ;;  %v3957_v37 = vshll.u32 %v3884_v50, 16  ;;  %v7200_v40 = vld [vmem:[#allocation2 + $0x2c] sm:$0x1] }
 0x1bd   : > { %5615 = vmatmul.msk.bf16.gmra.mxu0 %vm1352_vm11, %v2945_v24  ;;  %v3145_v24 = vld [vmem:[#allocation2 + $0x48] sm:$0xe] }
 0x1be   : > { %v7170_v49 = vpop.f32.mrf.mxu1  ;;  %v3952_v7 = vsel %vm6342_vm12, %v3947_v44, %v3951_v35  ;;  %v3959_v44 = vrot.slane %v3957_v37, 5 }
 0x1bf   : > { %v2378_v18 = vpop.f32.mrf.mxu3  ;;  %v2067_v12 = vpop.f32.mrf.mxu2 }
 0x1c0   : > { %v2439_v4 = vadd.f32 %v2378_v18, %v2125_v25  ;;  %v2126_v13 = vadd.f32 %v2067_v12, %v1687_v26  ;;  %v5622_v25 = vrot.slane %v3145_v24, 9  ;;  %v3942_v26 = vsel %vm6342_vm12, %v3937_v56, %v3941_v39  ;;  %v4563_v12 = vld [vmem:[#allocation2 + $0x18] sm:$0xe] }
 0x1c1   : > { %5661 = vmatmul.msk.bf16.gmra.mxu1 %vm1352_vm11, %v3361_v63  ;;  %v4629_v18 = vrot.slane %v7139_v45, 5  ;;  %v4322_v39 = vunpack.c.l.b16 %v3942_v26  ;;  %v5817_v9 = vrot.slane %v4563_v12, 9  ;;  %v4323_v45 = vunpack.c.l.b16 %v3952_v7 }
 0x1c2   : > { %v3060_v62 = vpop.f32.mrf.mxu0  ;;  %v3242_v36 = vsel %vm6677_vm15, %v5622_v25, %v3241_v34  ;;  %v3956_v34 = vrot.slane %v3954_v57, 4  ;;  %v3969_v24 = vrot.slane %v3967_v51, 4  ;;  %v1692_v25 = vadd.f32 %v6978_v20, %v6808_v60  ;;  %v6052_v60 = vld [vmem:[#allocation2 + $0x5c] sm:$0x1]  ;;  %v3887_v57 = vld [vmem:[#allocation2 + $0x30] sm:$0xf] }
 0x1c3   : > { %v7173_v29 = vadd.f32 %v3060_v62, %v2439_v4  ;;  %v3335_v10 = vunpack.c.l.b16 %v3242_v36  ;;  %v3336_v4 = vunpack.c.l.b16 %v3245_v2  ;;  %v4354_v2 = vpack.c.b16 %v4323_v45, %v4322_v39 }
 0x1c4   : > { %5576 = vmatmul.msk.bf16.gmra.mxu3 %vm1352_vm11, %v5920_v22  ;;  %v3963_v22 = vshll.u32 %v7182_v41, 16  ;;  %v3973_v7 = vshll.u32 %v7200_v40, 16  ;;  %v3251_v20 = vrot.slane %v6052_v60, 5  ;;  %v1694_v39 = vadd.f32 %v6998_v54, %v6822_v30 }
 0x1c5   : > { %v3362_v56 = vpack.c.b16 %v3336_v4, %v3335_v10 }
 0x1c6   : > { %v7191_v62 = vpop.f32.mrf.mxu1  ;;  %v3965_v35 = vrot.slane %v3963_v22, 5 }
 0x1c7   : > { %v2381_v46 = vpop.f32.mrf.mxu3  ;;  %v2069_v63 = vpop.f32.mrf.mxu2 }
 0x1c8   : > { %v2440_v8 = vadd.f32 %v2381_v46, %v2126_v13  ;;  %v2127_v33 = vadd.f32 %v2069_v63, %v1689_v27  ;;  %v4631_v13 = vrot.slane %v4629_v18, 4  ;;  %v4630_v46 = vsel %vm6677_vm15, %v5817_v9, %v4629_v18 }
 0x1c9   : > { %v3960_v63 = vor.u32 %v3959_v44, %v3956_v34  ;;  %v3970_v26 = vor.u32 %v3969_v24, %v3965_v35  ;;  %v4748_v18 = vunpack.c.l.b16 %v4630_v46  ;;  %v3978_v44 = vshrl.u32 %v3887_v57, 16 }
 0x1ca   : > { %v3063_v59 = vpop.f32.mrf.mxu0 }
 0x1cb   : > { %v7193_v5 = vadd.f32 %v3063_v59, %v2440_v8  ;;  %v7213_v59 = vld [vmem:[#allocation2 + $0x34] sm:$0xf]  ;;  %v3961_v9 = vrot.slane %v3960_v63, 4  ;;  %v3971_v45 = vrot.slane %v3970_v26, 4 }
 0x1cc   : > { %5761 = vmatmul.msk.bf16.vlgmr.msra.gmra.mxu2 %vm1352_vm11, %v5933_v23  ;;  %v6053_v23 = vld [vmem:[#allocation2 + $0x58] sm:$0xf]  ;;  %v3991_v30 = vshrl.u32 %v7213_v59, 16 }
 0x1cd   : > { %5616 = vmatmul.msk.bf16.gmra.mxu0 %vm1352_vm11, %v2946_v55  ;;  %v4633_v55 = vsel %vm6677_vm15, %v4631_v13, %v4632_v32  ;;  %v3248_v12 = vrot.slane %v6053_v23, 5  ;;  %v3975_v13 = vrot.slane %v3973_v7, 5  ;;  %v4636_v32 = vrot.slane %v7182_v41, 5 }
 0x1ce   : > { %v4749_v10 = vunpack.c.l.b16 %v4633_v55  ;;  %v7211_v4 = vpop.f32.mrf.mxu1  ;;  %v5934_v55 = vld [vmem:[#allocation2 + $0x24] sm:$0xff]  ;;  %v3966_v41 = vsel %vm6342_vm12, %v3961_v9, %v3965_v35  ;;  %v4639_v23 = vrot.slane %v7200_v40, 5 }
 0x1cf   : > { %v2383_v50 = vpop.f32.mrf.mxu3  ;;  %v2072_v27 = vpop.f32.mrf.mxu2  ;;  %v3250_v51 = vrot.slane %v3248_v12, 4  ;;  %v3976_v63 = vsel %vm6342_vm12, %v3971_v45, %v3975_v13 }
 0x1d0   : > { %v2441_v36 = vadd.f32 %v2383_v50, %v2127_v33  ;;  %v2128_v38 = vadd.f32 %v2072_v27, %v1692_v25  ;;  %v3146_v33 = vld [vmem:[#allocation2 + $0x54] sm:$0xe]  ;;  %v4564_v50 = vld [vmem:[#allocation2 + $0x24] sm:$0xe]  ;;  %v3981_v27 = vshll.u32 %v3887_v57, 16  ;;  %v4780_v54 = vpack.c.b16 %v4749_v10, %v4748_v18 }
 0x1d1   : > { %5662 = vmatmul.msk.bf16.gmra.mxu1 %vm1352_vm11, %v3362_v56  ;;  %v5623_v22 = vrot.slane %v3146_v33, 9  ;;  %v3252_v56 = vsel %vm6677_vm15, %v3250_v51, %v3251_v20  ;;  %v5818_v20 = vrot.slane %v4564_v50, 9  ;;  %v3993_v18 = vrot.slane %v3991_v30, 4 }
 0x1d2   : > { %v3065_v8 = vpop.f32.mrf.mxu0  ;;  %v3338_v7 = vunpack.c.l.b16 %v3252_v56  ;;  %v3983_v33 = vrot.slane %v3981_v27, 5  ;;  %v4324_v10 = vunpack.c.l.b16 %v3966_v41  ;;  %v4325_v35 = vunpack.c.l.b16 %v3976_v63  ;;  %v3147_v41 = vld [vmem:[#allocation2 + $0x60] sm:$0xe] }
 0x1d3   : > { %v7208_v37 = vadd.f32 %v3065_v8, %v2441_v36  ;;  %v3249_v34 = vsel %vm6677_vm15, %v5623_v22, %v3248_v12  ;;  %v3987_v36 = vshll.u32 %v7213_v59, 16  ;;  %v4638_v8 = vrot.slane %v4636_v32, 4  ;;  %v7232_v22 = vld [vmem:[#allocation2 + $0x38] sm:$0x1] }
 0x1d4   : > { %5801 = vmatmul.msk.bf16.vlgmr.msra.gmra.mxu3 %vm1352_vm11, %v4354_v2  ;;  %v3337_v26 = vunpack.c.l.b16 %v3249_v34  ;;  %v3980_v12 = vrot.slane %v3978_v44, 4  ;;  %v4637_v40 = vsel %vm6677_vm15, %v5818_v20, %v4636_v32  ;;  %v4355_v50 = vpack.c.b16 %v4325_v35, %v4324_v10  ;;  %v6054_v32 = vld [vmem:[#allocation2 + $0x64] sm:$0xf]  ;;  %v3890_v20 = vld [vmem:[#allocation2 + $0x3c] sm:$0xf] }
 0x1d5   : > { %v3989_v57 = vrot.slane %v3987_v36, 5  ;;  %v4640_v13 = vsel %vm6677_vm15, %v4638_v8, %v4639_v23  ;;  %v3255_v30 = vrot.slane %v6054_v32, 5  ;;  %v1699_v8 = vadd.f32 %v7031_v19, %v6854_v15 }
 0x1d6   : > { %v3363_v51 = vpack.c.b16 %v3338_v7, %v3337_v26  ;;  %v7239_v9 = vpop.f32.mrf.mxu1  ;;  %v3984_v56 = vor.u32 %v3983_v33, %v3980_v12  ;;  %v4751_v36 = vunpack.c.l.b16 %v4640_v13  ;;  %v5624_v26 = vrot.slane %v3147_v41, 9  ;;  %v7254_v33 = vld [vmem:[#allocation2 + $0x40] sm:$0xf]  ;;  %v5935_v13 = vld [vmem:[#allocation2 + $0x30] sm:$0xff] }
 0x1d7   : > { %v2386_v24 = vpop.f32.mrf.mxu3  ;;  %v2074_v25 = vpop.f32.mrf.mxu2  ;;  %v3994_v44 = vor.u32 %v3993_v18, %v3989_v57  ;;  %v3257_v7 = vrot.slane %v3255_v30, 4 }
 0x1d8   : > { %v2442_v2 = vadd.f32 %v2386_v24, %v2128_v38  ;;  %v2129_v46 = vadd.f32 %v2074_v25, %v1694_v39  ;;  %v1697_v39 = vadd.f32 %v7009_v6, %v6834_v53  ;;  %v3997_v24 = vshll.u32 %v7232_v22, 16 }
 0x1d9   : > { %v4750_v6 = vunpack.c.l.b16 %v4637_v40  ;;  %v3256_v23 = vsel %vm6677_vm15, %v5624_v26, %v3255_v30  ;;  %v4643_v40 = vrot.slane %v7213_v59, 5  ;;  %v4646_v30 = vrot.slane %v7232_v22, 5 }
 0x1da   : > { %v3068_v60 = vpop.f32.mrf.mxu0 }
 0x1db   : > { %v7229_v38 = vadd.f32 %v3068_v60, %v2442_v2  ;;  %v3995_v2 = vrot.slane %v3994_v44, 4  ;;  %v4781_v18 = vpack.c.b16 %v4751_v36, %v4750_v6  ;;  %v4005_v44 = vshll.u32 %v3890_v20, 16 }
 0x1dc   : > { %5762 = vmatmul.msk.bf16.gmra.mxu2 %vm1352_vm11, %v5934_v55  ;;  %v3999_v55 = vrot.slane %v3997_v24, 5  ;;  %v3339_v24 = vunpack.c.l.b16 %v3256_v23 }
 0x1dd   : > { %5857 = vmatmul.msk.bf16.vlgmr.msra.gmra.mxu0 %vm1352_vm11, %v4780_v54  ;;  %v3985_v54 = vrot.slane %v3984_v56, 4  ;;  %v4002_v56 = vshrl.u32 %v3890_v20, 16 }
 0x1df   : > { %v2388_v45 = vpop.f32.mrf.mxu3  ;;  %v2077_v34 = vpop.f32.mrf.mxu2 }
 0x1e0   : > { %v2443_v25 = vadd.f32 %v2388_v45, %v2129_v46  ;;  %v2130_v27 = vadd.f32 %v2077_v34, %v1697_v39  ;;  %v6055_v46 = vld [vmem:[#allocation2 + $0x68] sm:$0x1]  ;;  %v4000_v39 = vsel %vm6342_vm12, %v3995_v2, %v3999_v55  ;;  %v7261_v45 = vpop.f32.mrf.mxu1  ;;  %v4565_v34 = vld [vmem:[#allocation2 + $0x30] sm:$0xe]  ;;  %v4007_v55 = vrot.slane %v4005_v44, 5 }
 0x1e1   : > { %5663 = vmatmul.msk.bf16.gmra.mxu1 %vm1352_vm11, %v3363_v51  ;;  %v3258_v60 = vrot.slane %v6055_v46, 5  ;;  %v3990_v51 = vsel %vm6342_vm12, %v3985_v54, %v3989_v57  ;;  %v5819_v36 = vrot.slane %v4565_v34, 9  ;;  %v4327_v59 = vunpack.c.l.b16 %v4000_v39  ;;  %v7274_v46 = vld [vmem:[#allocation2 + $0x44] sm:$0x1]  ;;  %v6056_v39 = vld [vmem:[#allocation2 + $0x70] sm:$0xf] }
 0x1e2   : > { %v3070_v53 = vpop.f32.mrf.mxu0  ;;  %v4326_v6 = vunpack.c.l.b16 %v3990_v51  ;;  %v4004_v54 = vrot.slane %v4002_v56, 4  ;;  %v3893_v34 = vld [vmem:[#allocation2 + $0x48] sm:$0xf] }
 0x1e3   : > { %v7245_v63 = vadd.f32 %v3070_v53, %v2443_v25  ;;  %v3259_v12 = vsel %vm6677_vm15, %v3257_v7, %v3258_v60  ;;  %v4015_v53 = vshrl.u32 %v7254_v33, 16  ;;  %v1702_v7 = vadd.f32 %v7056_v58, %v6860_v61 }
 0x1e4   : > { %5802 = vmatmul.msk.bf16.gmra.mxu3 %vm1352_vm11, %v4355_v50  ;;  %v3340_v25 = vunpack.c.l.b16 %v3259_v12  ;;  %v4011_v50 = vshll.u32 %v7254_v33, 16  ;;  %v4356_v23 = vpack.c.b16 %v4327_v59, %v4326_v6  ;;  %v4644_v22 = vsel %vm6677_vm15, %v5819_v36, %v4643_v40 }
 0x1e5   : > { %v4017_v26 = vrot.slane %v4015_v53, 4  ;;  %v4021_v61 = vshll.u32 %v7274_v46, 16  ;;  %v7288_v53 = vld [vmem:[#allocation2 + $0x4c] sm:$0xf] }
 0x1e6   : > { %v3364_v2 = vpack.c.b16 %v3340_v25, %v3339_v24  ;;  %v7270_v41 = vrot.slane %v4011_v50, 5  ;;  %v6057_v25 = vld [vmem:[#allocation2 + $0x74] sm:$0x1] }
 0x1e7   : > { %v2391_v10 = vpop.f32.mrf.mxu3  ;;  %v2079_v35 = vpop.f32.mrf.mxu2  ;;  %v3265_v50 = vrot.slane %v6057_v25, 5  ;;  %v4023_v59 = vrot.slane %v4021_v61, 5  ;;  %v7310_v25 = vld [vmem:[#allocation2 + $0x50] sm:$0x1] }
 0x1e8   : > { %v2444_v15 = vadd.f32 %v2391_v10, %v2130_v27  ;;  %v2131_v19 = vadd.f32 %v2079_v35, %v1699_v8  ;;  %v4645_v27 = vrot.slane %v4643_v40, 4  ;;  %v4008_v10 = vor.u32 %v4007_v55, %v4004_v54  ;;  %v7283_v51 = vpop.f32.mrf.mxu1 }
 0x1e9   : > { %v4018_v35 = vor.u32 %v4017_v26, %v7270_v41 }
 0x1ea   : > { %v3073_v57 = vpop.f32.mrf.mxu0  ;;  %v4009_v6 = vrot.slane %v4008_v10, 4 }
 0x1eb   : > { %v7265_v32 = vadd.f32 %v3073_v57, %v2444_v15  ;;  %v3262_v15 = vrot.slane %v6056_v39, 5  ;;  %v1704_v57 = vadd.f32 %v7086_v21, %v6876_v28  ;;  %v4019_v36 = vrot.slane %v4018_v35, 4 }
 0x1ec   : > { %5763 = vmatmul.msk.bf16.gmra.mxu2 %vm1352_vm11, %v5935_v13  ;;  %v3148_v13 = vld [vmem:[#allocation2 + $0x6c] sm:$0xe]  ;;  %v4039_v28 = vshrl.u32 %v7288_v53, 16 }
 0x1ed   : > { %5858 = vmatmul.msk.bf16.gmra.mxu0 %vm1352_vm11, %v4781_v18  ;;  %v4647_v18 = vsel %vm6677_vm15, %v4645_v27, %v4646_v30  ;;  %v5625_v44 = vrot.slane %v3148_v13, 9  ;;  %v3264_v24 = vrot.slane %v3262_v15, 4  ;;  %v4650_v27 = vrot.slane %v7254_v33, 5 }
 0x1ee   : > { %v4753_v56 = vunpack.c.l.b16 %v4647_v18  ;;  %v4014_v33 = vsel %vm6342_vm12, %v4009_v6, %v7270_v41  ;;  %v4024_v18 = vsel %vm6342_vm12, %v4019_v36, %v4023_v59 }
 0x1ef   : > { %v2393_v60 = vpop.f32.mrf.mxu3  ;;  %v2082_v20 = vpop.f32.mrf.mxu2  ;;  %v3263_v30 = vsel %vm6677_vm15, %v5625_v44, %v3262_v15  ;;  %v3266_v54 = vsel %vm6677_vm15, %v3264_v24, %v3265_v50  ;;  %v4652_v39 = vrot.slane %v4650_v27, 4  ;;  %v4653_v15 = vrot.slane %v7274_v46, 5 }
 0x1f0   : > { %v2445_v8 = vadd.f32 %v2393_v60, %v2131_v19  ;;  %v2132_v12 = vadd.f32 %v2082_v20, %v1702_v7  ;;  %v4752_v19 = vunpack.c.l.b16 %v4644_v22  ;;  %v4566_v7 = vld [vmem:[#allocation2 + $0x3c] sm:$0xe]  ;;  %v4029_v60 = vshll.u32 %v3893_v34, 16  ;;  %v7307_v44 = vpop.f32.mrf.mxu1 }
 0x1f1   : > { %5664 = vmatmul.msk.bf16.gmra.mxu1 %vm1352_vm11, %v3364_v2  ;;  %v4026_v2 = vshrl.u32 %v3893_v34, 16  ;;  %v4035_v20 = vshll.u32 %v7288_v53, 16  ;;  %v5936_v22 = vld [vmem:[#allocation2 + $0x3c] sm:$0xff]  ;;  %v3341_v10 = vunpack.c.l.b16 %v3263_v30  ;;  %v3342_v35 = vunpack.c.l.b16 %v3266_v54 }
 0x1f2   : > { %v3075_v58 = vpop.f32.mrf.mxu0  ;;  %v4782_v21 = vpack.c.b16 %v4753_v56, %v4752_v19  ;;  %v4031_v34 = vrot.slane %v4029_v60, 5  ;;  %v4328_v41 = vunpack.c.l.b16 %v4014_v33  ;;  %v4329_v24 = vunpack.c.l.b16 %v4024_v18 }
 0x1f3   : > { %v7285_v40 = vadd.f32 %v3075_v58, %v2445_v8  ;;  %v5820_v58 = vrot.slane %v4566_v7, 9  ;;  %v4028_v13 = vrot.slane %v4026_v2, 4  ;;  %v4037_v19 = vrot.slane %v4035_v20, 5 }
 0x1f4   : > { %5803 = vmatmul.msk.bf16.gmra.mxu3 %vm1352_vm11, %v4356_v23  ;;  %v3365_v50 = vpack.c.b16 %v3342_v35, %v3341_v10  ;;  %v1707_v46 = vadd.f32 %v7105_v16, %v6762_v11  ;;  %v4654_v36 = vsel %vm6677_vm15, %v4652_v39, %v4653_v15  ;;  %v4045_v2 = vshll.u32 %v7310_v25, 16  ;;  %v6058_v16 = vld [vmem:[#allocation2 + $0x7c] sm:$0xf] }
 0x1f5   : > { %v4032_v30 = vor.u32 %v4031_v34, %v4028_v13  ;;  %v4755_v11 = vunpack.c.l.b16 %v4654_v36  ;;  %v7332_v34 = vld [vmem:[#allocation2 + $0x58] sm:$0xf]  ;;  %v4567_v36 = vld [vmem:[#allocation2 + $0x48] sm:$0xe] }
 0x1f7   : > { %v2396_v55 = vpop.f32.mrf.mxu3  ;;  %v2084_v26 = vpop.f32.mrf.mxu2 }
 0x1f8   : > { %v2446_v8 = vadd.f32 %v2396_v55, %v2132_v12  ;;  %v2133_v23 = vadd.f32 %v2084_v26, %v1704_v57  ;;  %v4041_v12 = vrot.slane %v4039_v28, 4  ;;  %v4651_v57 = vsel %vm6677_vm15, %v5820_v58, %v4650_v27  ;;  %v7326_v39 = vpop.f32.mrf.mxu1 }
 0x1f9   : > { %v4357_v26 = vpack.c.b16 %v4329_v24, %v4328_v41  ;;  %v4754_v20 = vunpack.c.l.b16 %v4651_v57  ;;  %v3269_v28 = vrot.slane %v6058_v16, 5  ;;  %v4033_v27 = vrot.slane %v4032_v30, 4 }
 0x1fa   : > { %v3078_v61 = vpop.f32.mrf.mxu0  ;;  %v4042_v54 = vor.u32 %v4041_v12, %v4037_v19  ;;  %v1709_v58 = vadd.f32 %v7145_v48, %v6778_v31  ;;  %v4657_v31 = vrot.slane %v7288_v53, 5  ;;  %v4660_v16 = vrot.slane %v7310_v25, 5 }
 0x1fb   : > { %v7305_v56 = vadd.f32 %v3078_v61, %v2446_v8  ;;  %v4047_v8 = vrot.slane %v4045_v2, 5  ;;  %v3271_v10 = vrot.slane %v3269_v28, 4  ;;  %v3896_v61 = vld [vmem:[#allocation2 + $0x54] sm:$0xf]  ;;  %v4783_v12 = vpack.c.b16 %v4755_v11, %v4754_v20 }
 0x1fc   : > { %5764 = vmatmul.msk.bf16.gmra.mxu2 %vm1352_vm11, %v5936_v22  ;;  %v3149_v22 = vld [vmem:[#allocation2 + $0x78] sm:$0xe]  ;;  %v4053_v30 = vshll.u32 %v3896_v61, 16 }
 0x1fd   : > { %5859 = vmatmul.msk.bf16.gmra.mxu0 %vm1352_vm11, %v4782_v21  ;;  %v4043_v21 = vrot.slane %v4042_v54, 4  ;;  %v5626_v18 = vrot.slane %v3149_v22, 9 }
 0x1ff   : > { %v2398_v6 = vpop.f32.mrf.mxu3  ;;  %v2087_v59 = vpop.f32.mrf.mxu2  ;;  %v3270_v15 = vsel %vm6677_vm15, %v5626_v18, %v3269_v28  ;;  %v8037_v18 = vld [vmem:[#allocation6_spill] sm:$0xff] }
 0x200   : > { %v2447_v55 = vadd.f32 %v2398_v6, %v2133_v23  ;;  %v2134_v7 = vadd.f32 %v2087_v59, %v1707_v46  ;;  %v6059_v23 = vld [vmem:[#allocation2 + $0x80] sm:$0x1]  ;;  %v4048_v46 = vsel %vm6342_vm12, %v4043_v21, %v4047_v8  ;;  %v5937_v6 = vld [vmem:[#allocation2 + $0x48] sm:$0xff]  ;;  %v4050_v59 = vshrl.u32 %v3896_v61, 16 }
 0x201   : > { %5665 = vmatmul.msk.bf16.gmra.mxu1 %vm1352_vm11, %v3365_v50  ;;  %v3272_v35 = vrot.slane %v6059_v23, 5  ;;  %v4038_v50 = vsel %vm6342_vm12, %v4033_v27, %v4037_v19  ;;  %v3343_v54 = vunpack.c.l.b16 %v3270_v15  ;;  %v5821_v19 = vrot.slane %v4567_v36, 9  ;;  %v7350_v23 = vld [vmem:[#allocation2 + $0x5c] sm:$0x1]  ;;  %v7352_v15 = vpop.f32.mrf.mxu1  ;;  %v3150_v36 = vld [vmem:[#allocation2 + $0x84] sm:$0xe] }
 0x202   : > { %v3080_v60 = vpop.f32.mrf.mxu0  ;;  %v4330_v20 = vunpack.c.l.b16 %v4038_v50  ;;  %v4331_v53 = vunpack.c.l.b16 %v4048_v46  ;;  %v4052_v28 = vrot.slane %v4050_v59, 4  ;;  %v4055_v21 = vrot.slane %v4053_v30, 5  ;;  %v3899_v59 = vld [vmem:[#allocation2 + $0x60] sm:$0xf] }
 0x203   : > { %v7321_v33 = vadd.f32 %v3080_v60, %v2447_v55  ;;  %v3273_v13 = vsel %vm6677_vm15, %v3271_v10, %v3272_v35  ;;  %v4059_v55 = vshll.u32 %v7332_v34, 16  ;;  %v1712_v10 = vadd.f32 %v7170_v49, %v8037_v18 }
 0x204   : > { %5804 = vmatmul.msk.bf16.gmra.mxu3 %vm1352_vm11, %v4357_v26  ;;  %v3344_v2 = vunpack.c.l.b16 %v3273_v13  ;;  %v4063_v26 = vshrl.u32 %v7332_v34, 16  ;;  %v4358_v13 = vpack.c.b16 %v4331_v53, %v4330_v20  ;;  %v4658_v25 = vsel %vm6677_vm15, %v5821_v19, %v4657_v31  ;;  %v8038_v20 = vld [vmem:[#allocation7_spill] sm:$0xff] }
 0x205   : > { %v7346_v8 = vrot.slane %v4059_v55, 5  ;;  %v4069_v50 = vshll.u32 %v7350_v23, 16  ;;  %v6061_v55 = vld [vmem:[#allocation2 + $0x8c] sm:$0x1]  ;;  %v1714_v19 = vadd.f32 %v7191_v62, %v8038_v20  ;;  %v7386_v20 = vld [vmem:[#allocation2 + $0x68] sm:$0x1] }
 0x206   : > { %v3366_v27 = vpack.c.b16 %v3344_v2, %v3343_v54  ;;  %v4065_v22 = vrot.slane %v4063_v26, 4  ;;  %v5627_v54 = vrot.slane %v3150_v36, 9  ;;  %v3279_v26 = vrot.slane %v6061_v55, 5 }
 0x207   : > { %v2401_v41 = vpop.f32.mrf.mxu3  ;;  %v2089_v24 = vpop.f32.mrf.mxu2 }
 0x208   : > { %v2448_v48 = vadd.f32 %v2401_v41, %v2134_v7  ;;  %v2135_v57 = vadd.f32 %v2089_v24, %v1709_v58  ;;  %v4659_v7 = vrot.slane %v4657_v31, 4  ;;  %v4056_v24 = vor.u32 %v4055_v21, %v4052_v28 }
 0x209   : > { %v4066_v49 = vor.u32 %v4065_v22, %v7346_v8  ;;  %v4664_v28 = vrot.slane %v7332_v34, 5  ;;  %v4074_v22 = vshrl.u32 %v3899_v59, 16 }
 0x20a   : > { %v3083_v60 = vpop.f32.mrf.mxu0  ;;  %v4661_v41 = vsel %vm6677_vm15, %v4659_v7, %v4660_v16  ;;  %v4057_v53 = vrot.slane %v4056_v24, 4  ;;  %v4071_v16 = vrot.slane %v4069_v50, 5  ;;  %v5938_v24 = vld [vmem:[#allocation2 + $0x54] sm:$0xff] }
 0x20b   : > { %v7341_v11 = vadd.f32 %v3083_v60, %v2448_v48  ;;  %v6060_v48 = vld [vmem:[#allocation2 + $0x88] sm:$0xf]  ;;  %v4757_v31 = vunpack.c.l.b16 %v4661_v41  ;;  %v7364_v60 = vld [vmem:[#allocation2 + $0x64] sm:$0xf]  ;;  %v4067_v7 = vrot.slane %v4066_v49, 4 }
 0x20c   : > { %5765 = vmatmul.msk.bf16.gmra.mxu2 %vm1352_vm11, %v5937_v6  ;;  %v4756_v6 = vunpack.c.l.b16 %v4658_v25  ;;  %v4087_v62 = vshrl.u32 %v7364_v60, 16  ;;  %v4062_v34 = vsel %vm6342_vm12, %v4057_v53, %v7346_v8  ;;  %v8039_v53 = vld [vmem:[#allocation8_spill] sm:$0xff] }
 0x20d   : > { %5860 = vmatmul.msk.bf16.gmra.mxu0 %vm1352_vm11, %v4783_v12  ;;  %v4072_v49 = vsel %vm6342_vm12, %v4067_v7, %v4071_v16  ;;  %v4332_v8 = vunpack.c.l.b16 %v4062_v34  ;;  %v1717_v7 = vadd.f32 %v7211_v4, %v8039_v53 }
 0x20f   : > { %v2403_v35 = vpop.f32.mrf.mxu3  ;;  %v2092_v61 = vpop.f32.mrf.mxu2 }
 0x210   : > { %v2449_v58 = vadd.f32 %v2403_v35, %v2135_v57  ;;  %v2136_v12 = vadd.f32 %v2092_v61, %v1712_v10  ;;  %v3276_v57 = vrot.slane %v6060_v48, 5  ;;  %v4568_v35 = vld [vmem:[#allocation2 + $0x54] sm:$0xe]  ;;  %v4077_v61 = vshll.u32 %v3899_v59, 16 }
 0x211   : > { %5666 = vmatmul.msk.bf16.gmra.mxu1 %vm1352_vm11, %v3366_v27  ;;  %v5822_v36 = vrot.slane %v4568_v35, 9  ;;  %v4666_v59 = vrot.slane %v4664_v28, 4 }
 0x212   : > { %v3085_v46 = vpop.f32.mrf.mxu0  ;;  %v3278_v2 = vrot.slane %v3276_v57, 4  ;;  %v3277_v27 = vsel %vm6677_vm15, %v5627_v54, %v3276_v57  ;;  %v7380_v57 = vpop.f32.mrf.mxu1  ;;  %v4667_v54 = vrot.slane %v7350_v23, 5 }
 0x213   : > { %v7361_v30 = vadd.f32 %v3085_v46, %v2449_v58  ;;  %v4083_v58 = vshll.u32 %v7364_v60, 16  ;;  %v3345_v50 = vunpack.c.l.b16 %v3277_v27  ;;  %v4665_v23 = vsel %vm6677_vm15, %v5822_v36, %v4664_v28 }
 0x214   : > { %5805 = vmatmul.msk.bf16.gmra.mxu3 %vm1352_vm11, %v4358_v13  ;;  %v3280_v21 = vsel %vm6677_vm15, %v3278_v2, %v3279_v26  ;;  %v4784_v13 = vpack.c.b16 %v4757_v31, %v4756_v6  ;;  %v4076_v6 = vrot.slane %v4074_v22, 4  ;;  %v4089_v2 = vrot.slane %v4087_v62, 4 }
 0x215   : > { %v3346_v46 = vunpack.c.l.b16 %v3280_v21  ;;  %v4085_v31 = vrot.slane %v4083_v58, 5  ;;  %v4333_v26 = vunpack.c.l.b16 %v4072_v49  ;;  %v4668_v27 = vsel %vm6677_vm15, %v4666_v59, %v4667_v54  ;;  %v6063_v59 = vld [vmem:[#allocation2 + $0x98] sm:$0x1] }
 0x216   : > { %v4759_v4 = vunpack.c.l.b16 %v4668_v27  ;;  %v3286_v54 = vrot.slane %v6063_v59, 5 }
 0x217   : > { %v2406_v18 = vpop.f32.mrf.mxu3  ;;  %v2094_v10 = vpop.f32.mrf.mxu2 }
 0x218   : > { %v2450_v25 = vadd.f32 %v2406_v18, %v2136_v12  ;;  %v2137_v41 = vadd.f32 %v2094_v10, %v1714_v19  ;;  %v4079_v12 = vrot.slane %v4077_v61, 5  ;;  %v3367_v19 = vpack.c.b16 %v3346_v46, %v3345_v50  ;;  %v3151_v50 = vld [vmem:[#allocation2 + $0x90] sm:$0xe] }
 0x219   : > { %v4090_v18 = vor.u32 %v4089_v2, %v4085_v31  ;;  %v4093_v10 = vshll.u32 %v7386_v20, 16  ;;  %v4359_v61 = vpack.c.b16 %v4333_v26, %v4332_v8 }
 0x21a   : > { %v3088_v48 = vpop.f32.mrf.mxu0  ;;  %v4080_v22 = vor.u32 %v4079_v12, %v4076_v6  ;;  %v3902_v6 = vld [vmem:[#allocation2 + $0x6c] sm:$0xf]  ;;  %v8040_v12 = vld [vmem:[#allocation9_spill] sm:$0xff] }
 0x21b   : > { %v7383_v55 = vadd.f32 %v3088_v48, %v2450_v25  ;;  %v6062_v25 = vld [vmem:[#allocation2 + $0x94] sm:$0xf]  ;;  %v4091_v34 = vrot.slane %v4090_v18, 4  ;;  %v4095_v49 = vrot.slane %v4093_v10, 5  ;;  %v7399_v48 = vpop.f32.mrf.mxu1  ;;  %v1719_v2 = vadd.f32 %v7239_v9, %v8040_v12  ;;  %v5939_v18 = vld [vmem:[#allocation2 + $0x60] sm:$0xff] }
 0x21c   : > { %5766 = vmatmul.msk.bf16.gmra.mxu2 %vm1352_vm11, %v5938_v24  ;;  %v3283_v24 = vrot.slane %v6062_v25, 5  ;;  %v4081_v28 = vrot.slane %v4080_v22, 4  ;;  %v4569_v10 = vld [vmem:[#allocation2 + $0x60] sm:$0xe] }
 0x21d   : > { %5861 = vmatmul.msk.bf16.gmra.mxu0 %vm1352_vm11, %v4784_v13  ;;  %v4758_v13 = vunpack.c.l.b16 %v4665_v23  ;;  %v4096_v27 = vsel %vm6342_vm12, %v4091_v34, %v4095_v49  ;;  %v4674_v34 = vrot.slane %v7386_v20, 5 }
 0x21e   : > { %v3285_v36 = vrot.slane %v3283_v24, 4 }
 0x21f   : > { %v2408_v16 = vpop.f32.mrf.mxu3  ;;  %v2097_v21 = vpop.f32.mrf.mxu2  ;;  %v4785_v53 = vpack.c.b16 %v4759_v4, %v4758_v13 }
 0x220   : > { %v2451_v35 = vadd.f32 %v2408_v16, %v2137_v41  ;;  %v2138_v58 = vadd.f32 %v2097_v21, %v1717_v7  ;;  %v5628_v41 = vrot.slane %v3151_v50, 9  ;;  %v3287_v26 = vsel %vm6677_vm15, %v3285_v36, %v3286_v54 }
 0x221   : > { %5667 = vmatmul.msk.bf16.gmra.mxu1 %vm1352_vm11, %v3367_v19  ;;  %v7408_v19 = vld [vmem:[#allocation2 + $0x70] sm:$0xf]  ;;  %v4086_v16 = vsel %vm6342_vm12, %v4081_v28, %v4085_v31  ;;  %v4671_v21 = vrot.slane %v7364_v60, 5  ;;  %v3348_v25 = vunpack.c.l.b16 %v3287_v26  ;;  %v5823_v31 = vrot.slane %v4569_v10, 9 }
 0x222   : > { %v3090_v62 = vpop.f32.mrf.mxu0  ;;  %v3284_v8 = vsel %vm6677_vm15, %v5628_v41, %v3283_v24  ;;  %v4107_v13 = vshll.u32 %v7408_v19, 16  ;;  %v4111_v4 = vshrl.u32 %v7408_v19, 16  ;;  %v4334_v50 = vunpack.c.l.b16 %v4086_v16 }
 0x223   : > { %v7397_v46 = vadd.f32 %v3090_v62, %v2451_v35  ;;  %v4098_v35 = vshrl.u32 %v3902_v6, 16  ;;  %v3347_v62 = vunpack.c.l.b16 %v3284_v8  ;;  %v4335_v60 = vunpack.c.l.b16 %v4096_v27  ;;  %v7428_v8 = vld [vmem:[#allocation2 + $0x74] sm:$0x1] }
 0x224   : > { %5806 = vmatmul.msk.bf16.gmra.mxu3 %vm1352_vm11, %v4359_v61  ;;  %v4101_v61 = vshll.u32 %v3902_v6, 16  ;;  %v7422_v59 = vrot.slane %v4107_v13, 5  ;;  %v4113_v54 = vrot.slane %v4111_v4, 4  ;;  %v8041_v6 = vld [vmem:[#allocation10_spill] sm:$0xff]  ;;  %v4672_v20 = vsel %vm6677_vm15, %v5823_v31, %v4671_v21 }
 0x225   : > { %v4100_v49 = vrot.slane %v4098_v35, 4  ;;  %v3368_v41 = vpack.c.b16 %v3348_v25, %v3347_v62  ;;  %v1722_v12 = vadd.f32 %v7261_v45, %v8041_v6  ;;  %v4360_v16 = vpack.c.b16 %v4335_v60, %v4334_v50  ;;  %v6064_v35 = vld [vmem:[#allocation2 + $0xa0] sm:$0xf]  ;;  %v3905_v25 = vld [vmem:[#allocation2 + $0x78] sm:$0xf] }
 0x226   : > { %v4103_v36 = vrot.slane %v4101_v61, 5  ;;  %v4114_v45 = vor.u32 %v4113_v54, %v7422_v59  ;;  %v3290_v61 = vrot.slane %v6064_v35, 5  ;;  %v4760_v62 = vunpack.c.l.b16 %v4672_v20  ;;  %v6065_v50 = vld [vmem:[#allocation2 + $0xa4] sm:$0x1]  ;;  %v7440_v60 = vld [vmem:[#allocation2 + $0x7c] sm:$0xf] }
 0x227   : > { %v2411_v7 = vpop.f32.mrf.mxu3  ;;  %v2099_v23 = vpop.f32.mrf.mxu2  ;;  %v3293_v31 = vrot.slane %v6065_v50, 5  ;;  %v4678_v54 = vrot.slane %v7408_v19, 5  ;;  %v4125_v20 = vshll.u32 %v3905_v25, 16 }
 0x228   : > { %v2452_v9 = vadd.f32 %v2411_v7, %v2138_v58  ;;  %v2139_v22 = vadd.f32 %v2099_v23, %v1719_v2  ;;  %v4673_v58 = vrot.slane %v4671_v21, 4  ;;  %v7426_v2 = vpop.f32.mrf.mxu1 }
 0x229   : > { %v4680_v50 = vrot.slane %v4678_v54, 4 }
 0x22a   : > { %v3093_v24 = vpop.f32.mrf.mxu0  ;;  %v4675_v27 = vsel %vm6677_vm15, %v4673_v58, %v4674_v34  ;;  %v8043_v58 = vld [vmem:[#allocation11_spill] sm:$0xff] }
 0x22b   : > { %v7417_v28 = vadd.f32 %v3093_v24, %v2452_v9  ;;  %v4104_v9 = vor.u32 %v4103_v36, %v4100_v49  ;;  %v4761_v21 = vunpack.c.l.b16 %v4675_v27  ;;  %v3292_v24 = vrot.slane %v3290_v61, 4 }
 0x22c   : > { %5767 = vmatmul.msk.bf16.gmra.mxu2 %vm1352_vm11, %v5939_v18  ;;  %v4117_v18 = vshll.u32 %v7428_v8, 16  ;;  %v1724_v34 = vadd.f32 %v7283_v51, %v8043_v58  ;;  %v4131_v27 = vshll.u32 %v7440_v60, 16  ;;  %v4135_v51 = vshrl.u32 %v7440_v60, 16 }
 0x22d   : > { %5862 = vmatmul.msk.bf16.gmra.mxu0 %vm1352_vm11, %v4785_v53  ;;  %v4105_v49 = vrot.slane %v4104_v9, 4 }
 0x22e   : > { %v4119_v36 = vrot.slane %v4117_v18, 5 }
 0x22f   : > { %v2413_v26 = vpop.f32.mrf.mxu3  ;;  %v2102_v7 = vpop.f32.mrf.mxu2  ;;  %v4110_v35 = vsel %vm6342_vm12, %v4105_v49, %v7422_v59  ;;  %v7462_v49 = vld [vmem:[#allocation2 + $0x80] sm:$0x1] }
 0x230   : > { %v2453_v23 = vadd.f32 %v2413_v26, %v2139_v22  ;;  %v2140_v53 = vadd.f32 %v2102_v7, %v1722_v12  ;;  %v3152_v22 = vld [vmem:[#allocation2 + $0x9c] sm:$0xe]  ;;  %v3294_v12 = vsel %vm6677_vm15, %v3292_v24, %v3293_v31  ;;  %v4122_v26 = vshrl.u32 %v3905_v25, 16  ;;  %v7451_v9 = vpop.f32.mrf.mxu1 }
 0x231   : > { %5668 = vmatmul.msk.bf16.gmra.mxu1 %vm1352_vm11, %v3368_v41  ;;  %v5629_v4 = vrot.slane %v3152_v22, 9  ;;  %v4115_v41 = vrot.slane %v4114_v45, 4  ;;  %v4786_v45 = vpack.c.b16 %v4761_v21, %v4760_v62  ;;  %v4681_v31 = vrot.slane %v7428_v8, 5 }
 0x232   : > { %v3095_v10 = vpop.f32.mrf.mxu0  ;;  %v4124_v58 = vrot.slane %v4122_v26, 4  ;;  %v4133_v62 = vrot.slane %v4131_v27, 5 }
 0x233   : > { %v7437_v13 = vadd.f32 %v3095_v10, %v2453_v23  ;;  %v3291_v6 = vsel %vm6677_vm15, %v5629_v4, %v3290_v61  ;;  %v5940_v10 = vld [vmem:[#allocation2 + $0x6c] sm:$0xff]  ;;  %v4120_v61 = vsel %vm6342_vm12, %v4115_v41, %v4119_v36  ;;  %v3350_v4 = vunpack.c.l.b16 %v3294_v12 }
 0x234   : > { %5807 = vmatmul.msk.bf16.gmra.mxu3 %vm1352_vm11, %v4360_v16  ;;  %v4570_v16 = vld [vmem:[#allocation2 + $0x6c] sm:$0xe]  ;;  %v3349_v22 = vunpack.c.l.b16 %v3291_v6  ;;  %v4337_v59 = vunpack.c.l.b16 %v4120_v61  ;;  %v4682_v26 = vsel %vm6677_vm15, %v4680_v50, %v4681_v31  ;;  %v6067_v31 = vld [vmem:[#allocation2 + $0xb0] sm:$0x1] }
 0x235   : > { %8042 = vst [vmem:[#allocation6_spill] sm:$0xff] %v7437_v13  ;;  %v5824_v24 = vrot.slane %v4570_v16, 9  ;;  %v4127_v13 = vrot.slane %v4125_v20, 5  ;;  %v8044_v36 = vld [vmem:[#allocation12_spill] sm:$0xff]  ;;  %v4141_v20 = vshll.u32 %v7462_v49, 16 }
 0x236   : > { %v3369_v41 = vpack.c.b16 %v3350_v4, %v3349_v22  ;;  %v1727_v6 = vadd.f32 %v7307_v44, %v8044_v36 }
 0x237   : > { %v2416_v7 = vpop.f32.mrf.mxu3  ;;  %v2104_v23 = vpop.f32.mrf.mxu2  ;;  %v4679_v8 = vsel %vm6677_vm15, %v5824_v24, %v4678_v54  ;;  %v6066_v54 = vld [vmem:[#allocation2 + $0xac] sm:$0xf]  ;;  %v3153_v24 = vld [vmem:[#allocation2 + $0xa8] sm:$0xe] }
 0x238   : > { %v2454_v18 = vadd.f32 %v2416_v7, %v2140_v53  ;;  %v2141_v19 = vadd.f32 %v2104_v23, %v1724_v34  ;;  %v4137_v53 = vrot.slane %v4135_v51, 4  ;;  %v4336_v34 = vunpack.c.l.b16 %v4110_v35 }
 0x239   : > { %v4128_v23 = vor.u32 %v4127_v13, %v4124_v58  ;;  %v4763_v35 = vunpack.c.l.b16 %v4682_v26  ;;  %v3297_v61 = vrot.slane %v6066_v54, 5  ;;  %v3300_v58 = vrot.slane %v6067_v31, 5 }
 0x23a   : > { %v3098_v25 = vpop.f32.mrf.mxu0  ;;  %v4138_v16 = vor.u32 %v4137_v53, %v4133_v62  ;;  %v4361_v51 = vpack.c.b16 %v4337_v59, %v4336_v34  ;;  %v3908_v53 = vld [vmem:[#allocation2 + $0x84] sm:$0xf]  ;;  %v8046_v34 = vld [vmem:[#allocation13_spill] sm:$0xff] }
 0x23b   : > { %v7459_v21 = vadd.f32 %v3098_v25, %v2454_v18  ;;  %v4129_v22 = vrot.slane %v4128_v23, 4  ;;  %v4143_v25 = vrot.slane %v4141_v20, 5  ;;  %v3299_v50 = vrot.slane %v3297_v61, 4 }
 0x23c   : > { %5768 = vmatmul.msk.bf16.gmra.mxu2 %vm1352_vm11, %v5940_v10  ;;  %v4762_v10 = vunpack.c.l.b16 %v4679_v8  ;;  %v4139_v4 = vrot.slane %v4138_v16, 4  ;;  %v1729_v59 = vadd.f32 %v7326_v39, %v8046_v34  ;;  %v4685_v16 = vrot.slane %v7440_v60, 5 }
 0x23d   : > { %5863 = vmatmul.msk.bf16.gmra.mxu0 %vm1352_vm11, %v4786_v45  ;;  %v7473_v45 = vpop.f32.mrf.mxu1  ;;  %v3301_v36 = vsel %vm6677_vm15, %v3299_v50, %v3300_v58  ;;  %v4149_v54 = vshll.u32 %v3908_v53, 16 }
 0x23e   : > { %v4787_v8 = vpack.c.b16 %v4763_v35, %v4762_v10  ;;  %v4144_v23 = vsel %vm6342_vm12, %v4139_v4, %v4143_v25  ;;  %v4688_v25 = vrot.slane %v7462_v49, 5 }
 0x23f   : > { %v2418_v12 = vpop.f32.mrf.mxu3  ;;  %v2107_v7 = vpop.f32.mrf.mxu2  ;;  %v4339_v60 = vunpack.c.l.b16 %v4144_v23 }
 0x240   : > { %v2455_v27 = vadd.f32 %v2418_v12, %v2141_v19  ;;  %v2142_v18 = vadd.f32 %v2107_v7, %v1727_v6  ;;  %v5630_v19 = vrot.slane %v3153_v24, 9  ;;  %v7484_v6 = vld [vmem:[#allocation2 + $0x88] sm:$0xf]  ;;  %v4134_v7 = vsel %vm6342_vm12, %v4129_v22, %v4133_v62 }
 0x241   : > { %5669 = vmatmul.msk.bf16.gmra.mxu1 %vm1352_vm11, %v3369_v41  ;;  %v3352_v24 = vunpack.c.l.b16 %v3301_v36  ;;  %v4155_v10 = vshll.u32 %v7484_v6, 16  ;;  %v4159_v35 = vshrl.u32 %v7484_v6, 16  ;;  %v4338_v50 = vunpack.c.l.b16 %v4134_v7 }
 0x242   : > { %v3100_v44 = vpop.f32.mrf.mxu0  ;;  %v3298_v41 = vsel %vm6677_vm15, %v5630_v19, %v3297_v61 }
 0x243   : > { %v7475_v13 = vadd.f32 %v3100_v44, %v2455_v27  ;;  %v5941_v27 = vld [vmem:[#allocation2 + $0x78] sm:$0xff]  ;;  %v4146_v44 = vshrl.u32 %v3908_v53, 16  ;;  %v3351_v61 = vunpack.c.l.b16 %v3298_v41  ;;  %v4151_v53 = vrot.slane %v4149_v54, 5  ;;  %v7502_v41 = vld [vmem:[#allocation2 + $0x8c] sm:$0x1] }
 0x244   : > { %5808 = vmatmul.msk.bf16.gmra.mxu3 %vm1352_vm11, %v4361_v51  ;;  %v4571_v51 = vld [vmem:[#allocation2 + $0x78] sm:$0xe]  ;;  %v7500_v34 = vrot.slane %v4155_v10, 5  ;;  %v4362_v7 = vpack.c.b16 %v4339_v60, %v4338_v50  ;;  %v3154_v10 = vld [vmem:[#allocation2 + $0xb4] sm:$0xe] }
 0x245   : > { %8045 = vst [vmem:[#allocation7_spill] sm:$0xff] %v7475_v13  ;;  %v5825_v62 = vrot.slane %v4571_v51, 9  ;;  %v7495_v4 = vpop.f32.mrf.mxu1  ;;  %v4148_v31 = vrot.slane %v4146_v44, 4  ;;  %v3370_v58 = vpack.c.b16 %v3352_v24, %v3351_v61  ;;  %v8048_v51 = vld [vmem:[#allocation14_spill] sm:$0xff] }
 0x246   : > { %v3534_v44 = vadd.f32 %v7352_v15, %v8048_v51  ;;  %v6068_v54 = vld [vmem:[#allocation2 + $0xb8] sm:$0xf]  ;;  %v4572_v51 = vld [vmem:[#allocation2 + $0x84] sm:$0xe] }
 0x247   : > { %v2421_v12 = vpop.f32.mrf.mxu3  ;;  %v2109_v26 = vpop.f32.mrf.mxu2  ;;  %v4686_v23 = vsel %vm6677_vm15, %v5825_v62, %v4685_v16  ;;  %v3304_v61 = vrot.slane %v6068_v54, 5  ;;  %v5631_v62 = vrot.slane %v3154_v10, 9  ;;  %v5942_v10 = vld [vmem:[#allocation2 + $0x84] sm:$0xff] }
 0x248   : > { %v2456_v39 = vadd.f32 %v2421_v12, %v2142_v18  ;;  %v2143_v20 = vadd.f32 %v2109_v26, %v1729_v59  ;;  %v4687_v18 = vrot.slane %v4685_v16, 4  ;;  %v4161_v59 = vrot.slane %v4159_v35, 4  ;;  %v3911_v35 = vld [vmem:[#allocation2 + $0x90] sm:$0xf] }
 0x249   : > { %v4764_v16 = vunpack.c.l.b16 %v4686_v23  ;;  %v3306_v60 = vrot.slane %v3304_v61, 4 }
 0x24a   : > { %v3103_v19 = vpop.f32.mrf.mxu0  ;;  %v4689_v49 = vsel %vm6677_vm15, %v4687_v18, %v4688_v25  ;;  %v6069_v18 = vld [vmem:[#allocation2 + $0xbc] sm:$0x1] }
 0x24b   : > { %v7493_v22 = vadd.f32 %v3103_v19, %v2456_v39  ;;  %v4162_v39 = vor.u32 %v4161_v59, %v7500_v34  ;;  %v4765_v24 = vunpack.c.l.b16 %v4689_v49  ;;  %v3307_v25 = vrot.slane %v6069_v18, 5 }
 0x24c   : > { %5769 = vmatmul.msk.bf16.gmra.mxu2 %vm1352_vm11, %v5941_v27  ;;  %v4165_v27 = vshll.u32 %v7502_v41, 16 }
 0x24d   : > { %8047 = vst [vmem:[#allocation8_spill] sm:$0xff] %v7493_v22  ;;  %5864 = vmatmul.msk.bf16.gmra.mxu0 %vm1352_vm11, %v4787_v8  ;;  %v4152_v8 = vor.u32 %v4151_v53, %v4148_v31  ;;  %v7517_v31 = vld [vmem:[#allocation2 + $0x94] sm:$0xf]  ;;  %v7524_v59 = vpop.f32.mrf.mxu1  ;;  %v4788_v54 = vpack.c.b16 %v4765_v24, %v4764_v16  ;;  %v4695_v22 = vrot.slane %v7502_v41, 5 }
 0x24e   : > { %v4167_v53 = vrot.slane %v4165_v27, 5  ;;  %v8050_v27 = vld [vmem:[#allocation15_spill] sm:$0xff] }
 0x24f   : > { %v2423_v36 = vpop.f32.mrf.mxu3  ;;  %v3769_v12 = vpop.f32.mrf.mxu2  ;;  %v4153_v15 = vrot.slane %v4152_v8, 4  ;;  %v4179_v8 = vshll.u32 %v7517_v31, 16 }
 0x250   : > { %v2457_v26 = vadd.f32 %v2423_v36, %v2143_v20  ;;  %v3849_v50 = vadd.f32 %v3769_v12, %v3534_v44  ;;  %v4692_v36 = vrot.slane %v7484_v6, 5  ;;  %v3305_v12 = vsel %vm6677_vm15, %v5631_v62, %v3304_v61 }
 0x251   : > { %5670 = vmatmul.msk.bf16.gmra.mxu1 %vm1352_vm11, %v3370_v58  ;;  %v4163_v58 = vrot.slane %v4162_v39, 4  ;;  %v4173_v44 = vshll.u32 %v3911_v35, 16  ;;  %v4183_v39 = vshrl.u32 %v7517_v31, 16  ;;  %v4158_v61 = vsel %vm6342_vm12, %v4153_v15, %v7500_v34 }
 0x252   : > { %v3105_v20 = vpop.f32.mrf.mxu0  ;;  %v7544_v24 = vrot.slane %v4179_v8, 5  ;;  %v4340_v15 = vunpack.c.l.b16 %v4158_v61 }
 0x253   : > { %v7514_v19 = vadd.f32 %v3105_v20, %v2457_v26  ;;  %v3308_v26 = vsel %vm6677_vm15, %v3306_v60, %v3307_v25  ;;  %v3535_v20 = vadd.f32 %v7380_v57, %v8050_v27  ;;  %v4168_v62 = vsel %vm6342_vm12, %v4163_v58, %v4167_v53  ;;  %v7552_v53 = vld [vmem:[#allocation2 + $0x98] sm:$0x1] }
 0x254   : > { %5809 = vmatmul.msk.bf16.gmra.mxu3 %vm1352_vm11, %v4362_v7  ;;  %v4170_v7 = vshrl.u32 %v3911_v35, 16  ;;  %v3353_v60 = vunpack.c.l.b16 %v3305_v12  ;;  %v3354_v35 = vunpack.c.l.b16 %v3308_v26  ;;  %v5826_v25 = vrot.slane %v4572_v51, 9 }
 0x255   : > { %8049 = vst [vmem:[#allocation9_spill] sm:$0xff] %v7514_v19  ;;  %v4694_v19 = vrot.slane %v4692_v36, 4  ;;  %v4175_v16 = vrot.slane %v4173_v44, 5  ;;  %v4341_v58 = vunpack.c.l.b16 %v4168_v62  ;;  %v4189_v8 = vshll.u32 %v7552_v53, 16  ;;  %v6070_v62 = vld [vmem:[#allocation2 + $0xc4] sm:$0xf] }
 0x256   : > { %v4172_v13 = vrot.slane %v4170_v7, 4  ;;  %v3371_v12 = vpack.c.b16 %v3354_v35, %v3353_v60  ;;  %v4693_v26 = vsel %vm6677_vm15, %v5826_v25, %v4692_v36 }
 0x257   : > { %v4451_v23 = vpop.f32.mrf.mxu3  ;;  %v3771_v49 = vpop.f32.mrf.mxu2  ;;  %v4191_v35 = vrot.slane %v4189_v8, 5  ;;  %v5943_v8 = vld [vmem:[#allocation2 + $0x90] sm:$0xff] }
 0x258   : > { %v4531_v6 = vadd.f32 %v4451_v23, %v3849_v50  ;;  %v4185_v50 = vrot.slane %v4183_v39, 4  ;;  %v3850_v34 = vadd.f32 %v3771_v49, %v3535_v20  ;;  %v4696_v23 = vsel %vm6677_vm15, %v4694_v19, %v4695_v22  ;;  %v7565_v39 = vpop.f32.mrf.mxu1 }
 0x259   : > { %v4176_v51 = vor.u32 %v4175_v16, %v4172_v13  ;;  %v4363_v20 = vpack.c.b16 %v4341_v58, %v4340_v15  ;;  %v4767_v61 = vunpack.c.l.b16 %v4696_v23  ;;  %v3311_v22 = vrot.slane %v6070_v62, 5  ;;  %v3914_v58 = vld [vmem:[#allocation2 + $0x9c] sm:$0xf] }
 0x25a   : > { %v4877_v18 = vpop.f32.mrf.mxu0  ;;  %v4186_v44 = vor.u32 %v4185_v50, %v7544_v24 }
 0x25b   : > { %v7542_v57 = vadd.f32 %v4877_v18, %v4531_v6  ;;  %v4177_v13 = vrot.slane %v4176_v51, 4  ;;  %v3155_v18 = vld [vmem:[#allocation2 + $0xc0] sm:$0xe]  ;;  %v3313_v50 = vrot.slane %v3311_v22, 4 }
 0x25c   : > { %5770 = vmatmul.msk.bf16.gmra.mxu2 %vm1352_vm11, %v5942_v10  ;;  %v4766_v10 = vunpack.c.l.b16 %v4693_v26  ;;  %v4187_v60 = vrot.slane %v4186_v44, 4  ;;  %v5632_v16 = vrot.slane %v3155_v18, 9  ;;  %v7579_v26 = vld [vmem:[#allocation2 + $0xa0] sm:$0xf] }
 0x25d   : > { %5865 = vmatmul.msk.bf16.gmra.mxu0 %vm1352_vm11, %v4788_v54  ;;  %v4989_v41 = vpack.c.bf16 %v7542_v57, %v7542_v57  ;;  %v8051_v54 = vld [vmem:[#allocation16_spill] sm:$0xff]  ;;  %v4182_v51 = vsel %vm6342_vm12, %v4177_v13, %v7544_v24  ;;  %v4699_v13 = vrot.slane %v7517_v31, 5 }
 0x25e   : > { %v3536_v36 = vadd.f32 %v7399_v48, %v8051_v54  ;;  %v4194_v54 = vshrl.u32 %v3914_v58, 16 }
 0x25f   : > { %5021 = vst.msk [vmem:[%s7549_s8] sm:$0xf] %vm237_vm0, %v4989_v41  ;;  %v4453_v7 = vpop.f32.mrf.mxu3  ;;  %v3774_v49 = vpop.f32.mrf.mxu2  ;;  %v3312_v41 = vsel %vm6677_vm15, %v5632_v16, %v3311_v22  ;;  %v4203_v22 = vshll.u32 %v7579_v26, 16  ;;  %v4701_v31 = vrot.slane %v4699_v13, 4 }
 0x260   : > { %v4532_v27 = vadd.f32 %v4453_v7, %v3850_v34  ;;  %v3851_v25 = vadd.f32 %v3774_v49, %v3536_v36  ;;  %v6071_v34 = vld [vmem:[#allocation2 + $0xc8] sm:$0x1]  ;;  %v4789_v7 = vpack.c.b16 %v4767_v61, %v4766_v10  ;;  %v4197_v36 = vshll.u32 %v3914_v58, 16  ;;  %v8052_v61 = vld [vmem:[#allocation17_spill] sm:$0xff]  ;;  %v7592_v16 = vpop.f32.mrf.mxu1 }
 0x261   : > { %5671 = vmatmul.msk.bf16.gmra.mxu1 %vm1352_vm11, %v3371_v12  ;;  %v3314_v15 = vrot.slane %v6071_v34, 5  ;;  %v4207_v10 = vshrl.u32 %v7579_v26, 16  ;;  %v3537_v18 = vadd.f32 %v7426_v2, %v8052_v61 }
 0x262   : > { %v4879_v6 = vpop.f32.mrf.mxu0 }
 0x263   : > { %v7570_v19 = vadd.f32 %v4879_v6, %v4532_v27  ;;  %v3315_v12 = vsel %vm6677_vm15, %v3313_v50, %v3314_v15  ;;  %v4192_v27 = vsel %vm6342_vm12, %v4187_v60, %v4191_v35  ;;  %v3355_v6 = vunpack.c.l.b16 %v3312_v41 }
 0x264   : > { %5810 = vmatmul.msk.bf16.gmra.mxu3 %vm1352_vm11, %v4363_v20  ;;  %v4573_v20 = vld [vmem:[#allocation2 + $0x90] sm:$0xe]  ;;  %v3356_v62 = vunpack.c.l.b16 %v3315_v12  ;;  %v4342_v60 = vunpack.c.l.b16 %v4182_v51  ;;  %v4343_v34 = vunpack.c.l.b16 %v4192_v27  ;;  %v4196_v15 = vrot.slane %v4194_v54, 4 }
 0x265   : > { %v4990_v48 = vpack.c.bf16 %v7570_v19, %v7570_v19  ;;  %v5827_v35 = vrot.slane %v4573_v20, 9  ;;  %v4205_v41 = vrot.slane %v4203_v22, 5  ;;  %v4209_v12 = vrot.slane %v4207_v10, 4 }
 0x266   : > { %v3372_v58 = vpack.c.b16 %v3356_v62, %v3355_v6  ;;  %v4364_v27 = vpack.c.b16 %v4343_v34, %v4342_v60  ;;  %v8053_v6 = vld [vmem:[#allocation18_spill] sm:$0xff] }
 0x267   : > { %5022 = vst.msk [vmem:[%s7549_s8 + $0x4] sm:$0xf] %vm237_vm0, %v4990_v48  ;;  %v4456_v23 = vpop.f32.mrf.mxu3  ;;  %v3776_v49 = vpop.f32.mrf.mxu2  ;;  %v4199_v48 = vrot.slane %v4197_v36, 5  ;;  %v4210_v54 = vor.u32 %v4209_v12, %v4205_v41  ;;  %v5944_v12 = vld [vmem:[#allocation2 + $0x9c] sm:$0xff] }
 0x268   : > { %v4533_v44 = vadd.f32 %v4456_v23, %v3851_v25  ;;  %v3852_v50 = vadd.f32 %v3776_v49, %v3537_v18  ;;  %v4702_v23 = vrot.slane %v7552_v53, 5  ;;  %v3538_v53 = vadd.f32 %v7451_v9, %v8053_v6  ;;  %v7616_v61 = vpop.f32.mrf.mxu1  ;;  %v3917_v9 = vld [vmem:[#allocation2 + $0xa8] sm:$0xf]  ;;  %v4574_v6 = vld [vmem:[#allocation2 + $0x9c] sm:$0xe] }
 0x269   : > { %v4200_v20 = vor.u32 %v4199_v48, %v4196_v15  ;;  %v7621_v15 = vld [vmem:[#allocation2 + $0xac] sm:$0xf] }
 0x26a   : > { %v4882_v24 = vpop.f32.mrf.mxu0  ;;  %v4703_v22 = vsel %vm6677_vm15, %v4701_v31, %v4702_v23  ;;  %v4218_v23 = vshrl.u32 %v3917_v9, 16 }
 0x26b   : > { %v7595_v25 = vadd.f32 %v4882_v24, %v4533_v44  ;;  %v7602_v44 = vld [vmem:[#allocation2 + $0xa4] sm:$0x1] }
 0x26c   : > { %5771 = vmatmul.msk.bf16.gmra.mxu2 %vm1352_vm11, %v5943_v8  ;;  %v4213_v36 = vshll.u32 %v7602_v44, 16 }
 0x26d   : > { %5866 = vmatmul.msk.bf16.gmra.mxu0 %vm1352_vm11, %v4789_v7  ;;  %v4991_v2 = vpack.c.bf16 %v7595_v25, %v7595_v25  ;;  %v4700_v7 = vsel %vm6677_vm15, %v5827_v35, %v4699_v13  ;;  %v4201_v13 = vrot.slane %v4200_v20, 4  ;;  %v4769_v35 = vunpack.c.l.b16 %v4703_v22 }
 0x26e   : > { %v4768_v18 = vunpack.c.l.b16 %v4700_v7  ;;  %v4215_v34 = vrot.slane %v4213_v36, 5  ;;  %v4231_v20 = vshrl.u32 %v7621_v15, 16  ;;  %v8054_v7 = vld [vmem:[#allocation19_spill] sm:$0xff] }
 0x26f   : > { %5023 = vst.msk [vmem:[%s7549_s8 + $0x8] sm:$0xf] %vm237_vm0, %v4991_v2  ;;  %v4458_v49 = vpop.f32.mrf.mxu3  ;;  %v3779_v51 = vpop.f32.mrf.mxu2  ;;  %v4206_v31 = vsel %vm6342_vm12, %v4201_v13, %v4205_v41 }
 0x270   : > { %v4534_v8 = vadd.f32 %v4458_v49, %v3852_v50  ;;  %v3853_v24 = vadd.f32 %v3779_v51, %v3538_v53  ;;  %v4211_v50 = vrot.slane %v4210_v54, 4  ;;  %v4221_v49 = vshll.u32 %v3917_v9, 16 }
 0x271   : > { %5672 = vmatmul.msk.bf16.gmra.mxu1 %vm1352_vm11, %v3372_v58  ;;  %v4790_v51 = vpack.c.b16 %v4769_v35, %v4768_v18  ;;  %v3539_v54 = vadd.f32 %v7473_v45, %v8054_v7  ;;  %v4706_v53 = vrot.slane %v7579_v26, 5  ;;  %v4344_v41 = vunpack.c.l.b16 %v4206_v31 }
 0x272   : > { %v4884_v62 = vpop.f32.mrf.mxu0  ;;  %v4223_v13 = vrot.slane %v4221_v49, 5  ;;  %v5828_v45 = vrot.slane %v4574_v6, 9  ;;  %v4709_v9 = vrot.slane %v7602_v44, 5 }
 0x273   : > { %v7614_v10 = vadd.f32 %v4884_v62, %v4534_v8  ;;  %v4216_v8 = vsel %vm6342_vm12, %v4211_v50, %v4215_v34  ;;  %v4233_v50 = vrot.slane %v4231_v20, 4  ;;  %v7640_v34 = vpop.f32.mrf.mxu1  ;;  %v4708_v26 = vrot.slane %v4706_v53, 4 }
 0x274   : > { %5811 = vmatmul.msk.bf16.gmra.mxu3 %vm1352_vm11, %v4364_v27  ;;  %v4227_v27 = vshll.u32 %v7621_v15, 16  ;;  %v4345_v18 = vunpack.c.l.b16 %v4216_v8  ;;  %v4707_v49 = vsel %vm6677_vm15, %v5828_v45, %v4706_v53 }
 0x275   : > { %v4992_v60 = vpack.c.bf16 %v7614_v10, %v7614_v10  ;;  %v4710_v7 = vsel %vm6677_vm15, %v4708_v26, %v4709_v9  ;;  %v4713_v26 = vrot.slane %v7621_v15, 5 }
 0x276   : > { %v4229_v35 = vrot.slane %v4227_v27, 5  ;;  %v4365_v31 = vpack.c.b16 %v4345_v18, %v4344_v41  ;;  %v8055_v27 = vld [vmem:[#allocation20_spill] sm:$0xff] }
 0x277   : > { %5024 = vst.msk [vmem:[%s7549_s8 + $0xc] sm:$0xf] %vm237_vm0, %v4992_v60  ;;  %v4461_v48 = vpop.f32.mrf.mxu3  ;;  %v3781_v2 = vpop.f32.mrf.mxu2  ;;  %v3540_v20 = vadd.f32 %v7495_v4, %v8055_v27 }
 0x278   : > { %v4535_v58 = vadd.f32 %v4461_v48, %v3853_v24  ;;  %v3854_v22 = vadd.f32 %v3781_v2, %v3539_v54  ;;  %v4220_v24 = vrot.slane %v4218_v23, 4  ;;  %v7643_v48 = vld [vmem:[#allocation2 + $0xb0] sm:$0x1] }
 0x279   : > { %v4237_v8 = vshll.u32 %v7643_v48, 16 }
 0x27a   : > { %v4887_v36 = vpop.f32.mrf.mxu0  ;;  %v4224_v23 = vor.u32 %v4223_v13, %v4220_v24  ;;  %v3920_v13 = vld [vmem:[#allocation2 + $0xb4] sm:$0xf] }
 0x27b   : > { %v7634_v62 = vadd.f32 %v4887_v36, %v4535_v58  ;;  %v4770_v36 = vunpack.c.l.b16 %v4707_v49  ;;  %v4239_v24 = vrot.slane %v4237_v8, 5  ;;  %v7664_v9 = vpop.f32.mrf.mxu1 }
 0x27c   : > { %5772 = vmatmul.msk.bf16.gmra.mxu2 %vm1352_vm11, %v5944_v12  ;;  %v4225_v41 = vrot.slane %v4224_v23, 4  ;;  %v4245_v23 = vshll.u32 %v3920_v13, 16 }
 0x27d   : > { %5867 = vmatmul.msk.bf16.gmra.mxu0 %vm1352_vm11, %v4790_v51  ;;  %v4993_v60 = vpack.c.bf16 %v7634_v62, %v7634_v62  ;;  %v4234_v51 = vor.u32 %v4233_v50, %v4229_v35  ;;  %v4575_v50 = vld [vmem:[#allocation2 + $0xa8] sm:$0xe] }
 0x27f   : > { %5025 = vst.msk [vmem:[%s7549_s8 + $0x10] sm:$0xf] %vm237_vm0, %v4993_v60  ;;  %v4463_v2 = vpop.f32.mrf.mxu3  ;;  %v3784_v58 = vpop.f32.mrf.mxu2  ;;  %v4235_v18 = vrot.slane %v4234_v51, 4  ;;  %v7659_v60 = vld [vmem:[#allocation2 + $0xb8] sm:$0xf] }
 0x280   : > { %v4536_v12 = vadd.f32 %v4463_v2, %v3854_v22  ;;  %v3855_v6 = vadd.f32 %v3784_v58, %v3540_v20  ;;  %v4771_v22 = vunpack.c.l.b16 %v4710_v7  ;;  %v5945_v58 = vld [vmem:[#allocation2 + $0xa8] sm:$0xff]  ;;  %v4251_v8 = vshll.u32 %v7659_v60, 16  ;;  %v8056_v20 = vld [vmem:[#allocation21_spill] sm:$0xff] }
 0x281   : > { %v4240_v51 = vsel %vm6342_vm12, %v4235_v18, %v4239_v24  ;;  %v4255_v27 = vshrl.u32 %v7659_v60, 16  ;;  %v3541_v15 = vadd.f32 %v7524_v59, %v8056_v20  ;;  %v5829_v7 = vrot.slane %v4575_v50, 9  ;;  %v7681_v50 = vld [vmem:[#allocation2 + $0xbc] sm:$0x1] }
 0x282   : > { %v4889_v44 = vpop.f32.mrf.mxu0  ;;  %v4791_v49 = vpack.c.b16 %v4771_v22, %v4770_v36  ;;  %v4347_v22 = vunpack.c.l.b16 %v4240_v51  ;;  %v4247_v24 = vrot.slane %v4245_v23, 5  ;;  %v4261_v51 = vshll.u32 %v7681_v50, 16 }
 0x283   : > { %v7654_v54 = vadd.f32 %v4889_v44, %v4536_v12  ;;  %v4230_v12 = vsel %vm6342_vm12, %v4225_v41, %v4229_v35  ;;  %v4715_v35 = vrot.slane %v4713_v26, 4  ;;  %v4716_v41 = vrot.slane %v7643_v48, 5 }
 0x284   : > { %5812 = vmatmul.msk.bf16.gmra.mxu3 %vm1352_vm11, %v4365_v31  ;;  %v4242_v31 = vshrl.u32 %v3920_v13, 16  ;;  %v4253_v13 = vrot.slane %v4251_v8, 5  ;;  %v4714_v48 = vsel %vm6677_vm15, %v5829_v7, %v4713_v26  ;;  %v3542_v8 = vadd.f32 %v7565_v39, %v7044_v42  ;;  %v7701_v39 = vld [vmem:[#allocation2 + $0xc4] sm:$0xf] }
 0x285   : > { %v4994_v53 = vpack.c.bf16 %v7654_v54, %v7654_v54  ;;  %v4772_v26 = vunpack.c.l.b16 %v4714_v48  ;;  %v4720_v48 = vrot.slane %v7659_v60, 5  ;;  %v3543_v60 = vadd.f32 %v7592_v16, %v7079_v17 }
 0x286   : > { %v4244_v18 = vrot.slane %v4242_v31, 4  ;;  %v4717_v31 = vsel %vm6677_vm15, %v4715_v35, %v4716_v41  ;;  %v300_v35 = vld [vmem:[#allocation2 + $0xcc] sm:$0x1]  ;;  %v4723_v16 = vrot.slane %v7681_v50, 5 }
 0x287   : > { %5026 = vst.msk [vmem:[%s7549_s8 + $0x14] sm:$0xf] %vm237_vm0, %v4994_v53  ;;  %v4466_v4 = vpop.f32.mrf.mxu3  ;;  %v3786_v45 = vpop.f32.mrf.mxu2  ;;  %v4346_v53 = vunpack.c.l.b16 %v4230_v12  ;;  %v301_v42 = vsel %vm6242_vm4, 0, %v300_v35 }
 0x288   : > { %v4537_v2 = vadd.f32 %v4466_v4, %v3855_v6  ;;  %v3856_v36 = vadd.f32 %v3786_v45, %v3541_v15  ;;  %v4257_v4 = vrot.slane %v4255_v27, 4  ;;  %v4248_v23 = vor.u32 %v4247_v24, %v4244_v18  ;;  %v7692_v27 = vpop.f32.mrf.mxu1  ;;  %v3923_v18 = vld [vmem:[#allocation2 + $0xc0] sm:$0xf]  ;;  %302 = vst [vmem:[#allocation2 + $0xcc] sm:$0x1] %v301_v42 }
 0x289   : > { %v4366_v12 = vpack.c.b16 %v4347_v22, %v4346_v53  ;;  %v4263_v22 = vrot.slane %v4261_v51, 5  ;;  %v4275_v51 = vshll.u32 %v7701_v39, 16 }
 0x28a   : > { %v4892_v44 = vpop.f32.mrf.mxu0  ;;  %v4249_v53 = vrot.slane %v4248_v23, 4  ;;  %v4269_v23 = vshll.u32 %v3923_v18, 16 }
 0x28b   : > { %v7674_v6 = vadd.f32 %v4892_v44, %v4537_v2  ;;  %v4773_v44 = vunpack.c.l.b16 %v4717_v31  ;;  %v4266_v31 = vshrl.u32 %v3923_v18, 16  ;;  %v4277_v18 = vrot.slane %v4275_v51, 5 }
 0x28c   : > { %5773 = vmatmul.msk.bf16.gmra.mxu2 %vm1352_vm11, %v5945_v58  ;;  %v4271_v3 = vrot.slane %v4269_v23, 5 }
 0x28d   : > { %5868 = vmatmul.msk.bf16.gmra.mxu0 %vm1352_vm11, %v4791_v49  ;;  %v4995_v59 = vpack.c.bf16 %v7674_v6, %v7674_v6  ;;  %v4258_v49 = vor.u32 %v4257_v4, %v4253_v13  ;;  %v4792_v24 = vpack.c.b16 %v4773_v44, %v4772_v26 }
 0x28f   : > { %5027 = vst.msk [vmem:[%s7549_s8 + $0x18] sm:$0xf] %vm237_vm0, %v4995_v59  ;;  %v4468_v2 = vpop.f32.mrf.mxu3  ;;  %v3789_v45 = vpop.f32.mrf.mxu2 }
 0x290   : > { %v4538_v58 = vadd.f32 %v4468_v2, %v3856_v36  ;;  %v3857_v7 = vadd.f32 %v3789_v45, %v3542_v8  ;;  %v4259_v36 = vrot.slane %v4258_v49, 4  ;;  %v4576_v2 = vld [vmem:[#allocation2 + $0xb4] sm:$0xe]  ;;  %v4279_v8 = vshrl.u32 %v7701_v39, 16  ;;  %v7718_v35 = vpop.f32.mrf.mxu1 }
 0x292   : > { %v4894_v20 = vpop.f32.mrf.mxu0  ;;  %v4264_v49 = vsel %vm6342_vm12, %v4259_v36, %v4263_v22  ;;  %v4268_v22 = vrot.slane %v4266_v31, 4  ;;  %v4281_v42 = vrot.slane %v4279_v8, 4 }
 0x293   : > { %v7694_v15 = vadd.f32 %v4894_v20, %v4538_v58  ;;  %v5946_v58 = vld [vmem:[#allocation2 + $0xb4] sm:$0xff]  ;;  %v357_v20 = vsel %vm6251_vm5, 0, %v356_v1  ;;  %v4349_v36 = vunpack.c.l.b16 %v4264_v49  ;;  %v3544_v1 = vadd.f32 %v7616_v61, %v7093_v0 }
 0x294   : > { %5813 = vmatmul.msk.bf16.gmra.mxu3 %vm1352_vm11, %v4366_v12  ;;  %v4254_v12 = vsel %vm6342_vm12, %v4249_v53, %v4253_v13  ;;  %358 = vst [vmem:[#allocation2 + $0xd4] sm:$0x1] %v357_v20  ;;  %v4722_v53 = vrot.slane %v4720_v48, 4  ;;  %v4282_v23 = vor.u32 %v4281_v42, %v4277_v18 }
 0x295   : > { %v4996_v41 = vpack.c.bf16 %v7694_v15, %v7694_v15  ;;  %v4348_v13 = vunpack.c.l.b16 %v4254_v12  ;;  %v4272_v12 = vor.u32 %v4271_v3, %v4268_v22  ;;  %v4727_v22 = vrot.slane %v7701_v39, 5 }
 0x297   : > { %5028 = vst.msk [vmem:[%s7549_s8 + $0x1c] sm:$0xf] %vm237_vm0, %v4996_v41  ;;  %v4471_v59 = vpop.f32.mrf.mxu3  ;;  %v3791_v4 = vpop.f32.mrf.mxu2 }
 0x298   : > { %v4539_v45 = vadd.f32 %v4471_v59, %v3857_v7  ;;  %v5830_v7 = vrot.slane %v4576_v2, 9  ;;  %v3858_v41 = vadd.f32 %v3791_v4, %v3543_v60  ;;  %v7725_v59 = vld [vmem:[#allocation2 + $0xc8] sm:$0x1] }
 0x299   : > { %v4285_v50 = vshll.u32 %v7725_v59, 16 }
 0x29a   : > { %v4897_v26 = vpop.f32.mrf.mxu0  ;;  %v4721_v31 = vsel %vm6677_vm15, %v5830_v7, %v4720_v48 }
 0x29b   : > { %v7716_v44 = vadd.f32 %v4897_v26, %v4539_v45  ;;  %v4774_v8 = vunpack.c.l.b16 %v4721_v31  ;;  %v4273_v26 = vrot.slane %v4272_v12, 4  ;;  %v4287_v7 = vrot.slane %v4285_v50, 5 }
 0x29c   : > { %5774 = vmatmul.msk.bf16.gmra.mxu2 %vm1352_vm11, %v5946_v58  ;;  %v4367_v58 = vpack.c.b16 %v4349_v36, %v4348_v13  ;;  %v4283_v13 = vrot.slane %v4282_v23, 4  ;;  %v7743_v36 = vld [vmem:[#allocation2 + $0xd0] sm:$0xf] }
 0x29d   : > { %5869 = vmatmul.msk.bf16.gmra.mxu0 %vm1352_vm11, %v4792_v24  ;;  %v4997_v17 = vpack.c.bf16 %v7716_v44, %v7716_v44  ;;  %v4724_v24 = vsel %vm6677_vm15, %v4722_v53, %v4723_v16  ;;  %v3926_v53 = vld [vmem:[#allocation2 + $0xcc] sm:$0xf]  ;;  %v5947_v16 = vld [vmem:[#allocation2 + $0xc0] sm:$0xff]  ;;  %v4278_v42 = vsel %vm6342_vm12, %v4273_v26, %v4277_v18  ;;  %v4299_v12 = vshll.u32 %v7743_v36, 16 }
 0x29e   : > { %v4775_v20 = vunpack.c.l.b16 %v4724_v24  ;;  %v4303_v31 = vshrl.u32 %v7743_v36, 16  ;;  %v3545_v24 = vadd.f32 %v7640_v34, %v7133_v47  ;;  %v4730_v18 = vrot.slane %v7725_v59, 5 }
 0x29f   : > { %5029 = vst.msk [vmem:[%s7549_s8 + $0x20] sm:$0xf] %vm237_vm0, %v4997_v17  ;;  %v4473_v2 = vpop.f32.mrf.mxu3  ;;  %v3794_v4 = vpop.f32.mrf.mxu2  ;;  %v4301_v34 = vrot.slane %v4299_v12, 5 }
 0x2a0   : > { %v4540_v45 = vadd.f32 %v4473_v2, %v3858_v41  ;;  %v3859_v60 = vadd.f32 %v3794_v4, %v3544_v1  ;;  %v7741_v41 = vpop.f32.mrf.mxu1  ;;  %v4793_v3 = vpack.c.b16 %v4775_v20, %v4774_v8  ;;  %v4577_v2 = vld [vmem:[#allocation2 + $0xc0] sm:$0xe]  ;;  %v4290_v4 = vshrl.u32 %v3926_v53, 16 }
 0x2a1   : > { %v5831_v50 = vrot.slane %v4577_v2, 9  ;;  %v4729_v1 = vrot.slane %v4727_v22, 4  ;;  %v4350_v8 = vunpack.c.l.b16 %v4278_v42 }
 0x2a2   : > { %v4899_v49 = vpop.f32.mrf.mxu0 }
 0x2a3   : > { %v7736_v51 = vadd.f32 %v4899_v49, %v4540_v45  ;;  %v4288_v45 = vsel %vm6342_vm12, %v4283_v13, %v4287_v7  ;;  %v3928_v13 = vld [vmem:[#allocation2 + $0xd4] sm:$0x1] }
 0x2a4   : > { %5814 = vmatmul.msk.bf16.gmra.mxu3 %vm1352_vm11, %v4367_v58  ;;  %v4293_v58 = vshll.u32 %v3926_v53, 16  ;;  %v4351_v20 = vunpack.c.l.b16 %v4288_v45  ;;  %v4309_v2 = vshll.u32 %v3928_v13, 16 }
 0x2a5   : > { %v4998_v48 = vpack.c.bf16 %v7736_v51, %v7736_v51 }
 0x2a6   : > { %v4295_v47 = vrot.slane %v4293_v58, 5 }
 0x2a7   : > { %5030 = vst.msk [vmem:[%s7549_s8 + $0x24] sm:$0xf] %vm237_vm0, %v4998_v48  ;;  %v4476_v0 = vpop.f32.mrf.mxu3  ;;  %v3796_v61 = vpop.f32.mrf.mxu2  ;;  %v4305_v48 = vrot.slane %v4303_v31, 4 }
 0x2a8   : > { %v4541_v17 = vadd.f32 %v4476_v0, %v3859_v60  ;;  %v3860_v49 = vadd.f32 %v3796_v61, %v3545_v24  ;;  %v4292_v60 = vrot.slane %v4290_v4, 4  ;;  %v7765_v59 = vpop.f32.mrf.mxu1  ;;  %v4368_v61 = vpack.c.b16 %v4351_v20, %v4350_v8 }
 0x2a9   : > { %v4306_v42 = vor.u32 %v4305_v48, %v4301_v34  ;;  %v3546_v4 = vadd.f32 %v7664_v9, %v7156_v43  ;;  %v5948_v43 = vld [vmem:[#allocation2 + $0xcc] sm:$0xff] }
 0x2aa   : > { %v4902_v39 = vpop.f32.mrf.mxu0 }
 0x2ab   : > { %v7756_v23 = vadd.f32 %v4902_v39, %v4541_v17  ;;  %v4728_v17 = vsel %vm6677_vm15, %v5831_v50, %v4727_v22  ;;  %v4307_v50 = vrot.slane %v4306_v42, 4 }
 0x2ac   : > { %5775 = vmatmul.msk.bf16.gmra.mxu2 %vm1352_vm11, %v5947_v16  ;;  %v4296_v16 = vor.u32 %v4295_v47, %v4292_v60  ;;  %v4776_v12 = vunpack.c.l.b16 %v4728_v17 }
 0x2ad   : > { %5870 = vmatmul.msk.bf16.gmra.mxu0 %vm1352_vm11, %v4793_v3  ;;  %v4999_v26 = vpack.c.bf16 %v7756_v23, %v7756_v23  ;;  %v4731_v3 = vsel %vm6677_vm15, %v4729_v1, %v4730_v18  ;;  %v4311_v1 = vrot.slane %v4309_v2, 5 }
 0x2ae   : > { %v4777_v31 = vunpack.c.l.b16 %v4731_v3  ;;  %v4297_v39 = vrot.slane %v4296_v16, 4 }
 0x2af   : > { %5031 = vst.msk [vmem:[%s7549_s8 + $0x28] sm:$0xf] %vm237_vm0, %v4999_v26  ;;  %v4478_v7 = vpop.f32.mrf.mxu3  ;;  %v3799_v53 = vpop.f32.mrf.mxu2  ;;  %v4312_v60 = vsel %vm6342_vm12, %v4307_v50, %v4311_v1  ;;  %v3547_v26 = vadd.f32 %v7692_v27, %v7173_v29  ;;  %v4737_v27 = vrot.slane %v3928_v13, 5 }
 0x2b0   : > { %v4542_v0 = vadd.f32 %v4478_v7, %v3860_v49  ;;  %v3861_v24 = vadd.f32 %v3799_v53, %v3546_v4  ;;  %v4794_v9 = vpack.c.b16 %v4777_v31, %v4776_v12  ;;  %v4302_v20 = vsel %vm6342_vm12, %v4297_v39, %v4301_v34  ;;  %v7786_v47 = vpop.f32.mrf.mxu1 }
 0x2b1   : > { %v4734_v7 = vrot.slane %v7743_v36, 5  ;;  %v4352_v17 = vunpack.c.l.b16 %v4302_v20  ;;  %v4353_v34 = vunpack.c.l.b16 %v4312_v60  ;;  %v3548_v4 = vadd.f32 %v7718_v35, %v7193_v5 }
 0x2b2   : > { %v4904_v45 = vpop.f32.mrf.mxu0 }
 0x2b3   : > { %v7773_v58 = vadd.f32 %v4904_v45, %v4542_v0  ;;  %v4578_v0 = vld [vmem:[#allocation2 + $0xcc] sm:$0xe]  ;;  %v4736_v29 = vrot.slane %v4734_v7, 4  ;;  %v4369_v2 = vpack.c.b16 %v4353_v34, %v4352_v17 }
 0x2b4   : > { %5815 = vmatmul.msk.bf16.gmra.mxu3 %vm1352_vm11, %v4368_v61  ;;  %v5832_v3 = vrot.slane %v4578_v0, 9  ;;  %v3550_v0 = vadd.f32 %v7765_v59, %v7229_v38  ;;  %v3551_v59 = vadd.f32 %v7786_v47, %v7245_v63  ;;  %v5103_v47 = vmul.f32 %v7756_v23, %v7756_v23 }
 0x2b5   : > { %v5000_v22 = vpack.c.bf16 %v7773_v58, %v7773_v58  ;;  %v4738_v31 = vsel %vm6677_vm15, %v4736_v29, %v4737_v27 }
 0x2b6   : > { %v4735_v12 = vsel %vm6677_vm15, %v5832_v3, %v4734_v7  ;;  %v4779_v1 = vunpack.c.l.b16 %v4738_v31 }
 0x2b7   : > { %5032 = vst.msk [vmem:[%s7549_s8 + $0x2c] sm:$0xf] %vm237_vm0, %v5000_v22  ;;  %v4481_v18 = vpop.f32.mrf.mxu3  ;;  %v3801_v49 = vpop.f32.mrf.mxu2  ;;  %v4778_v50 = vunpack.c.l.b16 %v4735_v12  ;;  %v5104_v12 = vmul.f32 %v7773_v58, %v7773_v58 }
 0x2b8   : > { %v4543_v8 = vadd.f32 %v4481_v18, %v3861_v24  ;;  %v3862_v61 = vadd.f32 %v3801_v49, %v3547_v26  ;;  %v3499_v22 = vpop.f32.mrf.mxu1 }
 0x2b9   : > { %v4795_v49 = vpack.c.b16 %v4779_v1, %v4778_v50 }
 0x2ba   : > { %v4907_v48 = vpop.f32.mrf.mxu0 }
 0x2bb   : > { %v7789_v53 = vadd.f32 %v4907_v48, %v4543_v8  ;;  %v3549_v8 = vadd.f32 %v7741_v41, %v7208_v37 }
 0x2bc   : > { %5776 = vmatmul.msk.bf16.gmra.mxu2 %vm1352_vm11, %v5948_v43 }
 0x2bd   : > { %5871 = vmatmul.msk.bf16.gmra.mxu0 %vm1352_vm11, %v4794_v9  ;;  %v5001_v52 = vpack.c.bf16 %v7789_v53, %v7789_v53 }
 0x2bf   : > { %5033 = vst.msk [vmem:[%s7549_s8 + $0x30] sm:$0xf] %vm237_vm0, %v5001_v52  ;;  %v4483_v36 = vpop.f32.mrf.mxu3  ;;  %v3804_v16 = vpop.f32.mrf.mxu2 }
 0x2c0   : > { %v4544_v42 = vadd.f32 %v4483_v36, %v3862_v61  ;;  %v3863_v13 = vadd.f32 %v3804_v16, %v3548_v4  ;;  %v7809_v60 = vpop.f32.mrf.mxu1 }
 0x2c2   : > { %v4909_v45 = vpop.f32.mrf.mxu0 }
 0x2c3   : > { %v4970_v24 = vadd.f32 %v4909_v45, %v4544_v42 }
 0x2c4   : > { %5816 = vmatmul.msk.bf16.gmra.mxu3 %vm1352_vm11, %v4369_v2  ;;  %v5105_v2 = vmul.f32 %v7789_v53, %v7789_v53 }
 0x2c5   : > { %v5002_v39 = vpack.c.bf16 %v4970_v24, %v4970_v24  ;;  %v5106_v38 = vmul.f32 %v4970_v24, %v4970_v24 }
 0x2c7   : > { %5034 = vst.msk [vmem:[%s7549_s8 + $0x34] sm:$0xf] %vm237_vm0, %v5002_v39  ;;  %v4486_v18 = vpop.f32.mrf.mxu3  ;;  %v3806_v5 = vpop.f32.mrf.mxu2 }
 0x2c8   : > { %v4545_v35 = vadd.f32 %v4486_v18, %v3863_v13  ;;  %v3864_v9 = vadd.f32 %v3806_v5, %v3549_v8  ;;  %v7817_v27 = vpop.f32.mrf.mxu1 }
 0x2ca   : > { %v4912_v14 = vpop.f32.mrf.mxu0 }
 0x2cb   : > { %v4971_v43 = vadd.f32 %v4912_v14, %v4545_v35  ;;  %v5098_v35 = vmul.f32 %v7654_v54, %v7654_v54 }
 0x2cd   : > { %5872 = vmatmul.msk.bf16.gmra.mxu0 %vm1352_vm11, %v4795_v49  ;;  %v5003_v20 = vpack.c.bf16 %v4971_v43, %v4971_v43  ;;  %v5107_v3 = vmul.f32 %v4971_v43, %v4971_v43 }
 0x2cf   : > { %5035 = vst.msk [vmem:[%s7549_s8 + $0x38] sm:$0xf] %vm237_vm0, %v5003_v20  ;;  %v4488_v26 = vpop.f32.mrf.mxu3  ;;  %v3809_v48 = vpop.f32.mrf.mxu2 }
 0x2d0   : > { %v4546_v7 = vadd.f32 %v4488_v26, %v3864_v9  ;;  %v3865_v37 = vadd.f32 %v3809_v48, %v3550_v0  ;;  %v3506_v13 = vpop.f32.mrf.mxu1  ;;  %v5094_v26 = vmul.f32 %v7570_v19, %v7570_v19 }
 0x2d2   : > { %v4914_v61 = vpop.f32.mrf.mxu0 }
 0x2d3   : > { %v4972_v17 = vadd.f32 %v4914_v61, %v4546_v7 }
 0x2d5   : > { %v5004_v41 = vpack.c.bf16 %v4972_v17, %v4972_v17  ;;  %v5108_v34 = vmul.f32 %v4972_v17, %v4972_v17  ;;  %5053 = vmatpush.msrb.mxu1 %v4972_v17 }
 0x2d7   : > { %5036 = vst.msk [vmem:[%s7549_s8 + $0x3c] sm:$0xf] %vm237_vm0, %v5004_v41  ;;  %v4491_v52 = vpop.f32.mrf.mxu3  ;;  %5054 = vmatpush.msrb.mxu1 %v4971_v43  ;;  %5125 = vmatpush.msrb.mxu3 %v5108_v34  ;;  %v3811_v29 = vpop.f32.mrf.mxu2  ;;  %v3555_v41 = vadd.f32 %v3506_v13, %v7321_v33 }
 0x2d8   : > { %v4547_v36 = vadd.f32 %v4491_v52, %v3865_v37  ;;  %v3866_v4 = vadd.f32 %v3811_v29, %v3551_v59  ;;  %v3509_v14 = vpop.f32.mrf.mxu1 }
 0x2d9   : > { %5055 = vmatpush.msrb.mxu1 %v4970_v24  ;;  %5126 = vmatpush.msrb.mxu3 %v5107_v3  ;;  %v5102_v24 = vmul.f32 %v7736_v51, %v7736_v51  ;;  %v3556_v59 = vadd.f32 %v3509_v14, %v7341_v11 }
 0x2da   : > { %v4917_v16 = vpop.f32.mrf.mxu0 }
 0x2db   : > { %v7821_v42 = vadd.f32 %v4917_v16, %v4547_v36  ;;  %5056 = vmatpush.msrb.mxu1 %v7789_v53  ;;  %5127 = vmatpush.msrb.mxu3 %v5106_v38 }
 0x2dd   : > { %v5005_v45 = vpack.c.bf16 %v7821_v42, %v7821_v42  ;;  %5057 = vmatpush.msrb.mxu1 %v7773_v58  ;;  %5128 = vmatpush.msrb.mxu3 %v5105_v2  ;;  %v3552_v58 = vadd.f32 %v3499_v22, %v7265_v32  ;;  %v5100_v32 = vmul.f32 %v7694_v15, %v7694_v15 }
 0x2de   : > { %v5099_v22 = vmul.f32 %v7674_v6, %v7674_v6 }
 0x2df   : > { %5037 = vst.msk [vmem:[%s7549_s8 + $0x40] sm:$0xf] %vm237_vm0, %v5005_v45  ;;  %v4493_v63 = vpop.f32.mrf.mxu3  ;;  %5058 = vmatpush.msrb.mxu1 %v7756_v23  ;;  %5129 = vmatpush.msrb.mxu3 %v5104_v12  ;;  %v3814_v53 = vpop.f32.mrf.mxu2  ;;  %v5101_v23 = vmul.f32 %v7716_v44, %v7716_v44 }
 0x2e0   : > { %v4548_v31 = vadd.f32 %v4493_v63, %v3866_v4  ;;  %v3867_v1 = vadd.f32 %v3814_v53, %v3552_v58  ;;  %v3511_v17 = vpop.f32.mrf.mxu1 }
 0x2e1   : > { %5059 = vmatpush.msrb.mxu1 %v7736_v51  ;;  %5130 = vmatpush.msrb.mxu3 %v5103_v47  ;;  %v3557_v47 = vadd.f32 %v3511_v17, %v7361_v30 }
 0x2e2   : > { %v4919_v39 = vpop.f32.mrf.mxu0 }
 0x2e3   : > { %v7840_v50 = vadd.f32 %v4919_v39, %v4548_v31  ;;  %5060 = vmatpush.msrb.mxu1 %v7716_v44  ;;  %5131 = vmatpush.msrb.mxu3 %v5102_v24 }
 0x2e5   : > { %v5006_v18 = vpack.c.bf16 %v7840_v50, %v7840_v50  ;;  %5061 = vmatpush.msrb.mxu1 %v7694_v15  ;;  %5132 = vmatpush.msrb.mxu3 %v5101_v23  ;;  %v3553_v15 = vadd.f32 %v7809_v60, %v7285_v40  ;;  %v5096_v40 = vmul.f32 %v7614_v10, %v7614_v10 }
 0x2e7   : > { %5038 = vst.msk [vmem:[%s7549_s8 + $0x44] sm:$0xf] %vm237_vm0, %v5006_v18  ;;  %v4496_v51 = vpop.f32.mrf.mxu3  ;;  %5062 = vmatpush.msrb.mxu1 %v7674_v6  ;;  %5133 = vmatpush.msrb.mxu3 %v5100_v32  ;;  %v3816_v44 = vpop.f32.mrf.mxu2  ;;  %v5097_v6 = vmul.f32 %v7634_v62, %v7634_v62 }
 0x2e8   : > { %v4549_v5 = vadd.f32 %v4496_v51, %v3867_v1  ;;  %v3868_v43 = vadd.f32 %v3816_v44, %v3553_v15  ;;  %v3514_v36 = vpop.f32.mrf.mxu1 }
 0x2e9   : > { %5063 = vmatpush.msrb.mxu1 %v7654_v54  ;;  %5134 = vmatpush.msrb.mxu3 %v5099_v22  ;;  %v3558_v1 = vadd.f32 %v3514_v36, %v7383_v55 }
 0x2ea   : > { %v4922_v49 = vpop.f32.mrf.mxu0 }
 0x2eb   : > { %v7860_v8 = vadd.f32 %v4922_v49, %v4549_v5  ;;  %5064 = vmatpush.msrb.mxu1 %v7634_v62  ;;  %5135 = vmatpush.msrb.mxu3 %v5098_v35  ;;  %v5095_v62 = vmul.f32 %v7595_v25, %v7595_v25 }
 0x2ed   : > { %v5007_v9 = vpack.c.bf16 %v7860_v8, %v7860_v8  ;;  %5065 = vmatpush.msrb.mxu1 %v7614_v10  ;;  %5136 = vmatpush.msrb.mxu3 %v5097_v6  ;;  %v3554_v10 = vadd.f32 %v7817_v27, %v7305_v56 }
 0x2ef   : > { %5039 = vst.msk [vmem:[%s7549_s8 + $0x48] sm:$0xf] %vm237_vm0, %v5007_v9  ;;  %v4498_v54 = vpop.f32.mrf.mxu3  ;;  %5066 = vmatpush.msrb.mxu1 %v7595_v25  ;;  %5137 = vmatpush.msrb.mxu3 %v5096_v40  ;;  %v3819_v20 = vpop.f32.mrf.mxu2  ;;  %v5093_v25 = vmul.f32 %v7542_v57, %v7542_v57 }
 0x2f0   : > { %v4550_v60 = vadd.f32 %v4498_v54, %v3868_v43  ;;  %v3869_v0 = vadd.f32 %v3819_v20, %v3554_v10  ;;  %v3516_v53 = vpop.f32.mrf.mxu1 }
 0x2f1   : > { %5067 = vmatpush.msrb.mxu1 %v7570_v19  ;;  %5138 = vmatpush.msrb.mxu3 %v5095_v62  ;;  %v3559_v15 = vadd.f32 %v3516_v53, %v7397_v46 }
 0x2f2   : > { %v4924_v48 = vpop.f32.mrf.mxu0 }
 0x2f3   : > { %v7880_v7 = vadd.f32 %v4924_v48, %v4550_v60  ;;  %5068 = vmatpush.msrb.mxu1 %v7542_v57  ;;  %5139 = vmatpush.msrb.mxu3 %v5094_v26 }
 0x2f5   : > { %v5008_v61 = vpack.c.bf16 %v7880_v7, %v7880_v7  ;;  %5140 = vmatpush.msrb.mxu3 %v5093_v25 }
 0x2f7   : > { %5040 = vst.msk [vmem:[%s7549_s8 + $0x4c] sm:$0xf] %vm237_vm0, %v5008_v61  ;;  %v4501_v19 = vpop.f32.mrf.mxu3  ;;  %v3821_v56 = vpop.f32.mrf.mxu2  ;;  %v8057_v61 = vld [vmem:[#allocation6_spill] sm:$0xff] }
 0x2f8   : > { %v4551_v37 = vadd.f32 %v4501_v19, %v3869_v0  ;;  %v3870_v3 = vadd.f32 %v3821_v56, %v3555_v41  ;;  %v3519_v30 = vpop.f32.mrf.mxu1 }
 0x2f9   : > { %v3560_v62 = vadd.f32 %v3519_v30, %v7417_v28 }
 0x2fa   : > { %v4927_v34 = vpop.f32.mrf.mxu0 }
 0x2fb   : > { %v7890_v52 = vadd.f32 %v4927_v34, %v4551_v37 }
 0x2fd   : > { %v5009_v57 = vpack.c.bf16 %v7890_v52, %v7890_v52 }
 0x2ff   : > { %5041 = vst.msk [vmem:[%s7549_s8 + $0x50] sm:$0xf] %vm237_vm0, %v5009_v57  ;;  %v4503_v29 = vpop.f32.mrf.mxu3  ;;  %v3824_v27 = vpop.f32.mrf.mxu2 }
 0x300   : > { %v4552_v38 = vadd.f32 %v4503_v29, %v3870_v3  ;;  %v3871_v33 = vadd.f32 %v3824_v27, %v3556_v59  ;;  %v3521_v43 = vpop.f32.mrf.mxu1 }
 0x301   : > { %v3561_v17 = vadd.f32 %v3521_v43, %v8057_v61 }
 0x302   : > { %v4929_v16 = vpop.f32.mrf.mxu0 }
 0x303   : > { %v7897_v2 = vadd.f32 %v4929_v16, %v4552_v38 }
 0x305   : > { %v5010_v4 = vpack.c.bf16 %v7897_v2, %v7897_v2 }
 0x307   : > { %5042 = vst.msk [vmem:[%s7549_s8 + $0x54] sm:$0xf] %vm237_vm0, %v5010_v4  ;;  %v4506_v45 = vpop.f32.mrf.mxu3  ;;  %v3826_v12 = vpop.f32.mrf.mxu2 }
 0x308   : > { %v4553_v63 = vadd.f32 %v4506_v45, %v3871_v33  ;;  %v3872_v11 = vadd.f32 %v3826_v12, %v3557_v47  ;;  %v3524_v0 = vpop.f32.mrf.mxu1  ;;  %v8058_v45 = vld [vmem:[#allocation7_spill] sm:$0xff] }
 0x309   : > { %v3562_v57 = vadd.f32 %v3524_v0, %v7459_v21 }
 0x30a   : > { %v4932_v31 = vpop.f32.mrf.mxu0 }
 0x30b   : > { %v7904_v24 = vadd.f32 %v4932_v31, %v4553_v63 }
 0x30d   : > { %v5011_v58 = vpack.c.bf16 %v7904_v24, %v7904_v24 }
 0x30f   : > { %5043 = vst.msk [vmem:[%s7549_s8 + $0x58] sm:$0xf] %vm237_vm0, %v5011_v58  ;;  %v4508_v13 = vpop.f32.mrf.mxu3  ;;  %v3829_v39 = vpop.f32.mrf.mxu2 }
 0x310   : > { %v4554_v23 = vadd.f32 %v4508_v13, %v3872_v11  ;;  %v3873_v51 = vadd.f32 %v3829_v39, %v3558_v1  ;;  %v3526_v27 = vpop.f32.mrf.mxu1  ;;  %v8059_v39 = vld [vmem:[#allocation8_spill] sm:$0xff] }
 0x311   : > { %v3563_v12 = vadd.f32 %v3526_v27, %v8058_v45 }
 0x312   : > { %v4934_v18 = vpop.f32.mrf.mxu0 }
 0x313   : > { %v7911_v32 = vadd.f32 %v4934_v18, %v4554_v23 }
 0x315   : > { %v5012_v22 = vpack.c.bf16 %v7911_v32, %v7911_v32 }
 0x317   : > { %5044 = vst.msk [vmem:[%s7549_s8 + $0x5c] sm:$0xf] %vm237_vm0, %v5012_v22  ;;  %v4511_v44 = vpop.f32.mrf.mxu3  ;;  %v3831_v5 = vpop.f32.mrf.mxu2 }
 0x318   : > { %v4555_v35 = vadd.f32 %v4511_v44, %v3873_v51  ;;  %v3874_v55 = vadd.f32 %v3831_v5, %v3559_v15  ;;  %v3529_v31 = vpop.f32.mrf.mxu1  ;;  %v8060_v15 = vld [vmem:[#allocation9_spill] sm:$0xff] }
 0x319   : > { %v3564_v23 = vadd.f32 %v3529_v31, %v8059_v39 }
 0x31a   : > { %v4937_v49 = vpop.f32.mrf.mxu0 }
 0x31b   : > { %v7918_v6 = vadd.f32 %v4937_v49, %v4555_v35 }
 0x31d   : > { %v5013_v14 = vpack.c.bf16 %v7918_v6, %v7918_v6 }
 0x31f   : > { %5045 = vst.msk [vmem:[%s7549_s8 + $0x60] sm:$0xf] %vm237_vm0, %v5013_v14  ;;  %v4513_v9 = vpop.f32.mrf.mxu3  ;;  %v3834_v40 = vpop.f32.mrf.mxu2 }
 0x320   : > { %v4556_v54 = vadd.f32 %v4513_v9, %v3874_v55  ;;  %v3875_v46 = vadd.f32 %v3834_v40, %v3560_v62  ;;  %v3531_v22 = vpop.f32.mrf.mxu1 }
 0x321   : > { %v3565_v49 = vadd.f32 %v3531_v22, %v8060_v15 }
 0x322   : > { %v4939_v20 = vpop.f32.mrf.mxu0 }
 0x323   : > { %v7925_v60 = vadd.f32 %v4939_v20, %v4556_v54 }
 0x325   : > { %v5014_v26 = vpack.c.bf16 %v7925_v60, %v7925_v60 }
 0x327   : > { %5046 = vst.msk [vmem:[%s7549_s8 + $0x64] sm:$0xf] %vm237_vm0, %v5014_v26  ;;  %v4516_v10 = vpop.f32.mrf.mxu3  ;;  %v3836_v48 = vpop.f32.mrf.mxu2 }
 0x328   : > { %v4557_v25 = vadd.f32 %v4516_v10, %v3875_v46  ;;  %v3876_v28 = vadd.f32 %v3836_v48, %v3561_v17  ;;  %v6141_v10 = vmov 1.0  }
 0x329   : > { %5069 = vmatmul.f32.vlgmr.msrb.gmra.mxu1 %v6141_v10  ;;  %5141 = vmatmul.f32.vlgmr.msrb.gmra.mxu3 %v6141_v10 }
 0x32a   : > { %v4942_v19 = vpop.f32.mrf.mxu0 }
 0x32b   : > { %v7932_v56 = vadd.f32 %v4942_v19, %v4557_v25  ;;  %v5118_v19 = vmul.f32 %v7925_v60, %v7925_v60 }
 0x32d   : > { %v5015_v37 = vpack.c.bf16 %v7932_v56, %v7932_v56  ;;  %v5119_v17 = vmul.f32 %v7932_v56, %v7932_v56 }
 0x32f   : > { %5047 = vst.msk [vmem:[%s7549_s8 + $0x68] sm:$0xf] %vm237_vm0, %v5015_v37  ;;  %v4518_v41 = vpop.f32.mrf.mxu3  ;;  %v3839_v34 = vpop.f32.mrf.mxu2  ;;  %v5116_v37 = vmul.f32 %v7911_v32, %v7911_v32 }
 0x330   : > { %v4558_v3 = vadd.f32 %v4518_v41, %v3876_v28  ;;  %v3877_v38 = vadd.f32 %v3839_v34, %v3562_v57  ;;  %v5117_v28 = vmul.f32 %v7918_v6, %v7918_v6 }
 0x332   : > { %v4944_v29 = vpop.f32.mrf.mxu0 }
 0x333   : > { %v4984_v36 = vadd.f32 %v4944_v29, %v4558_v3 }
 0x335   : > { %v5016_v59 = vpack.c.bf16 %v4984_v36, %v4984_v36  ;;  %v5120_v61 = vmul.f32 %v4984_v36, %v4984_v36 }
 0x337   : > { %5048 = vst.msk [vmem:[%s7549_s8 + $0x6c] sm:$0xf] %vm237_vm0, %v5016_v59  ;;  %v4521_v16 = vpop.f32.mrf.mxu3  ;;  %v3841_v33 = vpop.f32.mrf.mxu2 }
 0x338   : > { %v4559_v4 = vadd.f32 %v4521_v16, %v3877_v38  ;;  %v3878_v53 = vadd.f32 %v3841_v33, %v3563_v12 }
 0x33a   : > { %v4947_v63 = vpop.f32.mrf.mxu0 }
 0x33b   : > { %v4985_v47 = vadd.f32 %v4947_v63, %v4559_v4 }
 0x33d   : > { %v5017_v11 = vpack.c.bf16 %v4985_v47, %v4985_v47  ;;  %v5121_v0 = vmul.f32 %v4985_v47, %v4985_v47 }
 0x33f   : > { %5049 = vst.msk [vmem:[%s7549_s8 + $0x70] sm:$0xf] %vm237_vm0, %v5017_v11  ;;  %v4523_v21 = vpop.f32.mrf.mxu3  ;;  %v3844_v58 = vpop.f32.mrf.mxu2 }
 0x340   : > { %v4560_v13 = vadd.f32 %v4523_v21, %v3878_v53  ;;  %v3879_v30 = vadd.f32 %v3844_v58, %v3564_v23 }
 0x342   : > { %v4949_v1 = vpop.f32.mrf.mxu0 }
 0x343   : > { %v4986_v18 = vadd.f32 %v4949_v1, %v4560_v13 }
 0x345   : > { %v5018_v51 = vpack.c.bf16 %v4986_v18, %v4986_v18  ;;  %v5122_v25 = vmul.f32 %v4986_v18, %v4986_v18 }
 0x347   : > { %5050 = vst.msk [vmem:[%s7549_s8 + $0x74] sm:$0xf] %vm237_vm0, %v5018_v51  ;;  %v4526_v44 = vpop.f32.mrf.mxu3  ;;  %v3846_v35 = vpop.f32.mrf.mxu2 }
 0x348   : > { %v4561_v5 = vadd.f32 %v4526_v44, %v3879_v30  ;;  %v3880_v43 = vadd.f32 %v3846_v35, %v3565_v49 }
 0x34a   : > { %v4952_v55 = vpop.f32.mrf.mxu0 }
 0x34b   : > { %v4987_v14 = vadd.f32 %v4952_v55, %v4561_v5 }
 0x34d   : > { %v5019_v9 = vpack.c.bf16 %v4987_v14, %v4987_v14  ;;  %v5123_v48 = vmul.f32 %v4987_v14, %v4987_v14 }
 0x34f   : > { %5051 = vst.msk [vmem:[%s7549_s8 + $0x78] sm:$0xf] %vm237_vm0, %v5019_v9  ;;  %v4528_v40 = vpop.f32.mrf.mxu3 }
 0x350   : > { %v4562_v54 = vadd.f32 %v4528_v40, %v3880_v43 }
 0x352   : > { %v4954_v62 = vpop.f32.mrf.mxu0 }
 0x353   : > { %v4988_v20 = vadd.f32 %v4954_v62, %v4562_v54 }
 0x355   : > { %v5020_v46 = vpack.c.bf16 %v4988_v20, %v4988_v20  ;;  %v5124_v26 = vmul.f32 %v4988_v20, %v4988_v20  ;;  %5073 = vmatpush.msrb.mxu2 %v4988_v20 }
 0x357   : > { %5052 = vst.msk [vmem:[%s7549_s8 + $0x7c] sm:$0xf] %vm237_vm0, %v5020_v46  ;;  %5074 = vmatpush.msrb.mxu2 %v4987_v14  ;;  %5145 = vmatpush.msra.mxu1 %v5124_v26  ;;  %vm5168_vm0 = vcmask 1040384  }
 0x359   : > { %5075 = vmatpush.msrb.mxu2 %v4986_v18  ;;  %5146 = vmatpush.msra.mxu1 %v5123_v48 }
 0x35b   : > { %5076 = vmatpush.msrb.mxu2 %v4985_v47  ;;  %5147 = vmatpush.msra.mxu1 %v5122_v25 }
 0x35d   : > { %5077 = vmatpush.msrb.mxu2 %v4984_v36  ;;  %5148 = vmatpush.msra.mxu1 %v5121_v0 }
 0x35f   : > { %5078 = vmatpush.msrb.mxu2 %v7932_v56  ;;  %5149 = vmatpush.msra.mxu1 %v5120_v61  ;;  %v5115_v56 = vmul.f32 %v7904_v24, %v7904_v24 }
 0x361   : > { %5079 = vmatpush.msrb.mxu2 %v7925_v60  ;;  %5150 = vmatpush.msra.mxu1 %v5119_v17  ;;  %v5114_v60 = vmul.f32 %v7897_v2, %v7897_v2 }
 0x363   : > { %5080 = vmatpush.msrb.mxu2 %v7918_v6  ;;  %5151 = vmatpush.msra.mxu1 %v5118_v19  ;;  %v5113_v6 = vmul.f32 %v7890_v52, %v7890_v52 }
 0x365   : > { %5081 = vmatpush.msrb.mxu2 %v7911_v32  ;;  %5152 = vmatpush.msra.mxu1 %v5117_v28  ;;  %v5112_v32 = vmul.f32 %v7880_v7, %v7880_v7 }
 0x367   : > { %5082 = vmatpush.msrb.mxu2 %v7904_v24  ;;  %5153 = vmatpush.msra.mxu1 %v5116_v37  ;;  %v5111_v24 = vmul.f32 %v7860_v8, %v7860_v8 }
 0x369   : > { %5083 = vmatpush.msrb.mxu2 %v7897_v2  ;;  %5154 = vmatpush.msra.mxu1 %v5115_v56  ;;  %v5110_v2 = vmul.f32 %v7840_v50, %v7840_v50 }
 0x36b   : > { %5084 = vmatpush.msrb.mxu2 %v7890_v52  ;;  %5155 = vmatpush.msra.mxu1 %v5114_v60  ;;  %v5109_v52 = vmul.f32 %v7821_v42, %v7821_v42 }
 0x36d   : > { %5085 = vmatpush.msrb.mxu2 %v7880_v7  ;;  %5156 = vmatpush.msra.mxu1 %v5113_v6 }
 0x36f   : > { %5086 = vmatpush.msrb.mxu2 %v7860_v8  ;;  %5157 = vmatpush.msra.mxu1 %v5112_v32 }
 0x371   : > { %5087 = vmatpush.msrb.mxu2 %v7840_v50  ;;  %5158 = vmatpush.msra.mxu1 %v5111_v24 }
 0x373   : > { %5088 = vmatpush.msrb.mxu2 %v7821_v42  ;;  %5159 = vmatpush.msra.mxu1 %v5110_v2 }
 0x374   : > { %5089 = vmatmul.f32.vlgmr.msrb.gmra.mxu2 %v6141_v10 }
 0x375   : > { %5160 = vmatpush.msra.mxu1 %v5109_v52 }
 0x376   : > { %5161 = vmatmul.f32.vlgmr.msra.gmra.mxu1 %v6141_v10 }
 0x3a6   : > { %v5070_v7 = vpop.f32.mrf.mxu1 }
 0x3ac   : > { %v5142_v41 = vpop.f32.mrf.mxu3 }
 0x3f3   : > { %v5162_v34 = vpop.f32.mrf.mxu1 }
 0x3f4   : > { %v5163_v3 = vadd.f32 %v5162_v34, %v5142_v41 }
 0x3f6   : > { %v5166_v8 = vrot.slane %v5163_v3, 7 }
 0x3f7   : > { %v5090_v57 = vpop.f32.mrf.mxu2 }
 0x3f8   : > { %v5091_v50 = vadd.f32 %v5090_v57, %v5070_v7 }
 0x3fa   : > { %v5169_v29 = vsel %vm5168_vm0, %v5091_v50, %v5166_v8 }
 0x3fb   : > { %5171 = vst.msk [vmem:[%s203_s12] sm:$0x3] %vm5170_vm1, %v5169_v29 }
 0x3fc PF: > { %p14_p7 = scmp.ge.s32.totalorder %s6184_s17, 4   ;;  %s8061_s12 = smov %s6128_s13 }
 0x3fd   : > { %s8062_s13 = smov %s6132_s14  ;;  %s8063_s14 = smov %s6194_s20 }
 0x3fe   : > { %s8064_s15 = smov %s6184_s17  ;;  %16 = sbr.rel (!%p14_p7) target bundleno = 3 (0x3), region = 91 }
 0x403   :  { %5207 = vsyncpa [#allocation4], 1 }
 0x404   :  { %5209 = vsyncpa [#allocation4 + $0x1], 1 }

</bundles_post_ra>
